<compile_context>
chip_gen: v7x
topology: tpu7x:2x2x1
jax: 0.10.0
libtpu: 0.0.40
codegen_flags: <defaults>
</compile_context>

<pallas_src>
import functools
import math

import jax
import jax.numpy as jnp
from jax.experimental import pallas as pl
from jax.experimental.pallas import tpu as pltpu

NEG_SLOPE = 0.2
BN_EPS = 1e-5


def _bn_lrelu_mask(y_raw, mask, inv_count):
    """Train-mode BatchNorm + LeakyReLU(0.2) on the padded flat layout.

    y_raw : [C, Mp] raw conv output (garbage at halo positions).
    mask  : [1, Mp] {0,1} valid-position mask.
    Stats are single-pass (sum / sum-of-squares over the masked tensor,
    divided by the true valid count), variance is biased, gamma=1 / beta=0.
    The final mask multiply re-zeroes the halo positions for the next conv.
    """
    ym = y_raw * mask
    s = jnp.sum(ym, axis=1, keepdims=True)
    ss = jnp.sum(ym * ym, axis=1, keepdims=True)
    mean = s * inv_count
    var = ss * inv_count - mean * mean
    inv = jax.lax.rsqrt(var + BN_EPS)
    yn = (ym - mean) * inv
    return jnp.maximum(yn, NEG_SLOPE * yn) * mask


def _im2col(src_ref, base, row_stride, m):
    """[9*C_in, m] im2col for a 3x3 'same' conv from a flat, zero-haloed ref.

    src_ref holds the activation in the padded per-image layout starting at
    lane `base` (a multiple of 128).  Because every image carries its own
    zero halo ring, the shifted windows need no masking; reads that run into
    the (zeroed) end pads only ever feed halo outputs, which are discarded.
    """
    cin = src_ref.shape[0]
    wins = []
    for dh in (-1, 0, 1):
        for dw in (-1, 0, 1):
            s = base + dh * row_stride + dw
            wins.append(src_ref[:, s:s + m])
    # [9, C_in, m] -> [9*C_in, m]  (leading-dim merge, lane dim untouched)
    return jnp.stack(wins, axis=0).reshape(9 * cin, m)


def stage2_kernel(xpad_ref, v1_ref, v2_ref,
                  w1_ref, w2_ref, wr1_ref, wr2_ref,
                  wpool_ref, wlt_ref, bl_ref,
                  o_ref,
                  fbufA, fbufB,
                  *, n_batch, H, W, H2, W2, L1, L2):
    f32 = jnp.float32
    Wg1, Wg2 = W + 2, W2 + 2
    Hp1, Hp2 = H + 2, H2 + 2
    Mimg1, Mimg2 = Hp1 * Wg1, Hp2 * Wg2
    Mp1, Mp2 = n_batch * Mimg1, n_batch * Mimg2
    c1 = fbufA.shape[0]              # conv1 out channels (4)
    c2 = fbufB.shape[0]              # conv2 out channels (16)
    JOUT = wlt_ref.shape[1]          # 8
    inv_cnt1 = 1.0 / float(n_batch * H * W)
    inv_cnt2 = 1.0 / float(n_batch * H2 * W2)

    mask1 = v1_ref[...]              # [1, Mp1]
    mask2 = v2_ref[...]              # [1, Mp2]

    # One-time scratch init: only fbufA's flat end pads must be zero (their
    # reads feed only halo outputs, but must not be NaN); fbufB is zeroed in
    # full because the per-row pool stores never touch its halo lanes.
    fbufA[:, 0:L1] = jnp.zeros((c1, L1), f32)
    fbufA[:, L1 + Mp1:L1 + Mp1 + L1] = jnp.zeros((c1, L1), f32)
    fbufB[...] = jnp.zeros_like(fbufB)

    # ---- ConvBlock 1 (1 -> 4): one [4, 9] x [9, Mp1] MXU matmul -------------
    x_cols = _im2col(xpad_ref, L1, Wg1, Mp1)
    y1 = _bn_lrelu_mask(
        jnp.dot(w1_ref[...], x_cols, preferred_element_type=f32),
        mask1, inv_cnt1)                                            # [4, Mp1]

    # ---- ConvBlock 2 (4 -> 16): one [16, 36] x [36, Mp1] matmul -------------
    fbufA[:, L1:L1 + Mp1] = y1                       # 128-aligned store
    y1_cols = _im2col(fbufA, L1, Wg1, Mp1)
    y2 = _bn_lrelu_mask(
        jnp.dot(w2_ref[...], y1_cols, preferred_element_type=f32),
        mask1, inv_cnt1)                                            # [16, Mp1]

    # ---- AvgPool2d(2): one [16, 2*Wg1] x [2*Wg1, W2] dot per pooled row, ----
    #      written straight into the padded layout-2 staging buffer (whose
    #      halos stay zero, so no extra masking of the pooled tensor).
    for nb in range(n_batch):
        for r2 in range(H2):
            src = nb * Mimg1 + (2 * r2 + 1) * Wg1          # rows 2r2, 2r2+1
            dst = L2 + nb * Mimg2 + (r2 + 1) * Wg2 + 1
            fbufB[:, dst:dst + W2] = jnp.dot(
                y2[:, src:src + 2 * Wg1], wpool_ref[...],
                preferred_element_type=f32)
    pooled = fbufB[:, L2:L2 + Mp2]                   # 128-aligned load

    # ---- ResidualBlock 1: one [16, 144] x [144, Mp2] matmul -----------------
    p_cols = _im2col(fbufB, L2, Wg2, Mp2)
    y3 = _bn_lrelu_mask(
        jnp.dot(wr1_ref[...], p_cols, preferred_element_type=f32),
        mask2, inv_cnt2) + pooled

    # ---- ResidualBlock 2 (halos of y3 are already zero) ---------------------
    fbufB[:, L2:L2 + Mp2] = y3
    y3_cols = _im2col(fbufB, L2, Wg2, Mp2)
    y4 = _bn_lrelu_mask(
        jnp.dot(wr2_ref[...], y3_cols, preferred_element_type=f32),
        mask2, inv_cnt2) + y3

    # ---- Linear over the pooled width axis: N*H2 small [16,W2]x[W2,8] dots --
    for nb in range(n_batch):
        for r2 in range(H2):
            src = nb * Mimg2 + (r2 + 1) * Wg2 + 1
            idx = nb * H2 + r2
            o_ref[:, idx * JOUT:(idx + 1) * JOUT] = (
                jnp.dot(y4[:, src:src + W2], wlt_ref[...],
                        preferred_element_type=f32) + bl_ref[...])


def stage2_forward(x_nchw, params):
    w1, b1, w2, b2, wr1, br1, wr2, br2, wl, bl = params
    N, C, H, W = x_nchw.shape
    H2, W2 = H // 2, W // 2
    assert C == 1 and H % 2 == 0 and W % 2 == 0
    assert W2 == wl.shape[1], "nn.Linear in_features must equal W/2"
    f32 = jnp.float32

    Wg1, Wg2 = W + 2, W2 + 2
    Hp1, Hp2 = H + 2, H2 + 2
    Mimg1, Mimg2 = Hp1 * Wg1, Hp2 * Wg2
    Mp1, Mp2 = N * Mimg1, N * Mimg2

    def rup(v, m):
        return ((v + m - 1) // m) * m

    L1 = rup(Wg1 + 1, 128)       # 128-aligned flat end pad (>= max tap shift)
    L2 = rup(Wg2 + 1, 128)
    C1, C2 = w1.shape[0], w2.shape[0]      # 4, 16
    JOUT = wl.shape[0]                     # 8

    # ---- XLA-side layout plumbing (shape-only, tiny; folds under jit) ------
    # Input -> per-image zero-haloed (H+2)x(W+2) grid, flattened, with
    # 128-aligned zero end pads so every tap window stays in-bounds.
    ximg = jnp.pad(x_nchw.astype(f32).reshape(N, H, W), ((0, 0), (1, 1), (1, 1)))
    xpad = jnp.pad(ximg.reshape(1, Mp1), ((0, 0), (L1, L1)))

    # {0,1} valid-position masks for the two padded layouts (one row each).
    def valid_mask(hv, wv, hp, wg, total):
        pos = jnp.arange(total)
        wi = pos % wg
        hi = (pos // wg) % hp
        ok = (wi >= 1) & (wi <= wv) & (hi >= 1) & (hi <= hv)
        return ok.astype(f32)[None, :]

    valid1 = valid_mask(H, W, Hp1, Wg1, Mp1)       # [1, Mp1]
    valid2 = valid_mask(H2, W2, Hp2, Wg2, Mp2)     # [1, Mp2]

    def colw(w):     # [cout, cin, 3, 3] -> [cout, 9*cin] (tap-major columns)
        return jnp.transpose(w.astype(f32), (0, 2, 3, 1)).reshape(w.shape[0], -1)

    # NOTE: conv biases (b1, b2, br1, br2) are not passed to the kernel:
    # train-mode BatchNorm subtracts the per-channel batch mean, so any
    # per-channel constant bias cancels exactly.

    # Per-output-row 2x2 average-pool matrix: [2*(W+2), W2]; both input rows
    # of a pooled row use the same column map, each tap weighted 0.25.
    rr = jnp.arange(2 * Wg1) % Wg1
    cc = jnp.arange(W2)
    wpool = 0.25 * ((rr[:, None] >= 1) & (rr[:, None] <= W) &
                    ((rr[:, None] - 1) // 2 == cc[None, :])).astype(f32)

    wlt = jnp.transpose(wl.astype(f32))            # [W2, 8]
    blr = bl.astype(f32).reshape(1, JOUT)          # [1, 8]

    kernel = functools.partial(
        stage2_kernel, n_batch=N, H=H, W=W, H2=H2, W2=W2, L1=L1, L2=L2)

    # Single-invocation kernel (no grid): train-mode BatchNorm couples the
    # whole batch and at these sizes launch overhead dominates any split.
    # TODO(synk): at larger spatial extents, shard the flat axis across the two
    # v7x TensorCores with per-core partial BN sums combined via shared scratch.
    out = pl.pallas_call(
        kernel,
        out_shape=jax.ShapeDtypeStruct((C2, N * H2 * JOUT), f32),
        in_specs=[pl.BlockSpec(memory_space=pltpu.MemorySpace.VMEM)] * 10,
        out_specs=pl.BlockSpec(memory_space=pltpu.MemorySpace.VMEM),
        scratch_shapes=[
            pltpu.VMEM((C1, L1 + Mp1 + L1), f32),   # conv2 input staging
            pltpu.VMEM((C2, L2 + Mp2 + L2), f32),   # pool / residual staging
        ],
    )(xpad, valid1, valid2,
      colw(w1), colw(w2), colw(wr1), colw(wr2),
      wpool, wlt, blr)

    # [16, N*H2*8] -> [N, 16, H2, 8]
    return jnp.transpose(out.reshape(C2, N, H2, JOUT), (1, 0, 2, 3))


def init_params(key):
    """Deterministic params matching the module's __init__ (kaiming_normal
    fan_out with leaky_relu gain for convs, zero conv bias, default Linear
    init).  Conv weights use the PyTorch [cout, cin, 3, 3] layout."""
    ks = jax.random.split(key, 6)

    def kconv(k, cout, cin):
        fan_out = cout * 9
        std = math.sqrt(2.0) / math.sqrt(fan_out)
        return std * jax.random.normal(k, (cout, cin, 3, 3), jnp.float32)

    w1 = kconv(ks[0], 4, 1);    b1 = jnp.zeros((4,), jnp.float32)
    w2 = kconv(ks[1], 16, 4);   b2 = jnp.zeros((16,), jnp.float32)
    wr1 = kconv(ks[2], 16, 16); br1 = jnp.zeros((16,), jnp.float32)
    wr2 = kconv(ks[3], 16, 16); br2 = jnp.zeros((16,), jnp.float32)
    bound = 1.0 / math.sqrt(64.0)
    wl = jax.random.uniform(ks[4], (8, 64), jnp.float32, -bound, bound)
    bl = jax.random.uniform(ks[5], (8,), jnp.float32, -bound, bound)
    return (w1, b1, w2, b2, wr1, br1, wr2, br2, wl, bl)


def _ref_forward(x_nchw, params):
    """Pure-JAX reference with identical semantics (correctness check)."""
    w1, b1, w2, b2, wr1, br1, wr2, br2, wl, bl = params
    x = jnp.transpose(x_nchw, (0, 2, 3, 1)).astype(jnp.float32)

    def conv(x, w, b):
        y = jax.lax.conv_general_dilated(
            x, jnp.transpose(w, (2, 3, 1, 0)), window_strides=(1, 1),
            padding=((1, 1), (1, 1)),
            dimension_numbers=("NHWC", "HWIO", "NHWC"),
            precision=jax.lax.Precision.HIGHEST)
        return y + b[None, None, None, :]

    def bn_lrelu(y):
        m = jnp.mean(y, axis=(0, 1, 2), keepdims=True)
        v = jnp.mean((y - m) ** 2, axis=(0, 1, 2), keepdims=True)
        yn = (y - m) / jnp.sqrt(v + BN_EPS)
        return jnp.where(yn >= 0, yn, NEG_SLOPE * yn)

    x = bn_lrelu(conv(x, w1, b1))
    x = bn_lrelu(conv(x, w2, b2))
    n, h, w, c = x.shape
    x = x.reshape(n, h // 2, 2, w // 2, 2, c).mean(axis=(2, 4))
    x = bn_lrelu(conv(x, wr1, br1)) + x
    x = bn_lrelu(conv(x, wr2, br2)) + x
    y = jnp.einsum("nhwc,jw->nhjc", x, wl, precision=jax.lax.Precision.HIGHEST)
    y = y + bl[None, None, :, None]
    return jnp.transpose(y, (0, 3, 1, 2))


if __name__ == "__main__":
    key = jax.random.PRNGKey(0)
    pkey, xkey = jax.random.split(key)
    params = init_params(pkey)

    # batch=2, 1 input channel, H=8, W=128 (W must be 128 so the pooled width
    # equals nn.Linear's in_features = 64, as the module's forward requires).
    x = jax.random.normal(xkey, (2, 1, 8, 128), jnp.float32)

    out = jax.jit(stage2_forward)(x, params)
    out = jax.block_until_ready(out)
    assert out.shape == (2, 16, 4, 8), out.shape

    ref = _ref_forward(x, params)
    err = float(jnp.max(jnp.abs(out - ref)))
    assert err < 2e-2, f"kernel/reference mismatch: max abs err = {err}"
    print("KERNEL_OK")
</pallas_src>

<mosaic_0001>
module attributes {stable_mosaic.version = 11 : i64} {
  func.func @stage2_kernel(%arg0: memref<1x3112xf32, #tpu.memory_space<vmem>>, %arg1: memref<1x2600xf32, #tpu.memory_space<vmem>>, %arg2: memref<1x792xf32, #tpu.memory_space<vmem>>, %arg3: memref<4x9xf32, #tpu.memory_space<vmem>>, %arg4: memref<16x36xf32, #tpu.memory_space<vmem>>, %arg5: memref<16x144xf32, #tpu.memory_space<vmem>>, %arg6: memref<16x144xf32, #tpu.memory_space<vmem>>, %arg7: memref<260x64xf32, #tpu.memory_space<vmem>>, %arg8: memref<64x8xf32, #tpu.memory_space<vmem>>, %arg9: memref<1x8xf32, #tpu.memory_space<vmem>>, %arg10: memref<16x64xf32, #tpu.memory_space<vmem>>, %arg11: memref<4x3112xf32, #tpu.memory_space<vmem>>, %arg12: memref<16x1048xf32, #tpu.memory_space<vmem>>) attributes {dimension_semantics = [], scalar_prefetch = 0 : i64, scratch_operands = 2 : i64, tpu.core_type = #tpu.core_type<tc>} {
    %c0 = arith.constant 0 : index
    %c0_0 = arith.constant 0 : index
    %0 = vector.load %arg1[%c0, %c0_0] : memref<1x2600xf32, #tpu.memory_space<vmem>>, vector<1x2600xf32>
    %c0_1 = arith.constant 0 : index
    %c0_2 = arith.constant 0 : index
    %1 = vector.load %arg2[%c0_1, %c0_2] : memref<1x792xf32, #tpu.memory_space<vmem>>, vector<1x792xf32>
    %cst = arith.constant 0.000000e+00 : f32
    %2 = vector.broadcast %cst : f32 to vector<4x256xf32>
    %c0_3 = arith.constant 0 : index
    %c0_4 = arith.constant 0 : index
    %3 = vector.load %arg11[%c0_3, %c0_4] : memref<4x3112xf32, #tpu.memory_space<vmem>>, vector<4x256xf32>
    tpu.vector_store %arg11[%c0_3, %c0_4], %2 {strides = array<i32>} : memref<4x3112xf32, #tpu.memory_space<vmem>>, vector<4x256xf32>,
    %cst_5 = arith.constant 0.000000e+00 : f32
    %4 = vector.broadcast %cst_5 : f32 to vector<4x256xf32>
    %c0_6 = arith.constant 0 : index
    %c2856 = arith.constant 2856 : index
    %5 = vector.load %arg11[%c0_6, %c2856] : memref<4x3112xf32, #tpu.memory_space<vmem>>, vector<4x256xf32>
    tpu.vector_store %arg11[%c0_6, %c2856], %4 {strides = array<i32>} : memref<4x3112xf32, #tpu.memory_space<vmem>>, vector<4x256xf32>,
    %cst_7 = arith.constant 0.000000e+00 : f32
    %6 = vector.broadcast %cst_7 : f32 to vector<16x1048xf32>
    %c0_8 = arith.constant 0 : index
    %c0_9 = arith.constant 0 : index
    %7 = vector.load %arg12[%c0_8, %c0_9] : memref<16x1048xf32, #tpu.memory_space<vmem>>, vector<16x1048xf32>
    tpu.vector_store %arg12[%c0_8, %c0_9], %6 {strides = array<i32>} : memref<16x1048xf32, #tpu.memory_space<vmem>>, vector<16x1048xf32>,
    %c0_10 = arith.constant 0 : index
    %c125 = arith.constant 125 : index
    %8 = vector.load %arg0[%c0_10, %c125] : memref<1x3112xf32, #tpu.memory_space<vmem>>, vector<1x2600xf32>
    %c0_11 = arith.constant 0 : index
    %c126 = arith.constant 126 : index
    %9 = vector.load %arg0[%c0_11, %c126] : memref<1x3112xf32, #tpu.memory_space<vmem>>, vector<1x2600xf32>
    %c0_12 = arith.constant 0 : index
    %c127 = arith.constant 127 : index
    %10 = vector.load %arg0[%c0_12, %c127] : memref<1x3112xf32, #tpu.memory_space<vmem>>, vector<1x2600xf32>
    %c0_13 = arith.constant 0 : index
    %c255 = arith.constant 255 : index
    %11 = vector.load %arg0[%c0_13, %c255] : memref<1x3112xf32, #tpu.memory_space<vmem>>, vector<1x2600xf32>
    %c0_14 = arith.constant 0 : index
    %c256 = arith.constant 256 : index
    %12 = vector.load %arg0[%c0_14, %c256] : memref<1x3112xf32, #tpu.memory_space<vmem>>, vector<1x2600xf32>
    %c0_15 = arith.constant 0 : index
    %c257 = arith.constant 257 : index
    %13 = vector.load %arg0[%c0_15, %c257] : memref<1x3112xf32, #tpu.memory_space<vmem>>, vector<1x2600xf32>
    %c0_16 = arith.constant 0 : index
    %c385 = arith.constant 385 : index
    %14 = vector.load %arg0[%c0_16, %c385] : memref<1x3112xf32, #tpu.memory_space<vmem>>, vector<1x2600xf32>
    %c0_17 = arith.constant 0 : index
    %c386 = arith.constant 386 : index
    %15 = vector.load %arg0[%c0_17, %c386] : memref<1x3112xf32, #tpu.memory_space<vmem>>, vector<1x2600xf32>
    %c0_18 = arith.constant 0 : index
    %c387 = arith.constant 387 : index
    %16 = vector.load %arg0[%c0_18, %c387] : memref<1x3112xf32, #tpu.memory_space<vmem>>, vector<1x2600xf32>
    %17 = vector.shape_cast %8 : vector<1x2600xf32> to vector<1x1x2600xf32>
    %18 = vector.shape_cast %9 : vector<1x2600xf32> to vector<1x1x2600xf32>
    %19 = vector.shape_cast %10 : vector<1x2600xf32> to vector<1x1x2600xf32>
    %20 = vector.shape_cast %11 : vector<1x2600xf32> to vector<1x1x2600xf32>
    %21 = vector.shape_cast %12 : vector<1x2600xf32> to vector<1x1x2600xf32>
    %22 = vector.shape_cast %13 : vector<1x2600xf32> to vector<1x1x2600xf32>
    %23 = vector.shape_cast %14 : vector<1x2600xf32> to vector<1x1x2600xf32>
    %24 = vector.shape_cast %15 : vector<1x2600xf32> to vector<1x1x2600xf32>
    %25 = vector.shape_cast %16 : vector<1x2600xf32> to vector<1x1x2600xf32>
    %26 = tpu.concatenate %17, %18, %19, %20, %21, %22, %23, %24, %25 in 0 : vector<1x1x2600xf32>, vector<1x1x2600xf32>, vector<1x1x2600xf32>, vector<1x1x2600xf32>, vector<1x1x2600xf32>, vector<1x1x2600xf32>, vector<1x1x2600xf32>, vector<1x1x2600xf32>, vector<1x1x2600xf32> -> vector<9x1x2600xf32>
    %27 = vector.shape_cast %26 : vector<9x1x2600xf32> to vector<9x2600xf32>
    %c0_19 = arith.constant 0 : index
    %c0_20 = arith.constant 0 : index
    %28 = vector.load %arg3[%c0_19, %c0_20] : memref<4x9xf32, #tpu.memory_space<vmem>>, vector<4x9xf32>
    %cst_21 = arith.constant dense<0.000000e+00> : vector<4x2600xf32>
    %29 = tpu.matmul %28, %27, %cst_21 {dimension_numbers = #tpu.dot_dimension_numbers<[1], [0], [0], [1], [0, 0, 1, 1], [], []>} : vector<4x9xf32>, vector<9x2600xf32>, vector<4x2600xf32> -> vector<4x2600xf32>
    %30 = vector.broadcast %0 : vector<1x2600xf32> to vector<4x2600xf32>
    %31 = arith.mulf %29, %30 : vector<4x2600xf32>
    %cst_22 = arith.constant dense<0.000000e+00> : vector<4xf32>
    %32 = vector.multi_reduction <add>, %31, %cst_22 [1] : vector<4x2600xf32> to vector<4xf32>
    %33 = vector.shape_cast %32 : vector<4xf32> to vector<4x1xf32>
    %34 = arith.mulf %31, %31 : vector<4x2600xf32>
    %cst_23 = arith.constant dense<0.000000e+00> : vector<4xf32>
    %35 = vector.multi_reduction <add>, %34, %cst_23 [1] : vector<4x2600xf32> to vector<4xf32>
    %36 = vector.shape_cast %35 : vector<4xf32> to vector<4x1xf32>
    %cst_24 = arith.constant 4.8828125E-4 : f32
    %37 = vector.broadcast %cst_24 : f32 to vector<4x1xf32>
    %38 = arith.mulf %33, %37 : vector<4x1xf32>
    %cst_25 = arith.constant 4.8828125E-4 : f32
    %39 = vector.broadcast %cst_25 : f32 to vector<4x1xf32>
    %40 = arith.mulf %36, %39 : vector<4x1xf32>
    %41 = arith.mulf %38, %38 : vector<4x1xf32>
    %42 = arith.subf %40, %41 : vector<4x1xf32>
    %cst_26 = arith.constant 9.99999974E-6 : f32
    %43 = vector.broadcast %cst_26 : f32 to vector<4x1xf32>
    %44 = arith.addf %42, %43 : vector<4x1xf32>
    %45 = math.rsqrt %44 : vector<4x1xf32>
    %46 = vector.broadcast %38 : vector<4x1xf32> to vector<4x2600xf32>
    %47 = arith.subf %31, %46 : vector<4x2600xf32>
    %48 = vector.broadcast %45 : vector<4x1xf32> to vector<4x2600xf32>
    %49 = arith.mulf %47, %48 : vector<4x2600xf32>
    %cst_27 = arith.constant 2.000000e-01 : f32
    %50 = vector.broadcast %cst_27 : f32 to vector<4x2600xf32>
    %51 = arith.mulf %50, %49 : vector<4x2600xf32>
    %52 = arith.maximumf %49, %51 : vector<4x2600xf32>
    %53 = vector.broadcast %0 : vector<1x2600xf32> to vector<4x2600xf32>
    %54 = arith.mulf %52, %53 : vector<4x2600xf32>
    %c0_28 = arith.constant 0 : index
    %c256_29 = arith.constant 256 : index
    %55 = vector.load %arg11[%c0_28, %c256_29] : memref<4x3112xf32, #tpu.memory_space<vmem>>, vector<4x2600xf32>
    tpu.vector_store %arg11[%c0_28, %c256_29], %54 {strides = array<i32>} : memref<4x3112xf32, #tpu.memory_space<vmem>>, vector<4x2600xf32>,
    %c0_30 = arith.constant 0 : index
    %c125_31 = arith.constant 125 : index
    %56 = vector.load %arg11[%c0_30, %c125_31] : memref<4x3112xf32, #tpu.memory_space<vmem>>, vector<4x2600xf32>
    %c0_32 = arith.constant 0 : index
    %c126_33 = arith.constant 126 : index
    %57 = vector.load %arg11[%c0_32, %c126_33] : memref<4x3112xf32, #tpu.memory_space<vmem>>, vector<4x2600xf32>
    %c0_34 = arith.constant 0 : index
    %c127_35 = arith.constant 127 : index
    %58 = vector.load %arg11[%c0_34, %c127_35] : memref<4x3112xf32, #tpu.memory_space<vmem>>, vector<4x2600xf32>
    %c0_36 = arith.constant 0 : index
    %c255_37 = arith.constant 255 : index
    %59 = vector.load %arg11[%c0_36, %c255_37] : memref<4x3112xf32, #tpu.memory_space<vmem>>, vector<4x2600xf32>
    %c0_38 = arith.constant 0 : index
    %c256_39 = arith.constant 256 : index
    %60 = vector.load %arg11[%c0_38, %c256_39] : memref<4x3112xf32, #tpu.memory_space<vmem>>, vector<4x2600xf32>
    %c0_40 = arith.constant 0 : index
    %c257_41 = arith.constant 257 : index
    %61 = vector.load %arg11[%c0_40, %c257_41] : memref<4x3112xf32, #tpu.memory_space<vmem>>, vector<4x2600xf32>
    %c0_42 = arith.constant 0 : index
    %c385_43 = arith.constant 385 : index
    %62 = vector.load %arg11[%c0_42, %c385_43] : memref<4x3112xf32, #tpu.memory_space<vmem>>, vector<4x2600xf32>
    %c0_44 = arith.constant 0 : index
    %c386_45 = arith.constant 386 : index
    %63 = vector.load %arg11[%c0_44, %c386_45] : memref<4x3112xf32, #tpu.memory_space<vmem>>, vector<4x2600xf32>
    %c0_46 = arith.constant 0 : index
    %c387_47 = arith.constant 387 : index
    %64 = vector.load %arg11[%c0_46, %c387_47] : memref<4x3112xf32, #tpu.memory_space<vmem>>, vector<4x2600xf32>
    %65 = vector.shape_cast %56 : vector<4x2600xf32> to vector<1x4x2600xf32>
    %66 = vector.shape_cast %57 : vector<4x2600xf32> to vector<1x4x2600xf32>
    %67 = vector.shape_cast %58 : vector<4x2600xf32> to vector<1x4x2600xf32>
    %68 = vector.shape_cast %59 : vector<4x2600xf32> to vector<1x4x2600xf32>
    %69 = vector.shape_cast %60 : vector<4x2600xf32> to vector<1x4x2600xf32>
    %70 = vector.shape_cast %61 : vector<4x2600xf32> to vector<1x4x2600xf32>
    %71 = vector.shape_cast %62 : vector<4x2600xf32> to vector<1x4x2600xf32>
    %72 = vector.shape_cast %63 : vector<4x2600xf32> to vector<1x4x2600xf32>
    %73 = vector.shape_cast %64 : vector<4x2600xf32> to vector<1x4x2600xf32>
    %74 = tpu.concatenate %65, %66, %67, %68, %69, %70, %71, %72, %73 in 0 : vector<1x4x2600xf32>, vector<1x4x2600xf32>, vector<1x4x2600xf32>, vector<1x4x2600xf32>, vector<1x4x2600xf32>, vector<1x4x2600xf32>, vector<1x4x2600xf32>, vector<1x4x2600xf32>, vector<1x4x2600xf32> -> vector<9x4x2600xf32>
    %75 = vector.shape_cast %74 : vector<9x4x2600xf32> to vector<36x2600xf32>
    %c0_48 = arith.constant 0 : index
    %c0_49 = arith.constant 0 : index
    %76 = vector.load %arg4[%c0_48, %c0_49] : memref<16x36xf32, #tpu.memory_space<vmem>>, vector<16x36xf32>
    %cst_50 = arith.constant dense<0.000000e+00> : vector<16x2600xf32>
    %77 = tpu.matmul %76, %75, %cst_50 {dimension_numbers = #tpu.dot_dimension_numbers<[1], [0], [0], [1], [0, 0, 1, 1], [], []>} : vector<16x36xf32>, vector<36x2600xf32>, vector<16x2600xf32> -> vector<16x2600xf32>
    %78 = vector.broadcast %0 : vector<1x2600xf32> to vector<16x2600xf32>
    %79 = arith.mulf %77, %78 : vector<16x2600xf32>
    %cst_51 = arith.constant dense<0.000000e+00> : vector<16xf32>
    %80 = vector.multi_reduction <add>, %79, %cst_51 [1] : vector<16x2600xf32> to vector<16xf32>
    %81 = vector.shape_cast %80 : vector<16xf32> to vector<16x1xf32>
    %82 = arith.mulf %79, %79 : vector<16x2600xf32>
    %cst_52 = arith.constant dense<0.000000e+00> : vector<16xf32>
    %83 = vector.multi_reduction <add>, %82, %cst_52 [1] : vector<16x2600xf32> to vector<16xf32>
    %84 = vector.shape_cast %83 : vector<16xf32> to vector<16x1xf32>
    %cst_53 = arith.constant 4.8828125E-4 : f32
    %85 = vector.broadcast %cst_53 : f32 to vector<16x1xf32>
    %86 = arith.mulf %81, %85 : vector<16x1xf32>
    %cst_54 = arith.constant 4.8828125E-4 : f32
    %87 = vector.broadcast %cst_54 : f32 to vector<16x1xf32>
    %88 = arith.mulf %84, %87 : vector<16x1xf32>
    %89 = arith.mulf %86, %86 : vector<16x1xf32>
    %90 = arith.subf %88, %89 : vector<16x1xf32>
    %cst_55 = arith.constant 9.99999974E-6 : f32
    %91 = vector.broadcast %cst_55 : f32 to vector<16x1xf32>
    %92 = arith.addf %90, %91 : vector<16x1xf32>
    %93 = math.rsqrt %92 : vector<16x1xf32>
    %94 = vector.broadcast %86 : vector<16x1xf32> to vector<16x2600xf32>
    %95 = arith.subf %79, %94 : vector<16x2600xf32>
    %96 = vector.broadcast %93 : vector<16x1xf32> to vector<16x2600xf32>
    %97 = arith.mulf %95, %96 : vector<16x2600xf32>
    %cst_56 = arith.constant 2.000000e-01 : f32
    %98 = vector.broadcast %cst_56 : f32 to vector<16x2600xf32>
    %99 = arith.mulf %98, %97 : vector<16x2600xf32>
    %100 = arith.maximumf %97, %99 : vector<16x2600xf32>
    %101 = vector.broadcast %0 : vector<1x2600xf32> to vector<16x2600xf32>
    %102 = arith.mulf %100, %101 : vector<16x2600xf32>
    %103 = vector.extract_strided_slice %102 {offsets = [0, 130], sizes = [16, 260], strides = [1, 1]} : vector<16x2600xf32> to vector<16x260xf32>
    %c0_57 = arith.constant 0 : index
    %c0_58 = arith.constant 0 : index
    %104 = vector.load %arg7[%c0_57, %c0_58] : memref<260x64xf32, #tpu.memory_space<vmem>>, vector<260x64xf32>
    %cst_59 = arith.constant dense<0.000000e+00> : vector<16x64xf32>
    %105 = tpu.matmul %103, %104, %cst_59 {dimension_numbers = #tpu.dot_dimension_numbers<[1], [0], [0], [1], [0, 0, 1, 1], [], []>} : vector<16x260xf32>, vector<260x64xf32>, vector<16x64xf32> -> vector<16x64xf32>
    %c0_60 = arith.constant 0 : index
    %c195 = arith.constant 195 : index
    %106 = vector.load %arg12[%c0_60, %c195] : memref<16x1048xf32, #tpu.memory_space<vmem>>, vector<16x64xf32>
    tpu.vector_store %arg12[%c0_60, %c195], %105 {strides = array<i32>} : memref<16x1048xf32, #tpu.memory_space<vmem>>, vector<16x64xf32>,
    %107 = vector.extract_strided_slice %102 {offsets = [0, 390], sizes = [16, 260], strides = [1, 1]} : vector<16x2600xf32> to vector<16x260xf32>
    %c0_61 = arith.constant 0 : index
    %c0_62 = arith.constant 0 : index
    %108 = vector.load %arg7[%c0_61, %c0_62] : memref<260x64xf32, #tpu.memory_space<vmem>>, vector<260x64xf32>
    %cst_63 = arith.constant dense<0.000000e+00> : vector<16x64xf32>
    %109 = tpu.matmul %107, %108, %cst_63 {dimension_numbers = #tpu.dot_dimension_numbers<[1], [0], [0], [1], [0, 0, 1, 1], [], []>} : vector<16x260xf32>, vector<260x64xf32>, vector<16x64xf32> -> vector<16x64xf32>
    %c0_64 = arith.constant 0 : index
    %c261 = arith.constant 261 : index
    %110 = vector.load %arg12[%c0_64, %c261] : memref<16x1048xf32, #tpu.memory_space<vmem>>, vector<16x64xf32>
    tpu.vector_store %arg12[%c0_64, %c261], %109 {strides = array<i32>} : memref<16x1048xf32, #tpu.memory_space<vmem>>, vector<16x64xf32>,
    %111 = vector.extract_strided_slice %102 {offsets = [0, 650], sizes = [16, 260], strides = [1, 1]} : vector<16x2600xf32> to vector<16x260xf32>
    %c0_65 = arith.constant 0 : index
    %c0_66 = arith.constant 0 : index
    %112 = vector.load %arg7[%c0_65, %c0_66] : memref<260x64xf32, #tpu.memory_space<vmem>>, vector<260x64xf32>
    %cst_67 = arith.constant dense<0.000000e+00> : vector<16x64xf32>
    %113 = tpu.matmul %111, %112, %cst_67 {dimension_numbers = #tpu.dot_dimension_numbers<[1], [0], [0], [1], [0, 0, 1, 1], [], []>} : vector<16x260xf32>, vector<260x64xf32>, vector<16x64xf32> -> vector<16x64xf32>
    %c0_68 = arith.constant 0 : index
    %c327 = arith.constant 327 : index
    %114 = vector.load %arg12[%c0_68, %c327] : memref<16x1048xf32, #tpu.memory_space<vmem>>, vector<16x64xf32>
    tpu.vector_store %arg12[%c0_68, %c327], %113 {strides = array<i32>} : memref<16x1048xf32, #tpu.memory_space<vmem>>, vector<16x64xf32>,
    %115 = vector.extract_strided_slice %102 {offsets = [0, 910], sizes = [16, 260], strides = [1, 1]} : vector<16x2600xf32> to vector<16x260xf32>
    %c0_69 = arith.constant 0 : index
    %c0_70 = arith.constant 0 : index
    %116 = vector.load %arg7[%c0_69, %c0_70] : memref<260x64xf32, #tpu.memory_space<vmem>>, vector<260x64xf32>
    %cst_71 = arith.constant dense<0.000000e+00> : vector<16x64xf32>
    %117 = tpu.matmul %115, %116, %cst_71 {dimension_numbers = #tpu.dot_dimension_numbers<[1], [0], [0], [1], [0, 0, 1, 1], [], []>} : vector<16x260xf32>, vector<260x64xf32>, vector<16x64xf32> -> vector<16x64xf32>
    %c0_72 = arith.constant 0 : index
    %c393 = arith.constant 393 : index
    %118 = vector.load %arg12[%c0_72, %c393] : memref<16x1048xf32, #tpu.memory_space<vmem>>, vector<16x64xf32>
    tpu.vector_store %arg12[%c0_72, %c393], %117 {strides = array<i32>} : memref<16x1048xf32, #tpu.memory_space<vmem>>, vector<16x64xf32>,
    %119 = vector.extract_strided_slice %102 {offsets = [0, 1430], sizes = [16, 260], strides = [1, 1]} : vector<16x2600xf32> to vector<16x260xf32>
    %c0_73 = arith.constant 0 : index
    %c0_74 = arith.constant 0 : index
    %120 = vector.load %arg7[%c0_73, %c0_74] : memref<260x64xf32, #tpu.memory_space<vmem>>, vector<260x64xf32>
    %cst_75 = arith.constant dense<0.000000e+00> : vector<16x64xf32>
    %121 = tpu.matmul %119, %120, %cst_75 {dimension_numbers = #tpu.dot_dimension_numbers<[1], [0], [0], [1], [0, 0, 1, 1], [], []>} : vector<16x260xf32>, vector<260x64xf32>, vector<16x64xf32> -> vector<16x64xf32>
    %c0_76 = arith.constant 0 : index
    %c591 = arith.constant 591 : index
    %122 = vector.load %arg12[%c0_76, %c591] : memref<16x1048xf32, #tpu.memory_space<vmem>>, vector<16x64xf32>
    tpu.vector_store %arg12[%c0_76, %c591], %121 {strides = array<i32>} : memref<16x1048xf32, #tpu.memory_space<vmem>>, vector<16x64xf32>,
    %123 = vector.extract_strided_slice %102 {offsets = [0, 1690], sizes = [16, 260], strides = [1, 1]} : vector<16x2600xf32> to vector<16x260xf32>
    %c0_77 = arith.constant 0 : index
    %c0_78 = arith.constant 0 : index
    %124 = vector.load %arg7[%c0_77, %c0_78] : memref<260x64xf32, #tpu.memory_space<vmem>>, vector<260x64xf32>
    %cst_79 = arith.constant dense<0.000000e+00> : vector<16x64xf32>
    %125 = tpu.matmul %123, %124, %cst_79 {dimension_numbers = #tpu.dot_dimension_numbers<[1], [0], [0], [1], [0, 0, 1, 1], [], []>} : vector<16x260xf32>, vector<260x64xf32>, vector<16x64xf32> -> vector<16x64xf32>
    %c0_80 = arith.constant 0 : index
    %c657 = arith.constant 657 : index
    %126 = vector.load %arg12[%c0_80, %c657] : memref<16x1048xf32, #tpu.memory_space<vmem>>, vector<16x64xf32>
    tpu.vector_store %arg12[%c0_80, %c657], %125 {strides = array<i32>} : memref<16x1048xf32, #tpu.memory_space<vmem>>, vector<16x64xf32>,
    %127 = vector.extract_strided_slice %102 {offsets = [0, 1950], sizes = [16, 260], strides = [1, 1]} : vector<16x2600xf32> to vector<16x260xf32>
    %c0_81 = arith.constant 0 : index
    %c0_82 = arith.constant 0 : index
    %128 = vector.load %arg7[%c0_81, %c0_82] : memref<260x64xf32, #tpu.memory_space<vmem>>, vector<260x64xf32>
    %cst_83 = arith.constant dense<0.000000e+00> : vector<16x64xf32>
    %129 = tpu.matmul %127, %128, %cst_83 {dimension_numbers = #tpu.dot_dimension_numbers<[1], [0], [0], [1], [0, 0, 1, 1], [], []>} : vector<16x260xf32>, vector<260x64xf32>, vector<16x64xf32> -> vector<16x64xf32>
    %c0_84 = arith.constant 0 : index
    %c723 = arith.constant 723 : index
    %130 = vector.load %arg12[%c0_84, %c723] : memref<16x1048xf32, #tpu.memory_space<vmem>>, vector<16x64xf32>
    tpu.vector_store %arg12[%c0_84, %c723], %129 {strides = array<i32>} : memref<16x1048xf32, #tpu.memory_space<vmem>>, vector<16x64xf32>,
    %131 = vector.extract_strided_slice %102 {offsets = [0, 2210], sizes = [16, 260], strides = [1, 1]} : vector<16x2600xf32> to vector<16x260xf32>
    %c0_85 = arith.constant 0 : index
    %c0_86 = arith.constant 0 : index
    %132 = vector.load %arg7[%c0_85, %c0_86] : memref<260x64xf32, #tpu.memory_space<vmem>>, vector<260x64xf32>
    %cst_87 = arith.constant dense<0.000000e+00> : vector<16x64xf32>
    %133 = tpu.matmul %131, %132, %cst_87 {dimension_numbers = #tpu.dot_dimension_numbers<[1], [0], [0], [1], [0, 0, 1, 1], [], []>} : vector<16x260xf32>, vector<260x64xf32>, vector<16x64xf32> -> vector<16x64xf32>
    %c0_88 = arith.constant 0 : index
    %c789 = arith.constant 789 : index
    %134 = vector.load %arg12[%c0_88, %c789] : memref<16x1048xf32, #tpu.memory_space<vmem>>, vector<16x64xf32>
    tpu.vector_store %arg12[%c0_88, %c789], %133 {strides = array<i32>} : memref<16x1048xf32, #tpu.memory_space<vmem>>, vector<16x64xf32>,
    %c0_89 = arith.constant 0 : index
    %c128 = arith.constant 128 : index
    %135 = vector.load %arg12[%c0_89, %c128] : memref<16x1048xf32, #tpu.memory_space<vmem>>, vector<16x792xf32>
    %c0_90 = arith.constant 0 : index
    %c61 = arith.constant 61 : index
    %136 = vector.load %arg12[%c0_90, %c61] : memref<16x1048xf32, #tpu.memory_space<vmem>>, vector<16x792xf32>
    %c0_91 = arith.constant 0 : index
    %c62 = arith.constant 62 : index
    %137 = vector.load %arg12[%c0_91, %c62] : memref<16x1048xf32, #tpu.memory_space<vmem>>, vector<16x792xf32>
    %c0_92 = arith.constant 0 : index
    %c63 = arith.constant 63 : index
    %138 = vector.load %arg12[%c0_92, %c63] : memref<16x1048xf32, #tpu.memory_space<vmem>>, vector<16x792xf32>
    %c0_93 = arith.constant 0 : index
    %c127_94 = arith.constant 127 : index
    %139 = vector.load %arg12[%c0_93, %c127_94] : memref<16x1048xf32, #tpu.memory_space<vmem>>, vector<16x792xf32>
    %c0_95 = arith.constant 0 : index
    %c128_96 = arith.constant 128 : index
    %140 = vector.load %arg12[%c0_95, %c128_96] : memref<16x1048xf32, #tpu.memory_space<vmem>>, vector<16x792xf32>
    %c0_97 = arith.constant 0 : index
    %c129 = arith.constant 129 : index
    %141 = vector.load %arg12[%c0_97, %c129] : memref<16x1048xf32, #tpu.memory_space<vmem>>, vector<16x792xf32>
    %c0_98 = arith.constant 0 : index
    %c193 = arith.constant 193 : index
    %142 = vector.load %arg12[%c0_98, %c193] : memref<16x1048xf32, #tpu.memory_space<vmem>>, vector<16x792xf32>
    %c0_99 = arith.constant 0 : index
    %c194 = arith.constant 194 : index
    %143 = vector.load %arg12[%c0_99, %c194] : memref<16x1048xf32, #tpu.memory_space<vmem>>, vector<16x792xf32>
    %c0_100 = arith.constant 0 : index
    %c195_101 = arith.constant 195 : index
    %144 = vector.load %arg12[%c0_100, %c195_101] : memref<16x1048xf32, #tpu.memory_space<vmem>>, vector<16x792xf32>
    %145 = vector.shape_cast %136 : vector<16x792xf32> to vector<1x16x792xf32>
    %146 = vector.shape_cast %137 : vector<16x792xf32> to vector<1x16x792xf32>
    %147 = vector.shape_cast %138 : vector<16x792xf32> to vector<1x16x792xf32>
    %148 = vector.shape_cast %139 : vector<16x792xf32> to vector<1x16x792xf32>
    %149 = vector.shape_cast %140 : vector<16x792xf32> to vector<1x16x792xf32>
    %150 = vector.shape_cast %141 : vector<16x792xf32> to vector<1x16x792xf32>
    %151 = vector.shape_cast %142 : vector<16x792xf32> to vector<1x16x792xf32>
    %152 = vector.shape_cast %143 : vector<16x792xf32> to vector<1x16x792xf32>
    %153 = vector.shape_cast %144 : vector<16x792xf32> to vector<1x16x792xf32>
    %154 = tpu.concatenate %145, %146, %147, %148, %149, %150, %151, %152, %153 in 0 : vector<1x16x792xf32>, vector<1x16x792xf32>, vector<1x16x792xf32>, vector<1x16x792xf32>, vector<1x16x792xf32>, vector<1x16x792xf32>, vector<1x16x792xf32>, vector<1x16x792xf32>, vector<1x16x792xf32> -> vector<9x16x792xf32>
    %155 = vector.shape_cast %154 : vector<9x16x792xf32> to vector<144x792xf32>
    %c0_102 = arith.constant 0 : index
    %c0_103 = arith.constant 0 : index
    %156 = vector.load %arg5[%c0_102, %c0_103] : memref<16x144xf32, #tpu.memory_space<vmem>>, vector<16x144xf32>
    %cst_104 = arith.constant dense<0.000000e+00> : vector<16x792xf32>
    %157 = tpu.matmul %156, %155, %cst_104 {dimension_numbers = #tpu.dot_dimension_numbers<[1], [0], [0], [1], [0, 0, 1, 1], [], []>} : vector<16x144xf32>, vector<144x792xf32>, vector<16x792xf32> -> vector<16x792xf32>
    %158 = vector.broadcast %1 : vector<1x792xf32> to vector<16x792xf32>
    %159 = arith.mulf %157, %158 : vector<16x792xf32>
    %cst_105 = arith.constant dense<0.000000e+00> : vector<16xf32>
    %160 = vector.multi_reduction <add>, %159, %cst_105 [1] : vector<16x792xf32> to vector<16xf32>
    %161 = vector.shape_cast %160 : vector<16xf32> to vector<16x1xf32>
    %162 = arith.mulf %159, %159 : vector<16x792xf32>
    %cst_106 = arith.constant dense<0.000000e+00> : vector<16xf32>
    %163 = vector.multi_reduction <add>, %162, %cst_106 [1] : vector<16x792xf32> to vector<16xf32>
    %164 = vector.shape_cast %163 : vector<16xf32> to vector<16x1xf32>
    %cst_107 = arith.constant 0.001953125 : f32
    %165 = vector.broadcast %cst_107 : f32 to vector<16x1xf32>
    %166 = arith.mulf %161, %165 : vector<16x1xf32>
    %cst_108 = arith.constant 0.001953125 : f32
    %167 = vector.broadcast %cst_108 : f32 to vector<16x1xf32>
    %168 = arith.mulf %164, %167 : vector<16x1xf32>
    %169 = arith.mulf %166, %166 : vector<16x1xf32>
    %170 = arith.subf %168, %169 : vector<16x1xf32>
    %cst_109 = arith.constant 9.99999974E-6 : f32
    %171 = vector.broadcast %cst_109 : f32 to vector<16x1xf32>
    %172 = arith.addf %170, %171 : vector<16x1xf32>
    %173 = math.rsqrt %172 : vector<16x1xf32>
    %174 = vector.broadcast %166 : vector<16x1xf32> to vector<16x792xf32>
    %175 = arith.subf %159, %174 : vector<16x792xf32>
    %176 = vector.broadcast %173 : vector<16x1xf32> to vector<16x792xf32>
    %177 = arith.mulf %175, %176 : vector<16x792xf32>
    %cst_110 = arith.constant 2.000000e-01 : f32
    %178 = vector.broadcast %cst_110 : f32 to vector<16x792xf32>
    %179 = arith.mulf %178, %177 : vector<16x792xf32>
    %180 = arith.maximumf %177, %179 : vector<16x792xf32>
    %181 = vector.broadcast %1 : vector<1x792xf32> to vector<16x792xf32>
    %182 = arith.mulf %180, %181 : vector<16x792xf32>
    %183 = arith.addf %182, %135 : vector<16x792xf32>
    %c0_111 = arith.constant 0 : index
    %c128_112 = arith.constant 128 : index
    %184 = vector.load %arg12[%c0_111, %c128_112] : memref<16x1048xf32, #tpu.memory_space<vmem>>, vector<16x792xf32>
    tpu.vector_store %arg12[%c0_111, %c128_112], %183 {strides = array<i32>} : memref<16x1048xf32, #tpu.memory_space<vmem>>, vector<16x792xf32>,
    %c0_113 = arith.constant 0 : index
    %c61_114 = arith.constant 61 : index
    %185 = vector.load %arg12[%c0_113, %c61_114] : memref<16x1048xf32, #tpu.memory_space<vmem>>, vector<16x792xf32>
    %c0_115 = arith.constant 0 : index
    %c62_116 = arith.constant 62 : index
    %186 = vector.load %arg12[%c0_115, %c62_116] : memref<16x1048xf32, #tpu.memory_space<vmem>>, vector<16x792xf32>
    %c0_117 = arith.constant 0 : index
    %c63_118 = arith.constant 63 : index
    %187 = vector.load %arg12[%c0_117, %c63_118] : memref<16x1048xf32, #tpu.memory_space<vmem>>, vector<16x792xf32>
    %c0_119 = arith.constant 0 : index
    %c127_120 = arith.constant 127 : index
    %188 = vector.load %arg12[%c0_119, %c127_120] : memref<16x1048xf32, #tpu.memory_space<vmem>>, vector<16x792xf32>
    %c0_121 = arith.constant 0 : index
    %c128_122 = arith.constant 128 : index
    %189 = vector.load %arg12[%c0_121, %c128_122] : memref<16x1048xf32, #tpu.memory_space<vmem>>, vector<16x792xf32>
    %c0_123 = arith.constant 0 : index
    %c129_124 = arith.constant 129 : index
    %190 = vector.load %arg12[%c0_123, %c129_124] : memref<16x1048xf32, #tpu.memory_space<vmem>>, vector<16x792xf32>
    %c0_125 = arith.constant 0 : index
    %c193_126 = arith.constant 193 : index
    %191 = vector.load %arg12[%c0_125, %c193_126] : memref<16x1048xf32, #tpu.memory_space<vmem>>, vector<16x792xf32>
    %c0_127 = arith.constant 0 : index
    %c194_128 = arith.constant 194 : index
    %192 = vector.load %arg12[%c0_127, %c194_128] : memref<16x1048xf32, #tpu.memory_space<vmem>>, vector<16x792xf32>
    %c0_129 = arith.constant 0 : index
    %c195_130 = arith.constant 195 : index
    %193 = vector.load %arg12[%c0_129, %c195_130] : memref<16x1048xf32, #tpu.memory_space<vmem>>, vector<16x792xf32>
    %194 = vector.shape_cast %185 : vector<16x792xf32> to vector<1x16x792xf32>
    %195 = vector.shape_cast %186 : vector<16x792xf32> to vector<1x16x792xf32>
    %196 = vector.shape_cast %187 : vector<16x792xf32> to vector<1x16x792xf32>
    %197 = vector.shape_cast %188 : vector<16x792xf32> to vector<1x16x792xf32>
    %198 = vector.shape_cast %189 : vector<16x792xf32> to vector<1x16x792xf32>
    %199 = vector.shape_cast %190 : vector<16x792xf32> to vector<1x16x792xf32>
    %200 = vector.shape_cast %191 : vector<16x792xf32> to vector<1x16x792xf32>
    %201 = vector.shape_cast %192 : vector<16x792xf32> to vector<1x16x792xf32>
    %202 = vector.shape_cast %193 : vector<16x792xf32> to vector<1x16x792xf32>
    %203 = tpu.concatenate %194, %195, %196, %197, %198, %199, %200, %201, %202 in 0 : vector<1x16x792xf32>, vector<1x16x792xf32>, vector<1x16x792xf32>, vector<1x16x792xf32>, vector<1x16x792xf32>, vector<1x16x792xf32>, vector<1x16x792xf32>, vector<1x16x792xf32>, vector<1x16x792xf32> -> vector<9x16x792xf32>
    %204 = vector.shape_cast %203 : vector<9x16x792xf32> to vector<144x792xf32>
    %c0_131 = arith.constant 0 : index
    %c0_132 = arith.constant 0 : index
    %205 = vector.load %arg6[%c0_131, %c0_132] : memref<16x144xf32, #tpu.memory_space<vmem>>, vector<16x144xf32>
    %cst_133 = arith.constant dense<0.000000e+00> : vector<16x792xf32>
    %206 = tpu.matmul %205, %204, %cst_133 {dimension_numbers = #tpu.dot_dimension_numbers<[1], [0], [0], [1], [0, 0, 1, 1], [], []>} : vector<16x144xf32>, vector<144x792xf32>, vector<16x792xf32> -> vector<16x792xf32>
    %207 = vector.broadcast %1 : vector<1x792xf32> to vector<16x792xf32>
    %208 = arith.mulf %206, %207 : vector<16x792xf32>
    %cst_134 = arith.constant dense<0.000000e+00> : vector<16xf32>
    %209 = vector.multi_reduction <add>, %208, %cst_134 [1] : vector<16x792xf32> to vector<16xf32>
    %210 = vector.shape_cast %209 : vector<16xf32> to vector<16x1xf32>
    %211 = arith.mulf %208, %208 : vector<16x792xf32>
    %cst_135 = arith.constant dense<0.000000e+00> : vector<16xf32>
    %212 = vector.multi_reduction <add>, %211, %cst_135 [1] : vector<16x792xf32> to vector<16xf32>
    %213 = vector.shape_cast %212 : vector<16xf32> to vector<16x1xf32>
    %cst_136 = arith.constant 0.001953125 : f32
    %214 = vector.broadcast %cst_136 : f32 to vector<16x1xf32>
    %215 = arith.mulf %210, %214 : vector<16x1xf32>
    %cst_137 = arith.constant 0.001953125 : f32
    %216 = vector.broadcast %cst_137 : f32 to vector<16x1xf32>
    %217 = arith.mulf %213, %216 : vector<16x1xf32>
    %218 = arith.mulf %215, %215 : vector<16x1xf32>
    %219 = arith.subf %217, %218 : vector<16x1xf32>
    %cst_138 = arith.constant 9.99999974E-6 : f32
    %220 = vector.broadcast %cst_138 : f32 to vector<16x1xf32>
    %221 = arith.addf %219, %220 : vector<16x1xf32>
    %222 = math.rsqrt %221 : vector<16x1xf32>
    %223 = vector.broadcast %215 : vector<16x1xf32> to vector<16x792xf32>
    %224 = arith.subf %208, %223 : vector<16x792xf32>
    %225 = vector.broadcast %222 : vector<16x1xf32> to vector<16x792xf32>
    %226 = arith.mulf %224, %225 : vector<16x792xf32>
    %cst_139 = arith.constant 2.000000e-01 : f32
    %227 = vector.broadcast %cst_139 : f32 to vector<16x792xf32>
    %228 = arith.mulf %227, %226 : vector<16x792xf32>
    %229 = arith.maximumf %226, %228 : vector<16x792xf32>
    %230 = vector.broadcast %1 : vector<1x792xf32> to vector<16x792xf32>
    %231 = arith.mulf %229, %230 : vector<16x792xf32>
    %232 = arith.addf %231, %183 : vector<16x792xf32>
    %233 = vector.extract_strided_slice %232 {offsets = [0, 67], sizes = [16, 64], strides = [1, 1]} : vector<16x792xf32> to vector<16x64xf32>
    %c0_140 = arith.constant 0 : index
    %c0_141 = arith.constant 0 : index
    %234 = vector.load %arg8[%c0_140, %c0_141] : memref<64x8xf32, #tpu.memory_space<vmem>>, vector<64x8xf32>
    %cst_142 = arith.constant dense<0.000000e+00> : vector<16x8xf32>
    %235 = tpu.matmul %233, %234, %cst_142 {dimension_numbers = #tpu.dot_dimension_numbers<[1], [0], [0], [1], [0, 0, 1, 1], [], []>} : vector<16x64xf32>, vector<64x8xf32>, vector<16x8xf32> -> vector<16x8xf32>
    %c0_143 = arith.constant 0 : index
    %c0_144 = arith.constant 0 : index
    %236 = vector.load %arg9[%c0_143, %c0_144] : memref<1x8xf32, #tpu.memory_space<vmem>>, vector<1x8xf32>
    %237 = vector.broadcast %236 : vector<1x8xf32> to vector<16x8xf32>
    %238 = arith.addf %235, %237 : vector<16x8xf32>
    %c0_145 = arith.constant 0 : index
    %c0_146 = arith.constant 0 : index
    %239 = vector.load %arg10[%c0_145, %c0_146] : memref<16x64xf32, #tpu.memory_space<vmem>>, vector<16x8xf32>
    tpu.vector_store %arg10[%c0_145, %c0_146], %238 {strides = array<i32>} : memref<16x64xf32, #tpu.memory_space<vmem>>, vector<16x8xf32>,
    %240 = vector.extract_strided_slice %232 {offsets = [0, 133], sizes = [16, 64], strides = [1, 1]} : vector<16x792xf32> to vector<16x64xf32>
    %c0_147 = arith.constant 0 : index
    %c0_148 = arith.constant 0 : index
    %241 = vector.load %arg8[%c0_147, %c0_148] : memref<64x8xf32, #tpu.memory_space<vmem>>, vector<64x8xf32>
    %cst_149 = arith.constant dense<0.000000e+00> : vector<16x8xf32>
    %242 = tpu.matmul %240, %241, %cst_149 {dimension_numbers = #tpu.dot_dimension_numbers<[1], [0], [0], [1], [0, 0, 1, 1], [], []>} : vector<16x64xf32>, vector<64x8xf32>, vector<16x8xf32> -> vector<16x8xf32>
    %c0_150 = arith.constant 0 : index
    %c0_151 = arith.constant 0 : index
    %243 = vector.load %arg9[%c0_150, %c0_151] : memref<1x8xf32, #tpu.memory_space<vmem>>, vector<1x8xf32>
    %244 = vector.broadcast %243 : vector<1x8xf32> to vector<16x8xf32>
    %245 = arith.addf %242, %244 : vector<16x8xf32>
    %c0_152 = arith.constant 0 : index
    %c8 = arith.constant 8 : index
    %246 = vector.load %arg10[%c0_152, %c8] : memref<16x64xf32, #tpu.memory_space<vmem>>, vector<16x8xf32>
    tpu.vector_store %arg10[%c0_152, %c8], %245 {strides = array<i32>} : memref<16x64xf32, #tpu.memory_space<vmem>>, vector<16x8xf32>,
    %247 = vector.extract_strided_slice %232 {offsets = [0, 199], sizes = [16, 64], strides = [1, 1]} : vector<16x792xf32> to vector<16x64xf32>
    %c0_153 = arith.constant 0 : index
    %c0_154 = arith.constant 0 : index
    %248 = vector.load %arg8[%c0_153, %c0_154] : memref<64x8xf32, #tpu.memory_space<vmem>>, vector<64x8xf32>
    %cst_155 = arith.constant dense<0.000000e+00> : vector<16x8xf32>
    %249 = tpu.matmul %247, %248, %cst_155 {dimension_numbers = #tpu.dot_dimension_numbers<[1], [0], [0], [1], [0, 0, 1, 1], [], []>} : vector<16x64xf32>, vector<64x8xf32>, vector<16x8xf32> -> vector<16x8xf32>
    %c0_156 = arith.constant 0 : index
    %c0_157 = arith.constant 0 : index
    %250 = vector.load %arg9[%c0_156, %c0_157] : memref<1x8xf32, #tpu.memory_space<vmem>>, vector<1x8xf32>
    %251 = vector.broadcast %250 : vector<1x8xf32> to vector<16x8xf32>
    %252 = arith.addf %249, %251 : vector<16x8xf32>
    %c0_158 = arith.constant 0 : index
    %c16 = arith.constant 16 : index
    %253 = vector.load %arg10[%c0_158, %c16] : memref<16x64xf32, #tpu.memory_space<vmem>>, vector<16x8xf32>
    tpu.vector_store %arg10[%c0_158, %c16], %252 {strides = array<i32>} : memref<16x64xf32, #tpu.memory_space<vmem>>, vector<16x8xf32>,
    %254 = vector.extract_strided_slice %232 {offsets = [0, 265], sizes = [16, 64], strides = [1, 1]} : vector<16x792xf32> to vector<16x64xf32>
    %c0_159 = arith.constant 0 : index
    %c0_160 = arith.constant 0 : index
    %255 = vector.load %arg8[%c0_159, %c0_160] : memref<64x8xf32, #tpu.memory_space<vmem>>, vector<64x8xf32>
    %cst_161 = arith.constant dense<0.000000e+00> : vector<16x8xf32>
    %256 = tpu.matmul %254, %255, %cst_161 {dimension_numbers = #tpu.dot_dimension_numbers<[1], [0], [0], [1], [0, 0, 1, 1], [], []>} : vector<16x64xf32>, vector<64x8xf32>, vector<16x8xf32> -> vector<16x8xf32>
    %c0_162 = arith.constant 0 : index
    %c0_163 = arith.constant 0 : index
    %257 = vector.load %arg9[%c0_162, %c0_163] : memref<1x8xf32, #tpu.memory_space<vmem>>, vector<1x8xf32>
    %258 = vector.broadcast %257 : vector<1x8xf32> to vector<16x8xf32>
    %259 = arith.addf %256, %258 : vector<16x8xf32>
    %c0_164 = arith.constant 0 : index
    %c24 = arith.constant 24 : index
    %260 = vector.load %arg10[%c0_164, %c24] : memref<16x64xf32, #tpu.memory_space<vmem>>, vector<16x8xf32>
    tpu.vector_store %arg10[%c0_164, %c24], %259 {strides = array<i32>} : memref<16x64xf32, #tpu.memory_space<vmem>>, vector<16x8xf32>,
    %261 = vector.extract_strided_slice %232 {offsets = [0, 463], sizes = [16, 64], strides = [1, 1]} : vector<16x792xf32> to vector<16x64xf32>
    %c0_165 = arith.constant 0 : index
    %c0_166 = arith.constant 0 : index
    %262 = vector.load %arg8[%c0_165, %c0_166] : memref<64x8xf32, #tpu.memory_space<vmem>>, vector<64x8xf32>
    %cst_167 = arith.constant dense<0.000000e+00> : vector<16x8xf32>
    %263 = tpu.matmul %261, %262, %cst_167 {dimension_numbers = #tpu.dot_dimension_numbers<[1], [0], [0], [1], [0, 0, 1, 1], [], []>} : vector<16x64xf32>, vector<64x8xf32>, vector<16x8xf32> -> vector<16x8xf32>
    %c0_168 = arith.constant 0 : index
    %c0_169 = arith.constant 0 : index
    %264 = vector.load %arg9[%c0_168, %c0_169] : memref<1x8xf32, #tpu.memory_space<vmem>>, vector<1x8xf32>
    %265 = vector.broadcast %264 : vector<1x8xf32> to vector<16x8xf32>
    %266 = arith.addf %263, %265 : vector<16x8xf32>
    %c0_170 = arith.constant 0 : index
    %c32 = arith.constant 32 : index
    %267 = vector.load %arg10[%c0_170, %c32] : memref<16x64xf32, #tpu.memory_space<vmem>>, vector<16x8xf32>
    tpu.vector_store %arg10[%c0_170, %c32], %266 {strides = array<i32>} : memref<16x64xf32, #tpu.memory_space<vmem>>, vector<16x8xf32>,
    %268 = vector.extract_strided_slice %232 {offsets = [0, 529], sizes = [16, 64], strides = [1, 1]} : vector<16x792xf32> to vector<16x64xf32>
    %c0_171 = arith.constant 0 : index
    %c0_172 = arith.constant 0 : index
    %269 = vector.load %arg8[%c0_171, %c0_172] : memref<64x8xf32, #tpu.memory_space<vmem>>, vector<64x8xf32>
    %cst_173 = arith.constant dense<0.000000e+00> : vector<16x8xf32>
    %270 = tpu.matmul %268, %269, %cst_173 {dimension_numbers = #tpu.dot_dimension_numbers<[1], [0], [0], [1], [0, 0, 1, 1], [], []>} : vector<16x64xf32>, vector<64x8xf32>, vector<16x8xf32> -> vector<16x8xf32>
    %c0_174 = arith.constant 0 : index
    %c0_175 = arith.constant 0 : index
    %271 = vector.load %arg9[%c0_174, %c0_175] : memref<1x8xf32, #tpu.memory_space<vmem>>, vector<1x8xf32>
    %272 = vector.broadcast %271 : vector<1x8xf32> to vector<16x8xf32>
    %273 = arith.addf %270, %272 : vector<16x8xf32>
    %c0_176 = arith.constant 0 : index
    %c40 = arith.constant 40 : index
    %274 = vector.load %arg10[%c0_176, %c40] : memref<16x64xf32, #tpu.memory_space<vmem>>, vector<16x8xf32>
    tpu.vector_store %arg10[%c0_176, %c40], %273 {strides = array<i32>} : memref<16x64xf32, #tpu.memory_space<vmem>>, vector<16x8xf32>,
    %275 = vector.extract_strided_slice %232 {offsets = [0, 595], sizes = [16, 64], strides = [1, 1]} : vector<16x792xf32> to vector<16x64xf32>
    %c0_177 = arith.constant 0 : index
    %c0_178 = arith.constant 0 : index
    %276 = vector.load %arg8[%c0_177, %c0_178] : memref<64x8xf32, #tpu.memory_space<vmem>>, vector<64x8xf32>
    %cst_179 = arith.constant dense<0.000000e+00> : vector<16x8xf32>
    %277 = tpu.matmul %275, %276, %cst_179 {dimension_numbers = #tpu.dot_dimension_numbers<[1], [0], [0], [1], [0, 0, 1, 1], [], []>} : vector<16x64xf32>, vector<64x8xf32>, vector<16x8xf32> -> vector<16x8xf32>
    %c0_180 = arith.constant 0 : index
    %c0_181 = arith.constant 0 : index
    %278 = vector.load %arg9[%c0_180, %c0_181] : memref<1x8xf32, #tpu.memory_space<vmem>>, vector<1x8xf32>
    %279 = vector.broadcast %278 : vector<1x8xf32> to vector<16x8xf32>
    %280 = arith.addf %277, %279 : vector<16x8xf32>
    %c0_182 = arith.constant 0 : index
    %c48 = arith.constant 48 : index
    %281 = vector.load %arg10[%c0_182, %c48] : memref<16x64xf32, #tpu.memory_space<vmem>>, vector<16x8xf32>
    tpu.vector_store %arg10[%c0_182, %c48], %280 {strides = array<i32>} : memref<16x64xf32, #tpu.memory_space<vmem>>, vector<16x8xf32>,
    %282 = vector.extract_strided_slice %232 {offsets = [0, 661], sizes = [16, 64], strides = [1, 1]} : vector<16x792xf32> to vector<16x64xf32>
    %c0_183 = arith.constant 0 : index
    %c0_184 = arith.constant 0 : index
    %283 = vector.load %arg8[%c0_183, %c0_184] : memref<64x8xf32, #tpu.memory_space<vmem>>, vector<64x8xf32>
    %cst_185 = arith.constant dense<0.000000e+00> : vector<16x8xf32>
    %284 = tpu.matmul %282, %283, %cst_185 {dimension_numbers = #tpu.dot_dimension_numbers<[1], [0], [0], [1], [0, 0, 1, 1], [], []>} : vector<16x64xf32>, vector<64x8xf32>, vector<16x8xf32> -> vector<16x8xf32>
    %c0_186 = arith.constant 0 : index
    %c0_187 = arith.constant 0 : index
    %285 = vector.load %arg9[%c0_186, %c0_187] : memref<1x8xf32, #tpu.memory_space<vmem>>, vector<1x8xf32>
    %286 = vector.broadcast %285 : vector<1x8xf32> to vector<16x8xf32>
    %287 = arith.addf %284, %286 : vector<16x8xf32>
    %c0_188 = arith.constant 0 : index
    %c56 = arith.constant 56 : index
    %288 = vector.load %arg10[%c0_188, %c56] : memref<16x64xf32, #tpu.memory_space<vmem>>, vector<16x8xf32>
    tpu.vector_store %arg10[%c0_188, %c56], %287 {strides = array<i32>} : memref<16x64xf32, #tpu.memory_space<vmem>>, vector<16x8xf32>,
    return
  }
}

</mosaic_0001>

<bundles_post_ra>
// kernel: stage2_forward.1
= control target key start
LH: loop header
LB: loop body
LE: loop exit
PB: predicated region body
PF: predicated region fallthrough
CT: control target
= control target key end

     0   :  { %s13086_s15 = smov 126   ;;  %s13087_s16 = smov 127   ;;  %vm89_vm0 = vcmask 1046528   ;;  %v221_v22 = vlaneseq  ;;  %v13092_v25 = vmov 1966171168   ;;  %vm156_vm1 = vcmask 1014784   ;;  %s19114_s0 = inlined_call_operand.vmem [shape: f32[1,3112], index: 0, kind: input, shape index: {}]   ;;  %s19115_s3 = inlined_call_operand.vmem [shape: f32[4,9], index: 3, kind: input, shape index: {}]   ;;  %s19116_s1 = inlined_call_operand.vmem [shape: f32[1,2600], index: 1, kind: input, shape index: {}]   ;;  %s19117_s4 = inlined_call_operand.vmem [shape: f32[16,36], index: 4, kind: input, shape index: {}]   ;;  %s19118_s7 = inlined_call_operand.vmem [shape: f32[260,64], index: 7, kind: input, shape index: {}]   ;;  %s19119_s5 = inlined_call_operand.vmem [shape: f32[16,144], index: 5, kind: input, shape index: {}]   ;;  %s19120_s2 = inlined_call_operand.vmem [shape: f32[1,792], index: 2, kind: input, shape index: {}]   ;;  %s19121_s6 = inlined_call_operand.vmem [shape: f32[16,144], index: 6, kind: input, shape index: {}]   ;;  %s19122_s8 = inlined_call_operand.vmem [shape: f32[64,8], index: 8, kind: input, shape index: {}]   ;;  %s19123_s9 = inlined_call_operand.vmem [shape: f32[1,8], index: 9, kind: input, shape index: {}]   ;;  %s19124_s10 = inlined_call_operand.vmem [shape: f32[16,64], index: 10, kind: output, shape index: {}]  }
   0x1   :  { %v13186_v0 = vld [vmem:[%s19114_s0] sm:$0xff]  ;;  %v13195_v1 = vld [vmem:[%s19114_s0 + $0x8] sm:$0xff]  ;;  %s13088_s25 = smov 124   ;;  %s13089_s26 = smov 125   ;;  %v13222_v6 = vld [vmem:[%s19114_s0 + $0x10] sm:$0x3f]  ;;  %v219_v26 = vunpack.c.l.s4 %v13092_v25 }
   0x2   :  { %96 = vrot.lane.b32.xlu1 %v13186_v0, %s13086_s15  ;;  %80 = vrot.lane.b32.xlu0 %v13186_v0, %s13087_s16  ;;  %v69_v2 = vld [vmem:[%s19114_s0 + $0x9] sm:$0xff]  ;;  %v68_v3 = vld [vmem:[%s19114_s0 + $0x1] sm:$0xff]  ;;  %s13090_s29 = smov 123   ;;  %s13091_s12 = smov 122   ;;  %vm140_vm2 = vcmask 1022976   ;;  %vm91_vm3 = vcmask 1039360  }
   0x3   :  { %v71_v4 = vld [vmem:[%s19114_s0 + $0x2] sm:$0xff]  ;;  %v70_v7 = vld [vmem:[%s19114_s0 + $0x11] sm:$0x3f]  ;;  %vm106_vm4 = vcmask 1031168   ;;  %v220_v35 = vunpack.c.0.s8 %v219_v26  ;;  %v13280_v36 = vshrl.u32 %v221_v22, 7  ;;  %vm188_vm5 = vcmask 1006592  }
   0x4   :  { %v74_v5 = vld [vmem:[%s19114_s0 + $0x3] sm:$0xff]  ;;  %v75_v9 = vld [vmem:[%s19114_s0 + $0xb] sm:$0xff]  ;;  %v76_v11 = vld [vmem:[%s19114_s0 + $0x13] sm:$0x1f]  ;;  %vm203_vm6 = vcmask 998400   ;;  %vm142_vm7 = vcmask 1040384  }
   0x5   :  { %v72_v8 = vld [vmem:[%s19114_s0 + $0xa] sm:$0xff]  ;;  %v73_v10 = vld [vmem:[%s19114_s0 + $0x12] sm:$0x1f]  ;;  %v13300_v48 = vsub.s32 %v220_v35, %v13280_v36  ;;  %s13093_s0 = smov 3   ;;  %vm849_vm8 = vcmask 23552   ;;  %vm13095_vm9 = vmmov 1  }
   0x6   :  { %98 = vrot.lane.b32.xlu1 %v13195_v1, %s13086_s15  ;;  %82 = vrot.lane.b32.xlu0 %v13195_v1, %s13087_s16  ;;  %vm13611_vm10 = vmpackc.low %vm142_vm7, %vm13095_vm9  ;;  %vm913_vm11 = vcmask 72704   ;;  %vm13097_vm12 = vmmov 0   ;;  %vm40_vm13 = vcmask 1043776   ;;  %vm41_vm14 = vcmask 1047556   ;;  %s13098_s20 = smov 118   ;;  %s13099_s21 = smov 114  }
   0x7   :  { %vm42_vm15 = vmor %vm41_vm14, %vm40_vm13  ;;  %vm4083_vm9 = vcmask 326656   ;;  %s13100_s14 = smov 106   ;;  %s13101_s17 = smov 102   ;;  %vm5352_vm13 = vcmask 867328   ;;  %vm5581_vm14 = vcmask 834560  }
   0x8   :  { %s13105_s11 = smov 67   ;;  %s13107_s27 = smov 71  }
   0x9   :  { %s13108_s28 = smov 9   ;;  %s13110_s30 = smov 17  }
   0xa   :  { %116 = vrot.lane.b32.xlu1 %v69_v2, %s13086_s15  ;;  %114 = vrot.lane.b32.xlu0 %v68_v3, %s13086_s15  ;;  %s13111_s13 = smov 83   ;;  %s13119_s24 = smov 45  }
   0xe   :  { %147 = vrot.lane.b32.xlu1 %v71_v4, %s13088_s25  ;;  %131 = vrot.lane.b32.xlu0 %v71_v4, %s13089_s26 }
  0x12   :  { %179 = vrot.lane.b32.xlu1 %v74_v5, %s13090_s29  ;;  %165 = vrot.lane.b32.xlu0 %v74_v5, %s13088_s25 }
  0x16   :  { %84 = vrot.lane.b32.xlu1 %v13222_v6, %s13087_s16  ;;  %194 = vrot.lane.b32.xlu0 %v74_v5, %s13091_s12 }
  0x1a   :  { %118 = vrot.lane.b32.xlu1 %v70_v7, %s13086_s15  ;;  %100 = vrot.lane.b32.xlu0 %v13222_v6, %s13086_s15 }
  0x1e   :  { %149 = vrot.lane.b32.xlu1 %v72_v8, %s13088_s25  ;;  %133 = vrot.lane.b32.xlu0 %v72_v8, %s13089_s26 }
  0x22   :  { %181 = vrot.lane.b32.xlu1 %v75_v9, %s13090_s29  ;;  %167 = vrot.lane.b32.xlu0 %v75_v9, %s13088_s25 }
  0x26   :  { %135 = vrot.lane.b32.xlu1 %v73_v10, %s13089_s26  ;;  %196 = vrot.lane.b32.xlu0 %v75_v9, %s13091_s12 }
  0x2a   :  { %169 = vrot.lane.b32.xlu1 %v76_v11, %s13088_s25  ;;  %151 = vrot.lane.b32.xlu0 %v73_v10, %s13088_s25 }
  0x2e   :  { %198 = vrot.lane.b32.xlu1 %v76_v11, %s13091_s12  ;;  %183 = vrot.lane.b32.xlu0 %v76_v11, %s13090_s29 }
  0x74   :  { %v97_v12 = vpop.permute.xlu1 %96  ;;  %v81_v13 = vpop.permute.xlu0 %80 }
  0x75   :  { %v102_v23 = vrot.slane %v97_v12, 1  ;;  %v86_v24 = vrot.slane %v81_v13, 1 }
  0x78   :  { %v13255_v14 = vpop.permute.xlu1 %98  ;;  %v13257_v15 = vpop.permute.xlu0 %82 }
  0x79   :  { %v103_v20 = vrot.slane %v13255_v14, 1  ;;  %v87_v21 = vrot.slane %v13257_v15, 1 }
  0x7b   :  { %v90_v32 = vsel %vm89_vm0, %v86_v24, %v87_v21  ;;  %v105_v33 = vsel %vm89_vm0, %v102_v23, %v103_v20 }
  0x7c   :  { %v13259_v16 = vpop.permute.xlu1 %116  ;;  %v115_v17 = vpop.permute.xlu0 %114  ;;  %v92_v41 = vsel %vm91_vm3, %v81_v13, %v90_v32  ;;  %v107_v42 = vsel %vm106_vm4, %v97_v12, %v105_v33 }
  0x7d   :  { %v121_v18 = vrot.slane %v13259_v16, 1  ;;  %v120_v19 = vrot.slane %v115_v17, 1  ;;  %v210_v47 = vcombine.low %v13186_v0, %v92_v41  ;;  %v211_v58 = vcombine.high %v13186_v0, %v92_v41 }
  0x7f   :  { %v123_v27 = vsel %vm89_vm0, %v120_v19, %v121_v18  ;;  %v224_v61 = vrot.slane %v210_v47, %v13300_v48  ;;  %v231_v10 = vrot.slane %v211_v58, %v13300_v48 }
  0x80   :  { %v13267_v28 = vpop.permute.xlu1 %147  ;;  %v13269_v29 = vpop.permute.xlu0 %131  ;;  %v124_v34 = vsel %vm106_vm4, %v115_v17, %v123_v27 }
  0x81   :  { %v153_v30 = vrot.slane %v13267_v28, 7  ;;  %v137_v31 = vrot.slane %v13269_v29, 7  ;;  %v212_v43 = vcombine.low %v107_v42, %v124_v34  ;;  %v213_v53 = vcombine.high %v107_v42, %v124_v34 }
  0x83   :  { %v157_v37 = vsel %vm156_vm1, %v153_v30, %v13267_v28  ;;  %v141_v38 = vsel %vm140_vm2, %v137_v31, %v13269_v29  ;;  %v238_v56 = vrot.slane %v212_v43, %v13300_v48  ;;  %v245_v5 = vrot.slane %v213_v53, %v13300_v48 }
  0x84   :  { %v13290_v39 = vpop.permute.xlu1 %179  ;;  %v13292_v40 = vpop.permute.xlu0 %165  ;;  %v214_v46 = vcombine.low %v141_v38, %v157_v37  ;;  %v215_v62 = vcombine.high %v141_v38, %v157_v37 }
  0x85   :  { %v185_v44 = vrot.slane %v13290_v39, 7  ;;  %v171_v45 = vrot.slane %v13292_v40, 7  ;;  %v274_v7 = vcombine.low %v224_v61, %v238_v56  ;;  %v275_v11 = vcombine.high %v224_v61, %v238_v56 }
  0x86   :  { %v252_v59 = vrot.slane %v214_v46, %v13300_v48  ;;  %v259_v13 = vrot.slane %v215_v62, %v13300_v48  ;;  %v276_v24 = vcombine.low %v231_v10, %v245_v5  ;;  %v277_v25 = vcombine.high %v231_v10, %v245_v5 }
  0x87   :  { %v189_v49 = vsel %vm188_vm5, %v185_v44, %v13290_v39  ;;  %v174_v50 = vsel %vm156_vm1, %v171_v45, %v13292_v40  ;;  %v288_v32 = vrot.slane %v274_v7, %v13300_v48  ;;  %v302_v37 = vrot.slane %v275_v11, %v13300_v48 }
  0x88   :  { %v85_v51 = vpop.permute.xlu1 %84  ;;  %v13310_v52 = vpop.permute.xlu0 %194  ;;  %v216_v54 = vcombine.low %v174_v50, %v189_v49  ;;  %v217_v57 = vcombine.high %v174_v50, %v189_v49 }
  0x89   :  { %v200_v55 = vrot.slane %v13310_v52, 7  ;;  %v88_v63 = vrot.slane %v85_v51, 1 }
  0x8a   :  { %v266_v60 = vrot.slane %v216_v54, %v13300_v48  ;;  %v273_v8 = vrot.slane %v217_v57, %v13300_v48 }
  0x8b   :  { %v204_v2 = vsel %vm203_vm6, %v200_v55, %v13310_v52  ;;  %v93_v17 = vsel %vm89_vm0, %v87_v21, %v88_v63  ;;  %v13346_v21 = vsel %vm91_vm3, %v85_v51, %v88_v63  ;;  %v295_v51 = vrot.slane %v276_v24, %v13300_v48 }
  0x8c   :  { %v13322_v3 = vpop.permute.xlu1 %118  ;;  %v13324_v4 = vpop.permute.xlu0 %100  ;;  %v278_v0 = vcombine.low %v252_v59, %v266_v60  ;;  %v279_v9 = vcombine.high %v252_v59, %v266_v60  ;;  %v623_v12 = vrot.slane %v204_v2, %v13300_v48  ;;  %v280_v26 = vcombine.low %v259_v13, %v273_v8 }
  0x8d   :  { %v281_v34 = vcombine.high %v259_v13, %v273_v8  ;;  %v13343_v35 = vsel %vm91_vm3, %v13257_v15, %v93_v17  ;;  %v616_v49 = vcombine.high %v204_v2, %v204_v2  ;;  %v122_v15 = vrot.slane %v13322_v3, 1 }
  0x8e   :  { %v316_v23 = vrot.slane %v278_v0, %v13300_v48  ;;  %v631_v27 = vcombine.high %v623_v12, %v623_v12  ;;  %v330_v33 = vrot.slane %v279_v9, %v13300_v48  ;;  %v639_v38 = vrot.slane %v623_v12, %v13300_v48 }
  0x8f   :  { %v104_v53 = vrot.slane %v13324_v4, 1  ;;  %v323_v57 = vrot.slane %v280_v26, %v13300_v48  ;;  %v346_v58 = vcombine.low %v13195_v1, %v13343_v35  ;;  %v482_v59 = vcombine.low %v13222_v6, %v13346_v21 }
  0x90   :  { %v13334_v19 = vpop.permute.xlu1 %149  ;;  %v13336_v22 = vpop.permute.xlu0 %133  ;;  %v339_v46 = vcombine.high %v288_v32, %v316_v23  ;;  %v342_v54 = vcombine.low %v302_v37, %v330_v33  ;;  %v13361_v56 = vrot.slane %v631_v27, %v13300_v48  ;;  %v13369_v60 = vrot.slane %v277_v25, %v13300_v48 }
  0x91   :  { %v154_v41 = vrot.slane %v13334_v19, 7  ;;  %v138_v42 = vrot.slane %v13336_v22, 7  ;;  %v13372_v61 = vrot.slane %v281_v34, %v13300_v48  ;;  %v661_v5 = vcombine.high %v639_v38, %v639_v38 }
  0x92   :  { %v11426_v2 = vpack.i.bf16 %v339_v46, %v342_v54  ;;  %v630_v8 = vrot.slane %v616_v49, %v13300_v48  ;;  %v125_v28 = vsel %vm89_vm0, %v121_v18, %v122_v15  ;;  %v338_v10 = vcombine.low %v288_v32, %v316_v23 }
  0x93   :  { %v158_v62 = vsel %vm142_vm7, %v153_v30, %v154_v41  ;;  %v143_v63 = vsel %vm142_vm7, %v137_v31, %v138_v42  ;;  %v108_v31 = vsel %vm89_vm0, %v103_v20, %v104_v53  ;;  %v11421_v9 = vpack.i.bf16 %v661_v5, %v13361_v56 }
  0x94   :  { %v13352_v43 = vpop.permute.xlu1 %181  ;;  %v13354_v47 = vpop.permute.xlu0 %167  ;;  %11427 = vrot.lane.b32.xlu0 %v11426_v2, %s13093_s0  ;;  %v340_v11 = vcombine.low %v295_v51, %v323_v57  ;;  %v13405_v18 = vsel %vm156_vm1, %v158_v62, %v13334_v19  ;;  %v13409_v39 = vsel %vm140_vm2, %v143_v63, %v13336_v22  ;;  %v343_v20 = vcombine.high %v302_v37, %v330_v33 }
  0x95   :  { %v186_v50 = vrot.slane %v13352_v43, 7  ;;  %v172_v30 = vrot.slane %v13354_v47, 7  ;;  %11422 = vrot.lane.b32.xlu1 %v11421_v9, %s13093_s0  ;;  %v11431_v17 = vpack.i.bf16 %v639_v38, %v338_v10  ;;  %v13422_v26 = vsel %vm106_vm4, %v13259_v16, %v125_v28 }
  0x96   :  { %v13426_v40 = vsel %vm106_vm4, %v13322_v3, %v122_v15  ;;  %v13434_v27 = vsel %vm106_vm4, %v13324_v4, %v104_v53  ;;  %v11466_v32 = vpack.i.bf16 %v340_v11, %v343_v20  ;;  %v341_v33 = vcombine.high %v295_v51, %v323_v57 }
  0x97   :  { %v190_v29 = vsel %vm142_vm7, %v185_v44, %v186_v50  ;;  %v175_v44 = vsel %vm142_vm7, %v171_v45, %v172_v30  ;;  %v13430_v45 = vsel %vm106_vm4, %v13255_v14, %v108_v31  ;;  %v344_v3 = vcombine.low %v13369_v60, %v13372_v61 }
  0x98   :  { %v13384_v0 = vpop.permute.xlu1 %135  ;;  %v13386_v7 = vpop.permute.xlu0 %196  ;;  %v191_v12 = vsel %vm188_vm5, %v190_v29, %v13352_v43  ;;  %v176_v13 = vsel %vm156_vm1, %v175_v44, %v13354_v47  ;;  %11432 = vrot.lane.b32.xlu0 %v11431_v17, %s13093_s0  ;;  %v347_v14 = vcombine.high %v13195_v1, %v13343_v35  ;;  %v350_v4 = vcombine.low %v13409_v39, %v13405_v18 }
  0x99   :  { %v201_v23 = vrot.slane %v13386_v7, 7  ;;  %v352_v34 = vcombine.low %v176_v13, %v191_v12  ;;  %v13451_v38 = vrot.slane %v482_v59, %v13300_v48  ;;  %v484_v52 = vcombine.low %v13434_v27, %v13426_v40  ;;  %11467 = vrot.lane.b32.xlu1 %v11466_v32, %s13093_s0 }
  0x9a   :  { %v646_v46 = vrot.slane %v630_v8, %v13300_v48  ;;  %v348_v47 = vcombine.low %v13430_v45, %v13422_v26  ;;  %v349_v49 = vcombine.high %v13430_v45, %v13422_v26  ;;  %v351_v15 = vcombine.high %v13409_v39, %v13405_v18 }
  0x9b   :  { %v205_v16 = vsel %vm142_vm7, %v200_v55, %v201_v23  ;;  %v353_v55 = vcombine.high %v176_v13, %v191_v12  ;;  %v139_v54 = vrot.slane %v13384_v0, 7  ;;  %v11471_v59 = vpack.i.bf16 %v341_v33, %v344_v3 }
  0x9c   :  { %v170_v24 = vpop.permute.xlu1 %169  ;;  %v152_v25 = vpop.permute.xlu0 %151  ;;  %v206_v37 = vsel %vm203_vm6, %v205_v16, %v13386_v7  ;;  %v663_v62 = vcombine.high %v13361_v56, %v13361_v56  ;;  %v388_v2 = vrot.slane %v350_v4, %v13300_v48  ;;  %v402_v5 = vrot.slane %v352_v34, %v13300_v48 }
  0x9d   :  { %v173_v51 = vrot.slane %v170_v24, 7  ;;  %v672_v57 = vrot.slane %v206_v37, %v13300_v48  ;;  %v155_v28 = vrot.slane %v152_v25, 7  ;;  %v632_v29 = vcombine.high %v630_v8, %v630_v8  ;;  %11472 = vrot.lane.b32.xlu1 %v11471_v59, %s13093_s0 }
  0x9e   :  { %v13470_v31 = vrot.slane %v353_v55, %v13300_v48  ;;  %v11436_v9 = vpack.i.bf16 %v646_v46, %v663_v62  ;;  %v662_v10 = vcombine.high %v646_v46, %v646_v46  ;;  %v665_v18 = vcombine.high %v206_v37, %v206_v37 }
  0x9f   :  { %v177_v39 = vsel %vm142_vm7, %v172_v30, %v173_v51  ;;  %v660_v56 = vrot.slane %v632_v29, %v13300_v48  ;;  %v688_v20 = vrot.slane %v672_v57, %v13300_v48  ;;  %v360_v12 = vrot.slane %v346_v58, %v13300_v48 }
  0xa0   :  { %v184_v53 = vpop.permute.xlu0 %183  ;;  %v199_v63 = vpop.permute.xlu1 %198  ;;  %11437 = vrot.lane.b32.xlu0 %v11436_v9, %s13093_s0  ;;  %v374_v13 = vrot.slane %v348_v47, %v13300_v48  ;;  %v414_v17 = vcombine.low %v388_v2, %v402_v5  ;;  %v415_v30 = vcombine.high %v388_v2, %v402_v5  ;;  %v680_v32 = vcombine.high %v672_v57, %v672_v57 }
  0xa1   :  { %v187_v11 = vrot.slane %v184_v53, 7  ;;  %v202_v44 = vrot.slane %v199_v63, 7  ;;  %v160_v16 = vsel %vm142_vm7, %v154_v41, %v155_v28  ;;  %v11441_v33 = vpack.i.bf16 %v662_v10, %v660_v56 }
  0xa2   :  { %v410_v3 = vcombine.low %v360_v12, %v374_v13  ;;  %v395_v4 = vrot.slane %v351_v15, %v13300_v48  ;;  %v145_v58 = vsel %vm142_vm7, %v138_v42, %v139_v54  ;;  %v679_v34 = vrot.slane %v665_v18, %v13300_v48 }
  0xa3   :  { %v192_v8 = vsel %vm142_vm7, %v186_v50, %v187_v11  ;;  %v664_v50 = vcombine.high %v660_v56, %v660_v56  ;;  %v178_v37 = vsel %vm156_vm1, %v177_v39, %v170_v24  ;;  %v161_v55 = vsel %vm156_vm1, %v160_v16, %v152_v25 }
  0xa4   :  { %v193_v43 = vsel %vm188_vm5, %v192_v8, %v184_v53  ;;  %v207_v19 = vsel %vm142_vm7, %v201_v23, %v202_v44  ;;  %11442 = vrot.lane.b32.xlu0 %v11441_v33, %s13093_s0  ;;  %v424_v47 = vrot.slane %v410_v3, %v13300_v48  ;;  %v452_v22 = vrot.slane %v414_v17, %v13300_v48 }
  0xa5   :  { %v488_v41 = vcombine.low %v178_v37, %v193_v43  ;;  %v11446_v46 = vpack.i.bf16 %v688_v20, %v664_v50  ;;  %v702_v42 = vrot.slane %v680_v32, %v13300_v48  ;;  %v411_v15 = vcombine.high %v360_v12, %v374_v13 }
  0xa6   :  { %v416_v51 = vcombine.low %v395_v4, %v13470_v31  ;;  %v146_v24 = vsel %vm140_vm2, %v145_v58, %v13384_v0  ;;  %v710_v25 = vcombine.high %v688_v20, %v688_v20  ;;  %v466_v7 = vrot.slane %v415_v30, %v13300_v48 }
  0xa7   :  { %v486_v23 = vcombine.low %v146_v24, %v161_v55  ;;  %v345_v53 = vcombine.high %v13369_v60, %v13372_v61  ;;  %v474_v54 = vcombine.low %v424_v47, %v452_v22  ;;  %v438_v57 = vrot.slane %v411_v15, %v13300_v48 }
  0xa8   :  { %v417_v59 = vcombine.high %v395_v4, %v13470_v31  ;;  %v13512_v62 = vsel %vm203_vm6, %v207_v19, %v199_v63  ;;  %v538_v2 = vrot.slane %v488_v41, %v13300_v48  ;;  %11447 = vrot.lane.b32.xlu0 %v11446_v46, %s13093_s0  ;;  %v695_v0 = vrot.slane %v679_v34, %v13300_v48 }
  0xa9   :  { %v11476_v5 = vpack.i.bf16 %v474_v54, %v345_v53  ;;  %v475_v28 = vcombine.high %v424_v47, %v452_v22  ;;  %v478_v29 = vcombine.low %v438_v57, %v466_v7  ;;  %v712_v9 = vcombine.high %v702_v42, %v702_v42 }
  0xaa   :  { %v11451_v10 = vpack.i.bf16 %v710_v25, %v702_v42  ;;  %v367_v60 = vrot.slane %v347_v14, %v13300_v48  ;;  %v381_v61 = vrot.slane %v349_v49, %v13300_v48  ;;  %v681_v63 = vcombine.high %v679_v34, %v679_v34 }
  0xab   :  { %v13529_v31 = vrot.slane %v484_v52, %v13300_v48  ;;  %v487_v11 = vcombine.high %v146_v24, %v161_v55  ;;  %v524_v18 = vrot.slane %v486_v23, %v13300_v48  ;;  %v721_v39 = vrot.slane %v13512_v62, %v13300_v48  ;;  %11477 = vrot.lane.b32.xlu1 %v11476_v5, %s13093_s0 }
  0xac   :  { %v489_v1 = vcombine.high %v178_v37, %v193_v43  ;;  %11452 = vrot.lane.b32.xlu0 %v11451_v10, %s13093_s0  ;;  %v412_v35 = vcombine.low %v367_v60, %v381_v61  ;;  %v459_v26 = vrot.slane %v416_v51, %v13300_v48  ;;  %v413_v45 = vcombine.high %v367_v60, %v381_v61 }
  0xad   :  { %v550_v14 = vcombine.low %v524_v18, %v538_v2  ;;  %v11481_v49 = vpack.i.bf16 %v475_v28, %v478_v29  ;;  %v11456_v44 = vpack.i.bf16 %v695_v0, %v712_v9  ;;  %v479_v52 = vcombine.high %v438_v57, %v466_v7 }
  0xae   :  { %v431_v56 = vrot.slane %v412_v35, %v13300_v48  ;;  %v709_v8 = vrot.slane %v681_v63, %v13300_v48  ;;  %v711_v20 = vcombine.high %v695_v0, %v695_v0  ;;  %v473_v12 = vrot.slane %v417_v59, %v13300_v48 }
  0xaf   :  { %v483_v13 = vcombine.high %v13222_v6, %v13346_v21  ;;  %v485_v17 = vcombine.high %v13434_v27, %v13426_v40  ;;  %v546_v30 = vcombine.low %v13451_v38, %v13529_v31  ;;  %11482 = vrot.lane.b32.xlu1 %v11481_v49, %s13093_s0  ;;  %v13548_v32 = vrot.slane %v487_v11, %v13300_v48 }
  0xb0   :  { %v13551_v16 = vrot.slane %v489_v1, %v13300_v48  ;;  %11457 = vrot.lane.b32.xlu0 %v11456_v44, %s13093_s0  ;;  %v476_v33 = vcombine.low %v431_v56, %v459_v26  ;;  %v445_v43 = vrot.slane %v413_v45, %v13300_v48  ;;  %v729_v6 = vcombine.high %v721_v39, %v721_v39 }
  0xb1   :  { %v551_v21 = vcombine.high %v524_v18, %v538_v2  ;;  %v737_v40 = vrot.slane %v721_v39, %v13300_v48  ;;  %v588_v27 = vrot.slane %v550_v14, %v13300_v48  ;;  %v11461_v3 = vpack.i.bf16 %v711_v20, %v709_v8 }
  0xb2   :  { %v11486_v50 = vpack.i.bf16 %v476_v33, %v479_v52  ;;  %v477_v4 = vcombine.high %v431_v56, %v459_v26  ;;  %v480_v58 = vcombine.low %v445_v43, %v473_v12  ;;  %v503_v34 = vrot.slane %v483_v13, %v13300_v48 }
  0xb3   :  { %v517_v37 = vrot.slane %v485_v17, %v13300_v48  ;;  %v547_v55 = vcombine.high %v13451_v38, %v13529_v31  ;;  %v560_v19 = vrot.slane %v546_v30, %v13300_v48  ;;  %v714_v41 = vcombine.high %v13512_v62, %v13512_v62 }
  0xb4   :  { %v552_v46 = vcombine.low %v13548_v32, %v13551_v16  ;;  %11487 = vrot.lane.b32.xlu1 %v11486_v50, %s13093_s0  ;;  %11462 = vrot.lane.b32.xlu0 %v11461_v3, %s13093_s0  ;;  %v713_v47 = vcombine.high %v709_v8, %v709_v8  ;;  %v751_v42 = vrot.slane %v729_v6, %v13300_v48  ;;  %v13094_v25 = vmov 0.0  }
  0xb5   :  { %v610_v22 = vcombine.low %v560_v19, %v588_v27  ;;  %v602_v15 = vrot.slane %v551_v21, %v13300_v48  ;;  %v11491_v51 = vpack.i.bf16 %v477_v4, %v480_v58  ;;  %v759_v24 = vcombine.high %v737_v40, %v737_v40  ;;  %1023 = vmatprep.mubr.f32.mxu0 %v13094_v25 }
  0xb6   :  { %v11501_v38 = vpack.i.bf16 %v737_v40, %v713_v47  ;;  %39 = vst [vmem:[#allocation2] sm:$0xff] %v13094_v25  ;;  %47 = vst [vmem:[#allocation3 + $0x8] sm:$0xff] %v13094_v25  ;;  %1094 = vmatprep.mubr.f32.mxu1 %v13094_v25  ;;  %v574_v7 = vrot.slane %v547_v55, %v13300_v48  ;;  %v548_v23 = vcombine.low %v503_v34, %v517_v37  ;;  %vm44_vm0 = vcmask 322560  }
  0xb7   :  { %48 = vst [vmem:[#allocation3 + $0x10] sm:$0xff] %v13094_v25  ;;  %49 = vst [vmem:[#allocation3 + $0x18] sm:$0xff] %v13094_v25  ;;  %v728_v53 = vrot.slane %v714_v41, %v13300_v48  ;;  %v481_v54 = vcombine.high %v445_v43, %v473_v12  ;;  %v553_v57 = vcombine.high %v13548_v32, %v13551_v16  ;;  %vm1868_vm7 = vcmask 1043456  }
  0xb8   :  { %50 = vst [vmem:[#allocation3 + $0x20] sm:$0xff] %v13094_v25  ;;  %51 = vst [vmem:[#allocation3 + $0x28] sm:$0xff] %v13094_v25  ;;  %11492 = vrot.lane.b32.xlu1 %v11491_v51, %s13093_s0  ;;  %11502 = vrot.lane.b32.xlu0 %v11501_v38, %s13093_s0  ;;  %v611_v59 = vcombine.high %v560_v19, %v588_v27  ;;  %v613_v62 = vcombine.low %v574_v7, %v602_v15  ;;  %v13625_v27 = vld [vmem:[%s19115_s3] sm:$0xf]  ;;  %s13109_s3 = smov 79  }
  0xb9   :  { %52 = vst [vmem:[#allocation3 + $0x30] sm:$0xff] %v13094_v25  ;;  %53 = vst [vmem:[#allocation3 + $0x38] sm:$0xff] %v13094_v25  ;;  %v11496_v2 = vpack.i.bf16 %v610_v22, %v481_v54  ;;  %v11506_v0 = vpack.i.bf16 %v759_v24, %v751_v42  ;;  %v760_v5 = vcombine.high %v751_v42, %v751_v42 }
  0xba   :  { %57 = vst [vmem:[#allocation3 + $0x50] sm:$0xff] %v13094_v25  ;;  %58 = vst [vmem:[#allocation3 + $0x58] sm:$0xff] %v13094_v25  ;;  %v595_v28 = vrot.slane %v552_v46, %v13300_v48  ;;  %v549_v29 = vcombine.high %v503_v34, %v517_v37  ;;  %v744_v9 = vrot.slane %v728_v53, %v13300_v48 }
  0xbb   :  { %59 = vst [vmem:[#allocation3 + $0x60] sm:$0xff] %v13094_v25  ;;  %60 = vst [vmem:[#allocation3 + $0x68] sm:$0xff] %v13094_v25  ;;  %v567_v10 = vrot.slane %v548_v23, %v13300_v48  ;;  %v11511_v60 = vpack.i.bf16 %v611_v59, %v613_v62  ;;  %v614_v31 = vcombine.high %v574_v7, %v602_v15 }
  0xbc   :  { %61 = vst [vmem:[#allocation3 + $0x70] sm:$0xff] %v13094_v25  ;;  %62 = vst [vmem:[#allocation3 + $0x78] sm:$0xff] %v13094_v25  ;;  %11497 = vrot.lane.b32.xlu1 %v11496_v2, %s13093_s0  ;;  %11507 = vrot.lane.b32.xlu0 %v11506_v0, %s13093_s0  ;;  %v11521_v61 = vpack.i.bf16 %v744_v9, %v760_v5  ;;  %v609_v11 = vrot.slane %v553_v57, %v13300_v48 }
  0xbd   :  { %63 = vst [vmem:[#allocation3 + $0x80] sm:$0xff] %v13094_v25  ;;  %v612_v63 = vcombine.low %v567_v10, %v595_v28  ;;  %v581_v18 = vrot.slane %v549_v29, %v13300_v48  ;;  %v730_v39 = vcombine.high %v728_v53, %v728_v53  ;;  %43 = vst.msk [vmem:[#allocation2 + $0x58] sm:$0xff] %vm42_vm15, %v13094_v25  ;;  %vm5807_vm15 = vcmask 801792  }
  0xbf   :  { %v11516_v1 = vpack.i.bf16 %v612_v63, %v614_v31  ;;  %v615_v35 = vcombine.low %v581_v18, %v609_v11  ;;  %v758_v26 = vrot.slane %v730_v39, %v13300_v48  ;;  %v13742_v48 = vsub.s32 0, %v13280_v36 }
  0xc0   :  { %11512 = vrot.lane.b32.xlu1 %v11511_v60, %s13093_s0  ;;  %11522 = vrot.lane.b32.xlu0 %v11521_v61, %s13093_s0 }
  0xc1   :  { %v11526_v45 = vpack.i.bf16 %v758_v26, %v615_v35  ;;  %19339 = vst [vmem:[#allocation4_spill] sm:$0xff] %v13742_v48 }
  0xc4   :  { %11517 = vrot.lane.b32.xlu1 %v11516_v1, %s13093_s0  ;;  %2173 = vrot.lane.b32.xlu0 %v13094_v25, %s13087_s16 }
  0xc8   :  { %11527 = vrot.lane.b32.xlu1 %v11526_v45, %s13093_s0 }
  0xcc   :  { %2227 = vrot.lane.b32.xlu1 %v13094_v25, %s13086_s15 }
 0x106   :  { %v11428_v14 = vpop.permute.xlu0 %11427 }
 0x107   :  { %v11430_v49 = vunpack.i.h.bf16 %v11428_v14  ;;  %v11429_v44 = vunpack.i.l.bf16 %v11428_v14  ;;  %v11423_v52 = vpop.permute.xlu1 %11422 }
 0x108   :  { %v11425_v56 = vunpack.i.h.bf16 %v11423_v52  ;;  %v11424_v8 = vunpack.i.l.bf16 %v11423_v52 }
 0x109   :  { %v851_v20 = vsel %vm849_vm8, %v11429_v44, %v11430_v49 }
 0x10a   :  { %v11433_v12 = vpop.permute.xlu0 %11432  ;;  %v872_v30 = vsel %vm849_vm8, %v11424_v8, %v11425_v56 }
 0x10b   :  { %v11435_v13 = vunpack.i.h.bf16 %v11433_v12  ;;  %v11434_v17 = vunpack.i.l.bf16 %v11433_v12  ;;  %v11468_v32 = vpop.permute.xlu1 %11467  ;;  %v10573_v16 = vpack.c.bf16 %v872_v30, %v851_v20 }
 0x10c   :  { %v11470_v21 = vunpack.i.h.bf16 %v11468_v32  ;;  %v11469_v40 = vunpack.i.l.bf16 %v11468_v32 }
 0x10d   :  { %v850_v33 = vsel %vm849_vm8, %v11434_v17, %v11429_v44  ;;  %v871_v43 = vsel %vm849_vm8, %v11435_v13, %v11424_v8  ;;  %10575 = vmatprep.subr.msk.bf16.mxu0 %vm13611_vm10, %v10573_v16 }
 0x10e   :  { %v10576_v6 = vpack.c.bf16 %v871_v43, %v850_v33  ;;  %v853_v34 = vsel %vm849_vm8, %v11469_v40, %v11470_v21  ;;  %v852_v37 = vsel %vm849_vm8, %v11430_v49, %v11469_v40 }
 0x10f   :  { %v11473_v50 = vpop.permute.xlu1 %11472 }
 0x110   :  { %10578 = vmatpush1.bf16.msk.msra.mxu0 %vm13611_vm10, %v10576_v6  ;;  %v11475_v55 = vunpack.i.h.bf16 %v11473_v50  ;;  %v11474_v19 = vunpack.i.l.bf16 %v11473_v50 }
 0x112   :  { %v11438_v3 = vpop.permute.xlu0 %11437  ;;  %v854_v38 = vsel %vm849_vm8, %v11470_v21, %v11474_v19  ;;  %v855_v24 = vsel %vm849_vm8, %v11474_v19, %v11475_v55 }
 0x113   :  { %v11440_v4 = vunpack.i.h.bf16 %v11438_v3  ;;  %v11439_v58 = vunpack.i.l.bf16 %v11438_v3  ;;  %9806 = vmatmul.mubr.msk.f32.vlgmr.msra.gmra.mrb[0].mxu0 %vm913_vm11, %v13625_v27 }
 0x114   :  { %1165 = vmatprep.mubr.f32.mxu0 %v13094_v25 }
 0x115   :  { %v874_v41 = vsel %vm849_vm8, %v11439_v58, %v11440_v4  ;;  %v873_v46 = vsel %vm849_vm8, %v11425_v56, %v11439_v58 }
 0x116   :  { %v11443_v47 = vpop.permute.xlu0 %11442  ;;  %v10579_v22 = vpack.c.bf16 %v874_v41, %v853_v34  ;;  %v10582_v42 = vpack.c.bf16 %v873_v46, %v852_v37 }
 0x117   :  { %v11445_v15 = vunpack.i.h.bf16 %v11443_v47  ;;  %v11444_v51 = vunpack.i.l.bf16 %v11443_v47 }
 0x118   :  { %10581 = vmatprep.subr.msk.bf16.mxu1 %vm13611_vm10, %v10579_v22 }
 0x119   :  { %v875_v7 = vsel %vm849_vm8, %v11440_v4, %v11444_v51  ;;  %v876_v23 = vsel %vm849_vm8, %v11444_v51, %v11445_v15  ;;  %10584 = vmatpush1.bf16.msk.msra.mxu1 %vm13611_vm10, %v10582_v42 }
 0x11a   :  { %v10588_v53 = vpack.c.bf16 %v875_v7, %v854_v38  ;;  %v11448_v54 = vpop.permute.xlu0 %11447  ;;  %v10585_v57 = vpack.c.bf16 %v876_v23, %v855_v24 }
 0x11b   :  { %v11450_v59 = vunpack.i.h.bf16 %v11448_v54  ;;  %v11449_v62 = vunpack.i.l.bf16 %v11448_v54 }
 0x11c   :  { %9809 = vmatmul.mubr.msk.f32.vlgmr.msra.gmra.mrb[0].mxu1 %vm913_vm11, %v13625_v27  ;;  %10587 = vmatprep.subr.msk.bf16.mxu0 %vm13611_vm10, %v10585_v57 }
 0x11d   :  { %v11478_v2 = vpop.permute.xlu1 %11477  ;;  %10590 = vmatpush1.bf16.msk.msra.mxu0 %vm13611_vm10, %v10588_v53  ;;  %1236 = vmatprep.mubr.f32.mxu1 %v13094_v25  ;;  %v877_v0 = vsel %vm849_vm8, %v11445_v15, %v11449_v62  ;;  %v878_v5 = vsel %vm849_vm8, %v11449_v62, %v11450_v59 }
 0x11e   :  { %v11480_v28 = vunpack.i.h.bf16 %v11478_v2  ;;  %v11479_v29 = vunpack.i.l.bf16 %v11478_v2  ;;  %v11453_v9 = vpop.permute.xlu0 %11452 }
 0x11f   :  { %v11455_v10 = vunpack.i.h.bf16 %v11453_v9  ;;  %v11454_v60 = vunpack.i.l.bf16 %v11453_v9 }
 0x120   :  { %v856_v61 = vsel %vm849_vm8, %v11475_v55, %v11479_v29  ;;  %v857_v63 = vsel %vm849_vm8, %v11479_v29, %v11480_v28  ;;  %9812 = vmatmul.mubr.msk.f32.vlgmr.msra.gmra.mrb[2].mxu0 %vm913_vm11, %v13625_v27 }
 0x121   :  { %v10594_v31 = vpack.c.bf16 %v877_v0, %v856_v61  ;;  %v11483_v11 = vpop.permute.xlu1 %11482  ;;  %v10591_v18 = vpack.c.bf16 %v878_v5, %v857_v63  ;;  %1307 = vmatprep.mubr.f32.mxu0 %v13094_v25  ;;  %v879_v39 = vsel %vm849_vm8, %v11450_v59, %v11454_v60  ;;  %v880_v1 = vsel %vm849_vm8, %v11454_v60, %v11455_v10 }
 0x122   :  { %v11485_v35 = vunpack.i.h.bf16 %v11483_v11  ;;  %v11484_v26 = vunpack.i.l.bf16 %v11483_v11  ;;  %v11458_v45 = vpop.permute.xlu0 %11457 }
 0x123   :  { %10593 = vmatprep.subr.msk.bf16.mxu1 %vm13611_vm10, %v10591_v18  ;;  %v11460_v14 = vunpack.i.h.bf16 %v11458_v45  ;;  %v11459_v49 = vunpack.i.l.bf16 %v11458_v45 }
 0x124   :  { %v858_v44 = vsel %vm849_vm8, %v11480_v28, %v11484_v26  ;;  %v859_v52 = vsel %vm849_vm8, %v11484_v26, %v11485_v35  ;;  %10596 = vmatpush1.bf16.msk.msra.mxu1 %vm13611_vm10, %v10594_v31 }
 0x125   :  { %v10600_v56 = vpack.c.bf16 %v879_v39, %v858_v44  ;;  %v10597_v8 = vpack.c.bf16 %v880_v1, %v859_v52  ;;  %v881_v20 = vsel %vm849_vm8, %v11455_v10, %v11459_v49  ;;  %v882_v12 = vsel %vm849_vm8, %v11459_v49, %v11460_v14 }
 0x126   :  { %v11488_v13 = vpop.permute.xlu1 %11487  ;;  %v11463_v17 = vpop.permute.xlu0 %11462 }
 0x127   :  { %v11490_v30 = vunpack.i.h.bf16 %v11488_v13  ;;  %v11489_v32 = vunpack.i.l.bf16 %v11488_v13  ;;  %9815 = vmatmul.mubr.msk.f32.vlgmr.msra.gmra.mrb[2].mxu1 %vm913_vm11, %v13625_v27  ;;  %10599 = vmatprep.subr.msk.bf16.mxu0 %vm13611_vm10, %v10597_v8  ;;  %v11465_v16 = vunpack.i.h.bf16 %v11463_v17  ;;  %v11464_v33 = vunpack.i.l.bf16 %v11463_v17 }
 0x128   :  { %10602 = vmatpush1.bf16.msk.msra.mxu0 %vm13611_vm10, %v10600_v56  ;;  %1378 = vmatprep.mubr.f32.mxu1 %v13094_v25  ;;  %v19125_v56 = vmov 0.0|0.0  }
 0x129   :  { %v860_v43 = vsel %vm849_vm8, %v11485_v35, %v11489_v32  ;;  %v861_v6 = vsel %vm849_vm8, %v11489_v32, %v11490_v30  ;;  %v883_v40 = vsel %vm849_vm8, %v11460_v14, %v11464_v33  ;;  %v884_v50 = vsel %vm849_vm8, %v11464_v33, %v11465_v16 }
 0x12a   :  { %v10606_v21 = vpack.c.bf16 %v881_v20, %v860_v43  ;;  %v11493_v3 = vpop.permute.xlu1 %11492  ;;  %v10603_v4 = vpack.c.bf16 %v882_v12, %v861_v6  ;;  %v11503_v58 = vpop.permute.xlu0 %11502  ;;  %v13748_v32 = vsub.s32 1, %v13280_v36 }
 0x12b   :  { %v11495_v34 = vunpack.i.h.bf16 %v11493_v3  ;;  %v11494_v37 = vunpack.i.l.bf16 %v11493_v3  ;;  %9818 = vmatmul.mubr.msk.f32.vlgmr.msra.gmra.mrb[4].mxu0 %vm913_vm11, %v13625_v27  ;;  %v11505_v55 = vunpack.i.h.bf16 %v11503_v58  ;;  %v11504_v19 = vunpack.i.l.bf16 %v11503_v58 }
 0x12c   :  { %10605 = vmatprep.subr.msk.bf16.mxu1 %vm13611_vm10, %v10603_v4  ;;  %1449 = vmatprep.mubr.f32.mxu0 %v13094_v25  ;;  %19340 = vst [vmem:[#allocation5_spill] sm:$0xff] %v13748_v32 }
 0x12d   :  { %v862_v41 = vsel %vm849_vm8, %v11490_v30, %v11494_v37  ;;  %v863_v46 = vsel %vm849_vm8, %v11494_v37, %v11495_v34  ;;  %10608 = vmatpush1.bf16.msk.msra.mxu1 %vm13611_vm10, %v10606_v21  ;;  %v885_v22 = vsel %vm849_vm8, %v11465_v16, %v11504_v19  ;;  %v886_v42 = vsel %vm849_vm8, %v11504_v19, %v11505_v55  ;;  %v2161_v30 = vld [vmem:[#allocation2 + $0x5c] sm:$0xf] }
 0x12e   :  { %v10612_v47 = vpack.c.bf16 %v883_v40, %v862_v41  ;;  %v11498_v15 = vpop.permute.xlu1 %11497  ;;  %v10609_v51 = vpack.c.bf16 %v884_v50, %v863_v46  ;;  %v11508_v38 = vpop.permute.xlu0 %11507  ;;  %2530 = vrot.lane.b32.xlu1 %v2161_v30, %s13090_s29  ;;  %2476 = vrot.lane.b32.xlu0 %v2161_v30, %s13088_s25  ;;  %v13763_v40 = vsub.s32 2, %v13280_v36  ;;  %v13766_v50 = vsub.s32 3, %v13280_v36 }
 0x12f   :  { %v11500_v24 = vunpack.i.h.bf16 %v11498_v15  ;;  %v11499_v7 = vunpack.i.l.bf16 %v11498_v15  ;;  %v11510_v23 = vunpack.i.h.bf16 %v11508_v38  ;;  %v11509_v53 = vunpack.i.l.bf16 %v11508_v38 }
 0x130   :  { %9821 = vmatmul.mubr.msk.f32.vlgmr.msra.gmra.mrb[4].mxu1 %vm913_vm11, %v13625_v27  ;;  %10611 = vmatprep.subr.msk.bf16.mxu0 %vm13611_vm10, %v10609_v51  ;;  %19343 = vst [vmem:[#allocation8_spill] sm:$0xff] %v13763_v40  ;;  %19344 = vst [vmem:[#allocation9_spill] sm:$0xff] %v13766_v50  ;;  %v13786_v41 = vsub.s32 5, %v13280_v36 }
 0x131   :  { %v864_v54 = vsel %vm849_vm8, %v11495_v34, %v11499_v7  ;;  %v865_v57 = vsel %vm849_vm8, %v11499_v7, %v11500_v24  ;;  %10614 = vmatpush1.bf16.msk.msra.mxu0 %vm13611_vm10, %v10612_v47  ;;  %v887_v62 = vsel %vm849_vm8, %v11505_v55, %v11509_v53  ;;  %v888_v2 = vsel %vm849_vm8, %v11509_v53, %v11510_v23 }
 0x132   :  { %v10618_v59 = vpack.c.bf16 %v885_v22, %v864_v54  ;;  %v11513_v0 = vpop.permute.xlu1 %11512  ;;  %v10615_v5 = vpack.c.bf16 %v886_v42, %v865_v57  ;;  %v11523_v28 = vpop.permute.xlu0 %11522  ;;  %1520 = vmatprep.mubr.f32.mxu1 %v13094_v25  ;;  %2584 = vrot.lane.b32.xlu1 %v2161_v30, %s13091_s12  ;;  %v13780_v55 = vsub.s32 4, %v13280_v36  ;;  %19348 = vst [vmem:[#allocation13_spill] sm:$0xff] %v13786_v41  ;;  %v13807_v57 = vsub.s32 6, %v13280_v36 }
 0x133   :  { %v11515_v29 = vunpack.i.h.bf16 %v11513_v0  ;;  %v11514_v9 = vunpack.i.l.bf16 %v11513_v0  ;;  %v11525_v10 = vunpack.i.h.bf16 %v11523_v28  ;;  %v11524_v60 = vunpack.i.l.bf16 %v11523_v28 }
 0x134   :  { %9824 = vmatmul.mubr.msk.f32.vlgmr.msra.gmra.mrb[6].mxu0 %vm913_vm11, %v13625_v27  ;;  %10617 = vmatprep.subr.msk.bf16.mxu1 %vm13611_vm10, %v10615_v5  ;;  %19346 = vst [vmem:[#allocation11_spill] sm:$0xff] %v13780_v55  ;;  %19351 = vst [vmem:[#allocation16_spill] sm:$0xff] %v13807_v57 }
 0x135   :  { %v866_v61 = vsel %vm849_vm8, %v11500_v24, %v11514_v9  ;;  %v867_v63 = vsel %vm849_vm8, %v11514_v9, %v11515_v29  ;;  %10620 = vmatpush1.bf16.msk.msra.mxu1 %vm13611_vm10, %v10618_v59  ;;  %1591 = vmatprep.mubr.f32.mxu0 %v13094_v25  ;;  %v889_v39 = vsel %vm849_vm8, %v11510_v23, %v11524_v60  ;;  %v1772_v9 = vsub.s32 7, %v13280_v36 }
 0x136   :  { %v10624_v31 = vpack.c.bf16 %v887_v62, %v866_v61  ;;  %v11518_v11 = vpop.permute.xlu1 %11517  ;;  %v10621_v18 = vpack.c.bf16 %v888_v2, %v867_v63  ;;  %v890_v1 = vsel %vm849_vm8, %v11524_v60, %v11525_v10 }
 0x137   :  { %v11520_v35 = vunpack.i.h.bf16 %v11518_v11  ;;  %v11519_v26 = vunpack.i.l.bf16 %v11518_v11 }
 0x138   :  { %9827 = vmatmul.mubr.msk.f32.vlgmr.msra.gmra.mrb[6].mxu1 %vm913_vm11, %v13625_v27  ;;  %10623 = vmatprep.subr.msk.bf16.mxu0 %vm13611_vm10, %v10621_v18 }
 0x139   :  { %v868_v45 = vsel %vm849_vm8, %v11515_v29, %v11519_v26  ;;  %v869_v14 = vsel %vm849_vm8, %v11519_v26, %v11520_v35  ;;  %10626 = vmatpush1.bf16.msk.msra.mxu0 %vm13611_vm10, %v10624_v31  ;;  %1662 = vmatprep.mubr.f32.mxu1 %v13094_v25 }
 0x13a   :  { %v10630_v49 = vpack.c.bf16 %v889_v39, %v868_v45  ;;  %v11528_v44 = vpop.permute.xlu1 %11527  ;;  %v10627_v52 = vpack.c.bf16 %v890_v1, %v869_v14  ;;  %10633 = vmatprep.subr.bf16.mxu0 %v19125_v56  ;;  %v36_v45 = vld [vmem:[%s19116_s1 + $0x8] sm:$0xff] }
 0x13b   :  { %v11530_v8 = vunpack.i.h.bf16 %v11528_v44  ;;  %v11529_v20 = vunpack.i.l.bf16 %v11528_v44 }
 0x13c   :  { %9830 = vmatmul.mubr.msk.f32.vlgmr.msra.gmra.mrb[8].mxu0 %vm913_vm11, %v13625_v27  ;;  %10629 = vmatprep.subr.msk.bf16.mxu1 %vm13611_vm10, %v10627_v52 }
 0x13d   :  { %v870_v12 = vsel %vm849_vm8, %v11520_v35, %v11529_v20  ;;  %v891_v13 = vsel %vm849_vm8, %v11525_v10, %v11530_v8  ;;  %10632 = vmatpush1.bf16.msk.msra.mxu1 %vm13611_vm10, %v10630_v49  ;;  %10365 = vmatprep.mubr.msk.f32.mxu0 %vm13097_vm12, %v13094_v25  ;;  %vm5124_vm12 = vcmask 932864  }
 0x13e   :  { %v10634_v17 = vpack.c.bf16 %v891_v13, %v870_v12 }
 0x140   :  { %9833 = vmatmul.mubr.msk.f32.vlgmr.msra.gmra.mrb[8].mxu1 %vm913_vm11, %v13625_v27  ;;  %10636 = vmatpush3.bf16.msk.msra.mxu0 %vm13611_vm10, %v10634_v17  ;;  %v13846_v17 = vrot.slane %v36_v45, %v13742_v48  ;;  %vm4450_vm10 = vcmask 31744  }
 0x141   :  { %3241 = vmatprep.mubr.f32.mxu1 %v13094_v25 }
 0x142   :  { %19354 = vst [vmem:[#allocation19_spill] sm:$0xff] %v13846_v17 }
 0x143   :  { %10366 = vmatmul.mubr.msk.f32.vlgmr.msra.gmra.mrb[10].mxu0 %vm913_vm11, %v13625_v27  ;;  %v35_v27 = vld [vmem:[%s19116_s1] sm:$0xff]  ;;  %vm4895_vm11 = vcmask 965632  }
 0x144   :  { %3318 = vmatprep.mubr.f32.mxu0 %v13094_v25  ;;  %v13751_v25 = vrot.slane %v35_v27, %v13742_v48  ;;  %v13754_v16 = vrot.slane %v35_v27, %v13748_v32  ;;  %v13777_v37 = vrot.slane %v35_v27, %v13763_v40  ;;  %v13783_v19 = vrot.slane %v35_v27, %v13766_v50 }
 0x145   :  { %v13794_v38 = vrot.slane %v35_v27, %v13780_v55  ;;  %v13800_v23 = vrot.slane %v35_v27, %v13786_v41  ;;  %v13827_v18 = vrot.slane %v35_v27, %v13807_v57  ;;  %v13839_v49 = vrot.slane %v35_v27, %v1772_v9 }
 0x146   :  { %19341 = vst [vmem:[#allocation6_spill] sm:$0xff] %v13751_v25  ;;  %19342 = vst [vmem:[#allocation7_spill] sm:$0xff] %v13754_v16 }
 0x147   :  { %19345 = vst [vmem:[#allocation10_spill] sm:$0xff] %v13777_v37  ;;  %19347 = vst [vmem:[#allocation12_spill] sm:$0xff] %v13783_v19 }
 0x148   :  { %19349 = vst [vmem:[#allocation14_spill] sm:$0xff] %v13794_v38  ;;  %19350 = vst [vmem:[#allocation15_spill] sm:$0xff] %v13800_v23 }
 0x149   :  { %19352 = vst [vmem:[#allocation17_spill] sm:$0xff] %v13827_v18  ;;  %19353 = vst [vmem:[#allocation18_spill] sm:$0xff] %v13839_v49 }
 0x1e6   :  { %v1025_v33 = vpop.f32.mrb[0].mxu0 }
 0x1e7   :  { %v13757_v43 = vmul.f32 %v13751_v25, %v1025_v33  ;;  %v1027_v6 = vpop.f32.mrb[1].mxu0 }
 0x1e8   :  { %v13760_v21 = vmul.f32 %v13754_v16, %v1027_v6  ;;  %v13852_v6 = vrot.slane %v36_v45, %v13748_v32 }
 0x1e9   :  { %v1912_v3 = vmul.f32 %v13757_v43, %v13757_v43  ;;  %v1869_v58 = vsel %vm1868_vm7, %v13757_v43, 0.0 }
 0x1ea   :  { %v1913_v4 = vmul.f32 %v13760_v21, %v13760_v21  ;;  %v1870_v34 = vsel %vm1868_vm7, %v13760_v21, 0.0  ;;  %19355 = vst [vmem:[#allocation20_spill] sm:$0xff] %v13852_v6 }
 0x1eb   :  { %v1933_v46 = vsel %vm1868_vm7, %v1912_v3, 0.0  ;;  %v1871_v22 = vadd.f32 %v1870_v34, %v1869_v58 }
 0x1ec   :  { %v1934_v47 = vsel %vm1868_vm7, %v1913_v4, 0.0 }
 0x1ed   :  { %v1935_v24 = vadd.f32 %v1934_v47, %v1933_v46 }
 0x1ef   :  { %v1096_v42 = vpop.f32.mrb[0].mxu1 }
 0x1f0   :  { %v13791_v15 = vmul.f32 %v13777_v37, %v1096_v42  ;;  %v1098_v51 = vpop.f32.mrb[1].mxu1 }
 0x1f1   :  { %v13797_v7 = vmul.f32 %v13783_v19, %v1098_v51  ;;  %v13867_v51 = vrot.slane %v36_v45, %v13763_v40 }
 0x1f2   :  { %v1872_v53 = vsel %vm1868_vm7, %v13791_v15, 0.0  ;;  %v1914_v54 = vmul.f32 %v13791_v15, %v13791_v15 }
 0x1f3   :  { %v1873_v59 = vadd.f32 %v1872_v53, %v1871_v22  ;;  %v1874_v62 = vsel %vm1868_vm7, %v13797_v7, 0.0  ;;  %v1915_v2 = vmul.f32 %v13797_v7, %v13797_v7  ;;  %v1167_v0 = vpop.f32.mrb[2].mxu0  ;;  %19356 = vst [vmem:[#allocation21_spill] sm:$0xff] %v13867_v51 }
 0x1f4   :  { %v1936_v5 = vsel %vm1868_vm7, %v1914_v54, 0.0  ;;  %v13815_v28 = vmul.f32 %v13794_v38, %v1167_v0  ;;  %v1169_v29 = vpop.f32.mrb[3].mxu0  ;;  %v13878_v0 = vrot.slane %v36_v45, %v13766_v50 }
 0x1f5   :  { %v1937_v10 = vadd.f32 %v1936_v5, %v1935_v24  ;;  %v1875_v60 = vadd.f32 %v1874_v62, %v1873_v59  ;;  %v1938_v61 = vsel %vm1868_vm7, %v1915_v2, 0.0  ;;  %v13820_v63 = vmul.f32 %v13800_v23, %v1169_v29 }
 0x1f6   :  { %v1876_v31 = vsel %vm1868_vm7, %v13815_v28, 0.0  ;;  %v1916_v11 = vmul.f32 %v13815_v28, %v13815_v28  ;;  %19357 = vst [vmem:[#allocation22_spill] sm:$0xff] %v13878_v0 }
 0x1f7   :  { %v1939_v39 = vadd.f32 %v1938_v61, %v1937_v10  ;;  %v1877_v1 = vadd.f32 %v1876_v31, %v1875_v60  ;;  %v1878_v35 = vsel %vm1868_vm7, %v13820_v63, 0.0  ;;  %v1917_v26 = vmul.f32 %v13820_v63, %v13820_v63 }
 0x1f8   :  { %v1940_v14 = vsel %vm1868_vm7, %v1916_v11, 0.0  ;;  %v13886_v11 = vrot.slane %v36_v45, %v13780_v55 }
 0x1f9   :  { %v1941_v44 = vadd.f32 %v1940_v14, %v1939_v39  ;;  %v1942_v52 = vsel %vm1868_vm7, %v1917_v26, 0.0  ;;  %v1879_v8 = vadd.f32 %v1878_v35, %v1877_v1 }
 0x1fa   :  { %v1238_v20 = vpop.f32.mrb[2].mxu1  ;;  %19358 = vst [vmem:[#allocation23_spill] sm:$0xff] %v13886_v11 }
 0x1fb   :  { %v13843_v12 = vmul.f32 %v13827_v18, %v1238_v20  ;;  %v1240_v13 = vpop.f32.mrb[3].mxu1  ;;  %v1943_v30 = vadd.f32 %v1942_v52, %v1941_v44  ;;  %v13896_v52 = vrot.slane %v36_v45, %v13786_v41 }
 0x1fc   :  { %v13849_v33 = vmul.f32 %v13839_v49, %v1240_v13 }
 0x1fd   :  { %v1880_v27 = vsel %vm1868_vm7, %v13843_v12, 0.0  ;;  %v1918_v3 = vmul.f32 %v13843_v12, %v13843_v12  ;;  %19359 = vst [vmem:[#allocation24_spill] sm:$0xff] %v13896_v52 }
 0x1fe   :  { %v1881_v4 = vadd.f32 %v1880_v27, %v1879_v8  ;;  %v1882_v58 = vsel %vm1868_vm7, %v13849_v33, 0.0  ;;  %v1919_v34 = vmul.f32 %v13849_v33, %v13849_v33  ;;  %v1309_v46 = vpop.f32.mrb[4].mxu0 }
 0x1ff   :  { %v1944_v47 = vsel %vm1868_vm7, %v1918_v3, 0.0  ;;  %v13864_v22 = vmul.f32 %v13846_v17, %v1309_v46  ;;  %v1311_v42 = vpop.f32.mrb[5].mxu0 }
 0x200   :  { %v1945_v24 = vadd.f32 %v1944_v47, %v1943_v30  ;;  %v1883_v53 = vadd.f32 %v1882_v58, %v1881_v4  ;;  %v1946_v54 = vsel %vm1868_vm7, %v1919_v34, 0.0  ;;  %v13871_v59 = vmul.f32 %v13852_v6, %v1311_v42 }
 0x201   :  { %v1884_v62 = vsel %vm1868_vm7, %v13864_v22, 0.0  ;;  %v1920_v2 = vmul.f32 %v13864_v22, %v13864_v22  ;;  %v13911_v47 = vrot.slane %v36_v45, %v13807_v57  ;;  %v13915_v42 = vrot.slane %v36_v45, %v1772_v9 }
 0x202   :  { %v1947_v5 = vadd.f32 %v1946_v54, %v1945_v24  ;;  %v1885_v29 = vadd.f32 %v1884_v62, %v1883_v53  ;;  %v1886_v10 = vsel %vm1868_vm7, %v13871_v59, 0.0  ;;  %v1921_v60 = vmul.f32 %v13871_v59, %v13871_v59 }
 0x203   :  { %v1948_v61 = vsel %vm1868_vm7, %v1920_v2, 0.0  ;;  %v1380_v31 = vpop.f32.mrb[4].mxu1  ;;  %19360 = vst [vmem:[#allocation25_spill] sm:$0xff] %v13911_v47  ;;  %19361 = vst [vmem:[#allocation26_spill] sm:$0xff] %v13915_v42  ;;  %v37_v2 = vld [vmem:[%s19116_s1 + $0x10] sm:$0x1f] }
 0x204   :  { %v1949_v39 = vadd.f32 %v1948_v61, %v1947_v5  ;;  %v1887_v1 = vadd.f32 %v1886_v10, %v1885_v29  ;;  %v1950_v35 = vsel %vm1868_vm7, %v1921_v60, 0.0  ;;  %v13890_v26 = vmul.f32 %v13867_v51, %v1380_v31  ;;  %v1382_v14 = vpop.f32.mrb[5].mxu1  ;;  %s13102_s1 = smov 98  }
 0x205   :  { %v13893_v44 = vmul.f32 %v13878_v0, %v1382_v14 }
 0x206   :  { %v1951_v8 = vadd.f32 %v1950_v35, %v1949_v39  ;;  %v1888_v20 = vsel %vm1868_vm7, %v13890_v26, 0.0  ;;  %v1922_v13 = vmul.f32 %v13890_v26, %v13890_v26  ;;  %v13940_v35 = vrot.slane %v37_v2, %v13748_v32 }
 0x207   :  { %v1889_v30 = vadd.f32 %v1888_v20, %v1887_v1  ;;  %v1890_v27 = vsel %vm1868_vm7, %v13893_v44, 0.0  ;;  %v1923_v3 = vmul.f32 %v13893_v44, %v13893_v44  ;;  %v1451_v4 = vpop.f32.mrb[6].mxu0  ;;  %v13937_v1 = vrot.slane %v37_v2, %v13742_v48 }
 0x208   :  { %v1952_v58 = vsel %vm1868_vm7, %v1922_v13, 0.0  ;;  %v13908_v34 = vmul.f32 %v13886_v11, %v1451_v4  ;;  %v1453_v46 = vpop.f32.mrb[7].mxu0  ;;  %19363 = vst [vmem:[#allocation28_spill] sm:$0xff] %v13940_v35 }
 0x209   :  { %v1953_v24 = vadd.f32 %v1952_v58, %v1951_v8  ;;  %v1891_v53 = vadd.f32 %v1890_v27, %v1889_v30  ;;  %v1954_v54 = vsel %vm1868_vm7, %v1923_v3, 0.0  ;;  %v13919_v62 = vmul.f32 %v13896_v52, %v1453_v46  ;;  %19362 = vst [vmem:[#allocation27_spill] sm:$0xff] %v13937_v1 }
 0x20a   :  { %v1892_v5 = vsel %vm1868_vm7, %v13908_v34, 0.0  ;;  %v1924_v29 = vmul.f32 %v13908_v34, %v13908_v34 }
 0x20b   :  { %v1955_v36 = vadd.f32 %v1954_v54, %v1953_v24  ;;  %v1893_v9 = vadd.f32 %v1892_v5, %v1891_v53  ;;  %v1894_v45 = vsel %vm1868_vm7, %v13919_v62, 0.0  ;;  %v1925_v10 = vmul.f32 %v13919_v62, %v13919_v62  ;;  %v1522_v60 = vpop.f32.mrb[6].mxu1 }
 0x20c   :  { %v1956_v61 = vsel %vm1868_vm7, %v1924_v29, 0.0  ;;  %v13934_v31 = vmul.f32 %v13911_v47, %v1522_v60  ;;  %v1524_v39 = vpop.f32.mrb[7].mxu1  ;;  %v13959_v29 = vrot.slane %v37_v2, %v13763_v40 }
 0x20d   :  { %v1957_v14 = vadd.f32 %v1956_v61, %v1955_v36  ;;  %v1895_v8 = vadd.f32 %v1894_v45, %v1893_v9  ;;  %v1958_v20 = vsel %vm1868_vm7, %v1925_v10, 0.0  ;;  %v13944_v13 = vmul.f32 %v13915_v42, %v1524_v39 }
 0x20e   :  { %v1896_v30 = vsel %vm1868_vm7, %v13934_v31, 0.0  ;;  %v1926_v27 = vmul.f32 %v13934_v31, %v13934_v31  ;;  %19364 = vst [vmem:[#allocation29_spill] sm:$0xff] %v13959_v29  ;;  %v13962_v36 = vrot.slane %v37_v2, %v13766_v50 }
 0x20f   :  { %v1959_v3 = vadd.f32 %v1958_v20, %v1957_v14  ;;  %v1897_v4 = vadd.f32 %v1896_v30, %v1895_v8  ;;  %v1898_v58 = vsel %vm1868_vm7, %v13944_v13, 0.0  ;;  %v1927_v46 = vmul.f32 %v13944_v13, %v13944_v13  ;;  %v1593_v24 = vpop.f32.mrb[8].mxu0 }
 0x210   :  { %v1960_v53 = vsel %vm1868_vm7, %v1926_v27, 0.0  ;;  %v13956_v54 = vmul.f32 %v13937_v1, %v1593_v24  ;;  %v1595_v5 = vpop.f32.mrb[9].mxu0  ;;  %19365 = vst [vmem:[#allocation30_spill] sm:$0xff] %v13962_v36  ;;  %v13973_v14 = vrot.slane %v37_v2, %v13780_v55 }
 0x211   :  { %v1961_v9 = vadd.f32 %v1960_v53, %v1959_v3  ;;  %v1899_v45 = vadd.f32 %v1898_v58, %v1897_v4  ;;  %v1962_v10 = vsel %vm1868_vm7, %v1927_v46, 0.0  ;;  %v13966_v60 = vmul.f32 %v13940_v35, %v1595_v5 }
 0x212   :  { %v1900_v61 = vsel %vm1868_vm7, %v13956_v54, 0.0  ;;  %v1928_v39 = vmul.f32 %v13956_v54, %v13956_v54  ;;  %19366 = vst [vmem:[#allocation31_spill] sm:$0xff] %v13973_v14 }
 0x213   :  { %v1963_v8 = vadd.f32 %v1962_v10, %v1961_v9  ;;  %v1901_v20 = vadd.f32 %v1900_v61, %v1899_v45  ;;  %v1902_v30 = vsel %vm1868_vm7, %v13966_v60, 0.0  ;;  %v1929_v27 = vmul.f32 %v13966_v60, %v13966_v60  ;;  %v1664_v3 = vpop.f32.mrb[8].mxu1 }
 0x214   :  { %v1964_v4 = vsel %vm1868_vm7, %v1928_v39, 0.0  ;;  %v13981_v58 = vmul.f32 %v13959_v29, %v1664_v3  ;;  %v1666_v46 = vpop.f32.mrb[9].mxu1 }
 0x215   :  { %v1965_v24 = vadd.f32 %v1964_v4, %v1963_v8  ;;  %v1903_v53 = vadd.f32 %v1902_v30, %v1901_v20  ;;  %v1966_v2 = vsel %vm1868_vm7, %v1929_v27, 0.0  ;;  %v13985_v5 = vmul.f32 %v13962_v36, %v1666_v46 }
 0x216   :  { %v1904_v9 = vsel %vm1868_vm7, %v13981_v58, 0.0  ;;  %v1930_v45 = vmul.f32 %v13981_v58, %v13981_v58  ;;  %v1735_v10 = vpop.f32.mrb[10].mxu0 }
 0x217   :  { %v1931_v61 = vmul.f32 %v13985_v5, %v13985_v5  ;;  %v1867_v39 = vmul.f32 %v13973_v14, %v1735_v10  ;;  %v10367_v3 = vpop.f32.mrb[11].mxu0  ;;  %v1905_v8 = vadd.f32 %v1904_v9, %v1903_v53  ;;  %v1906_v20 = vsel %vm1868_vm7, %v13985_v5, 0.0  ;;  %v14000_v53 = vpop.permute.xlu1 %2227 }
 0x218   :  { %v1967_v30 = vadd.f32 %v1966_v2, %v1965_v24  ;;  %v1968_v27 = vsel %vm1868_vm7, %v1930_v45, 0.0  ;;  %19367 = vst [vmem:[#allocation32_spill] sm:$0xff] %v14000_v53  ;;  %v14002_v9 = vpop.permute.xlu0 %2173 }
 0x219   :  { %v1907_v4 = vadd.f32 %v1906_v20, %v1905_v8  ;;  %v1908_v46 = vsel %vm44_vm0, %v1867_v39, 0.0  ;;  %v1932_v56 = vmul.f32 %v1867_v39, %v1867_v39  ;;  %v1970_v41 = vsel %vm1868_vm7, %v1931_v61, 0.0  ;;  %19368 = vst [vmem:[#allocation33_spill] sm:$0xff] %v14002_v9 }
 0x21a   :  { %v1969_v55 = vadd.f32 %v1968_v27, %v1967_v30 }
 0x21b   :  { %v1909_v57 = vadd.f32 %v1908_v46, %v1907_v4  ;;  %v1972_v50 = vsel %vm44_vm0, %v1932_v56, 0.0  ;;  %v14004_v24 = vpop.permute.xlu1 %2530 }
 0x21c   :  { %v1971_v40 = vadd.f32 %v1970_v41, %v1969_v55  ;;  %19369 = vst [vmem:[#allocation34_spill] sm:$0xff] %v14004_v24  ;;  %v14006_v2 = vpop.permute.xlu0 %2476 }
 0x21d   :  { %1910 = vadd.xlane.f32.xlu0 %v1909_v57  ;;  %19370 = vst [vmem:[#allocation35_spill] sm:$0xff] %v14006_v2 }
 0x21e   :  { %v1973_v10 = vadd.f32 %v1972_v50, %v1971_v40 }
 0x21f   :  { %v14008_v45 = vpop.permute.xlu1 %2584 }
 0x220   :  { %1974 = vadd.xlane.f32.xlu1 %v1973_v10  ;;  %19371 = vst [vmem:[#allocation36_spill] sm:$0xff] %v14008_v45 }
 0x2aa   :  { %v1911_v3 = vpop.xlane.xlu0 %1910 }
 0x2ab   :  { %v14010_v61 = vmul.f32 0.00048828125, %v1911_v3 }
 0x2ad   :  { %v1975_v8 = vpop.xlane.xlu1 %1974  ;;  %v1978_v56 = vmul.f32 %v14010_v61, %v14010_v61  ;;  %v2002_v41 = vsub.f32 %v1867_v39, %v14010_v61  ;;  %v1984_v57 = vsub.f32 %v13791_v15, %v14010_v61  ;;  %v1985_v20 = vsub.f32 %v13797_v7, %v14010_v61 }
 0x2ae   :  { %v1977_v55 = vmul.f32 0.00048828125, %v1975_v8  ;;  %v1982_v30 = vsub.f32 %v13757_v43, %v14010_v61  ;;  %v1983_v27 = vsub.f32 %v13760_v21, %v14010_v61  ;;  %v1986_v4 = vsub.f32 %v13815_v28, %v14010_v61 }
 0x2af   :  { %v1987_v46 = vsub.f32 %v13820_v63, %v14010_v61  ;;  %v1988_v39 = vsub.f32 %v13843_v12, %v14010_v61  ;;  %v1989_v15 = vsub.f32 %v13849_v33, %v14010_v61  ;;  %v1990_v7 = vsub.f32 %v13864_v22, %v14010_v61 }
 0x2b0   :  { %v1979_v40 = vsub.f32 %v1977_v55, %v1978_v56  ;;  %v1991_v43 = vsub.f32 %v13871_v59, %v14010_v61  ;;  %v1992_v21 = vsub.f32 %v13890_v26, %v14010_v61  ;;  %v1993_v28 = vsub.f32 %v13893_v44, %v14010_v61 }
 0x2b1   :  { %v1994_v63 = vsub.f32 %v13908_v34, %v14010_v61  ;;  %v1995_v12 = vsub.f32 %v13919_v62, %v14010_v61  ;;  %v1996_v33 = vsub.f32 %v13934_v31, %v14010_v61 }
 0x2b2   :  { %v1980_v50 = vadd.f32 1e-05, %v1979_v40 }
 0x2b4   :  { %13031 = vrsqrt.f32 %v1980_v50 }
 0x2be   :  { %v14047_v10 = vpop.eup %13031 }
 0x2bf   :  { %v2023_v62 = vmul.f32 %v14047_v10, %v2002_v41  ;;  %v2005_v31 = vmul.f32 %v14047_v10, %v1984_v57  ;;  %v2006_v3 = vmul.f32 %v14047_v10, %v1985_v20  ;;  %v2003_v8 = vmul.f32 %v14047_v10, %v1982_v30 }
 0x2c0   :  { %v2004_v56 = vmul.f32 %v14047_v10, %v1983_v27  ;;  %v2007_v55 = vmul.f32 %v14047_v10, %v1986_v4  ;;  %v2008_v40 = vmul.f32 %v14047_v10, %v1987_v46  ;;  %v2009_v50 = vmul.f32 %v14047_v10, %v1988_v39 }
 0x2c1   :  { %v2044_v44 = vmul.f32 0.2, %v2023_v62  ;;  %v2026_v26 = vmul.f32 0.2, %v2005_v31  ;;  %v2027_v59 = vmul.f32 0.2, %v2006_v3  ;;  %v2010_v34 = vmul.f32 %v14047_v10, %v1989_v15 }
 0x2c2   :  { %v2024_v41 = vmul.f32 0.2, %v2003_v8  ;;  %v2025_v22 = vmul.f32 0.2, %v2004_v56  ;;  %v2028_v57 = vmul.f32 0.2, %v2007_v55  ;;  %v2011_v20 = vmul.f32 %v14047_v10, %v1990_v7 }
 0x2c3   :  { %v2065_v32 = vmax.f32 %v2023_v62, %v2044_v44  ;;  %v2047_v30 = vmax.f32 %v2005_v31, %v2026_v26  ;;  %v2048_v48 = vmax.f32 %v2006_v3, %v2027_v59  ;;  %v2029_v27 = vmul.f32 0.2, %v2008_v40 }
 0x2c4   :  { %v2045_v45 = vmax.f32 %v2003_v8, %v2024_v41  ;;  %v2046_v4 = vmax.f32 %v2004_v56, %v2025_v22  ;;  %v2049_v2 = vmax.f32 %v2007_v55, %v2028_v57  ;;  %v2030_v46 = vmul.f32 0.2, %v2009_v50 }
 0x2c5   :  { %v2086_v39 = vmul.f32 %v2065_v32, %v13973_v14  ;;  %v14069_v24 = vmul.f32 %v2047_v30, %v13777_v37  ;;  %v2069_v15 = vmul.f32 %v2048_v48, %v13783_v19  ;;  %v2050_v9 = vmax.f32 %v2008_v40, %v2029_v27 }
 0x2c6   :  { %v14073_v53 = vmul.f32 %v2045_v45, %v13751_v25  ;;  %v2067_v7 = vmul.f32 %v2046_v4, %v13754_v16  ;;  %v14077_v59 = vmul.f32 %v2049_v2, %v13794_v38  ;;  %v2031_v26 = vmul.f32 0.2, %v2010_v34 }
 0x2c7   :  { %2137 = vst.msk [vmem:[#allocation2 + $0x58] sm:$0xf] %vm44_vm0, %v2086_v39  ;;  %v14081_v22 = vcombine.low %v14069_v24, %v2069_v15  ;;  %v2071_v32 = vmul.f32 %v2050_v9, %v13800_v23  ;;  %v2051_v44 = vmax.f32 %v2009_v50, %v2030_v46  ;;  %v2012_v48 = vmul.f32 %v14047_v10, %v1991_v43 }
 0x2c8   :  { %19372 = vst [vmem:[#allocation37_spill] sm:$0xff] %v14077_v59  ;;  %v14086_v62 = vcombine.low %v14073_v53, %v2067_v7  ;;  %v2052_v45 = vmax.f32 %v2010_v34, %v2031_v26  ;;  %v2032_v31 = vmul.f32 0.2, %v2011_v20  ;;  %v2013_v3 = vmul.f32 %v14047_v10, %v1992_v21 }
 0x2c9   :  { %19373 = vst [vmem:[#allocation38_spill] sm:$0xff] %v14081_v22  ;;  %2128 = vst [vmem:[#allocation2 + $0x10] sm:$0xff] %v14081_v22  ;;  %v14091_v2 = vcombine.low %v14077_v59, %v2071_v32  ;;  %v14094_v8 = vmul.f32 %v2051_v44, %v13827_v18  ;;  %v2033_v56 = vmul.f32 0.2, %v2012_v48  ;;  %v2014_v9 = vmul.f32 %v14047_v10, %v1993_v28 }
 0x2ca   :  { %2127 = vst [vmem:[#allocation2 + $0x8] sm:$0xff] %v14086_v62  ;;  %v2073_v43 = vmul.f32 %v2052_v45, %v13839_v49  ;;  %v2053_v55 = vmax.f32 %v2011_v20, %v2032_v31  ;;  %v2034_v34 = vmul.f32 0.2, %v2013_v3  ;;  %v2015_v40 = vmul.f32 %v14047_v10, %v1994_v63 }
 0x2cb   :  { %2129 = vst [vmem:[#allocation2 + $0x18] sm:$0xff] %v14091_v2  ;;  %v2054_v21 = vmax.f32 %v2012_v48, %v2033_v56  ;;  %v2035_v50 = vmul.f32 0.2, %v2014_v9  ;;  %v2016_v41 = vmul.f32 %v14047_v10, %v1995_v12  ;;  %v2017_v57 = vmul.f32 %v14047_v10, %v1996_v33 }
 0x2cc   :  { %v14104_v30 = vcombine.low %v14094_v8, %v2073_v43  ;;  %v14107_v28 = vmul.f32 %v2053_v55, %v13846_v17  ;;  %v2055_v27 = vmax.f32 %v2013_v3, %v2034_v34  ;;  %v2036_v4 = vmul.f32 0.2, %v2015_v40 }
 0x2cd   :  { %v2075_v20 = vmul.f32 %v2054_v21, %v13852_v6  ;;  %v2056_v46 = vmax.f32 %v2014_v9, %v2035_v50  ;;  %v2037_v63 = vmul.f32 0.2, %v2016_v41  ;;  %v19376_v39 = vsub.f32 %v13944_v13, %v14010_v61 }
 0x2ce   :  { %19374 = vst [vmem:[#allocation39_spill] sm:$0xff] %v14104_v30  ;;  %19375 = vst [vmem:[#allocation40_spill] sm:$0xff] %v14107_v28  ;;  %v2160_v12 = vld [vmem:[#allocation2 + $0x58] sm:$0xf]  ;;  %v14116_v33 = vmul.f32 %v2055_v27, %v13867_v51  ;;  %v2057_v7 = vmax.f32 %v2015_v40, %v2036_v4  ;;  %v2038_v26 = vmul.f32 0.2, %v2017_v57  ;;  %v19378_v32 = vsub.f32 %v13956_v54, %v14010_v61 }
 0x2cf   :  { %v2018_v15 = vmul.f32 %v14047_v10, %v19376_v39  ;;  %2130 = vst [vmem:[#allocation2 + $0x20] sm:$0xff] %v14104_v30  ;;  %2421 = vrot.lane.b32.xlu1 %v2160_v12, %s13088_s25  ;;  %2367 = vrot.lane.b32.xlu0 %v2160_v12, %s13089_s26  ;;  %v14125_v13 = vcombine.low %v14107_v28, %v2075_v20  ;;  %vm6036_vm0 = vcmask 769024  }
 0x2d0   :  { %19377 = vst [vmem:[#allocation41_spill] sm:$0xff] %v14116_v33  ;;  %v2019_v44 = vmul.f32 %v14047_v10, %v19378_v32  ;;  %v2077_v48 = vmul.f32 %v2056_v46, %v13878_v0  ;;  %v2058_v45 = vmax.f32 %v2016_v41, %v2037_v63  ;;  %v14129_v3 = vmul.f32 %v2057_v7, %v13886_v11 }
 0x2d1   :  { %19379 = vst [vmem:[#allocation42_spill] sm:$0xff] %v14125_v13  ;;  %v2039_v31 = vmul.f32 0.2, %v2018_v15  ;;  %v2059_v56 = vmax.f32 %v2017_v57, %v2038_v26  ;;  %v19381_v54 = vsub.f32 %v13966_v60, %v14010_v61  ;;  %2131 = vst [vmem:[#allocation2 + $0x28] sm:$0xff] %v14125_v13  ;;  %v19382_v21 = vsub.f32 %v13981_v58, %v14010_v61 }
 0x2d2   :  { %19380 = vst [vmem:[#allocation43_spill] sm:$0xff] %v14129_v3  ;;  %v2040_v43 = vmul.f32 0.2, %v2019_v44  ;;  %v14137_v55 = vcombine.low %v14116_v33, %v2077_v48  ;;  %v2079_v34 = vmul.f32 %v2058_v45, %v13896_v52  ;;  %v19383_v27 = vsub.f32 %v13985_v5, %v14010_v61  ;;  %v2150_v48 = vld [vmem:[#allocation2 + $0xc] sm:$0xff] }
 0x2d3   :  { %v2020_v9 = vmul.f32 %v14047_v10, %v19381_v54  ;;  %v2060_v40 = vmax.f32 %v2018_v15, %v2039_v31  ;;  %v2021_v50 = vmul.f32 %v14047_v10, %v19382_v21  ;;  %v2080_v41 = vmul.f32 %v2059_v56, %v13911_v47  ;;  %2177 = vrot.lane.b32.xlu0 %v14081_v22, %s13087_s16  ;;  %v2151_v31 = vld [vmem:[#allocation2 + $0x14] sm:$0xff] }
 0x2d4   :  { %v2061_v60 = vmax.f32 %v2019_v44, %v2040_v43  ;;  %v2022_v4 = vmul.f32 %v14047_v10, %v19383_v27  ;;  %2175 = vrot.lane.b32.xlu1 %v14086_v62, %s13087_s16  ;;  %2132 = vst [vmem:[#allocation2 + $0x30] sm:$0xff] %v14137_v55  ;;  %v14155_v58 = vcombine.low %v14129_v3, %v2079_v34  ;;  %v2149_v44 = vld [vmem:[#allocation2 + $0x4] sm:$0xff] }
 0x2d5   :  { %v2041_v57 = vmul.f32 0.2, %v2020_v9  ;;  %v2081_v20 = vmul.f32 %v2060_v40, %v13915_v42  ;;  %v2042_v46 = vmul.f32 0.2, %v2021_v50 }
 0x2d6   :  { %v2082_v39 = vmul.f32 %v2061_v60, %v13937_v1  ;;  %v2043_v5 = vmul.f32 0.2, %v2022_v4  ;;  %2133 = vst [vmem:[#allocation2 + $0x38] sm:$0xff] %v14155_v58  ;;  %v2152_v56 = vld [vmem:[#allocation2 + $0x1c] sm:$0xff] }
 0x2d7   :  { %v2062_v63 = vmax.f32 %v2020_v9, %v2041_v57  ;;  %v14160_v61 = vcombine.low %v2080_v41, %v2081_v20  ;;  %v2063_v10 = vmax.f32 %v2021_v50, %v2042_v46  ;;  %2229 = vrot.lane.b32.xlu0 %v14086_v62, %s13086_s15 }
 0x2d8   :  { %v2064_v12 = vmax.f32 %v2022_v4, %v2043_v5  ;;  %2231 = vrot.lane.b32.xlu1 %v14081_v22, %s13086_s15  ;;  %v2153_v54 = vld [vmem:[#allocation2 + $0x24] sm:$0xff] }
 0x2d9   :  { %v2083_v15 = vmul.f32 %v2062_v63, %v13940_v35  ;;  %2134 = vst [vmem:[#allocation2 + $0x40] sm:$0xff] %v14160_v61  ;;  %v14169_v7 = vmul.f32 %v2063_v10, %v13959_v29 }
 0x2da   :  { %v2085_v32 = vmul.f32 %v2064_v12, %v13962_v36 }
 0x2db   :  { %v14171_v26 = vcombine.low %v2082_v39, %v2083_v15  ;;  %2292 = vrot.lane.b32.xlu0 %v2149_v44, %s13086_s15  ;;  %v2154_v9 = vld [vmem:[#allocation2 + $0x2c] sm:$0xff] }
 0x2dc   :  { %v14176_v45 = vcombine.low %v14169_v7, %v2085_v32  ;;  %2294 = vrot.lane.b32.xlu1 %v2150_v48, %s13086_s15 }
 0x2dd   :  { %2135 = vst [vmem:[#allocation2 + $0x48] sm:$0xff] %v14171_v26  ;;  %v2155_v43 = vld [vmem:[#allocation2 + $0x34] sm:$0xff] }
 0x2de   :  { %2136 = vst [vmem:[#allocation2 + $0x50] sm:$0xff] %v14176_v45 }
 0x2df   :  { %2296 = vrot.lane.b32.xlu0 %v2151_v31, %s13086_s15 }
 0x2e0   :  { %2347 = vrot.lane.b32.xlu1 %v14086_v62, %s13089_s26  ;;  %v2156_v34 = vld [vmem:[#allocation2 + $0x3c] sm:$0xff] }
 0x2e3   :  { %2349 = vrot.lane.b32.xlu0 %v14081_v22, %s13089_s26 }
 0x2e4   :  { %2401 = vrot.lane.b32.xlu1 %v14086_v62, %s13088_s25  ;;  %v14260_v21 = vld [vmem:[#allocation2 + $0x44] sm:$0xff] }
 0x2e5   :  { %v2158_v46 = vld [vmem:[#allocation2 + $0x4c] sm:$0xff]  ;;  %v2159_v42 = vld [vmem:[#allocation2 + $0x54] sm:$0xff] }
 0x2e7   :  { %2403 = vrot.lane.b32.xlu0 %v14081_v22, %s13088_s25 }
 0x2e8   :  { %2456 = vrot.lane.b32.xlu1 %v2150_v48, %s13088_s25 }
 0x2eb   :  { %2458 = vrot.lane.b32.xlu0 %v2151_v31, %s13088_s25 }
 0x2ec   :  { %2510 = vrot.lane.b32.xlu1 %v2150_v48, %s13090_s29 }
 0x2ef   :  { %2512 = vrot.lane.b32.xlu0 %v2151_v31, %s13090_s29 }
 0x2f0   :  { %2179 = vrot.lane.b32.xlu1 %v14091_v2, %s13087_s16 }
 0x2f3   :  { %2233 = vrot.lane.b32.xlu0 %v14091_v2, %s13086_s15 }
 0x2f4   :  { %2298 = vrot.lane.b32.xlu1 %v2152_v56, %s13086_s15 }
 0x2f7   :  { %2351 = vrot.lane.b32.xlu0 %v14091_v2, %s13089_s26 }
 0x2f8   :  { %2405 = vrot.lane.b32.xlu1 %v14091_v2, %s13088_s25 }
 0x2fb   :  { %2460 = vrot.lane.b32.xlu0 %v2152_v56, %s13088_s25 }
 0x2fc   :  { %2514 = vrot.lane.b32.xlu1 %v2152_v56, %s13090_s29 }
 0x2ff   :  { %2181 = vrot.lane.b32.xlu0 %v14104_v30, %s13087_s16 }
 0x300   :  { %2235 = vrot.lane.b32.xlu1 %v14104_v30, %s13086_s15 }
 0x303   :  { %2300 = vrot.lane.b32.xlu0 %v2153_v54, %s13086_s15 }
 0x304   :  { %2564 = vrot.lane.b32.xlu1 %v2150_v48, %s13091_s12 }
 0x307   :  { %2566 = vrot.lane.b32.xlu0 %v2151_v31, %s13091_s12 }
 0x308   :  { %2353 = vrot.lane.b32.xlu1 %v14104_v30, %s13089_s26 }
 0x30b   :  { %2407 = vrot.lane.b32.xlu0 %v14104_v30, %s13088_s25 }
 0x30c   :  { %2462 = vrot.lane.b32.xlu1 %v2153_v54, %s13088_s25 }
 0x30f   :  { %2516 = vrot.lane.b32.xlu0 %v2153_v54, %s13090_s29 }
 0x310   :  { %2183 = vrot.lane.b32.xlu1 %v14125_v13, %s13087_s16 }
 0x313   :  { %2237 = vrot.lane.b32.xlu0 %v14125_v13, %s13086_s15 }
 0x314   :  { %2302 = vrot.lane.b32.xlu1 %v2154_v9, %s13086_s15 }
 0x317   :  { %2568 = vrot.lane.b32.xlu0 %v2152_v56, %s13091_s12 }
 0x318   :  { %2355 = vrot.lane.b32.xlu1 %v14125_v13, %s13089_s26 }
 0x31b   :  { %2409 = vrot.lane.b32.xlu0 %v14125_v13, %s13088_s25 }
 0x31c   :  { %2464 = vrot.lane.b32.xlu1 %v2154_v9, %s13088_s25 }
 0x31f   :  { %2518 = vrot.lane.b32.xlu0 %v2154_v9, %s13090_s29 }
 0x320   :  { %2185 = vrot.lane.b32.xlu1 %v14137_v55, %s13087_s16 }
 0x323   :  { %2239 = vrot.lane.b32.xlu0 %v14137_v55, %s13086_s15 }
 0x324   :  { %2304 = vrot.lane.b32.xlu1 %v2155_v43, %s13086_s15 }
 0x327   :  { %2570 = vrot.lane.b32.xlu0 %v2153_v54, %s13091_s12 }
 0x328   :  { %2357 = vrot.lane.b32.xlu1 %v14137_v55, %s13089_s26 }
 0x32b   :  { %2411 = vrot.lane.b32.xlu0 %v14137_v55, %s13088_s25 }
 0x32c   :  { %2466 = vrot.lane.b32.xlu1 %v2155_v43, %s13088_s25 }
 0x32f   :  { %2520 = vrot.lane.b32.xlu0 %v2155_v43, %s13090_s29 }
 0x330   :  { %2187 = vrot.lane.b32.xlu1 %v14155_v58, %s13087_s16 }
 0x333   :  { %2241 = vrot.lane.b32.xlu0 %v14155_v58, %s13086_s15 }
 0x334   :  { %2306 = vrot.lane.b32.xlu1 %v2156_v34, %s13086_s15 }
 0x337   :  { %2572 = vrot.lane.b32.xlu0 %v2154_v9, %s13091_s12 }
 0x338   :  { %2359 = vrot.lane.b32.xlu1 %v14155_v58, %s13089_s26 }
 0x33b   :  { %2413 = vrot.lane.b32.xlu0 %v14155_v58, %s13088_s25 }
 0x33c   :  { %2468 = vrot.lane.b32.xlu1 %v2156_v34, %s13088_s25 }
 0x33f   :  { %2522 = vrot.lane.b32.xlu0 %v2156_v34, %s13090_s29 }
 0x340   :  { %2189 = vrot.lane.b32.xlu1 %v14160_v61, %s13087_s16 }
 0x341   :  { %v14256_v55 = vpop.permute.xlu1 %2421  ;;  %v14258_v40 = vpop.permute.xlu0 %2367 }
 0x342   :  { %19384 = vst [vmem:[#allocation44_spill] sm:$0xff] %v14256_v55  ;;  %19385 = vst [vmem:[#allocation45_spill] sm:$0xff] %v14258_v40 }
 0x343   :  { %2243 = vrot.lane.b32.xlu0 %v14160_v61, %s13086_s15 }
 0x344   :  { %2308 = vrot.lane.b32.xlu1 %v14260_v21, %s13086_s15 }
 0x345   :  { %v14266_v50 = vpop.permute.xlu0 %2177 }
 0x346   :  { %v14268_v41 = vpop.permute.xlu1 %2175 }
 0x347   :  { %2574 = vrot.lane.b32.xlu0 %v2155_v43, %s13091_s12 }
 0x348   :  { %2361 = vrot.lane.b32.xlu1 %v14160_v61, %s13089_s26 }
 0x349   :  { %v14273_v57 = vpop.permute.xlu0 %2229 }
 0x34a   :  { %v14275_v60 = vpop.permute.xlu1 %2231 }
 0x34b   :  { %2415 = vrot.lane.b32.xlu0 %v14160_v61, %s13088_s25 }
 0x34c   :  { %2470 = vrot.lane.b32.xlu1 %v14260_v21, %s13088_s25 }
 0x34d   :  { %v14281_v27 = vpop.permute.xlu0 %2292 }
 0x34e   :  { %v14283_v4 = vpop.permute.xlu1 %2294 }
 0x34f   :  { %2524 = vrot.lane.b32.xlu0 %v14260_v21, %s13090_s29 }
 0x350   :  { %2191 = vrot.lane.b32.xlu1 %v14171_v26, %s13087_s16 }
 0x351   :  { %v14289_v58 = vpop.permute.xlu0 %2296 }
 0x352   :  { %v2348_v20 = vpop.permute.xlu1 %2347 }
 0x353   :  { %2245 = vrot.lane.b32.xlu0 %v14171_v26, %s13086_s15  ;;  %v2369_v63 = vrot.slane %v2348_v20, 4 }
 0x354   :  { %2310 = vrot.lane.b32.xlu1 %v2158_v46, %s13086_s15 }
 0x355   :  { %v14294_v39 = vpop.permute.xlu0 %2349  ;;  %v14301_v15 = vsel %vm140_vm2, %v2369_v63, %v2348_v20 }
 0x356   :  { %v2402_v5 = vpop.permute.xlu1 %2401  ;;  %v19139_v61 = vrot.slane %v14294_v39, 4 }
 0x357   :  { %v2423_v10 = vrot.slane %v2402_v5, 4  ;;  %2576 = vrot.lane.b32.xlu0 %v2156_v34, %s13091_s12 }
 0x358   :  { %2363 = vrot.lane.b32.xlu1 %v14171_v26, %s13089_s26  ;;  %v2381_v31 = vsel %vm1868_vm7, %v2369_v63, %v19139_v61 }
 0x359   :  { %v14304_v12 = vsel %vm156_vm1, %v2423_v10, %v2402_v5  ;;  %v14308_v44 = vpop.permute.xlu0 %2403  ;;  %v14322_v43 = vsel %vm140_vm2, %v2381_v31, %v14294_v39 }
 0x35a   :  { %v2665_v32 = vcombine.high %v14301_v15, %v14304_v12  ;;  %v2457_v48 = vpop.permute.xlu1 %2456  ;;  %v19140_v56 = vrot.slane %v14308_v44, 4  ;;  %19386 = vst [vmem:[#allocation46_spill] sm:$0xff] %v14322_v43 }
 0x35b   :  { %2417 = vrot.lane.b32.xlu0 %v14171_v26, %s13088_s25  ;;  %v2478_v9 = vrot.slane %v2457_v48, 4 }
 0x35c   :  { %2472 = vrot.lane.b32.xlu1 %v2158_v46, %s13088_s25  ;;  %v2435_v54 = vsel %vm1868_vm7, %v2423_v10, %v19140_v56 }
 0x35d   :  { %v14326_v34 = vsel %vm156_vm1, %v2435_v54, %v14308_v44  ;;  %v14328_v20 = vpop.permute.xlu0 %2458  ;;  %v2489_v54 = vsel %vm156_vm1, %v2478_v9, %v2457_v48 }
 0x35e   :  { %19387 = vst [vmem:[#allocation47_spill] sm:$0xff] %v14326_v34  ;;  %v2511_v63 = vpop.permute.xlu1 %2510  ;;  %v2666_v5 = vcombine.low %v14322_v43, %v14326_v34  ;;  %v19153_v10 = vrot.slane %v14328_v20, 4 }
 0x35f   :  { %v2532_v56 = vrot.slane %v2511_v63, 4  ;;  %2526 = vrot.lane.b32.xlu0 %v2158_v46, %s13090_s29 }
 0x360   :  { %2193 = vrot.lane.b32.xlu1 %v14176_v45, %s13087_s16  ;;  %v14338_v31 = vpack.i.bf16 %v2666_v5, %v2665_v32  ;;  %v2490_v61 = vsel %vm1868_vm7, %v2478_v9, %v19153_v10 }
 0x361   :  { %v2543_v14 = vsel %vm188_vm5, %v2532_v56, %v2511_v63  ;;  %v14342_v29 = vpop.permute.xlu0 %2512  ;;  %v14358_v48 = vsel %vm156_vm1, %v2490_v61, %v14328_v20 }
 0x362   :  { %v2687_v36 = vcombine.high %v2489_v54, %v2543_v14  ;;  %v14344_v35 = vpop.permute.xlu1 %2179  ;;  %v19156_v1 = vrot.slane %v14342_v29, 4  ;;  %v2686_v17 = vcombine.low %v2489_v54, %v2543_v14 }
 0x363   :  { %2247 = vrot.lane.b32.xlu0 %v14176_v45, %s13086_s15 }
 0x364   :  { %2312 = vrot.lane.b32.xlu1 %v2159_v42, %s13086_s15  ;;  %v2544_v32 = vsel %vm1868_vm7, %v2532_v56, %v19156_v1 }
 0x365   :  { %v14362_v63 = vsel %vm188_vm5, %v2544_v32, %v14342_v29  ;;  %v14364_v9 = vpop.permute.xlu0 %2233 }
 0x366   :  { %v14366_v5 = vpop.permute.xlu1 %2298  ;;  %v2688_v10 = vcombine.low %v14358_v48, %v14362_v63 }
 0x367   :  { %2578 = vrot.lane.b32.xlu0 %v14260_v21, %s13091_s12 }
 0x368   :  { %2365 = vrot.lane.b32.xlu1 %v14176_v45, %s13089_s26  ;;  %v14376_v61 = vpack.i.bf16 %v2688_v10, %v2687_v36  ;;  %s13103_s26 = smov 94  }
 0x369   :  { %v14378_v56 = vpop.permute.xlu0 %2351 }
 0x36a   :  { %19388 = vst [vmem:[#allocation48_spill] sm:$0xff] %v14376_v61  ;;  %v14380_v32 = vpop.permute.xlu1 %2405 }
 0x36b   :  { %2419 = vrot.lane.b32.xlu0 %v14176_v45, %s13088_s25 }
 0x36c   :  { %2474 = vrot.lane.b32.xlu1 %v2159_v42, %s13088_s25 }
 0x36d   :  { %v14385_v1 = vpop.permute.xlu0 %2460 }
 0x36e   :  { %v14387_v47 = vpop.permute.xlu1 %2514 }
 0x36f   :  { %2528 = vrot.lane.b32.xlu0 %v2159_v42, %s13090_s29 }
 0x370   :  { %2580 = vrot.lane.b32.xlu1 %v2158_v46, %s13091_s12 }
 0x371   :  { %v14391_v21 = vpop.permute.xlu0 %2181 }
 0x372   :  { %v14393_v36 = vpop.permute.xlu1 %2235 }
 0x373   :  { %2582 = vrot.lane.b32.xlu0 %v2159_v42, %s13091_s12 }
 0x375   :  { %v14396_v10 = vpop.permute.xlu0 %2300 }
 0x376   :  { %v2565_v52 = vpop.permute.xlu1 %2564 }
 0x377   :  { %v2586_v11 = vrot.slane %v2565_v52, 4 }
 0x379   :  { %v14399_v0 = vsel %vm203_vm6, %v2586_v11, %v2565_v52  ;;  %v2567_v51 = vpop.permute.xlu0 %2566  ;;  %v2664_v52 = vcombine.low %v14301_v15, %v14304_v12 }
 0x37a   :  { %2895 = vrot.lane.b32.xlu0 %v14399_v0, %s13093_s0  ;;  %v14403_v6 = vpop.permute.xlu1 %2353  ;;  %v2587_v46 = vrot.slane %v2567_v51, 4 }
 0x37b   :  { %v11531_v38 = vpack.i.bf16 %v2686_v17, %v2664_v52 }
 0x37c   :  { %v2598_v49 = vsel %vm1868_vm7, %v2586_v11, %v2587_v46 }
 0x37d   :  { %v14406_v18 = vpop.permute.xlu0 %2407  ;;  %v14411_v23 = vsel %vm203_vm6, %v2598_v49, %v2567_v51 }
 0x37e   :  { %v14408_v42 = vpop.permute.xlu1 %2462  ;;  %19390 = vst [vmem:[#allocation50_spill] sm:$0xff] %v14411_v23  ;;  %2899 = vrot.lane.b32.xlu1 %v14411_v23, %s13093_s0 }
 0x37f   :  { %19389 = vst [vmem:[#allocation49_spill] sm:$0xff] %v14408_v42  ;;  %v19237_v42 = vrot.slane %v14344_v35, 4 }
 0x381   :  { %v14417_v19 = vpop.permute.xlu0 %2516 }
 0x382   :  { %19391 = vst [vmem:[#allocation51_spill] sm:$0xff] %v14417_v19  ;;  %v14419_v37 = vpop.permute.xlu1 %2183  ;;  %11532 = vrot.lane.b32.xlu1 %v11531_v38, %s13093_s0 }
 0x385   :  { %v14422_v11 = vpop.permute.xlu0 %2237 }
 0x386   :  { %19392 = vst [vmem:[#allocation52_spill] sm:$0xff] %v14422_v11  ;;  %v14424_v14 = vpop.permute.xlu1 %2302 }
 0x387   :  { %19393 = vst [vmem:[#allocation53_spill] sm:$0xff] %v14424_v14 }
 0x389   :  { %v2569_v54 = vpop.permute.xlu0 %2568 }
 0x38a   :  { %v14426_v49 = vpop.permute.xlu1 %2355  ;;  %v2588_v51 = vrot.slane %v2569_v54, 4 }
 0x38c   :  { %v2600_v15 = vsel %vm1868_vm7, %v2587_v46, %v2588_v51 }
 0x38d   :  { %v14429_v12 = vpop.permute.xlu0 %2409  ;;  %v14434_v17 = vsel %vm203_vm6, %v2600_v15, %v2569_v54 }
 0x38e   :  { %v14431_v16 = vpop.permute.xlu1 %2464  ;;  %19395 = vst [vmem:[#allocation55_spill] sm:$0xff] %v14434_v17  ;;  %2903 = vrot.lane.b32.xlu0 %v14434_v17, %s13093_s0 }
 0x38f   :  { %19394 = vst [vmem:[#allocation54_spill] sm:$0xff] %v14431_v16 }
 0x391   :  { %v14438_v38 = vpop.permute.xlu0 %2518 }
 0x392   :  { %19396 = vst [vmem:[#allocation56_spill] sm:$0xff] %v14438_v38  ;;  %v14440_v52 = vpop.permute.xlu1 %2185  ;;  %v2197_v38 = vrot.slane %v14266_v50, 4 }
 0x395   :  { %v14442_v25 = vpop.permute.xlu0 %2239 }
 0x396   :  { %19397 = vst [vmem:[#allocation57_spill] sm:$0xff] %v14442_v25  ;;  %v14444_v40 = vpop.permute.xlu1 %2304 }
 0x397   :  { %19398 = vst [vmem:[#allocation58_spill] sm:$0xff] %v14444_v40 }
 0x399   :  { %v2571_v55 = vpop.permute.xlu0 %2570 }
 0x39a   :  { %v14446_v46 = vpop.permute.xlu1 %2357  ;;  %v2589_v3 = vrot.slane %v2571_v55, 4 }
 0x39b   :  { %19399 = vst [vmem:[#allocation59_spill] sm:$0xff] %v14446_v46 }
 0x39c   :  { %v2602_v13 = vsel %vm1868_vm7, %v2588_v51, %v2589_v3 }
 0x39d   :  { %v14449_v33 = vpop.permute.xlu0 %2411  ;;  %v14454_v15 = vsel %vm203_vm6, %v2602_v13, %v2571_v55 }
 0x39e   :  { %19400 = vst [vmem:[#allocation60_spill] sm:$0xff] %v14449_v33  ;;  %v14451_v54 = vpop.permute.xlu1 %2466  ;;  %19402 = vst [vmem:[#allocation62_spill] sm:$0xff] %v14454_v15  ;;  %2907 = vrot.lane.b32.xlu0 %v14454_v15, %s13093_s0  ;;  %v19426_v33 = vld [vmem:[#allocation32_spill] sm:$0xff] }
 0x39f   :  { %19401 = vst [vmem:[#allocation61_spill] sm:$0xff] %v14451_v54 }
 0x3a1   :  { %v14458_v17 = vpop.permute.xlu0 %2520 }
 0x3a2   :  { %19403 = vst [vmem:[#allocation63_spill] sm:$0xff] %v14458_v17  ;;  %v14460_v25 = vpop.permute.xlu1 %2187 }
 0x3a3   :  { %19404 = vst [vmem:[#allocation64_spill] sm:$0xff] %v14460_v25 }
 0x3a5   :  { %v14462_v40 = vpop.permute.xlu0 %2241 }
 0x3a6   :  { %19405 = vst [vmem:[#allocation65_spill] sm:$0xff] %v14462_v40  ;;  %v14464_v30 = vpop.permute.xlu1 %2306 }
 0x3a7   :  { %19406 = vst [vmem:[#allocation66_spill] sm:$0xff] %v14464_v30 }
 0x3a9   :  { %v2573_v16 = vpop.permute.xlu0 %2572 }
 0x3aa   :  { %v14466_v51 = vpop.permute.xlu1 %2359  ;;  %v2590_v28 = vrot.slane %v2573_v16, 4 }
 0x3ab   :  { %19407 = vst [vmem:[#allocation67_spill] sm:$0xff] %v14466_v51 }
 0x3ac   :  { %v2604_v54 = vsel %vm1868_vm7, %v2589_v3, %v2590_v28 }
 0x3ad   :  { %v14469_v46 = vpop.permute.xlu0 %2413  ;;  %v14474_v55 = vsel %vm203_vm6, %v2604_v54, %v2573_v16 }
 0x3ae   :  { %19408 = vst [vmem:[#allocation68_spill] sm:$0xff] %v14469_v46  ;;  %v14471_v13 = vpop.permute.xlu1 %2468  ;;  %19410 = vst [vmem:[#allocation70_spill] sm:$0xff] %v14474_v55  ;;  %2911 = vrot.lane.b32.xlu0 %v14474_v55, %s13093_s0 }
 0x3af   :  { %19409 = vst [vmem:[#allocation69_spill] sm:$0xff] %v14471_v13 }
 0x3b1   :  { %v14478_v15 = vpop.permute.xlu0 %2522 }
 0x3b2   :  { %19411 = vst [vmem:[#allocation71_spill] sm:$0xff] %v14478_v15  ;;  %v14480_v40 = vpop.permute.xlu1 %2189 }
 0x3b3   :  { %19412 = vst [vmem:[#allocation72_spill] sm:$0xff] %v14480_v40 }
 0x3b5   :  { %v14482_v30 = vpop.permute.xlu0 %2243 }
 0x3b6   :  { %19413 = vst [vmem:[#allocation73_spill] sm:$0xff] %v14482_v30  ;;  %v14484_v51 = vpop.permute.xlu1 %2308 }
 0x3b7   :  { %19414 = vst [vmem:[#allocation74_spill] sm:$0xff] %v14484_v51 }
 0x3b9   :  { %v2575_v17 = vpop.permute.xlu0 %2574 }
 0x3ba   :  { %v14486_v3 = vpop.permute.xlu1 %2361  ;;  %v2591_v46 = vrot.slane %v2575_v17, 4 }
 0x3bb   :  { %19415 = vst [vmem:[#allocation75_spill] sm:$0xff] %v14486_v3 }
 0x3bc   :  { %v2606_v13 = vsel %vm1868_vm7, %v2590_v28, %v2591_v46 }
 0x3bd   :  { %v14489_v25 = vpop.permute.xlu0 %2415  ;;  %v14494_v54 = vsel %vm203_vm6, %v2606_v13, %v2575_v17 }
 0x3be   :  { %19416 = vst [vmem:[#allocation76_spill] sm:$0xff] %v14489_v25  ;;  %v14491_v16 = vpop.permute.xlu1 %2470  ;;  %19418 = vst [vmem:[#allocation78_spill] sm:$0xff] %v14494_v54  ;;  %2915 = vrot.lane.b32.xlu0 %v14494_v54, %s13093_s0  ;;  %v19230_v54 = vrot.slane %v14289_v58, 4 }
 0x3bf   :  { %19417 = vst [vmem:[#allocation77_spill] sm:$0xff] %v14491_v16 }
 0x3c1   :  { %v14498_v55 = vpop.permute.xlu0 %2524 }
 0x3c2   :  { %19419 = vst [vmem:[#allocation79_spill] sm:$0xff] %v14498_v55  ;;  %v14500_v30 = vpop.permute.xlu1 %2191  ;;  %v2250_v55 = vrot.slane %v14273_v57, 4 }
 0x3c3   :  { %19420 = vst [vmem:[#allocation80_spill] sm:$0xff] %v14500_v30 }
 0x3c5   :  { %v14502_v51 = vpop.permute.xlu0 %2245 }
 0x3c6   :  { %v14504_v3 = vpop.permute.xlu1 %2310 }
 0x3c9   :  { %v2577_v15 = vpop.permute.xlu0 %2576 }
 0x3ca   :  { %v14506_v28 = vpop.permute.xlu1 %2363  ;;  %v2592_v25 = vrot.slane %v2577_v15, 4 }
 0x3cb   :  { %19421 = vst [vmem:[#allocation81_spill] sm:$0xff] %v14506_v28 }
 0x3cc   :  { %v2608_v16 = vsel %vm1868_vm7, %v2591_v46, %v2592_v25  ;;  %v2315_v46 = vrot.slane %v14283_v4, 4 }
 0x3cd   :  { %v14509_v40 = vpop.permute.xlu0 %2417  ;;  %v14514_v13 = vsel %vm203_vm6, %v2608_v16, %v2577_v15  ;;  %v2249_v15 = vrot.slane %v19426_v33, 4  ;;  %v2314_v16 = vrot.slane %v14281_v27, 4 }
 0x3ce   :  { %19422 = vst [vmem:[#allocation82_spill] sm:$0xff] %v14509_v40  ;;  %v14511_v17 = vpop.permute.xlu1 %2472  ;;  %19424 = vst [vmem:[#allocation84_spill] sm:$0xff] %v14514_v13  ;;  %2919 = vrot.lane.b32.xlu0 %v14514_v13, %s13093_s0  ;;  %v19231_v40 = vrot.slane %v14500_v30, 4  ;;  %v2327_v13 = vsel %vm1868_vm7, %v2315_v46, %v19230_v54  ;;  %v19427_v54 = vrot.slane %v14275_v60, 4 }
 0x3cf   :  { %19423 = vst [vmem:[#allocation83_spill] sm:$0xff] %v14511_v17  ;;  %v2260_v43 = vsel %vm1868_vm7, %v2249_v15, %v2250_v55  ;;  %v2325_v15 = vsel %vm1868_vm7, %v2314_v16, %v2315_v46 }
 0x3d0   :  { %v2262_v61 = vsel %vm1868_vm7, %v2250_v55, %v19427_v54 }
 0x3d1   :  { %v14520_v22 = vpop.permute.xlu0 %2526 }
 0x3d2   :  { %19425 = vst [vmem:[#allocation85_spill] sm:$0xff] %v14520_v22  ;;  %v2194_v28 = vpop.permute.xlu1 %2193 }
 0x3d3   :  { %v2205_v17 = vrot.slane %v2194_v28, 4 }
 0x3d5   :  { %v2224_v22 = vsel %vm1868_vm7, %v19231_v40, %v2205_v17  ;;  %v2226_v34 = vsel %vm91_vm3, %v2194_v28, %v2205_v17  ;;  %v2248_v23 = vpop.permute.xlu0 %2247  ;;  %v19235_v40 = vrot.slane %v14502_v51, 4 }
 0x3d6   :  { %v14538_v59 = vsel %vm91_vm3, %v14500_v30, %v2224_v22  ;;  %v13078_v14 = vcombine.low %v14169_v7, %v2226_v34  ;;  %v2313_v11 = vpop.permute.xlu1 %2312  ;;  %v2259_v17 = vrot.slane %v2248_v23, 4  ;;  %v14550_v22 = vsel %vm106_vm4, %v14283_v4, %v2327_v13 }
 0x3d7   :  { %v2639_v28 = vcombine.high %v14171_v26, %v14538_v59  ;;  %v19236_v7 = vrot.slane %v14504_v3, 4  ;;  %v2324_v30 = vrot.slane %v2313_v11, 4  ;;  %v2641_v54 = vcombine.high %v14176_v45, %v2226_v34 }
 0x3d8   :  { %v2278_v55 = vsel %vm1868_vm7, %v19235_v40, %v2259_v17  ;;  %v2280_v26 = vsel %vm106_vm4, %v2248_v23, %v2259_v17  ;;  %v14577_v34 = vsel %vm106_vm4, %v14273_v57, %v2262_v61  ;;  %v14593_v57 = vsel %vm106_vm4, %v19426_v33, %v2260_v43  ;;  %v19429_v43 = vld [vmem:[#allocation33_spill] sm:$0xff] }
 0x3d9   :  { %v14554_v19 = vpack.i.bf16 %v13078_v14, %v2639_v28  ;;  %v14563_v46 = vsel %vm106_vm4, %v14502_v51, %v2278_v55  ;;  %v2345_v4 = vsel %vm106_vm4, %v2313_v11, %v2324_v30  ;;  %v2343_v13 = vsel %vm1868_vm7, %v19236_v7, %v2324_v30  ;;  %v2579_v14 = vpop.permute.xlu0 %2578 }
 0x3da   :  { %v14569_v16 = vpop.permute.xlu1 %2365  ;;  %v2663_v28 = vcombine.high %v2280_v26, %v2345_v4  ;;  %v14573_v40 = vsel %vm106_vm4, %v14504_v3, %v2343_v13  ;;  %v2662_v23 = vcombine.low %v2280_v26, %v2345_v4  ;;  %v2593_v45 = vrot.slane %v2579_v14, 4 }
 0x3db   :  { %v14581_v11 = vsel %vm106_vm4, %v14281_v27, %v2325_v15  ;;  %v2661_v30 = vcombine.high %v14563_v46, %v14573_v40  ;;  %v2196_v55 = vrot.slane %v14268_v41, 4  ;;  %v2644_v4 = vcombine.low %v14577_v34, %v14550_v22 }
 0x3dc   :  { %v11536_v13 = vpack.i.bf16 %v2663_v28, %v2641_v54  ;;  %v2610_v26 = vsel %vm1868_vm7, %v2592_v25, %v2593_v45  ;;  %v2210_v54 = vsel %vm1868_vm7, %v2197_v38, %v19237_v42  ;;  %v19241_v25 = vrot.slane %v14385_v1, 4 }
 0x3dd   :  { %v14595_v27 = vpack.i.bf16 %v2662_v23, %v2661_v30  ;;  %v14600_v15 = vsel %vm203_vm6, %v2610_v26, %v2579_v14  ;;  %v2643_v33 = vcombine.high %v14593_v57, %v14581_v11  ;;  %v2195_v23 = vrot.slane %v19429_v43, 4 }
 0x3de   :  { %v14597_v61 = vpop.permute.xlu1 %2474  ;;  %19428 = vst [vmem:[#allocation32_spill] sm:$0xff] %v14600_v15  ;;  %11537 = vrot.lane.b32.xlu1 %v11536_v13, %s13093_s0  ;;  %2923 = vrot.lane.b32.xlu0 %v14600_v15, %s13093_s0  ;;  %v2208_v14 = vsel %vm1868_vm7, %v2196_v55, %v2197_v38  ;;  %v14617_v17 = vsel %vm91_vm3, %v14266_v50, %v2210_v54  ;;  %v2252_v13 = vrot.slane %v14364_v9, 4  ;;  %v19431_v42 = vrot.slane %v14328_v20, 4 }
 0x3df   :  { %v11546_v30 = vpack.i.bf16 %v2644_v4, %v2643_v33  ;;  %v2206_v26 = vsel %vm1868_vm7, %v2195_v23, %v2196_v55  ;;  %v19432_v15 = vrot.slane %v14387_v47, 4  ;;  %v19433_v38 = vrot.slane %v14342_v29, 4 }
 0x3e0   :  { %v2492_v28 = vsel %vm1868_vm7, %v19431_v42, %v19241_v25  ;;  %v19240_v4 = vrot.slane %v14396_v10, 4  ;;  %v2209_v50 = vsel %vm91_vm3, %v14268_v41, %v2208_v14  ;;  %v2317_v54 = vrot.slane %v14366_v5, 4 }
 0x3e1   :  { %v2546_v55 = vsel %vm1868_vm7, %v19433_v38, %v19432_v15  ;;  %v19243_v20 = vrot.slane %v14393_v36, 4  ;;  %v13079_v42 = vcombine.low %v14069_v24, %v14617_v17  ;;  %v2207_v29 = vsel %vm91_vm3, %v19429_v43, %v2206_v26 }
 0x3e2   :  { %v14619_v7 = vpop.permute.xlu1 %2580  ;;  %11547 = vrot.lane.b32.xlu1 %v11546_v30, %s13093_s0  ;;  %v14645_v15 = vsel %vm156_vm1, %v2492_v28, %v14385_v1  ;;  %v14649_v23 = vsel %vm188_vm5, %v2546_v55, %v14387_v47  ;;  %v2623_v14 = vcombine.high %v14086_v62, %v2209_v50  ;;  %v19434_v30 = vrot.slane %v14275_v60, 4 }
 0x3e3   :  { %19430 = vst [vmem:[#allocation33_spill] sm:$0xff] %v14619_v7  ;;  %v19239_v33 = vrot.slane %v14619_v7, 4  ;;  %v2331_v43 = vsel %vm1868_vm7, %v2317_v54, %v19240_v4  ;;  %v2426_v28 = vrot.slane %v14406_v18, 4  ;;  %v19435_v26 = vrot.slane %v14289_v58, 4 }
 0x3e4   :  { %v2264_v24 = vsel %vm1868_vm7, %v19434_v30, %v2252_v13  ;;  %v2425_v62 = vrot.slane %v14380_v32, 4  ;;  %v2690_v30 = vcombine.low %v14645_v15, %v14649_v23  ;;  %v14687_v25 = vsel %vm106_vm4, %v14366_v5, %v2331_v43 }
 0x3e5   :  { %v2612_v41 = vsel %vm1868_vm7, %v2593_v45, %v19239_v33  ;;  %v2329_v38 = vsel %vm1868_vm7, %v19435_v26, %v2317_v54  ;;  %v2371_v45 = vrot.slane %v14378_v56, 4  ;;  %v2266_v33 = vsel %vm1868_vm7, %v2252_v13, %v19243_v20  ;;  %v14681_v26 = vld [vmem:[#allocation2] sm:$0xff] }
 0x3e6   :  { %11557 = vrot.lane.b32.xlu1 %v14338_v31, %s13093_s0  ;;  %v14671_v55 = vsel %vm203_vm6, %v2612_v41, %v14619_v7  ;;  %v2372_v31 = vrot.slane %v14403_v6, 4  ;;  %v11566_v54 = vpack.i.bf16 %v13079_v42, %v2623_v14  ;;  %v2621_v4 = vcombine.high %v14681_v26, %v2207_v29 }
 0x3e7   :  { %2927 = vrot.lane.b32.xlu0 %v14671_v55, %s13093_s0  ;;  %v13080_v41 = vcombine.low %v14073_v53, %v2209_v50  ;;  %v2265_v7 = vsel %vm106_vm4, %v14275_v60, %v2264_v24  ;;  %v2708_v13 = vcombine.high %v14399_v0, %v14399_v0  ;;  %v2439_v20 = vsel %vm1868_vm7, %v2425_v62, %v2426_v28 }
 0x3e8   :  { %v2200_v42 = vrot.slane %v14419_v37, 4  ;;  %v2330_v14 = vsel %vm106_vm4, %v14289_v58, %v2329_v38  ;;  %v19436_v53 = vrot.slane %v14294_v39, 4  ;;  %v19437_v50 = vrot.slane %v14308_v44, 4 }
 0x3e9   :  { %v14706_v0 = vsel %vm106_vm4, %v14364_v9, %v2266_v33  ;;  %v19438_v24 = vcombine.high %v14358_v48, %v14362_v63  ;;  %v2385_v58 = vsel %vm1868_vm7, %v2371_v45, %v2372_v31  ;;  %v2440_v44 = vsel %vm156_vm1, %v2439_v20, %v14406_v18 }
 0x3ea   :  { %11567 = vrot.lane.b32.xlu1 %v11566_v54, %s13093_s0  ;;  %v2383_v5 = vsel %vm1868_vm7, %v19436_v53, %v2371_v45  ;;  %v2437_v60 = vsel %vm1868_vm7, %v19437_v50, %v2425_v62  ;;  %v2199_v54 = vrot.slane %v14391_v21, 4  ;;  %v2648_v39 = vcombine.low %v14706_v0, %v14687_v25 }
 0x3eb   :  { %v11581_v43 = vpack.i.bf16 %v2690_v30, %v19438_v24  ;;  %2897 = vrot.lane.b32.xlu0 %v2708_v13, %s13093_s0  ;;  %v11541_v38 = vpack.i.bf16 %v13080_v41, %v2621_v4  ;;  %v2647_v33 = vcombine.high %v2265_v7, %v2330_v14  ;;  %v2642_v48 = vcombine.low %v14593_v57, %v14581_v11  ;;  %v19440_v24 = vld [vmem:[#allocation51_spill] sm:$0xff] }
 0x3ec   :  { %v2214_v9 = vsel %vm1868_vm7, %v2199_v54, %v2200_v42  ;;  %v2384_v63 = vsel %vm140_vm2, %v2383_v5, %v14378_v56  ;;  %v2438_v45 = vsel %vm156_vm1, %v2437_v60, %v14380_v32  ;;  %v2386_v62 = vsel %vm140_vm2, %v2385_v58, %v14403_v6 }
 0x3ed   :  { %v19439_v18 = vrot.slane %v14344_v35, 4  ;;  %v2670_v20 = vcombine.low %v2386_v62, %v2440_v44  ;;  %v11591_v30 = vpack.i.bf16 %v2648_v39, %v2647_v33  ;;  %v2620_v41 = vcombine.low %v14681_v26, %v2207_v29  ;;  %v19442_v39 = vld [vmem:[#allocation48_spill] sm:$0xff] }
 0x3ee   :  { %11582 = vrot.lane.b32.xlu1 %v11581_v43, %s13093_s0  ;;  %v14735_v11 = vsel %vm91_vm3, %v14391_v21, %v2214_v9  ;;  %v2669_v56 = vcombine.high %v2384_v63, %v2438_v45  ;;  %v2427_v32 = vrot.slane %v14429_v12, 4  ;;  %v2373_v53 = vrot.slane %v14426_v49, 4  ;;  %v19444_v33 = vld [vmem:[#allocation52_spill] sm:$0xff] }
 0x3ef   :  { %v2212_v4 = vsel %vm1868_vm7, %v19439_v18, %v2199_v54  ;;  %11542 = vrot.lane.b32.xlu0 %v11541_v38, %s13093_s0  ;;  %v11551_v6 = vpack.i.bf16 %v2642_v48, %v2620_v41  ;;  %v13081_v29 = vcombine.low %v14094_v8, %v14735_v11  ;;  %v2201_v5 = vrot.slane %v14440_v52, 4 }
 0x3f0   :  { %v2213_v57 = vsel %vm91_vm3, %v14344_v35, %v2212_v4  ;;  %v11596_v13 = vpack.i.bf16 %v2670_v20, %v2669_v56  ;;  %v2441_v21 = vsel %vm1868_vm7, %v2426_v28, %v2427_v32  ;;  %v2646_v60 = vcombine.low %v2265_v7, %v2330_v14  ;;  %v19441_v35 = vld [vmem:[#allocation49_spill] sm:$0xff] }
 0x3f1   :  { %v2627_v50 = vcombine.high %v14091_v2, %v2213_v57  ;;  %v2535_v43 = vrot.slane %v19440_v24, 4  ;;  %v2481_v54 = vrot.slane %v19441_v35, 4  ;;  %v2387_v58 = vsel %vm1868_vm7, %v2372_v31, %v2373_v53 }
 0x3f2   :  { %11592 = vrot.lane.b32.xlu1 %v11591_v30, %s13093_s0  ;;  %v2645_v8 = vcombine.high %v14577_v34, %v14550_v22  ;;  %v14758_v28 = vsel %vm156_vm1, %v2441_v21, %v14429_v12  ;;  %v2668_v9 = vcombine.low %v2384_v63, %v2438_v45  ;;  %v2216_v2 = vsel %vm1868_vm7, %v2200_v42, %v2201_v5  ;;  %v19446_v34 = vld [vmem:[#allocation50_spill] sm:$0xff]  ;;  %v19447_v63 = vld [vmem:[#allocation53_spill] sm:$0xff] }
 0x3f3   :  { %11552 = vrot.lane.b32.xlu0 %v11551_v6, %s13093_s0  ;;  %v11606_v38 = vpack.i.bf16 %v13081_v29, %v2627_v50  ;;  %v19443_v14 = vrot.slane %v14387_v47, 4  ;;  %v2254_v48 = vrot.slane %v19444_v33, 4  ;;  %v14768_v18 = vsel %vm140_vm2, %v2387_v58, %v14426_v49  ;;  %v19448_v49 = vld [vmem:[#allocation37_spill] sm:$0xff]  ;;  %v19449_v30 = vld [vmem:[#allocation46_spill] sm:$0xff]  ;;  %v19452_v29 = vld [vmem:[#allocation60_spill] sm:$0xff] }
 0x3f4   :  { %v11571_v7 = vpack.i.bf16 %v2646_v60, %v2645_v8  ;;  %v19445_v22 = vrot.slane %v14385_v1, 4  ;;  %v2709_v42 = vcombine.high %v19446_v34, %v19446_v34  ;;  %v2319_v45 = vrot.slane %v19447_v63, 4  ;;  %v19450_v1 = vld [vmem:[#allocation47_spill] sm:$0xff]  ;;  %v19454_v60 = vld [vmem:[#allocation56_spill] sm:$0xff] }
 0x3f5   :  { %v2548_v31 = vsel %vm1868_vm7, %v19443_v14, %v2535_v43  ;;  %v2672_v47 = vcombine.low %v14768_v18, %v14758_v28  ;;  %v14781_v4 = vsel %vm91_vm3, %v14419_v37, %v2216_v2  ;;  %v13082_v20 = vcombine.low %v19448_v49, %v2213_v57  ;;  %v19457_v8 = vld [vmem:[#allocation59_spill] sm:$0xff] }
 0x3f6   :  { %11597 = vrot.lane.b32.xlu1 %v11596_v13, %s13093_s0  ;;  %v2494_v12 = vsel %vm1868_vm7, %v19445_v22, %v2481_v54  ;;  %v19451_v41 = vcombine.high %v19449_v30, %v19450_v1  ;;  %v2671_v6 = vcombine.high %v2386_v62, %v2440_v44  ;;  %v14789_v13 = vsel %vm188_vm5, %v2548_v31, %v19440_v24  ;;  %v19459_v31 = vld [vmem:[#allocation54_spill] sm:$0xff]  ;;  %v19462_v1 = vld [vmem:[#allocation57_spill] sm:$0xff] }
 0x3f7   :  { %11562 = vrot.lane.b32.xlu0 %v19442_v39, %s13093_s0  ;;  %v2428_v21 = vrot.slane %v19452_v29, 4  ;;  %v2495_v50 = vsel %vm156_vm1, %v2494_v12, %v19441_v35  ;;  %v19453_v37 = vrot.slane %v14393_v36, 4  ;;  %v2536_v58 = vrot.slane %v19454_v60, 4  ;;  %v19455_v39 = vld [vmem:[#allocation38_spill] sm:$0xff]  ;;  %v19458_v35 = vld [vmem:[#allocation40_spill] sm:$0xff] }
 0x3f8   :  { %v11576_v56 = vpack.i.bf16 %v2668_v9, %v19451_v41  ;;  %v2625_v44 = vcombine.high %v19455_v39, %v14617_v17  ;;  %v19456_v62 = vrot.slane %v14396_v10, 4  ;;  %v2374_v9 = vrot.slane %v19457_v8, 4  ;;  %v19460_v17 = vld [vmem:[#allocation64_spill] sm:$0xff] }
 0x3f9   :  { %v2268_v57 = vsel %vm1868_vm7, %v19453_v37, %v2254_v48  ;;  %v13083_v2 = vcombine.low %v19458_v35, %v14781_v4  ;;  %v2482_v22 = vrot.slane %v19459_v31, 4  ;;  %v2443_v12 = vsel %vm1868_vm7, %v2427_v32, %v2428_v21 }
 0x3fa   :  { %11607 = vrot.lane.b32.xlu1 %v11606_v38, %s13093_s0  ;;  %v2333_v24 = vsel %vm1868_vm7, %v19456_v62, %v2319_v45  ;;  %v11616_v38 = vpack.i.bf16 %v2672_v47, %v2671_v6  ;;  %v11586_v14 = vpack.i.bf16 %v13082_v20, %v2625_v44  ;;  %v2202_v34 = vrot.slane %v19460_v17, 4 }
 0x3fb   :  { %11572 = vrot.lane.b32.xlu0 %v11571_v7, %s13093_s0  ;;  %v2692_v7 = vcombine.low %v2495_v50, %v14789_v13  ;;  %v2691_v49 = vcombine.high %v14645_v15, %v14649_v23  ;;  %v14819_v30 = vsel %vm106_vm4, %v14393_v36, %v2268_v57  ;;  %v14823_v20 = vsel %vm106_vm4, %v14396_v10, %v2333_v24  ;;  %v19465_v24 = vld [vmem:[#allocation63_spill] sm:$0xff] }
 0x3fc   :  { %v2550_v32 = vsel %vm1868_vm7, %v2535_v43, %v2536_v58  ;;  %v2255_v41 = vrot.slane %v19462_v1, 4  ;;  %v2389_v37 = vsel %vm1868_vm7, %v2373_v53, %v2374_v9  ;;  %v14832_v15 = vsel %vm156_vm1, %v2443_v12, %v19452_v29  ;;  %v19464_v53 = vld [vmem:[#allocation55_spill] sm:$0xff] }
 0x3fd   :  { %v11601_v36 = vpack.i.bf16 %v2692_v7, %v2691_v49  ;;  %v2496_v23 = vsel %vm1868_vm7, %v2481_v54, %v2482_v22  ;;  %v2218_v10 = vsel %vm1868_vm7, %v2201_v5, %v2202_v34  ;;  %v2650_v43 = vcombine.low %v14819_v30, %v14823_v20  ;;  %v19469_v12 = vld [vmem:[#allocation67_spill] sm:$0xff] }
 0x3fe   :  { %2901 = vrot.lane.b32.xlu1 %v2709_v42, %s13093_s0  ;;  %v19461_v42 = vld [vmem:[#allocation39_spill] sm:$0xff]  ;;  %v2710_v57 = vcombine.high %v19464_v53, %v19464_v53  ;;  %v2551_v39 = vsel %vm188_vm5, %v2550_v32, %v19454_v60  ;;  %v14847_v29 = vsel %vm140_vm2, %v2389_v37, %v19457_v8  ;;  %v2649_v54 = vcombine.high %v14706_v0, %v14687_v25  ;;  %v19466_v25 = vld [vmem:[#allocation68_spill] sm:$0xff]  ;;  %v19471_v32 = vld [vmem:[#allocation41_spill] sm:$0xff] }
 0x3ff   :  { %11577 = vrot.lane.b32.xlu0 %v11576_v56, %s13093_s0  ;;  %v2629_v47 = vcombine.high %v19461_v42, %v14735_v11  ;;  %v19463_v56 = vld [vmem:[#allocation58_spill] sm:$0xff]  ;;  %v2270_v5 = vsel %vm1868_vm7, %v2254_v48, %v2255_v41  ;;  %v2674_v62 = vcombine.low %v14847_v29, %v14832_v15  ;;  %v2693_v60 = vcombine.high %v2495_v50, %v14789_v13 }
 0x400   :  { %v2320_v6 = vrot.slane %v19463_v56, 4  ;;  %v2497_v8 = vsel %vm156_vm1, %v2496_v23, %v19459_v31  ;;  %v14862_v35 = vsel %vm91_vm3, %v14440_v52, %v2218_v10  ;;  %v2429_v0 = vrot.slane %v19466_v25, 4  ;;  %v19468_v52 = vld [vmem:[#allocation65_spill] sm:$0xff] }
 0x401   :  { %v11626_v11 = vpack.i.bf16 %v13083_v2, %v2629_v47  ;;  %v2673_v48 = vcombine.high %v14768_v18, %v14758_v28  ;;  %v19467_v2 = vld [vmem:[#allocation61_spill] sm:$0xff]  ;;  %v14871_v13 = vsel %vm106_vm4, %v19444_v33, %v2270_v5  ;;  %v2256_v31 = vrot.slane %v19468_v52, 4  ;;  %v19470_v18 = vld [vmem:[#allocation66_spill] sm:$0xff]  ;;  %v19474_v5 = vld [vmem:[#allocation71_spill] sm:$0xff] }
 0x402   :  { %11617 = vrot.lane.b32.xlu1 %v11616_v38, %s13093_s0  ;;  %v2335_v44 = vsel %vm1868_vm7, %v2319_v45, %v2320_v6  ;;  %v2537_v38 = vrot.slane %v19465_v24, 4  ;;  %v2694_v45 = vcombine.low %v2497_v8, %v2551_v39  ;;  %v2483_v7 = vrot.slane %v19467_v2, 4 }
 0x403   :  { %11587 = vrot.lane.b32.xlu0 %v11586_v14, %s13093_s0  ;;  %v11611_v14 = vpack.i.bf16 %v2650_v43, %v2649_v54  ;;  %v14875_v50 = vsel %vm106_vm4, %v19447_v63, %v2335_v44  ;;  %v2375_v42 = vrot.slane %v19469_v12, 4  ;;  %v11636_v47 = vpack.i.bf16 %v2674_v62, %v2673_v48  ;;  %v19472_v63 = vld [vmem:[#allocation72_spill] sm:$0xff] }
 0x404   :  { %v2552_v28 = vsel %vm1868_vm7, %v2536_v58, %v2537_v38  ;;  %v2321_v49 = vrot.slane %v19470_v18, 4  ;;  %v13084_v37 = vcombine.low %v19471_v32, %v14862_v35  ;;  %v2445_v33 = vsel %vm1868_vm7, %v2428_v21, %v2429_v0  ;;  %v19473_v58 = vld [vmem:[#allocation42_spill] sm:$0xff] }
 0x405   :  { %v2498_v23 = vsel %vm1868_vm7, %v2482_v22, %v2483_v7  ;;  %v2631_v10 = vcombine.high %v19473_v58, %v14781_v4  ;;  %v2652_v43 = vcombine.low %v14871_v13, %v14875_v50  ;;  %v2553_v53 = vsel %vm188_vm5, %v2552_v28, %v19465_v24  ;;  %v19477_v28 = vld [vmem:[#allocation73_spill] sm:$0xff] }
 0x406   :  { %11627 = vrot.lane.b32.xlu1 %v11626_v11, %s13093_s0  ;;  %v2203_v11 = vrot.slane %v19472_v63, 4  ;;  %v2391_v21 = vsel %vm1868_vm7, %v2374_v9, %v2375_v42  ;;  %v2651_v22 = vcombine.high %v14819_v30, %v14823_v20  ;;  %v2337_v54 = vsel %vm1868_vm7, %v2320_v6, %v2321_v49  ;;  %v19475_v6 = vld [vmem:[#allocation69_spill] sm:$0xff] }
 0x407   :  { %11602 = vrot.lane.b32.xlu0 %v11601_v36, %s13093_s0  ;;  %v11621_v36 = vpack.i.bf16 %v2694_v45, %v2693_v60  ;;  %v14905_v4 = vsel %vm156_vm1, %v2445_v33, %v19466_v25  ;;  %v2538_v44 = vrot.slane %v19474_v5, 4  ;;  %v11646_v62 = vpack.i.bf16 %v13084_v37, %v2631_v10  ;;  %v19478_v37 = vld [vmem:[#allocation74_spill] sm:$0xff] }
 0x408   :  { %v2695_v24 = vcombine.high %v2497_v8, %v2551_v39  ;;  %v2220_v9 = vsel %vm1868_vm7, %v2202_v34, %v2203_v11  ;;  %v14918_v20 = vsel %vm140_vm2, %v2391_v21, %v19469_v12  ;;  %v2484_v60 = vrot.slane %v19475_v6, 4  ;;  %v19476_v39 = vld [vmem:[#allocation62_spill] sm:$0xff] }
 0x409   :  { %v11631_v48 = vpack.i.bf16 %v2652_v43, %v2651_v22  ;;  %v2711_v8 = vcombine.high %v19476_v39, %v19476_v39  ;;  %v2676_v34 = vcombine.low %v14918_v20, %v14905_v4  ;;  %v2257_v32 = vrot.slane %v19477_v28, 4 }
 0x40a   :  { %2905 = vrot.lane.b32.xlu1 %v2710_v57, %s13093_s0  ;;  %v2272_v57 = vsel %vm1868_vm7, %v2255_v41, %v2256_v31  ;;  %v2499_v41 = vsel %vm156_vm1, %v2498_v23, %v19467_v2  ;;  %v2338_v2 = vsel %vm106_vm4, %v19463_v56, %v2337_v54  ;;  %v2322_v33 = vrot.slane %v19478_v37, 4  ;;  %v19479_v23 = vld [vmem:[#allocation76_spill] sm:$0xff]  ;;  %v19482_v54 = vld [vmem:[#allocation79_spill] sm:$0xff] }
 0x40b   :  { %11612 = vrot.lane.b32.xlu0 %v11611_v14, %s13093_s0  ;;  %v2696_v30 = vcombine.low %v2499_v41, %v2553_v53  ;;  %v2273_v45 = vsel %vm106_vm4, %v19462_v1, %v2272_v57  ;;  %v2554_v14 = vsel %vm1868_vm7, %v2537_v38, %v2538_v44  ;;  %v2675_v1 = vcombine.high %v14847_v29, %v14832_v15  ;;  %v19480_v57 = vld [vmem:[#allocation43_spill] sm:$0xff] }
 0x40c   :  { %v2500_v56 = vsel %vm1868_vm7, %v2483_v7, %v2484_v60  ;;  %v2430_v58 = vrot.slane %v19479_v23, 4  ;;  %v2654_v38 = vcombine.low %v2273_v45, %v2338_v2  ;;  %v2653_v43 = vcombine.high %v14871_v13, %v14875_v50  ;;  %v19481_v7 = vld [vmem:[#allocation75_spill] sm:$0xff] }
 0x40d   :  { %v11656_v10 = vpack.i.bf16 %v2676_v34, %v2675_v1  ;;  %v2274_v15 = vsel %vm1868_vm7, %v2256_v31, %v2257_v32  ;;  %v2339_v29 = vsel %vm1868_vm7, %v2321_v49, %v2322_v33  ;;  %v2376_v22 = vrot.slane %v19481_v7, 4  ;;  %v19483_v31 = vld [vmem:[#allocation77_spill] sm:$0xff] }
 0x40e   :  { %11637 = vrot.lane.b32.xlu1 %v11636_v47, %s13093_s0  ;;  %v14933_v47 = vsel %vm91_vm3, %v19460_v17, %v2220_v9  ;;  %v2555_v17 = vsel %vm188_vm5, %v2554_v14, %v19474_v5  ;;  %v13046_v5 = vld [vmem:[#allocation2 + $0x30] sm:$0xff]  ;;  %v2447_v50 = vsel %vm1868_vm7, %v2429_v0, %v2430_v58  ;;  %v2485_v49 = vrot.slane %v19483_v31, 4 }
 0x40f   :  { %11622 = vrot.lane.b32.xlu0 %v11621_v36, %s13093_s0  ;;  %v11641_v36 = vpack.i.bf16 %v2696_v30, %v2695_v24  ;;  %v13085_v21 = vcombine.low %v19480_v57, %v14933_v47  ;;  %v2501_v24 = vsel %vm156_vm1, %v2500_v56, %v19475_v6  ;;  %v2633_v9 = vcombine.high %v13046_v5, %v14862_v35  ;;  %v19484_v14 = vld [vmem:[#allocation80_spill] sm:$0xff]  ;;  %v19489_v57 = vld [vmem:[#allocation85_spill] sm:$0xff] }
 0x410   :  { %v2698_v13 = vcombine.low %v2501_v24, %v2555_v17  ;;  %v11651_v30 = vpack.i.bf16 %v2654_v38, %v2653_v43  ;;  %v2340_v6 = vsel %vm106_vm4, %v19470_v18, %v2339_v29  ;;  %v2697_v39 = vcombine.high %v2499_v41, %v2553_v53  ;;  %v19486_v18 = vld [vmem:[#allocation70_spill] sm:$0xff] }
 0x411   :  { %v2393_v35 = vsel %vm1868_vm7, %v2375_v42, %v2376_v22  ;;  %v11666_v0 = vpack.i.bf16 %v13085_v21, %v2633_v9  ;;  %v19485_v1 = vrot.slane %v19484_v14, 4  ;;  %v2712_v53 = vcombine.high %v19486_v18, %v19486_v18  ;;  %v19492_v9 = vld [vmem:[#allocation81_spill] sm:$0xff] }
 0x412   :  { %11647 = vrot.lane.b32.xlu1 %v11646_v62, %s13093_s0  ;;  %v2539_v62 = vrot.slane %v19482_v54, 4  ;;  %v11661_v34 = vpack.i.bf16 %v2698_v13, %v2697_v39  ;;  %v19487_v38 = vrot.slane %v14502_v51, 4  ;;  %v2540_v21 = vrot.slane %v19489_v57, 4  ;;  %v13048_v39 = vld [vmem:[#allocation2 + $0x38] sm:$0xff] }
 0x413   :  { %11632 = vrot.lane.b32.xlu0 %v11631_v48, %s13093_s0  ;;  %v2275_v48 = vsel %vm106_vm4, %v19468_v52, %v2274_v15  ;;  %v2502_v52 = vsel %vm1868_vm7, %v2484_v60, %v2485_v49  ;;  %v2222_v12 = vsel %vm1868_vm7, %v2203_v11, %v19485_v1  ;;  %v2655_v60 = vcombine.high %v2273_v45, %v2338_v2  ;;  %v19493_v1 = vld [vmem:[#allocation78_spill] sm:$0xff] }
 0x414   :  { %v2556_v25 = vsel %vm1868_vm7, %v2538_v44, %v2539_v62  ;;  %v2656_v42 = vcombine.low %v2275_v48, %v2340_v6  ;;  %v2394_v44 = vsel %vm140_vm2, %v2393_v35, %v19481_v7  ;;  %v2276_v11 = vsel %vm1868_vm7, %v2257_v32, %v19487_v38  ;;  %v19490_v32 = vld [vmem:[#allocation82_spill] sm:$0xff] }
 0x415   :  { %v2557_v41 = vsel %vm188_vm5, %v2556_v25, %v19482_v54  ;;  %v2677_v15 = vcombine.high %v14918_v20, %v14905_v4  ;;  %v2503_v45 = vsel %vm156_vm1, %v2502_v52, %v19483_v31  ;;  %v15007_v2 = vsel %vm91_vm3, %v19472_v63, %v2222_v12 }
 0x416   :  { %2909 = vrot.lane.b32.xlu1 %v2711_v8, %s13093_s0  ;;  %v14975_v8 = vsel %vm156_vm1, %v2447_v50, %v19479_v23  ;;  %v2700_v51 = vcombine.low %v2503_v45, %v2557_v41  ;;  %v2431_v29 = vrot.slane %v19490_v32, 4  ;;  %v2699_v54 = vcombine.high %v2501_v24, %v2555_v17  ;;  %v13047_v50 = vld [vmem:[#allocation2 + $0x40] sm:$0xff] }
 0x417   :  { %11642 = vrot.lane.b32.xlu0 %v11641_v36, %s13093_s0  ;;  %v14990_v36 = vpop.permute.xlu0 %2419  ;;  %v2678_v56 = vcombine.low %v2394_v44, %v14975_v8  ;;  %v2277_v5 = vsel %vm106_vm4, %v19477_v28, %v2276_v11  ;;  %v2377_v13 = vrot.slane %v19492_v9, 4  ;;  %v2558_v63 = vsel %vm1868_vm7, %v2539_v62, %v2540_v21 }
 0x418   :  { %v2636_v31 = vcombine.low %v13047_v50, %v15007_v2  ;;  %v2635_v17 = vcombine.high %v13048_v39, %v14933_v47  ;;  %v11681_v24 = vpack.i.bf16 %v2700_v51, %v2699_v54  ;;  %v2449_v28 = vsel %vm1868_vm7, %v2430_v58, %v2431_v29  ;;  %v19498_v39 = vld [vmem:[#allocation44_spill] sm:$0xff] }
 0x419   :  { %v11676_v20 = vpack.i.bf16 %v2678_v56, %v2677_v15  ;;  %v2559_v62 = vsel %vm188_vm5, %v2558_v63, %v19489_v57  ;;  %v2395_v25 = vsel %vm1868_vm7, %v2376_v22, %v2377_v13  ;;  %v2657_v47 = vcombine.high %v2275_v48, %v2340_v6 }
 0x41a   :  { %11657 = vrot.lane.b32.xlu1 %v11656_v10, %s13093_s0  ;;  %v19488_v10 = vrot.slane %v14504_v3, 4  ;;  %v19491_v3 = vld [vmem:[#allocation83_spill] sm:$0xff]  ;;  %v2450_v23 = vsel %vm156_vm1, %v2449_v28, %v19490_v32  ;;  %v2487_v52 = vrot.slane %v14597_v61, 4  ;;  %v2396_v22 = vsel %vm140_vm2, %v2395_v25, %v19492_v9 }
 0x41b   :  { %11652 = vrot.lane.b32.xlu0 %v11651_v30, %s13093_s0  ;;  %v2486_v7 = vrot.slane %v19491_v3, 4  ;;  %v2529_v30 = vpop.permute.xlu0 %2528  ;;  %v2713_v12 = vcombine.high %v19493_v1, %v19493_v1  ;;  %v2680_v48 = vcombine.low %v2396_v22, %v2450_v23  ;;  %v2679_v18 = vcombine.high %v2394_v44, %v14975_v8 }
 0x41c   :  { %v2341_v43 = vsel %vm1868_vm7, %v2322_v33, %v19488_v10  ;;  %v11671_v33 = vpack.i.bf16 %v2656_v42, %v2655_v60  ;;  %v2701_v42 = vcombine.high %v2503_v45, %v2557_v41  ;;  %v2432_v60 = vrot.slane %v14990_v36, 4 }
 0x41d   :  { %v2342_v4 = vsel %vm106_vm4, %v19478_v37, %v2341_v43  ;;  %v2504_v37 = vsel %vm1868_vm7, %v2485_v49, %v2486_v7  ;;  %v2506_v56 = vsel %vm1868_vm7, %v2486_v7, %v2487_v52  ;;  %v11696_v11 = vpack.i.bf16 %v2680_v48, %v2679_v18  ;;  %v13049_v43 = vld [vmem:[#allocation2 + $0x48] sm:$0xff] }
 0x41e   :  { %11667 = vrot.lane.b32.xlu1 %v11666_v0, %s13093_s0  ;;  %v2658_v35 = vcombine.low %v2277_v5, %v2342_v4  ;;  %v2541_v0 = vrot.slane %v2529_v30, 4  ;;  %v2505_v58 = vsel %vm156_vm1, %v2504_v37, %v19491_v3  ;;  %v2378_v10 = vrot.slane %v14569_v16, 4  ;;  %v19496_v7 = vld [vmem:[#allocation35_spill] sm:$0xff] }
 0x41f   :  { %11662 = vrot.lane.b32.xlu0 %v11661_v34, %s13093_s0  ;;  %v11686_v34 = vpack.i.bf16 %v2636_v31, %v2635_v17  ;;  %v2702_v49 = vcombine.low %v2505_v58, %v2559_v62  ;;  %v2659_v41 = vcombine.high %v2277_v5, %v2342_v4  ;;  %v2638_v57 = vcombine.low %v13049_v43, %v14538_v59 }
 0x420   :  { %v11691_v14 = vpack.i.bf16 %v2658_v35, %v2657_v47  ;;  %v2560_v6 = vsel %vm1868_vm7, %v2540_v21, %v2541_v0  ;;  %v19494_v21 = vld [vmem:[#allocation34_spill] sm:$0xff]  ;;  %v2507_v44 = vsel %vm156_vm1, %v2506_v56, %v14597_v61  ;;  %v2451_v15 = vsel %vm1868_vm7, %v2431_v29, %v2432_v60 }
 0x421   :  { %v2561_v38 = vsel %vm188_vm5, %v2560_v6, %v2529_v30  ;;  %v2542_v8 = vrot.slane %v19494_v21, 4  ;;  %v19495_v51 = vcombine.low %v14563_v46, %v14573_v40  ;;  %v2637_v3 = vcombine.high %v13047_v50, %v15007_v2  ;;  %v19497_v2 = vld [vmem:[#allocation84_spill] sm:$0xff]  ;;  %v2583_v30 = vpop.permute.xlu0 %2582 }
 0x422   :  { %2913 = vrot.lane.b32.xlu1 %v2712_v53, %s13093_s0  ;;  %v11701_v53 = vpack.i.bf16 %v2702_v49, %v2701_v42  ;;  %v2704_v45 = vcombine.low %v2507_v44, %v2561_v38  ;;  %v2703_v54 = vcombine.high %v2505_v58, %v2559_v62  ;;  %v2397_v59 = vsel %vm1868_vm7, %v2377_v13, %v2378_v10  ;;  %v19500_v58 = vld [vmem:[#allocation32_spill] sm:$0xff]  ;;  %v15101_v42 = vpop.permute.xlu1 %2899 }
 0x423   :  { %11672 = vrot.lane.b32.xlu0 %v11671_v33, %s13093_s0  ;;  %v11711_v32 = vpack.i.bf16 %v19495_v51, %v2659_v41  ;;  %v2488_v33 = vrot.slane %v19496_v7, 4  ;;  %v2562_v5 = vsel %vm1868_vm7, %v2541_v0, %v2542_v8  ;;  %v11706_v61 = vpack.i.bf16 %v2638_v57, %v2637_v3 }
 0x424   :  { %v2452_v29 = vsel %vm156_vm1, %v2451_v15, %v14990_v36  ;;  %v2398_v40 = vsel %vm140_vm2, %v2397_v59, %v14569_v16  ;;  %v2563_v46 = vsel %vm188_vm5, %v2562_v5, %v19494_v21  ;;  %v2714_v9 = vcombine.high %v19497_v2, %v19497_v2 }
 0x425   :  { %v2508_v4 = vsel %vm1868_vm7, %v2487_v52, %v2488_v33  ;;  %v2682_v13 = vcombine.low %v2398_v40, %v2452_v29  ;;  %v2681_v63 = vcombine.high %v2396_v22, %v2450_v23  ;;  %v2705_v50 = vcombine.high %v2507_v44, %v2561_v38  ;;  %v15082_v62 = vpop.permute.xlu0 %2895 }
 0x426   :  { %11677 = vrot.lane.b32.xlu1 %v11676_v20, %s13093_s0  ;;  %v11721_v20 = vpack.i.bf16 %v2704_v45, %v2703_v54  ;;  %v2509_v36 = vsel %vm156_vm1, %v2508_v4, %v19496_v7  ;;  %v2433_v16 = vrot.slane %v19498_v39, 4  ;;  %v2715_v49 = vcombine.high %v19500_v58, %v19500_v58 }
 0x427   :  { %11682 = vrot.lane.b32.xlu0 %v11681_v24, %s13093_s0  ;;  %v2706_v31 = vcombine.low %v2509_v36, %v2563_v46  ;;  %v11716_v17 = vpack.i.bf16 %v2682_v13, %v2681_v63  ;;  %v19499_v24 = vld [vmem:[#allocation45_spill] sm:$0xff]  ;;  %v2707_v47 = vcombine.high %v2509_v36, %v2563_v46  ;;  %v2683_v52 = vcombine.high %v2398_v40, %v2452_v29 }
 0x428   :  { %v2379_v28 = vrot.slane %v19499_v24, 4  ;;  %v2453_v37 = vsel %vm1868_vm7, %v2432_v60, %v2433_v16  ;;  %v2595_v22 = vrot.slane %v2583_v30, 4  ;;  %v19502_v60 = vld [vmem:[#allocation33_spill] sm:$0xff] }
 0x429   :  { %v11741_v35 = vpack.i.bf16 %v2706_v31, %v2705_v50  ;;  %v2454_v0 = vsel %vm156_vm1, %v2453_v37, %v19498_v39  ;;  %v19503_v56 = vrot.slane %v19502_v60, 4 }
 0x42a   :  { %11687 = vrot.lane.b32.xlu1 %v11686_v34, %s13093_s0  ;;  %v2399_v25 = vsel %vm1868_vm7, %v2378_v10, %v2379_v28  ;;  %v2716_v34 = vcombine.high %v14671_v55, %v14671_v55  ;;  %v11533_v10 = vpop.permute.xlu1 %11532 }
 0x42b   :  { %11692 = vrot.lane.b32.xlu0 %v11691_v14, %s13093_s0  ;;  %v2400_v23 = vsel %vm140_vm2, %v2399_v25, %v19499_v24  ;;  %v2614_v38 = vsel %vm1868_vm7, %v19503_v56, %v2595_v22  ;;  %v11534_v24 = vunpack.i.l.bf16 %v11533_v10  ;;  %vm3128_vm2 = vcmask 293888  }
 0x42c   :  { %v2684_v14 = vcombine.low %v2400_v23, %v2454_v0  ;;  %v2685_v1 = vcombine.high %v2400_v23, %v2454_v0  ;;  %v2615_v41 = vsel %vm203_vm6, %v2614_v38, %v2583_v30 }
 0x42d   :  { %v2717_v57 = vcombine.high %v2615_v41, %v2615_v41 }
 0x42e   :  { %2917 = vrot.lane.b32.xlu1 %v2713_v12, %s13093_s0  ;;  %v19501_v12 = vld [vmem:[#allocation36_spill] sm:$0xff]  ;;  %v11736_v6 = vpack.i.bf16 %v2684_v14, %v2683_v52 }
 0x42f   :  { %11702 = vrot.lane.b32.xlu0 %v11701_v53, %s13093_s0  ;;  %v2596_v55 = vrot.slane %v19501_v12, 4 }
 0x431   :  { %v2616_v18 = vsel %vm1868_vm7, %v2595_v22, %v2596_v55 }
 0x432   :  { %11697 = vrot.lane.b32.xlu1 %v11696_v11, %s13093_s0  ;;  %v2617_v11 = vsel %vm203_vm6, %v2616_v18, %v19501_v12 }
 0x433   :  { %11712 = vrot.lane.b32.xlu0 %v11711_v32, %s13093_s0  ;;  %v2718_v44 = vcombine.high %v2617_v11, %v2617_v11 }
 0x436   :  { %11707 = vrot.lane.b32.xlu1 %v11706_v61, %s13093_s0 }
 0x437   :  { %11722 = vrot.lane.b32.xlu0 %v11721_v20, %s13093_s0 }
 0x43a   :  { %2921 = vrot.lane.b32.xlu1 %v2714_v9, %s13093_s0 }
 0x43b   :  { %11732 = vrot.lane.b32.xlu0 %v14595_v27, %s13093_s0  ;;  %v15091_v27 = vpop.permute.xlu0 %2903 }
 0x43e   :  { %11717 = vrot.lane.b32.xlu1 %v11716_v17, %s13093_s0  ;;  %v11535_v17 = vunpack.i.h.bf16 %v11533_v10 }
 0x43f   :  { %11742 = vrot.lane.b32.xlu0 %v11741_v35, %s13093_s0  ;;  %v15103_v48 = vpop.permute.xlu0 %2907 }
 0x442   :  { %11727 = vrot.lane.b32.xlu1 %v14554_v19, %s13093_s0  ;;  %v11746_v19 = vpack.i.bf16 %v2707_v47, %v2685_v1 }
 0x443   :  { %2929 = vrot.lane.b32.xlu0 %v2716_v34, %s13093_s0  ;;  %v15108_v53 = vpop.permute.xlu0 %2911 }
 0x446   :  { %2925 = vrot.lane.b32.xlu1 %v2715_v49, %s13093_s0 }
 0x447   :  { %11747 = vrot.lane.b32.xlu0 %v11746_v19, %s13093_s0  ;;  %v15118_v43 = vpop.permute.xlu0 %2915 }
 0x44a   :  { %11737 = vrot.lane.b32.xlu1 %v11736_v6, %s13093_s0 }
 0x44b   :  { %2935 = vrot.lane.b32.xlu0 %v2617_v11, %s13093_s0  ;;  %v15123_v8 = vpop.permute.xlu0 %2919 }
 0x44e   :  { %2931 = vrot.lane.b32.xlu1 %v2615_v41, %s13093_s0 }
 0x450   :  { %v15121_v21 = vpop.permute.xlu1 %11537  ;;  %v15126_v45 = vpop.permute.xlu0 %2923 }
 0x452   :  { %2933 = vrot.lane.b32.xlu1 %v2717_v57, %s13093_s0 }
 0x454   :  { %v11548_v15 = vpop.permute.xlu1 %11547 }
 0x455   :  { %v11550_v54 = vunpack.i.h.bf16 %v11548_v15  ;;  %v11549_v59 = vunpack.i.l.bf16 %v11548_v15 }
 0x456   :  { %2937 = vrot.lane.b32.xlu1 %v2718_v44, %s13093_s0  ;;  %s13104_s0 = smov 62  }
 0x457   :  { %v2961_v40 = vsel %vm849_vm8, %v11549_v59, %v11550_v54 }
 0x458   :  { %v15129_v51 = vpop.permute.xlu1 %11557 }
 0x459   :  { %v15131_v32 = vpop.permute.xlu0 %2927  ;;  %v11559_v63 = vunpack.i.l.bf16 %v15129_v51  ;;  %v11560_v30 = vunpack.i.h.bf16 %v15129_v51  ;;  %v15169_v51 = vld [vmem:[%s19117_s4] sm:$0xff] }
 0x45b   :  { %v2981_v34 = vsel %vm849_vm8, %v11534_v24, %v11559_v63  ;;  %v2982_v58 = vsel %vm849_vm8, %v11559_v63, %v11560_v30 }
 0x45c   :  { %v15133_v3 = vpop.permute.xlu1 %11567 }
 0x45d   :  { %v2898_v7 = vpop.permute.xlu0 %2897  ;;  %v11570_v35 = vunpack.i.h.bf16 %v15133_v3  ;;  %v11569_v25 = vunpack.i.l.bf16 %v15133_v3 }
 0x45e   :  { %v3024_v11 = vsel %vm849_vm8, %v2898_v7, %v15101_v42  ;;  %v3023_v3 = vsel %vm849_vm8, %v15082_v62, %v2898_v7 }
 0x45f   :  { %v2942_v19 = vsel %vm849_vm8, %v11569_v25, %v11570_v35 }
 0x460   :  { %v15135_v33 = vpop.permute.xlu1 %11582 }
 0x461   :  { %v11543_v5 = vpop.permute.xlu0 %11542  ;;  %v11585_v12 = vunpack.i.h.bf16 %v15135_v33  ;;  %v11584_v6 = vunpack.i.l.bf16 %v15135_v33 }
 0x462   :  { %v11545_v61 = vunpack.i.h.bf16 %v11543_v5  ;;  %v11544_v29 = vunpack.i.l.bf16 %v11543_v5 }
 0x463   :  { %v3005_v5 = vsel %vm849_vm8, %v11584_v6, %v11585_v12 }
 0x464   :  { %v15137_v4 = vpop.permute.xlu1 %11592  ;;  %v2940_v20 = vsel %vm849_vm8, %v11544_v29, %v11545_v61  ;;  %v2941_v18 = vsel %vm849_vm8, %v11545_v61, %v11569_v25 }
 0x465   :  { %v11553_v46 = vpop.permute.xlu0 %11552  ;;  %v10637_v2 = vpack.c.bf16 %v2961_v40, %v2940_v20  ;;  %v11595_v61 = vunpack.i.h.bf16 %v15137_v4 }
 0x466   :  { %v11555_v9 = vunpack.i.h.bf16 %v11553_v46  ;;  %v11554_v13 = vunpack.i.l.bf16 %v11553_v46 }
 0x467   :  { %10638 = vmatprep.subr.bf16.mxu1 %v10637_v2 }
 0x468   :  { %v15141_v36 = vpop.permute.xlu1 %11597  ;;  %v2939_v50 = vsel %vm849_vm8, %v11554_v13, %v11544_v29  ;;  %v2960_v31 = vsel %vm849_vm8, %v11555_v9, %v11549_v59  ;;  %v11594_v29 = vunpack.i.l.bf16 %v15137_v4  ;;  %v15192_v4 = vld [vmem:[%s19117_s4 + $0x8] sm:$0xff] }
 0x469   :  { %v11563_v39 = vpop.permute.xlu0 %11562  ;;  %v10639_v16 = vpack.c.bf16 %v2960_v31, %v2939_v50  ;;  %v11600_v9 = vunpack.i.h.bf16 %v15141_v36  ;;  %v11599_v13 = vunpack.i.l.bf16 %v15141_v36 }
 0x46a   :  { %v11565_v28 = vunpack.i.h.bf16 %v11563_v39  ;;  %v11564_v37 = vunpack.i.l.bf16 %v11563_v39 }
 0x46b   :  { %10640 = vmatpush1.bf16.msra.mxu1 %v10639_v16  ;;  %v2965_v16 = vsel %vm849_vm8, %v11594_v29, %v11595_v61 }
 0x46c   :  { %v15149_v0 = vpop.permute.xlu1 %11607  ;;  %v3002_v47 = vsel %vm849_vm8, %v11535_v17, %v11564_v37  ;;  %v3003_v49 = vsel %vm849_vm8, %v11564_v37, %v11565_v28 }
 0x46d   :  { %v11573_v23 = vpop.permute.xlu0 %11572  ;;  %v10643_v52 = vpack.c.bf16 %v3002_v47, %v2981_v34  ;;  %v10641_v1 = vpack.c.bf16 %v3003_v49, %v2982_v58  ;;  %v11609_v25 = vunpack.i.l.bf16 %v15149_v0  ;;  %v2986_v47 = vsel %vm849_vm8, %v11599_v13, %v11600_v9 }
 0x46e   :  { %v11575_v14 = vunpack.i.h.bf16 %v11573_v23  ;;  %v11574_v22 = vunpack.i.l.bf16 %v11573_v23 }
 0x46f   :  { %10642 = vmatprep.subr.bf16.mxu1 %v10641_v1 }
 0x470   :  { %v2902_v55 = vpop.permute.xlu1 %2901  ;;  %v2962_v60 = vsel %vm849_vm8, %v11550_v54, %v11574_v22  ;;  %v2963_v56 = vsel %vm849_vm8, %v11574_v22, %v11575_v14  ;;  %10644 = vmatpush1.bf16.msra.mxu1 %v10643_v52  ;;  %v3004_v54 = vsel %vm849_vm8, %v11565_v28, %v11584_v6  ;;  %v2964_v50 = vsel %vm849_vm8, %v11575_v14, %v11594_v29 }
 0x471   :  { %v11578_v38 = vpop.permute.xlu0 %11577  ;;  %v10645_v10 = vpack.c.bf16 %v2963_v56, %v2942_v19  ;;  %v10647_v41 = vpack.c.bf16 %v2962_v60, %v2941_v18  ;;  %9836 = vmatprep.subr.msk.mxu1 %vm1868_vm7, %v3024_v11  ;;  %v3026_v39 = vsel %vm849_vm8, %v2902_v55, %v15091_v27  ;;  %v3025_v23 = vsel %vm849_vm8, %v15101_v42, %v2902_v55 }
 0x472   :  { %v11580_v57 = vunpack.i.h.bf16 %v11578_v38  ;;  %v11579_v44 = vunpack.i.l.bf16 %v11578_v38 }
 0x473   :  { %10646 = vmatprep.subr.bf16.mxu0 %v10645_v10 }
 0x474   :  { %v15164_v15 = vpop.permute.xlu1 %11617  ;;  %v2983_v59 = vsel %vm849_vm8, %v11560_v30, %v11579_v44  ;;  %10648 = vmatpush1.bf16.msra.mxu0 %v10647_v41  ;;  %9837 = vmatpush1.msk.msra.mxu1 %vm1868_vm7, %v3023_v3  ;;  %v2984_v40 = vsel %vm849_vm8, %v11579_v44, %v11580_v57  ;;  %v2985_v58 = vsel %vm849_vm8, %v11580_v57, %v11599_v13 }
 0x475   :  { %v11588_v20 = vpop.permute.xlu0 %11587  ;;  %v10651_v46 = vpack.c.bf16 %v3004_v54, %v2983_v59  ;;  %v10649_v2 = vpack.c.bf16 %v3005_v5, %v2984_v40  ;;  %9838 = vmatmul.mubr.msk.f32.vlgmr.msra.gmra.mrb[10].mxu1 %vm3128_vm2, %v15169_v51  ;;  %v11620_v42 = vunpack.i.h.bf16 %v15164_v15  ;;  %v11619_v33 = vunpack.i.l.bf16 %v15164_v15 }
 0x476   :  { %v11590_v62 = vunpack.i.h.bf16 %v11588_v20  ;;  %v11589_v7 = vunpack.i.l.bf16 %v11588_v20  ;;  %3247 = vmatprep.mubr.f32.mxu1 %v14681_v26 }
 0x477   :  { %10650 = vmatprep.subr.bf16.mxu0 %v10649_v2  ;;  %v2987_v44 = vsel %vm849_vm8, %v11600_v9, %v11619_v33  ;;  %v2988_v54 = vsel %vm849_vm8, %v11619_v33, %v11620_v42 }
 0x478   :  { %v15186_v63 = vpop.permute.xlu1 %11627  ;;  %v2943_v31 = vsel %vm849_vm8, %v11570_v35, %v11589_v7  ;;  %10652 = vmatpush1.bf16.msra.mxu0 %v10651_v46  ;;  %v2944_v36 = vsel %vm849_vm8, %v11589_v7, %v11590_v62  ;;  %v11610_v35 = vunpack.i.h.bf16 %v15149_v0  ;;  %v2945_v55 = vsel %vm849_vm8, %v11590_v62, %v11609_v25 }
 0x479   :  { %v11603_v30 = vpop.permute.xlu0 %11602  ;;  %v10655_v17 = vpack.c.bf16 %v2964_v50, %v2943_v31  ;;  %9840 = vmatprep.subr.msk.mxu0 %vm1868_vm7, %v3026_v39  ;;  %v10653_v37 = vpack.c.bf16 %v2965_v16, %v2944_v36  ;;  %9839 = vmatmul.mubr.msk.f32.gmra.mrb[12].mxu1 %vm3128_vm2, %v15192_v4  ;;  %v11629_v15 = vunpack.i.l.bf16 %v15186_v63  ;;  %v11630_v59 = vunpack.i.h.bf16 %v15186_v63 }
 0x47a   :  { %v11605_v24 = vunpack.i.h.bf16 %v11603_v30  ;;  %v11604_v28 = vunpack.i.l.bf16 %v11603_v30  ;;  %3395 = vmatprep.mubr.f32.mxu1 %v14681_v26  ;;  %v2946_v18 = vsel %vm849_vm8, %v11609_v25, %v11610_v35 }
 0x47b   :  { %10654 = vmatprep.subr.bf16.mxu1 %v10653_v37  ;;  %v2947_v2 = vsel %vm849_vm8, %v11610_v35, %v11629_v15  ;;  %v2948_v31 = vsel %vm849_vm8, %v11629_v15, %v11630_v59 }
 0x47c   :  { %v2906_v34 = vpop.permute.xlu1 %2905  ;;  %v3006_v49 = vsel %vm849_vm8, %v11585_v12, %v11604_v28  ;;  %v3007_v52 = vsel %vm849_vm8, %v11604_v28, %v11605_v24  ;;  %9841 = vmatpush1.msk.msra.mxu0 %vm1868_vm7, %v3025_v23  ;;  %10656 = vmatpush1.bf16.msra.mxu1 %v10655_v17 }
 0x47d   :  { %v11613_v0 = vpop.permute.xlu0 %11612  ;;  %v10657_v14 = vpack.c.bf16 %v3007_v52, %v2986_v47  ;;  %v10659_v22 = vpack.c.bf16 %v3006_v49, %v2985_v58  ;;  %9842 = vmatmul.mubr.msk.f32.vlgmr.msra.gmra.mrb[12].mxu0 %vm3128_vm2, %v15169_v51  ;;  %v3028_v38 = vsel %vm849_vm8, %v2906_v34, %v15103_v48  ;;  %v3027_v5 = vsel %vm849_vm8, %v15091_v27, %v2906_v34 }
 0x47e   :  { %v11615_v1 = vunpack.i.h.bf16 %v11613_v0  ;;  %v11614_v19 = vunpack.i.l.bf16 %v11613_v0  ;;  %3324 = vmatprep.mubr.f32.mxu0 %v14681_v26 }
 0x47f   :  { %10658 = vmatprep.subr.bf16.mxu1 %v10657_v14 }
 0x480   :  { %v15219_v12 = vpop.permute.xlu1 %11637  ;;  %v2966_v6 = vsel %vm849_vm8, %v11595_v61, %v11614_v19  ;;  %v2967_v60 = vsel %vm849_vm8, %v11614_v19, %v11615_v1  ;;  %10660 = vmatpush1.bf16.msra.mxu1 %v10659_v22 }
 0x481   :  { %v11623_v56 = vpop.permute.xlu0 %11622  ;;  %v10661_v11 = vpack.c.bf16 %v2967_v60, %v2946_v18  ;;  %v10663_v10 = vpack.c.bf16 %v2966_v6, %v2945_v55  ;;  %9844 = vmatprep.subr.msk.mxu1 %vm1868_vm7, %v3028_v38  ;;  %9843 = vmatmul.mubr.msk.f32.gmra.mrb[14].mxu0 %vm3128_vm2, %v15192_v4  ;;  %v11640_v9 = vunpack.i.h.bf16 %v15219_v12  ;;  %v11639_v27 = vunpack.i.l.bf16 %v15219_v12 }
 0x482   :  { %v11625_v41 = vunpack.i.h.bf16 %v11623_v56  ;;  %v11624_v57 = vunpack.i.l.bf16 %v11623_v56  ;;  %3472 = vmatprep.mubr.f32.mxu0 %v14681_v26 }
 0x483   :  { %10662 = vmatprep.subr.bf16.mxu0 %v10661_v11  ;;  %v2989_v28 = vsel %vm849_vm8, %v11620_v42, %v11639_v27  ;;  %v2990_v25 = vsel %vm849_vm8, %v11639_v27, %v11640_v9 }
 0x484   :  { %v15233_v3 = vpop.permute.xlu1 %11647  ;;  %v3008_v61 = vsel %vm849_vm8, %v11605_v24, %v11624_v57  ;;  %10664 = vmatpush1.bf16.msra.mxu0 %v10663_v10  ;;  %v3009_v29 = vsel %vm849_vm8, %v11624_v57, %v11625_v41  ;;  %9845 = vmatpush1.msk.msra.mxu1 %vm1868_vm7, %v3027_v5 }
 0x485   :  { %v11633_v20 = vpop.permute.xlu0 %11632  ;;  %v10665_v40 = vpack.c.bf16 %v3009_v29, %v2988_v54  ;;  %v10667_v46 = vpack.c.bf16 %v3008_v61, %v2987_v44  ;;  %9846 = vmatmul.mubr.msk.f32.vlgmr.msra.gmra.mrb[14].mxu1 %vm3128_vm2, %v15169_v51  ;;  %v11650_v34 = vunpack.i.h.bf16 %v15233_v3  ;;  %v11649_v47 = vunpack.i.l.bf16 %v15233_v3 }
 0x486   :  { %v11635_v62 = vunpack.i.h.bf16 %v11633_v20  ;;  %v11634_v7 = vunpack.i.l.bf16 %v11633_v20  ;;  %3401 = vmatprep.mubr.f32.mxu1 %v14681_v26 }
 0x487   :  { %10666 = vmatprep.subr.bf16.mxu0 %v10665_v40  ;;  %v2949_v42 = vsel %vm849_vm8, %v11630_v59, %v11649_v47  ;;  %v2950_v12 = vsel %vm849_vm8, %v11649_v47, %v11650_v34 }
 0x488   :  { %v2910_v13 = vpop.permute.xlu1 %2909  ;;  %v2968_v63 = vsel %vm849_vm8, %v11615_v1, %v11634_v7  ;;  %10668 = vmatpush1.bf16.msra.mxu0 %v10667_v46  ;;  %v2969_v30 = vsel %vm849_vm8, %v11634_v7, %v11635_v62 }
 0x489   :  { %v3030_v50 = vsel %vm849_vm8, %v2910_v13, %v15108_v53  ;;  %v11643_v39 = vpop.permute.xlu0 %11642  ;;  %v10669_v36 = vpack.c.bf16 %v2969_v30, %v2948_v31  ;;  %v10671_v16 = vpack.c.bf16 %v2968_v63, %v2947_v2  ;;  %9847 = vmatmul.mubr.msk.f32.gmra.mrb[16].mxu1 %vm3128_vm2, %v15192_v4  ;;  %v3029_v37 = vsel %vm849_vm8, %v15103_v48, %v2910_v13 }
 0x48a   :  { %9848 = vmatprep.subr.msk.mxu0 %vm1868_vm7, %v3030_v50  ;;  %v11645_v17 = vunpack.i.h.bf16 %v11643_v39  ;;  %v11644_v24 = vunpack.i.l.bf16 %v11643_v39  ;;  %3549 = vmatprep.mubr.f32.mxu1 %v14681_v26  ;;  %v15271_v26 = vld [vmem:[#allocation2] sm:$0xff] }
 0x48b   :  { %10670 = vmatprep.subr.bf16.mxu1 %v10669_v36 }
 0x48c   :  { %v15260_v35 = vpop.permute.xlu1 %11657  ;;  %v3010_v23 = vsel %vm849_vm8, %v11625_v41, %v11644_v24  ;;  %9849 = vmatpush1.msk.msra.mxu0 %vm1868_vm7, %v3029_v37  ;;  %10672 = vmatpush1.bf16.msra.mxu1 %v10671_v16  ;;  %v3011_v58 = vsel %vm849_vm8, %v11644_v24, %v11645_v17 }
 0x48d   :  { %v11653_v49 = vpop.permute.xlu0 %11652  ;;  %v10673_v48 = vpack.c.bf16 %v3011_v58, %v2990_v25  ;;  %v10675_v52 = vpack.c.bf16 %v3010_v23, %v2989_v28  ;;  %9850 = vmatmul.mubr.msk.f32.vlgmr.msra.gmra.mrb[16].mxu0 %vm3128_vm2, %v15169_v51  ;;  %v11660_v22 = vunpack.i.h.bf16 %v15260_v35  ;;  %v11659_v1 = vunpack.i.l.bf16 %v15260_v35 }
 0x48e   :  { %v11655_v0 = vunpack.i.h.bf16 %v11653_v49  ;;  %v11654_v14 = vunpack.i.l.bf16 %v11653_v49  ;;  %3478 = vmatprep.mubr.f32.mxu0 %v15271_v26 }
 0x48f   :  { %10674 = vmatprep.subr.bf16.mxu1 %v10673_v48  ;;  %v2991_v11 = vsel %vm849_vm8, %v11640_v9, %v11659_v1  ;;  %v2992_v44 = vsel %vm849_vm8, %v11659_v1, %v11660_v22 }
 0x490   :  { %v15276_v19 = vpop.permute.xlu1 %11667  ;;  %v2970_v33 = vsel %vm849_vm8, %v11635_v62, %v11654_v14  ;;  %10676 = vmatpush1.bf16.msra.mxu1 %v10675_v52  ;;  %v2971_v55 = vsel %vm849_vm8, %v11654_v14, %v11655_v0 }
 0x491   :  { %v11663_v6 = vpop.permute.xlu0 %11662  ;;  %v10677_v18 = vpack.c.bf16 %v2971_v55, %v2950_v12  ;;  %v10679_v60 = vpack.c.bf16 %v2970_v33, %v2949_v42  ;;  %9851 = vmatmul.mubr.msk.f32.gmra.mrb[18].mxu0 %vm3128_vm2, %v15192_v4  ;;  %v11670_v10 = vunpack.i.h.bf16 %v15276_v19  ;;  %v11669_v41 = vunpack.i.l.bf16 %v15276_v19 }
 0x492   :  { %v11665_v56 = vunpack.i.h.bf16 %v11663_v6  ;;  %v11664_v38 = vunpack.i.l.bf16 %v11663_v6  ;;  %3626 = vmatprep.mubr.f32.mxu0 %v15271_v26 }
 0x493   :  { %10678 = vmatprep.subr.bf16.mxu0 %v10677_v18  ;;  %v2951_v46 = vsel %vm849_vm8, %v11650_v34, %v11669_v41 }
 0x494   :  { %v2914_v57 = vpop.permute.xlu1 %2913  ;;  %v3012_v15 = vsel %vm849_vm8, %v11645_v17, %v11664_v38  ;;  %10680 = vmatpush1.bf16.msra.mxu0 %v10679_v60  ;;  %v3013_v59 = vsel %vm849_vm8, %v11664_v38, %v11665_v56 }
 0x495   :  { %v3031_v3 = vsel %vm849_vm8, %v15108_v53, %v2914_v57  ;;  %v3032_v54 = vsel %vm849_vm8, %v2914_v57, %v15118_v43  ;;  %v11673_v5 = vpop.permute.xlu0 %11672  ;;  %v10681_v61 = vpack.c.bf16 %v3013_v59, %v2992_v44  ;;  %v10683_v29 = vpack.c.bf16 %v3012_v15, %v2991_v11 }
 0x496   :  { %9852 = vmatprep.subr.msk.mxu1 %vm1868_vm7, %v3032_v54  ;;  %v11675_v20 = vunpack.i.h.bf16 %v11673_v5  ;;  %v11674_v40 = vunpack.i.l.bf16 %v11673_v5  ;;  %v2952_v53 = vsel %vm849_vm8, %v11669_v41, %v11670_v10 }
 0x497   :  { %9853 = vmatpush1.msk.msra.mxu1 %vm1868_vm7, %v3031_v3  ;;  %10682 = vmatprep.subr.bf16.mxu0 %v10681_v61 }
 0x498   :  { %v11678_v62 = vpop.permute.xlu1 %11677  ;;  %9854 = vmatmul.mubr.msk.f32.vlgmr.msra.gmra.mrb[18].mxu1 %vm3128_vm2, %v15169_v51  ;;  %v2972_v7 = vsel %vm849_vm8, %v11655_v0, %v11674_v40  ;;  %10684 = vmatpush1.bf16.msra.mxu0 %v10683_v29  ;;  %v2973_v27 = vsel %vm849_vm8, %v11674_v40, %v11675_v20 }
 0x499   :  { %v11680_v2 = vunpack.i.h.bf16 %v11678_v62  ;;  %v11679_v9 = vunpack.i.l.bf16 %v11678_v62  ;;  %3555 = vmatprep.mubr.f32.mxu1 %v15271_v26  ;;  %v11683_v13 = vpop.permute.xlu0 %11682  ;;  %v10685_v63 = vpack.c.bf16 %v2973_v27, %v2952_v53  ;;  %v10687_v50 = vpack.c.bf16 %v2972_v7, %v2951_v46 }
 0x49a   :  { %v11685_v30 = vunpack.i.h.bf16 %v11683_v13  ;;  %v11684_v39 = vunpack.i.l.bf16 %v11683_v13 }
 0x49b   :  { %v2993_v31 = vsel %vm849_vm8, %v11660_v22, %v11679_v9  ;;  %v2994_v36 = vsel %vm849_vm8, %v11679_v9, %v11680_v2  ;;  %10686 = vmatprep.subr.bf16.mxu1 %v10685_v63 }
 0x49c   :  { %v11688_v16 = vpop.permute.xlu1 %11687  ;;  %9855 = vmatmul.mubr.msk.f32.gmra.mrb[20].mxu1 %vm3128_vm2, %v15192_v4  ;;  %v3014_v17 = vsel %vm849_vm8, %v11665_v56, %v11684_v39  ;;  %v3015_v37 = vsel %vm849_vm8, %v11684_v39, %v11685_v30 }
 0x49d   :  { %v11690_v24 = vunpack.i.h.bf16 %v11688_v16  ;;  %v11689_v28 = vunpack.i.l.bf16 %v11688_v16  ;;  %10688 = vmatpush1.bf16.msra.mxu1 %v10687_v50  ;;  %3703 = vmatprep.mubr.f32.mxu1 %v15271_v26  ;;  %v11693_v35 = vpop.permute.xlu0 %11692  ;;  %v10689_v25 = vpack.c.bf16 %v3015_v37, %v2994_v36  ;;  %v10691_v34 = vpack.c.bf16 %v3014_v17, %v2993_v31 }
 0x49e   :  { %v11695_v47 = vunpack.i.h.bf16 %v11693_v35  ;;  %v11694_v23 = vunpack.i.l.bf16 %v11693_v35 }
 0x49f   :  { %v2954_v58 = vsel %vm849_vm8, %v11689_v28, %v11690_v24  ;;  %v2953_v49 = vsel %vm849_vm8, %v11670_v10, %v11689_v28  ;;  %10690 = vmatprep.subr.bf16.mxu1 %v10689_v25 }
 0x4a0   :  { %v2918_v48 = vpop.permute.xlu1 %2917  ;;  %v2974_v52 = vsel %vm849_vm8, %v11675_v20, %v11694_v23  ;;  %v2975_v22 = vsel %vm849_vm8, %v11694_v23, %v11695_v47 }
 0x4a1   :  { %v3033_v0 = vsel %vm849_vm8, %v15118_v43, %v2918_v48  ;;  %10692 = vmatpush1.bf16.msra.mxu1 %v10691_v34  ;;  %v3034_v14 = vsel %vm849_vm8, %v2918_v48, %v15123_v8  ;;  %v11703_v1 = vpop.permute.xlu0 %11702  ;;  %v10693_v19 = vpack.c.bf16 %v2975_v22, %v2954_v58  ;;  %v10695_v12 = vpack.c.bf16 %v2974_v52, %v2953_v49 }
 0x4a2   :  { %9856 = vmatprep.subr.msk.mxu0 %vm1868_vm7, %v3034_v14  ;;  %v11705_v42 = vunpack.i.h.bf16 %v11703_v1  ;;  %v11704_v33 = vunpack.i.l.bf16 %v11703_v1 }
 0x4a3   :  { %9857 = vmatpush1.msk.msra.mxu0 %vm1868_vm7, %v3033_v0 }
 0x4a4   :  { %v11698_v55 = vpop.permute.xlu1 %11697  ;;  %10694 = vmatprep.subr.bf16.mxu0 %v10693_v19  ;;  %9858 = vmatmul.mubr.msk.f32.vlgmr.msra.gmra.mrb[20].mxu0 %vm3128_vm2, %v15169_v51  ;;  %v3016_v60 = vsel %vm849_vm8, %v11685_v30, %v11704_v33  ;;  %v3017_v11 = vsel %vm849_vm8, %v11704_v33, %v11705_v42 }
 0x4a5   :  { %v11700_v43 = vunpack.i.h.bf16 %v11698_v55  ;;  %v11699_v6 = vunpack.i.l.bf16 %v11698_v55  ;;  %10696 = vmatpush1.bf16.msra.mxu0 %v10695_v12  ;;  %3632 = vmatprep.mubr.f32.mxu0 %v15271_v26  ;;  %v15324_v18 = vpop.permute.xlu0 %11712 }
 0x4a6   :  { %v11715_v44 = vunpack.i.h.bf16 %v15324_v18  ;;  %v11714_v15 = vunpack.i.l.bf16 %v15324_v18 }
 0x4a7   :  { %v2995_v56 = vsel %vm849_vm8, %v11680_v2, %v11699_v6  ;;  %v2996_v38 = vsel %vm849_vm8, %v11699_v6, %v11700_v43 }
 0x4a8   :  { %v11708_v10 = vpop.permute.xlu1 %11707  ;;  %v10697_v41 = vpack.c.bf16 %v3017_v11, %v2996_v38  ;;  %v10699_v57 = vpack.c.bf16 %v3016_v60, %v2995_v56  ;;  %9859 = vmatmul.mubr.msk.f32.gmra.mrb[22].mxu0 %vm3128_vm2, %v15192_v4  ;;  %v2977_v46 = vsel %vm849_vm8, %v11714_v15, %v11715_v44  ;;  %v2976_v62 = vsel %vm849_vm8, %v11695_v47, %v11714_v15 }
 0x4a9   :  { %v11710_v3 = vunpack.i.h.bf16 %v11708_v10  ;;  %v11709_v54 = vunpack.i.l.bf16 %v11708_v10  ;;  %3780 = vmatprep.mubr.f32.mxu0 %v15271_v26  ;;  %v15335_v59 = vpop.permute.xlu0 %11722 }
 0x4aa   :  { %10698 = vmatprep.subr.bf16.mxu0 %v10697_v41  ;;  %v11725_v2 = vunpack.i.h.bf16 %v15335_v59  ;;  %v11724_v9 = vunpack.i.l.bf16 %v15335_v59 }
 0x4ab   :  { %10700 = vmatpush1.bf16.msra.mxu0 %v10699_v57  ;;  %v2956_v5 = vsel %vm849_vm8, %v11709_v54, %v11710_v3  ;;  %v2955_v61 = vsel %vm849_vm8, %v11690_v24, %v11709_v54 }
 0x4ac   :  { %v2922_v29 = vpop.permute.xlu1 %2921  ;;  %v10701_v7 = vpack.c.bf16 %v2977_v46, %v2956_v5  ;;  %v10703_v27 = vpack.c.bf16 %v2976_v62, %v2955_v61  ;;  %v3018_v31 = vsel %vm849_vm8, %v11705_v42, %v11724_v9  ;;  %v3019_v36 = vsel %vm849_vm8, %v11724_v9, %v11725_v2 }
 0x4ad   :  { %v3035_v20 = vsel %vm849_vm8, %v15123_v8, %v2922_v29  ;;  %v3036_v40 = vsel %vm849_vm8, %v2922_v29, %v15126_v45  ;;  %v15345_v53 = vpop.permute.xlu0 %11732  ;;  %v11539_v42 = vunpack.i.l.bf16 %v15121_v21 }
 0x4ae   :  { %9860 = vmatprep.subr.msk.mxu1 %vm1868_vm7, %v3036_v40  ;;  %v11735_v28 = vunpack.i.h.bf16 %v15345_v53  ;;  %v11734_v37 = vunpack.i.l.bf16 %v15345_v53 }
 0x4af   :  { %9861 = vmatpush1.msk.msra.mxu1 %vm1868_vm7, %v3035_v20 }
 0x4b0   :  { %v11718_v8 = vpop.permute.xlu1 %11717  ;;  %10702 = vmatprep.subr.bf16.mxu1 %v10701_v7  ;;  %9862 = vmatmul.mubr.msk.f32.vlgmr.msra.gmra.mrb[22].mxu1 %vm3128_vm2, %v15169_v51  ;;  %v2979_v52 = vsel %vm849_vm8, %v11734_v37, %v11735_v28  ;;  %v2978_v0 = vsel %vm849_vm8, %v11715_v44, %v11734_v37 }
 0x4b1   :  { %v11720_v13 = vunpack.i.h.bf16 %v11718_v8  ;;  %v11719_v63 = vunpack.i.l.bf16 %v11718_v8  ;;  %10704 = vmatpush1.bf16.msra.mxu1 %v10703_v27  ;;  %3709 = vmatprep.mubr.f32.mxu1 %v15271_v26  ;;  %v15354_v50 = vpop.permute.xlu0 %11742  ;;  %v19504_v27 = vld [vmem:[#allocation6_spill] sm:$0xff] }
 0x4b2   :  { %v11745_v14 = vunpack.i.h.bf16 %v15354_v50  ;;  %v11744_v22 = vunpack.i.l.bf16 %v15354_v50 }
 0x4b3   :  { %v2997_v30 = vsel %vm849_vm8, %v11700_v43, %v11719_v63  ;;  %v2998_v39 = vsel %vm849_vm8, %v11719_v63, %v11720_v13  ;;  %v11540_v43 = vunpack.i.h.bf16 %v15121_v21 }
 0x4b4   :  { %v11728_v16 = vpop.permute.xlu1 %11727  ;;  %v10705_v17 = vpack.c.bf16 %v3019_v36, %v2998_v39  ;;  %v10707_v24 = vpack.c.bf16 %v3018_v31, %v2997_v30  ;;  %9863 = vmatmul.mubr.msk.f32.gmra.mrb[24].mxu1 %vm3128_vm2, %v15192_v4  ;;  %v3020_v6 = vsel %vm849_vm8, %v11725_v2, %v11744_v22  ;;  %v3021_v18 = vsel %vm849_vm8, %v11744_v22, %v11745_v14  ;;  %v19506_v39 = vld [vmem:[#allocation10_spill] sm:$0xff] }
 0x4b5   :  { %v11730_v35 = vunpack.i.h.bf16 %v11728_v16  ;;  %v11729_v25 = vunpack.i.l.bf16 %v11728_v16  ;;  %3857 = vmatprep.mubr.f32.mxu1 %v15271_v26  ;;  %v2930_v34 = vpop.permute.xlu0 %2929  ;;  %v2980_v15 = vsel %vm849_vm8, %v11735_v28, %v11540_v43 }
 0x4b6   :  { %10706 = vmatprep.subr.bf16.mxu1 %v10705_v17  ;;  %v3039_v54 = vsel %vm849_vm8, %v15131_v32, %v2930_v34 }
 0x4b7   :  { %10708 = vmatpush1.bf16.msra.mxu1 %v10707_v24  ;;  %v2958_v47 = vsel %vm849_vm8, %v11729_v25, %v11730_v35  ;;  %v2957_v23 = vsel %vm849_vm8, %v11710_v3, %v11729_v25  ;;  %v2959_v60 = vsel %vm849_vm8, %v11730_v35, %v11539_v42  ;;  %v19508_v42 = vld [vmem:[#allocation14_spill] sm:$0xff] }
 0x4b8   :  { %v2926_v58 = vpop.permute.xlu1 %2925  ;;  %v10709_v1 = vpack.c.bf16 %v2979_v52, %v2958_v47  ;;  %v10711_v19 = vpack.c.bf16 %v2978_v0, %v2957_v23  ;;  %v10717_v59 = vpack.c.bf16 %v2980_v15, %v2959_v60  ;;  %v19507_v47 = vld [vmem:[#allocation12_spill] sm:$0xff] }
 0x4b9   :  { %v3037_v49 = vsel %vm849_vm8, %v15126_v45, %v2926_v58  ;;  %v3038_v48 = vsel %vm849_vm8, %v2926_v58, %v15131_v32  ;;  %v11748_v45 = vpop.permute.xlu0 %11747 }
 0x4ba   :  { %9864 = vmatprep.subr.msk.mxu0 %vm1868_vm7, %v3038_v48  ;;  %v11750_v56 = vunpack.i.h.bf16 %v11748_v45  ;;  %v11749_v38 = vunpack.i.l.bf16 %v11748_v45 }
 0x4bb   :  { %9865 = vmatpush1.msk.msra.mxu0 %vm1868_vm7, %v3037_v49 }
 0x4bc   :  { %v11738_v33 = vpop.permute.xlu1 %11737  ;;  %9866 = vmatmul.mubr.msk.f32.vlgmr.msra.gmra.mrb[24].mxu0 %vm3128_vm2, %v15169_v51  ;;  %10710 = vmatprep.subr.bf16.mxu0 %v10709_v1  ;;  %v3022_v5 = vsel %vm849_vm8, %v11745_v14, %v11750_v56 }
 0x4bd   :  { %v11740_v12 = vunpack.i.h.bf16 %v11738_v33  ;;  %v11739_v55 = vunpack.i.l.bf16 %v11738_v33  ;;  %10712 = vmatpush1.bf16.msra.mxu0 %v10711_v19  ;;  %3786 = vmatprep.mubr.f32.mxu0 %v15271_v26  ;;  %v2936_v61 = vpop.permute.xlu0 %2935 }
 0x4bf   :  { %v2999_v11 = vsel %vm849_vm8, %v11720_v13, %v11739_v55  ;;  %v3000_v10 = vsel %vm849_vm8, %v11739_v55, %v11740_v12  ;;  %v3001_v3 = vsel %vm849_vm8, %v11740_v12, %v11749_v38 }
 0x4c0   :  { %v2932_v41 = vpop.permute.xlu1 %2931  ;;  %9867 = vmatmul.mubr.msk.f32.gmra.mrb[26].mxu0 %vm3128_vm2, %v15192_v4  ;;  %v10713_v57 = vpack.c.bf16 %v3021_v18, %v3000_v10  ;;  %v10715_v44 = vpack.c.bf16 %v3020_v6, %v2999_v11  ;;  %v10721_v20 = vpack.c.bf16 %v3022_v5, %v3001_v3  ;;  %v19509_v11 = vld [vmem:[#allocation15_spill] sm:$0xff] }
 0x4c1   :  { %v3040_v21 = vsel %vm849_vm8, %v2930_v34, %v2932_v41  ;;  %3934 = vmatprep.mubr.f32.mxu0 %v15271_v26 }
 0x4c2   :  { %9868 = vmatprep.subr.msk.mxu1 %vm1868_vm7, %v3040_v21  ;;  %10714 = vmatprep.subr.bf16.mxu0 %v10713_v57 }
 0x4c3   :  { %9869 = vmatpush1.msk.msra.mxu1 %vm1868_vm7, %v3039_v54  ;;  %10716 = vmatpush1.bf16.msra.mxu0 %v10715_v44 }
 0x4c4   :  { %v2934_v29 = vpop.permute.xlu1 %2933  ;;  %9870 = vmatmul.mubr.msk.f32.vlgmr.msra.gmra.mrb[26].mxu1 %vm3128_vm2, %v15169_v51  ;;  %10718 = vmatprep.subr.bf16.mxu1 %v10717_v59 }
 0x4c5   :  { %v3041_v40 = vsel %vm849_vm8, %v2932_v41, %v2934_v29  ;;  %10720 = vmatpush3.bf16.msra.mxu1 %v10717_v59  ;;  %v3042_v32 = vsel %vm849_vm8, %v2934_v29, %v2936_v61  ;;  %3863 = vmatprep.mubr.f32.mxu1 %v15271_v26 }
 0x4c6   :  { %9872 = vmatprep.subr.msk.mxu0 %vm1868_vm7, %v3042_v32  ;;  %10722 = vmatprep.subr.bf16.mxu1 %v10721_v20 }
 0x4c7   :  { %9873 = vmatpush1.msk.msra.mxu0 %vm1868_vm7, %v3041_v40 }
 0x4c8   :  { %v2938_v46 = vpop.permute.xlu1 %2937  ;;  %9871 = vmatmul.mubr.msk.f32.gmra.mrb[28].mxu1 %vm3128_vm2, %v15192_v4  ;;  %9874 = vmatmul.mubr.msk.f32.vlgmr.msra.gmra.mrb[28].mxu0 %vm3128_vm2, %v15169_v51 }
 0x4c9   :  { %v3043_v62 = vsel %vm849_vm8, %v2936_v61, %v2938_v46  ;;  %10724 = vmatpush3.bf16.msra.mxu1 %v10721_v20  ;;  %3940 = vmatprep.mubr.f32.mxu0 %v15271_v26  ;;  %v19505_v26 = vld [vmem:[#allocation7_spill] sm:$0xff]  ;;  %v19510_v61 = vld [vmem:[#allocation17_spill] sm:$0xff] }
 0x4ca   :  { %10376 = vmatprep.subr.msk.mxu1 %vm1868_vm7, %v3043_v62  ;;  %10378 = vmatprep.mubr.msk.f32.mxu1 %vm3128_vm2, %v15169_v51 }
 0x4cc   :  { %9875 = vmatmul.mubr.msk.f32.gmra.mrb[30].mxu0 %vm3128_vm2, %v15192_v4 }
 0x4cd   :  { %10377 = vmatpush3.msk.msra.mxu1 %vm1868_vm7, %v3043_v62 }
 0x4ce   :  { %10379 = vmatmul.mubr.msk.f32.vlgmr.msra.gmra.mrb[30].mxu1 %vm3128_vm2, %v15192_v4  ;;  %vm4843_vm2 = vcmask 564264  }
 0x548   :  { %v3243_v53 = vpop.f32.mrb[10].mxu1 }
 0x549   :  { %v3245_v7 = vpop.f32.mrb[11].mxu1  ;;  %v4022_v8 = vmul.f32 %v3243_v53, %v19504_v27 }
 0x54a   :  { %v15421_v13 = vmul.f32 %v3245_v7, %v19505_v26 }
 0x54b   :  { %v4111_v30 = vmul.f32 %v4022_v8, %v4022_v8 }
 0x54c   :  { %v3249_v2 = vpop.f32.mrb[12].mxu1  ;;  %v4112_v4 = vmul.f32 %v15421_v13, %v15421_v13  ;;  %v4064_v16 = vadd.f32 %v15421_v13, %v4022_v8 }
 0x54d   :  { %v3251_v9 = vpop.f32.mrb[13].mxu1  ;;  %v4043_v51 = vmul.f32 %v3249_v2, %v19504_v27  ;;  %v19511_v27 = vld [vmem:[#allocation18_spill] sm:$0xff] }
 0x54e   :  { %v15425_v31 = vmul.f32 %v3251_v9, %v19505_v26  ;;  %v4153_v25 = vadd.f32 %v4112_v4, %v4111_v30 }
 0x54f   :  { %v4132_v24 = vmul.f32 %v4043_v51, %v4043_v51 }
 0x550   :  { %v3320_v63 = vpop.f32.mrb[12].mxu0  ;;  %v4133_v28 = vmul.f32 %v15425_v31, %v15425_v31  ;;  %v4088_v49 = vadd.f32 %v15425_v31, %v4043_v51 }
 0x551   :  { %v3322_v50 = vpop.f32.mrb[13].mxu0  ;;  %v15430_v36 = vmul.f32 %v3320_v63, %v19506_v39 }
 0x552   :  { %v15441_v23 = vmul.f32 %v3322_v50, %v19507_v47  ;;  %v4176_v52 = vadd.f32 %v4133_v28, %v4132_v24  ;;  %v19512_v28 = vld [vmem:[#allocation19_spill] sm:$0xff] }
 0x553   :  { %v4113_v34 = vmul.f32 %v15430_v36, %v15430_v36  ;;  %v4065_v58 = vadd.f32 %v4064_v16, %v15430_v36 }
 0x554   :  { %v3326_v17 = vpop.f32.mrb[14].mxu0  ;;  %v4114_v19 = vmul.f32 %v15441_v23, %v15441_v23 }
 0x555   :  { %v15436_v37 = vmul.f32 %v3326_v17, %v19506_v39  ;;  %v3328_v35 = vpop.f32.mrb[15].mxu0  ;;  %v4154_v1 = vadd.f32 %v4153_v25, %v4113_v34  ;;  %v4066_v33 = vadd.f32 %v4065_v58, %v15441_v23 }
 0x556   :  { %v15448_v22 = vmul.f32 %v3328_v35, %v19507_v47 }
 0x557   :  { %v4134_v0 = vmul.f32 %v15436_v37, %v15436_v37  ;;  %v4089_v12 = vadd.f32 %v4088_v49, %v15436_v37  ;;  %v4155_v56 = vadd.f32 %v4154_v1, %v4114_v19  ;;  %v19513_v1 = vld [vmem:[#allocation20_spill] sm:$0xff] }
 0x558   :  { %v3397_v48 = vpop.f32.mrb[14].mxu1  ;;  %v4135_v6 = vmul.f32 %v15448_v22, %v15448_v22 }
 0x559   :  { %v3399_v14 = vpop.f32.mrb[15].mxu1  ;;  %v15453_v45 = vmul.f32 %v3397_v48, %v19508_v42  ;;  %v4177_v43 = vadd.f32 %v4176_v52, %v4134_v0  ;;  %v4090_v44 = vadd.f32 %v4089_v12, %v15448_v22 }
 0x55a   :  { %v15465_v10 = vmul.f32 %v3399_v14, %v19509_v11 }
 0x55b   :  { %v4115_v38 = vmul.f32 %v15453_v45, %v15453_v45  ;;  %v4067_v57 = vadd.f32 %v4066_v33, %v15453_v45  ;;  %v4178_v15 = vadd.f32 %v4177_v43, %v4135_v6 }
 0x55c   :  { %v3403_v55 = vpop.f32.mrb[16].mxu1  ;;  %v4116_v5 = vmul.f32 %v15465_v10, %v15465_v10 }
 0x55d   :  { %v15460_v18 = vmul.f32 %v3403_v55, %v19508_v42  ;;  %v3405_v60 = vpop.f32.mrb[17].mxu1  ;;  %v4156_v59 = vadd.f32 %v4155_v56, %v4115_v38  ;;  %v4068_v40 = vadd.f32 %v4067_v57, %v15465_v10 }
 0x55e   :  { %v15472_v54 = vmul.f32 %v3405_v60, %v19509_v11 }
 0x55f   :  { %v4136_v3 = vmul.f32 %v15460_v18, %v15460_v18  ;;  %v4091_v32 = vadd.f32 %v4090_v44, %v15460_v18  ;;  %v4157_v2 = vadd.f32 %v4156_v59, %v4116_v5 }
 0x560   :  { %v3474_v41 = vpop.f32.mrb[16].mxu0  ;;  %v4137_v53 = vmul.f32 %v15472_v54, %v15472_v54 }
 0x561   :  { %v3476_v21 = vpop.f32.mrb[17].mxu0  ;;  %v15477_v29 = vmul.f32 %v3474_v41, %v19510_v61  ;;  %v4179_v62 = vadd.f32 %v4178_v15, %v4136_v3  ;;  %v4092_v51 = vadd.f32 %v4091_v32, %v15472_v54  ;;  %v19514_v15 = vld [vmem:[#allocation21_spill] sm:$0xff] }
 0x562   :  { %v15489_v8 = vmul.f32 %v3476_v21, %v19511_v27 }
 0x563   :  { %v4117_v9 = vmul.f32 %v15477_v29, %v15477_v29  ;;  %v4069_v63 = vadd.f32 %v4068_v40, %v15477_v29  ;;  %v4180_v50 = vadd.f32 %v4179_v62, %v4137_v53 }
 0x564   :  { %v3480_v20 = vpop.f32.mrb[18].mxu0  ;;  %v4118_v24 = vmul.f32 %v15489_v8, %v15489_v8 }
 0x565   :  { %v3482_v46 = vpop.f32.mrb[19].mxu0  ;;  %v15484_v7 = vmul.f32 %v3480_v20, %v19510_v61  ;;  %v4158_v17 = vadd.f32 %v4157_v2, %v4117_v9  ;;  %v4070_v34 = vadd.f32 %v4069_v63, %v15489_v8 }
 0x566   :  { %v15496_v16 = vmul.f32 %v3482_v46, %v19511_v27 }
 0x567   :  { %v4138_v4 = vmul.f32 %v15484_v7, %v15484_v7  ;;  %v4093_v58 = vadd.f32 %v4092_v51, %v15484_v7  ;;  %v4159_v0 = vadd.f32 %v4158_v17, %v4118_v24  ;;  %v19515_v17 = vld [vmem:[#allocation22_spill] sm:$0xff] }
 0x568   :  { %v4139_v48 = vmul.f32 %v15496_v16, %v15496_v16 }
 0x569   :  { %v4181_v49 = vadd.f32 %v4180_v50, %v4138_v4  ;;  %v4094_v43 = vadd.f32 %v4093_v58, %v15496_v16 }
 0x56b   :  { %v3551_v30 = vpop.f32.mrb[18].mxu1  ;;  %v4182_v6 = vadd.f32 %v4181_v49, %v4139_v48  ;;  %v19516_v49 = vld [vmem:[#allocation23_spill] sm:$0xff] }
 0x56c   :  { %v15501_v35 = vmul.f32 %v3551_v30, %v19512_v28  ;;  %v3553_v25 = vpop.f32.mrb[19].mxu1 }
 0x56d   :  { %v15510_v19 = vmul.f32 %v3553_v25, %v19513_v1 }
 0x56e   :  { %v4119_v14 = vmul.f32 %v15501_v35, %v15501_v35  ;;  %v4071_v55 = vadd.f32 %v4070_v34, %v15501_v35 }
 0x56f   :  { %v3557_v52 = vpop.f32.mrb[20].mxu1  ;;  %v4120_v56 = vmul.f32 %v15510_v19, %v15510_v19 }
 0x570   :  { %v15513_v33 = vmul.f32 %v3557_v52, %v19512_v28  ;;  %v3559_v12 = vpop.f32.mrb[21].mxu1  ;;  %v4160_v60 = vadd.f32 %v4159_v0, %v4119_v14  ;;  %v4072_v57 = vadd.f32 %v4071_v55, %v15510_v19 }
 0x571   :  { %v15522_v41 = vmul.f32 %v3559_v12, %v19513_v1 }
 0x572   :  { %v4140_v38 = vmul.f32 %v15513_v33, %v15513_v33  ;;  %v4095_v44 = vadd.f32 %v4094_v43, %v15513_v33  ;;  %v4161_v59 = vadd.f32 %v4160_v60, %v4120_v56 }
 0x573   :  { %v4141_v40 = vmul.f32 %v15522_v41, %v15522_v41 }
 0x574   :  { %v4183_v5 = vadd.f32 %v4182_v6, %v4140_v38  ;;  %v4096_v62 = vadd.f32 %v4095_v44, %v15522_v41  ;;  %v19517_v6 = vld [vmem:[#allocation24_spill] sm:$0xff] }
 0x576   :  { %v4184_v63 = vadd.f32 %v4183_v5, %v4141_v40  ;;  %v19518_v40 = vld [vmem:[#allocation25_spill] sm:$0xff] }
 0x577   :  { %v3628_v21 = vpop.f32.mrb[20].mxu0 }
 0x578   :  { %v4032_v3 = vmul.f32 %v3628_v21, %v19514_v15  ;;  %v3630_v20 = vpop.f32.mrb[21].mxu0 }
 0x579   :  { %v15532_v24 = vmul.f32 %v3630_v20, %v19515_v17 }
 0x57a   :  { %v4073_v32 = vadd.f32 %v4072_v57, %v4032_v3  ;;  %v4121_v46 = vmul.f32 %v4032_v3, %v4032_v3 }
 0x57b   :  { %v3634_v53 = vpop.f32.mrb[22].mxu0  ;;  %v4122_v58 = vmul.f32 %v15532_v24, %v15532_v24 }
 0x57c   :  { %v4162_v2 = vadd.f32 %v4161_v59, %v4121_v46  ;;  %v4053_v9 = vmul.f32 %v3634_v53, %v19514_v15  ;;  %v3636_v51 = vpop.f32.mrb[23].mxu0  ;;  %v4074_v12 = vadd.f32 %v4073_v32, %v15532_v24  ;;  %v19519_v53 = vld [vmem:[#allocation26_spill] sm:$0xff] }
 0x57d   :  { %v15540_v0 = vmul.f32 %v3636_v51, %v19515_v17 }
 0x57e   :  { %v4097_v50 = vadd.f32 %v4096_v62, %v4053_v9  ;;  %v4142_v30 = vmul.f32 %v4053_v9, %v4053_v9  ;;  %v4163_v55 = vadd.f32 %v4162_v2, %v4122_v58 }
 0x57f   :  { %v4143_v56 = vmul.f32 %v15540_v0, %v15540_v0 }
 0x580   :  { %v4185_v4 = vadd.f32 %v4184_v63, %v4142_v30  ;;  %v4098_v57 = vadd.f32 %v4097_v50, %v15540_v0 }
 0x582   :  { %v4186_v59 = vadd.f32 %v4185_v4, %v4143_v56 }
 0x583   :  { %v3705_v25 = vpop.f32.mrb[22].mxu1 }
 0x584   :  { %v3707_v34 = vpop.f32.mrb[23].mxu1  ;;  %v15537_v48 = vmul.f32 %v3705_v25, %v19516_v49 }
 0x585   :  { %v15546_v60 = vmul.f32 %v3707_v34, %v19517_v6 }
 0x586   :  { %v4123_v43 = vmul.f32 %v15537_v48, %v15537_v48  ;;  %v4075_v44 = vadd.f32 %v4074_v12, %v15537_v48 }
 0x587   :  { %v3711_v52 = vpop.f32.mrb[24].mxu1  ;;  %v4124_v15 = vmul.f32 %v15546_v60, %v15546_v60 }
 0x588   :  { %v3713_v14 = vpop.f32.mrb[25].mxu1  ;;  %v15551_v38 = vmul.f32 %v3711_v52, %v19516_v49  ;;  %v4164_v21 = vadd.f32 %v4163_v55, %v4123_v43  ;;  %v4076_v9 = vadd.f32 %v4075_v44, %v15546_v60 }
 0x589   :  { %v15560_v20 = vmul.f32 %v3713_v14, %v19517_v6 }
 0x58a   :  { %v4144_v5 = vmul.f32 %v15551_v38, %v15551_v38  ;;  %v4099_v62 = vadd.f32 %v4098_v57, %v15551_v38  ;;  %v4165_v51 = vadd.f32 %v4164_v21, %v4124_v15  ;;  %v19520_v15 = vld [vmem:[#allocation27_spill] sm:$0xff] }
 0x58b   :  { %v4145_v4 = vmul.f32 %v15560_v20, %v15560_v20 }
 0x58c   :  { %v4187_v30 = vadd.f32 %v4186_v59, %v4144_v5  ;;  %v4100_v52 = vadd.f32 %v4099_v62, %v15560_v20 }
 0x58e   :  { %v4188_v44 = vadd.f32 %v4187_v30, %v4145_v4 }
 0x58f   :  { %v3782_v3 = vpop.f32.mrb[24].mxu0 }
 0x590   :  { %v15563_v32 = vmul.f32 %v3782_v3, %v19518_v40  ;;  %v3784_v46 = vpop.f32.mrb[25].mxu0 }
 0x591   :  { %v15567_v2 = vmul.f32 %v3784_v46, %v19519_v53  ;;  %v19522_v46 = vld [vmem:[#allocation28_spill] sm:$0xff] }
 0x592   :  { %v4125_v63 = vmul.f32 %v15563_v32, %v15563_v32  ;;  %v4077_v25 = vadd.f32 %v4076_v9, %v15563_v32 }
 0x593   :  { %v3788_v50 = vpop.f32.mrb[26].mxu0  ;;  %v4126_v12 = vmul.f32 %v15567_v2, %v15567_v2 }
 0x594   :  { %v15576_v34 = vmul.f32 %v3788_v50, %v19518_v40  ;;  %v3790_v58 = vpop.f32.mrb[27].mxu0  ;;  %v4166_v14 = vadd.f32 %v4165_v51, %v4125_v63  ;;  %v4078_v21 = vadd.f32 %v4077_v25, %v15567_v2 }
 0x595   :  { %v15584_v43 = vmul.f32 %v3790_v58, %v19519_v53 }
 0x596   :  { %v4146_v55 = vmul.f32 %v15576_v34, %v15576_v34  ;;  %v4101_v56 = vadd.f32 %v4100_v52, %v15576_v34  ;;  %v4167_v5 = vadd.f32 %v4166_v14, %v4126_v12 }
 0x597   :  { %v3859_v57 = vpop.f32.mrb[26].mxu1  ;;  %v4147_v63 = vmul.f32 %v15584_v43, %v15584_v43 }
 0x598   :  { %v15589_v3 = vmul.f32 %v3859_v57, %v19520_v15  ;;  %v3861_v59 = vpop.f32.mrb[27].mxu1  ;;  %v4189_v9 = vadd.f32 %v4188_v44, %v4146_v55  ;;  %v4102_v30 = vadd.f32 %v4101_v56, %v15584_v43  ;;  %v19524_v55 = vld [vmem:[#allocation29_spill] sm:$0xff]  ;;  %v19525_v56 = vld [vmem:[#allocation30_spill] sm:$0xff] }
 0x599   :  { %v15592_v62 = vmul.f32 %v3861_v59, %v19522_v46 }
 0x59a   :  { %19521 = vst [vmem:[#allocation51_spill] sm:$0xff] %v15589_v3  ;;  %v4079_v51 = vadd.f32 %v4078_v21, %v15589_v3  ;;  %v4127_v50 = vmul.f32 %v15589_v3, %v15589_v3  ;;  %v4190_v53 = vadd.f32 %v4189_v9, %v4147_v63 }
 0x59b   :  { %v4128_v4 = vmul.f32 %v15592_v62, %v15592_v62  ;;  %v3865_v25 = vpop.f32.mrb[28].mxu1  ;;  %v3936_v58 = vpop.f32.mrb[28].mxu0 }
 0x59c   :  { %v4168_v52 = vadd.f32 %v4167_v5, %v4127_v50  ;;  %v4080_v14 = vadd.f32 %v4079_v51, %v15592_v62  ;;  %v15604_v12 = vmul.f32 %v3865_v25, %v19520_v15  ;;  %v15607_v57 = vmul.f32 %v3936_v58, %v19524_v55  ;;  %v3867_v44 = vpop.f32.mrb[29].mxu1  ;;  %v3938_v21 = vpop.f32.mrb[29].mxu0 }
 0x59d   :  { %v15610_v59 = vmul.f32 %v3867_v44, %v19522_v46  ;;  %v15613_v40 = vmul.f32 %v3938_v21, %v19525_v56 }
 0x59e   :  { %19523 = vst [vmem:[#allocation49_spill] sm:$0xff] %v15604_v12  ;;  %v4169_v3 = vadd.f32 %v4168_v52, %v4128_v4  ;;  %v4103_v5 = vadd.f32 %v4102_v30, %v15604_v12  ;;  %v4148_v51 = vmul.f32 %v15604_v12, %v15604_v12  ;;  %v4081_v50 = vadd.f32 %v4080_v14, %v15607_v57 }
 0x59f   :  { %19526 = vst [vmem:[#allocation48_spill] sm:$0xff] %v15613_v40  ;;  %v4129_v25 = vmul.f32 %v15607_v57, %v15607_v57  ;;  %v4149_v58 = vmul.f32 %v15610_v59, %v15610_v59  ;;  %v3942_v44 = vpop.f32.mrb[30].mxu0  ;;  %v4130_v4 = vmul.f32 %v15613_v40, %v15613_v40 }
 0x5a0   :  { %v4191_v15 = vadd.f32 %v4190_v53, %v4148_v51  ;;  %v4104_v21 = vadd.f32 %v4103_v5, %v15610_v59  ;;  %v15625_v9 = vmul.f32 %v3942_v44, %v19524_v55  ;;  %v3944_v63 = vpop.f32.mrb[31].mxu0  ;;  %v19527_v5 = vld [vmem:[#allocation31_spill] sm:$0xff]  ;;  %v4082_v55 = vadd.f32 %v4081_v50, %v15613_v40 }
 0x5a1   :  { %v4170_v30 = vadd.f32 %v4169_v3, %v4129_v25  ;;  %v15630_v52 = vmul.f32 %v3944_v63, %v19525_v56  ;;  %v10380_v14 = vpop.f32.mrb[30].mxu1 }
 0x5a2   :  { %v4192_v12 = vadd.f32 %v4191_v15, %v4149_v58  ;;  %v4105_v49 = vadd.f32 %v4104_v21, %v15625_v9  ;;  %v4150_v53 = vmul.f32 %v15625_v9, %v15625_v9  ;;  %v4063_v51 = vmul.f32 %v10380_v14, %v19527_v5  ;;  %v4013_v44 = vpop.f32.mrb[31].mxu1 }
 0x5a3   :  { %v4151_v3 = vmul.f32 %v15630_v52, %v15630_v52  ;;  %v4042_v25 = vmul.f32 %v4013_v44, %v19527_v5  ;;  %v4171_v46 = vadd.f32 %v4170_v30, %v4130_v4  ;;  %v4393_v4 = vld [vmem:[%s19118_s7 + $0x10] sm:$0xff]  ;;  %v4412_v44 = vld [vmem:[%s19118_s7 + $0xa8] sm:$0xff] }
 0x5a4   :  { %v4193_v63 = vadd.f32 %v4192_v12, %v4150_v53  ;;  %v4106_v56 = vadd.f32 %v4105_v49, %v15630_v52  ;;  %v4107_v15 = vsel %vm4083_vm9, %v4063_v51, 0.0  ;;  %v4152_v58 = vmul.f32 %v4063_v51, %v4063_v51  ;;  %v4407_v49 = vld [vmem:[%s19118_s7 + $0x80] sm:$0xff]  ;;  %v4394_v53 = vld [vmem:[%s19118_s7 + $0x18] sm:$0xff] }
 0x5a5   :  { %v4084_v21 = vsel %vm4083_vm9, %v4042_v25, 0.0  ;;  %v4131_v17 = vmul.f32 %v4042_v25, %v4042_v25  ;;  %v4411_v51 = vld [vmem:[%s19118_s7 + $0xa0] sm:$0xff] }
 0x5a6   :  { %v4108_v6 = vadd.f32 %v4107_v15, %v4106_v56  ;;  %v4195_v14 = vsel %vm4083_vm9, %v4152_v58, 0.0  ;;  %v4085_v1 = vadd.f32 %v4084_v21, %v4082_v55  ;;  %v4194_v50 = vadd.f32 %v4193_v63, %v4151_v3  ;;  %v4408_v56 = vld [vmem:[%s19118_s7 + $0x88] sm:$0xff]  ;;  %v4391_v55 = vld [vmem:[%s19118_s7] sm:$0xff]  ;;  %v4413_v58 = vld [vmem:[%s19118_s7 + $0xb0] sm:$0xff] }
 0x5a7   :  { %v4172_v40 = vsel %vm4083_vm9, %v4131_v17, 0.0  ;;  %v15654_v30 = vpack.c.bf16 %v4408_v56, %v4407_v49  ;;  %v4409_v17 = vld [vmem:[%s19118_s7 + $0x90] sm:$0xff]  ;;  %v15683_v3 = vpack.c.bf16 %v4394_v53, %v4393_v4  ;;  %v15686_v25 = vpack.c.bf16 %v4412_v44, %v4411_v51  ;;  %v4395_v63 = vld [vmem:[%s19118_s7 + $0x20] sm:$0xff]  ;;  %v4396_v15 = vld [vmem:[%s19118_s7 + $0x28] sm:$0xff] }
 0x5a8   :  { %4086 = vadd.xlane.f32.xlu0 %v4085_v1  ;;  %4109 = vadd.xlane.f32.xlu1 %v4108_v6  ;;  %v4173_v5 = vadd.f32 %v4172_v40, %v4171_v46  ;;  %v4196_v12 = vadd.f32 %v4195_v14, %v4194_v50  ;;  %v4392_v1 = vld [vmem:[%s19118_s7 + $0x8] sm:$0xff]  ;;  %v4410_v6 = vld [vmem:[%s19118_s7 + $0x98] sm:$0xff]  ;;  %v15701_v14 = vpack.c.bf16 %v4396_v15, %v4395_v63  ;;  %v4415_v49 = vld [vmem:[%s19118_s7 + $0xc0] sm:$0xff]  ;;  %vm5071_vm9 = vcmask 56320  }
 0x5a9   :  { %19528 = vst [vmem:[#allocation52_spill] sm:$0xff] %v15654_v30  ;;  %v15665_v40 = vpack.c.bf16 %v4392_v1, %v4391_v55  ;;  %v15667_v46 = vpack.c.bf16 %v4410_v6, %v4409_v17  ;;  %10726 = vmatprep.subr.bf16.mxu0 %v15654_v30  ;;  %19530 = vst [vmem:[#allocation53_spill] sm:$0xff] %v15683_v3  ;;  %v4414_v21 = vld [vmem:[%s19118_s7 + $0xb8] sm:$0xff]  ;;  %v4416_v56 = vld [vmem:[%s19118_s7 + $0xc8] sm:$0xff] }
 0x5aa   :  { %19531 = vst [vmem:[#allocation37_spill] sm:$0xff] %v15686_v25  ;;  %19532 = vst [vmem:[#allocation46_spill] sm:$0xff] %v15701_v14  ;;  %v15704_v50 = vpack.c.bf16 %v4414_v21, %v4413_v58  ;;  %v15722_v1 = vpack.c.bf16 %v4416_v56, %v4415_v49  ;;  %v4399_v17 = vld [vmem:[%s19118_s7 + $0x40] sm:$0xff]  ;;  %v4400_v6 = vld [vmem:[%s19118_s7 + $0x48] sm:$0xff] }
 0x5ab   :  { %19529 = vst [vmem:[#allocation50_spill] sm:$0xff] %v15667_v46  ;;  %10728 = vmatpush3.bf16.msra.mxu0 %v15665_v40  ;;  %v4417_v4 = vld [vmem:[%s19118_s7 + $0xd0] sm:$0xff]  ;;  %v4418_v53 = vld [vmem:[%s19118_s7 + $0xd8] sm:$0xff]  ;;  %v15737_v51 = vpack.c.bf16 %v4400_v6, %v4399_v17 }
 0x5ac   :  { %4174 = vadd.xlane.f32.xlu0 %v4173_v5  ;;  %10730 = vmatprep.subr.bf16.mxu0 %v15667_v46  ;;  %19533 = vst [vmem:[#allocation47_spill] sm:$0xff] %v15704_v50  ;;  %v4397_v5 = vld [vmem:[%s19118_s7 + $0x30] sm:$0xff]  ;;  %19535 = vst [vmem:[#allocation56_spill] sm:$0xff] %v15722_v1  ;;  %v15740_v44 = vpack.c.bf16 %v4418_v53, %v4417_v4  ;;  %v4402_v15 = vld [vmem:[%s19118_s7 + $0x58] sm:$0xff] }
 0x5ad   :  { %19536 = vst [vmem:[#allocation38_spill] sm:$0xff] %v15737_v51  ;;  %v4401_v63 = vld [vmem:[%s19118_s7 + $0x50] sm:$0xff] }
 0x5ae   :  { %19537 = vst [vmem:[#allocation59_spill] sm:$0xff] %v15740_v44  ;;  %v15749_v58 = vpack.c.bf16 %v4402_v15, %v4401_v63 }
 0x5af   :  { %10732 = vmatpush3.bf16.msra.mxu0 %v15683_v3 }
 0x5b0   :  { %4197 = vadd.xlane.f32.xlu0 %v4196_v12  ;;  %10734 = vmatprep.subr.bf16.mxu0 %v15686_v25  ;;  %v4398_v12 = vld [vmem:[%s19118_s7 + $0x38] sm:$0xff]  ;;  %19538 = vst [vmem:[#allocation40_spill] sm:$0xff] %v15749_v58 }
 0x5b1   :  { %v15719_v55 = vpack.c.bf16 %v4398_v12, %v4397_v5 }
 0x5b3   :  { %10736 = vmatpush3.bf16.msra.mxu0 %v15701_v14  ;;  %19534 = vst [vmem:[#allocation60_spill] sm:$0xff] %v15719_v55 }
 0x5b4   :  { %10738 = vmatprep.subr.bf16.mxu0 %v15704_v50 }
 0x5b7   :  { %10740 = vmatpush3.bf16.msra.mxu0 %v15719_v55 }
 0x5b8   :  { %10742 = vmatprep.subr.bf16.mxu0 %v15722_v1 }
 0x5bb   :  { %10744 = vmatpush3.bf16.msra.mxu0 %v15737_v51 }
 0x5bc   :  { %10746 = vmatprep.subr.bf16.mxu0 %v15740_v44 }
 0x5bf   :  { %10748 = vmatpush3.bf16.msra.mxu0 %v15749_v58 }
 0x635   :  { %v4087_v21 = vpop.xlane.xlu0 %4086  ;;  %v4110_v12 = vpop.xlane.xlu1 %4109 }
 0x636   :  { %v15753_v5 = vmul.f32 0.00048828125, %v4087_v21  ;;  %v15755_v56 = vmul.f32 0.00048828125, %v4110_v12  ;;  %v4419_v21 = vld [vmem:[%s19118_s7 + $0xe0] sm:$0xff]  ;;  %v4420_v12 = vld [vmem:[%s19118_s7 + $0xe8] sm:$0xff] }
 0x638   :  { %v4203_v17 = vmul.f32 %v15753_v5, %v15753_v5  ;;  %v4204_v15 = vmul.f32 %v15755_v56, %v15755_v56 }
 0x639   :  { %v4175_v49 = vpop.xlane.xlu0 %4174 }
 0x63a   :  { %v4201_v6 = vmul.f32 0.00048828125, %v4175_v49  ;;  %v4423_v49 = vld [vmem:[%s19118_s7 + $0x100] sm:$0xf] }
 0x63b   :  { %10381 = vmatprep.subr.msk.mxu1 %vm1868_vm7, %v4423_v49 }
 0x63c   :  { %v4205_v4 = vsub.f32 %v4201_v6, %v4203_v17  ;;  %v15770_v17 = vpack.c.bf16 %v4420_v12, %v4419_v21  ;;  %10382 = vmatpush3.msk.msra.mxu1 %vm1868_vm7, %v4423_v49  ;;  %v4213_v6 = vsub.f32 %v15441_v23, %v15753_v5  ;;  %v4231_v21 = vsub.f32 %v15448_v22, %v15755_v56 }
 0x63d   :  { %v4198_v53 = vpop.xlane.xlu0 %4197  ;;  %10758 = vmatprep.subr.bf16.mxu1 %v15654_v30  ;;  %v4229_v12 = vsub.f32 %v15425_v31, %v15755_v56  ;;  %v4230_v23 = vsub.f32 %v15436_v37, %v15755_v56  ;;  %v4233_v22 = vsub.f32 %v15472_v54, %v15755_v56  ;;  %v4217_v31 = vsub.f32 %v15489_v8, %v15753_v5 }
 0x63e   :  { %v4207_v51 = vadd.f32 1e-05, %v4205_v4  ;;  %v4202_v63 = vmul.f32 0.00048828125, %v4198_v53  ;;  %19539 = vst [vmem:[#allocation54_spill] sm:$0xff] %v15770_v17  ;;  %10750 = vmatprep.subr.bf16.mxu0 %v15770_v17  ;;  %v4211_v4 = vsub.f32 %v15421_v13, %v15753_v5  ;;  %v4212_v53 = vsub.f32 %v15430_v36, %v15753_v5 }
 0x63f   :  { %v4214_v13 = vsub.f32 %v15453_v45, %v15753_v5  ;;  %v4232_v37 = vsub.f32 %v15460_v18, %v15755_v56  ;;  %v4219_v54 = vsub.f32 %v15510_v19, %v15753_v5  ;;  %v4234_v8 = vsub.f32 %v15484_v7, %v15755_v56 }
 0x640   :  { %13033 = vrsqrt.f32 %v4207_v51  ;;  %v4206_v58 = vsub.f32 %v4202_v63, %v4204_v15  ;;  %v4403_v51 = vld [vmem:[%s19118_s7 + $0x60] sm:$0xff]  ;;  %v4215_v63 = vsub.f32 %v15465_v10, %v15753_v5  ;;  %v4218_v30 = vsub.f32 %v15501_v35, %v15753_v5 }
 0x642   :  { %v4208_v44 = vadd.f32 1e-05, %v4206_v58 }
 0x644   :  { %13035 = vrsqrt.f32 %v4208_v44  ;;  %v4404_v44 = vld [vmem:[%s19118_s7 + $0x68] sm:$0xff] }
 0x645   :  { %v15779_v58 = vpack.c.bf16 %v4404_v44, %v4403_v51 }
 0x647   :  { %19540 = vst [vmem:[#allocation64_spill] sm:$0xff] %v15779_v58  ;;  %10752 = vmatpush3.bf16.msra.mxu0 %v15779_v58 }
 0x64a   :  { %v15793_v15 = vpop.eup %13033 }
 0x64b   :  { %v4249_v36 = vmul.f32 %v15793_v15, %v4213_v6  ;;  %v4247_v10 = vmul.f32 %v15793_v15, %v4211_v4  ;;  %v4248_v49 = vmul.f32 %v15793_v15, %v4212_v53  ;;  %v4251_v51 = vmul.f32 %v15793_v15, %v4215_v63 }
 0x64c   :  { %v4250_v44 = vmul.f32 %v15793_v15, %v4214_v13  ;;  %v4216_v4 = vsub.f32 %v15477_v29, %v15753_v5  ;;  %v4235_v13 = vsub.f32 %v15496_v16, %v15755_v56 }
 0x64d   :  { %v4285_v45 = vmul.f32 0.2, %v4249_v36  ;;  %v4283_v58 = vmul.f32 0.2, %v4247_v10  ;;  %v4284_v6 = vmul.f32 0.2, %v4248_v49 }
 0x64e   :  { %v15816_v53 = vpop.eup %13035  ;;  %v4287_v63 = vmul.f32 0.2, %v4251_v51  ;;  %v4286_v14 = vmul.f32 0.2, %v4250_v44 }
 0x64f   :  { %v4321_v17 = vmax.f32 %v4249_v36, %v4285_v45  ;;  %v4319_v18 = vmax.f32 %v4247_v10, %v4283_v58  ;;  %v4320_v1 = vmax.f32 %v4248_v49, %v4284_v6  ;;  %v4267_v55 = vmul.f32 %v15816_v53, %v4231_v21 }
 0x650   :  { %v4265_v50 = vmul.f32 %v15816_v53, %v4229_v12  ;;  %v4266_v29 = vmul.f32 %v15816_v53, %v4230_v23  ;;  %v4253_v10 = vmul.f32 %v15793_v15, %v4217_v31  ;;  %v4237_v21 = vsub.f32 %v15522_v41, %v15755_v56 }
 0x651   :  { %v4357_v16 = vmul.f32 %v4321_v17, %v19507_v47  ;;  %v4355_v19 = vmul.f32 %v4319_v18, %v19505_v26  ;;  %v4356_v25 = vmul.f32 %v4320_v1, %v19506_v39  ;;  %v4303_v7 = vmul.f32 0.2, %v4267_v55 }
 0x652   :  { %v4301_v36 = vmul.f32 0.2, %v4265_v50  ;;  %v4302_v58 = vmul.f32 0.2, %v4266_v29  ;;  %v4323_v23 = vmax.f32 %v4251_v51, %v4287_v63  ;;  %v4269_v35 = vmul.f32 %v15816_v53, %v4233_v22 }
 0x653   :  { %4434 = vrot.lane.b32.xlu1 %v4357_v16, %s13086_s15  ;;  %v4339_v12 = vmax.f32 %v4267_v55, %v4303_v7  ;;  %v4252_v17 = vmul.f32 %v15793_v15, %v4216_v4  ;;  %v4322_v6 = vmax.f32 %v4250_v44, %v4286_v14  ;;  %v4268_v1 = vmul.f32 %v15816_v53, %v4232_v37 }
 0x654   :  { %v4337_v49 = vmax.f32 %v4265_v50, %v4301_v36  ;;  %v4338_v45 = vmax.f32 %v4266_v29, %v4302_v58  ;;  %v11751_v18 = vpack.i.bf16 %v4355_v19, %v4356_v25  ;;  %v4305_v31 = vmul.f32 0.2, %v4269_v35 }
 0x655   :  { %v4375_v3 = vmul.f32 %v4339_v12, %v19507_v47  ;;  %v4222_v41 = vsub.f32 %v15546_v60, %v15753_v5  ;;  %v4304_v51 = vmul.f32 0.2, %v4268_v1  ;;  %v4254_v22 = vmul.f32 %v15793_v15, %v4218_v30 }
 0x656   :  { %v4373_v46 = vmul.f32 %v4337_v49, %v19505_v26  ;;  %v4374_v55 = vmul.f32 %v4338_v45, %v19506_v39  ;;  %v15848_v14 = vmul.f32 %v15793_v15, %v4219_v54  ;;  %v4270_v47 = vmul.f32 %v15816_v53, %v4234_v8 }
 0x657   :  { %11752 = vrot.lane.b32.xlu1 %v11751_v18, %s13086_s15  ;;  %4440 = vrot.lane.b32.xlu0 %v4375_v3, %s13086_s15  ;;  %v4236_v25 = vsub.f32 %v15513_v33, %v15755_v56  ;;  %v15854_v60 = vmul.f32 %v4323_v23, %v19509_v11  ;;  %v4358_v26 = vmul.f32 %v4322_v6, %v19508_v42  ;;  %v4289_v39 = vmul.f32 0.2, %v4253_v10 }
 0x658   :  { %v4288_v50 = vmul.f32 0.2, %v4252_v17  ;;  %v11756_v30 = vpack.i.bf16 %v4373_v46, %v4374_v55  ;;  %v4341_v44 = vmax.f32 %v4269_v35, %v4305_v31  ;;  %v4340_v37 = vmax.f32 %v4268_v1, %v4304_v51 }
 0x659   :  { %v4271_v4 = vmul.f32 %v15816_v53, %v4235_v13  ;;  %v4290_v63 = vmul.f32 0.2, %v4254_v22  ;;  %v4220_v54 = vsub.f32 %v15532_v24, %v15753_v5  ;;  %v4221_v8 = vsub.f32 %v15537_v48, %v15753_v5 }
 0x65a   :  { %v4240_v33 = vsub.f32 %v15560_v20, %v15755_v56  ;;  %v4306_v46 = vmul.f32 0.2, %v4270_v47  ;;  %v4258_v29 = vmul.f32 %v15793_v15, %v4222_v41  ;;  %v4224_v13 = vsub.f32 %v15567_v2, %v15753_v5 }
 0x65b   :  { %4662 = vrot.lane.b32.xlu0 %v15854_v60, %s13091_s12  ;;  %11757 = vrot.lane.b32.xlu1 %v11756_v30, %s13086_s15  ;;  %v4238_v24 = vsub.f32 %v15540_v0, %v15755_v56  ;;  %v11761_v19 = vpack.i.bf16 %v4357_v16, %v4358_v26  ;;  %v4325_v7 = vmax.f32 %v4253_v10, %v4289_v39  ;;  %v4291_v36 = vmul.f32 0.2, %v15848_v14  ;;  %v19542_v39 = vld [vmem:[#allocation20_spill] sm:$0xff] }
 0x65c   :  { %v4324_v48 = vmax.f32 %v4252_v17, %v4288_v50  ;;  %v15874_v20 = vmul.f32 %v4341_v44, %v19509_v11  ;;  %v4376_v58 = vmul.f32 %v4340_v37, %v19508_v42  ;;  %v4307_v12 = vmul.f32 0.2, %v4271_v4 }
 0x65d   :  { %v4273_v23 = vmul.f32 %v15816_v53, %v4237_v21  ;;  %v4326_v35 = vmax.f32 %v4254_v22, %v4290_v63  ;;  %v4239_v2 = vsub.f32 %v15551_v38, %v15755_v56  ;;  %v4223_v0 = vsub.f32 %v15563_v32, %v15753_v5 }
 0x65e   :  { %v4242_v16 = vsub.f32 %v15584_v43, %v15755_v56  ;;  %v4342_v11 = vmax.f32 %v4270_v47, %v4306_v46  ;;  %v4272_v42 = vmul.f32 %v15816_v53, %v4236_v25  ;;  %v4226_v10 = vsub.f32 %v15592_v62, %v15753_v5  ;;  %v16001_v43 = vld [vmem:[%s19118_s7 + $0x100] sm:$0xf] }
 0x65f   :  { %11762 = vrot.lane.b32.xlu0 %v11761_v19, %s13091_s12  ;;  %4668 = vrot.lane.b32.xlu1 %v15874_v20, %s13091_s12  ;;  %v15891_v21 = vmul.f32 %v4325_v7, %v19511_v27  ;;  %v4360_v38 = vmul.f32 %v4324_v48, %v19510_v61  ;;  %v4327_v32 = vmax.f32 %v15848_v14, %v4291_v36  ;;  %v4309_v6 = vmul.f32 0.2, %v4273_v23 }
 0x660   :  { %v4241_v17 = vsub.f32 %v15576_v34, %v15755_v56  ;;  %v11766_v49 = vpack.i.bf16 %v4375_v3, %v4376_v58  ;;  %v4343_v45 = vmax.f32 %v4271_v4, %v4307_v12  ;;  %v4294_v1 = vmul.f32 0.2, %v4258_v29 }
 0x661   :  { %v15898_v18 = vmul.f32 %v4326_v35, %v19512_v28  ;;  %v4256_v31 = vmul.f32 %v15793_v15, %v4220_v54  ;;  %v4257_v62 = vmul.f32 %v15793_v15, %v4221_v8  ;;  %v4244_v41 = vsub.f32 %v15610_v59, %v15755_v56  ;;  %v19541_v59 = vld [vmem:[#allocation48_spill] sm:$0xff] }
 0x662   :  { %v4378_v3 = vmul.f32 %v4342_v11, %v19510_v61  ;;  %v4308_v55 = vmul.f32 0.2, %v4272_v42  ;;  %v4227_v51 = vsub.f32 %v15607_v57, %v15753_v5  ;;  %v4245_v22 = vsub.f32 %v15625_v9, %v15755_v56 }
 0x663   :  { %4887 = vrot.lane.b32.xlu0 %v15891_v21, %s13098_s20  ;;  %11767 = vrot.lane.b32.xlu1 %v11766_v49, %s13091_s12  ;;  %v11771_v14 = vpack.i.bf16 %v15854_v60, %v4360_v38  ;;  %v15914_v47 = vmul.f32 %v15816_v53, %v4240_v33  ;;  %v4228_v25 = vsub.f32 %v19541_v59, %v15753_v5  ;;  %v4292_v60 = vmul.f32 0.2, %v4256_v31  ;;  %v19544_v38 = vld [vmem:[#allocation28_spill] sm:$0xff] }
 0x664   :  { %v4246_v26 = vsub.f32 %v15630_v52, %v15755_v56  ;;  %v15921_v61 = vmul.f32 %v4343_v45, %v19511_v27  ;;  %v4363_v50 = vmul.f32 %v4327_v32, %v19542_v39  ;;  %v4345_v57 = vmax.f32 %v4273_v23, %v4309_v6  ;;  %v19545_v6 = vld [vmem:[#allocation22_spill] sm:$0xff] }
 0x665   :  { %v4330_v30 = vmax.f32 %v4258_v29, %v4294_v1  ;;  %v11781_v9 = vpack.i.bf16 %v15891_v21, %v15898_v18  ;;  %v4293_v44 = vmul.f32 0.2, %v4257_v62  ;;  %v4262_v37 = vmul.f32 %v15793_v15, %v4226_v10  ;;  %v19543_v29 = vld [vmem:[#allocation24_spill] sm:$0xff]  ;;  %v19546_v18 = vld [vmem:[#allocation23_spill] sm:$0xff] }
 0x666   :  { %v11776_v52 = vpack.i.bf16 %v15874_v20, %v4378_v3  ;;  %v4344_v27 = vmax.f32 %v4272_v42, %v4308_v55  ;;  %v4274_v4 = vmul.f32 %v15816_v53, %v4238_v24  ;;  %v4312_v63 = vmul.f32 0.2, %v15914_v47  ;;  %v4405_v3 = vld [vmem:[%s19118_s7 + $0x70] sm:$0xff]  ;;  %v4406_v55 = vld [vmem:[%s19118_s7 + $0x78] sm:$0xff] }
 0x667   :  { %11772 = vrot.lane.b32.xlu0 %v11771_v14, %s13098_s20  ;;  %4893 = vrot.lane.b32.xlu1 %v15921_v61, %s13098_s20  ;;  %v4275_v54 = vmul.f32 %v15816_v53, %v4239_v2  ;;  %v4298_v8 = vmul.f32 0.2, %v4262_v37  ;;  %v4280_v33 = vmul.f32 %v15816_v53, %v4244_v41  ;;  %v4381_v46 = vmul.f32 %v4345_v57, %v19542_v39 }
 0x668   :  { %v15937_v19 = vmul.f32 %v4330_v30, %v19543_v29  ;;  %v15940_v7 = vmul.f32 %v15793_v15, %v4224_v13  ;;  %v4263_v48 = vmul.f32 %v15793_v15, %v4227_v51  ;;  %v4328_v36 = vmax.f32 %v4256_v31, %v4292_v60 }
 0x669   :  { %v4329_v20 = vmax.f32 %v4257_v62, %v4293_v44  ;;  %v4334_v24 = vmax.f32 %v4262_v37, %v4298_v8  ;;  %v4316_v58 = vmul.f32 0.2, %v4280_v33  ;;  %v4380_v12 = vmul.f32 %v4344_v27, %v19512_v28  ;;  %v4421_v28 = vld [vmem:[%s19118_s7 + $0xf0] sm:$0xff] }
 0x66a   :  { %v4310_v23 = vmul.f32 0.2, %v4274_v4  ;;  %v4259_v35 = vmul.f32 %v15793_v15, %v4223_v0  ;;  %v4299_v2 = vmul.f32 0.2, %v4263_v48  ;;  %v4348_v13 = vmax.f32 %v15914_v47, %v4312_v63  ;;  %v4422_v0 = vld [vmem:[%s19118_s7 + $0xf8] sm:$0xff] }
 0x66b   :  { %5116 = vrot.lane.b32.xlu0 %v4363_v50, %s13099_s21  ;;  %11777 = vrot.lane.b32.xlu1 %v11776_v52, %s13098_s20  ;;  %v4311_v11 = vmul.f32 0.2, %v4275_v54  ;;  %v4352_v42 = vmax.f32 %v4280_v33, %v4316_v58  ;;  %v4281_v10 = vmul.f32 %v15816_v53, %v4245_v22  ;;  %v4296_v21 = vmul.f32 0.2, %v15940_v7  ;;  %v19547_v47 = vld [vmem:[#allocation29_spill] sm:$0xff] }
 0x66c   :  { %v15951_v32 = vmul.f32 %v4334_v24, %v19544_v38  ;;  %v4335_v49 = vmax.f32 %v4263_v48, %v4299_v2  ;;  %v15954_v45 = vmul.f32 %v15793_v15, %v4228_v25  ;;  %v4364_v1 = vmul.f32 %v4328_v36, %v19545_v6  ;;  %v19551_v36 = vld [vmem:[#allocation25_spill] sm:$0xff] }
 0x66d   :  { %v4365_v31 = vmul.f32 %v4329_v20, %v19546_v18  ;;  %v4317_v62 = vmul.f32 0.2, %v4281_v10  ;;  %v15965_v41 = vmul.f32 %v15816_v53, %v4246_v26  ;;  %v11786_v51 = vpack.i.bf16 %v15921_v61, %v4380_v12 }
 0x66e   :  { %v4346_v22 = vmax.f32 %v4274_v4, %v4310_v23  ;;  %v4295_v14 = vmul.f32 0.2, %v4259_v35  ;;  %v15977_v59 = vmul.f32 %v4335_v49, %v19547_v47  ;;  %v4347_v25 = vmax.f32 %v4275_v54, %v4311_v11 }
 0x66f   :  { %11782 = vrot.lane.b32.xlu0 %v11781_v9, %s13099_s21  ;;  %5122 = vrot.lane.b32.xlu1 %v4381_v46, %s13099_s21  ;;  %v15980_v26 = vmul.f32 %v4352_v42, %v19544_v38  ;;  %v4353_v39 = vmax.f32 %v4281_v10, %v4317_v62  ;;  %v15982_v50 = vpack.c.bf16 %v4422_v0, %v4421_v28  ;;  %v19552_v42 = vld [vmem:[#allocation27_spill] sm:$0xff]  ;;  %v4318_v0 = vmul.f32 0.2, %v15965_v41 }
 0x670   :  { %v4278_v57 = vmul.f32 %v15816_v53, %v4242_v16  ;;  %v4277_v61 = vmul.f32 %v15816_v53, %v4241_v17  ;;  %v11821_v30 = vpack.i.bf16 %v15951_v32, %v15977_v59  ;;  %v15994_v9 = vpack.c.bf16 %v4406_v55, %v4405_v3  ;;  %v19548_v17 = vld [vmem:[#allocation51_spill] sm:$0xff] }
 0x671   :  { %v4389_v60 = vmul.f32 %v4353_v39, %v19547_v47  ;;  %10754 = vmatprep.subr.bf16.mxu0 %v15982_v50  ;;  %v4384_v34 = vmul.f32 %v4348_v13, %v19543_v29  ;;  %v4332_v16 = vmax.f32 %v15940_v7, %v4296_v21  ;;  %v4225_v44 = vsub.f32 %v19548_v17, %v15753_v5  ;;  %v19549_v5 = vld [vmem:[#allocation49_spill] sm:$0xff]  ;;  %v19550_v29 = vld [vmem:[#allocation26_spill] sm:$0xff]  ;;  %v19559_v17 = vld [vmem:[#allocation47_spill] sm:$0xff] }
 0x672   :  { %v4382_v37 = vmul.f32 %v4346_v22, %v19545_v6  ;;  %v4383_v52 = vmul.f32 %v4347_v25, %v19546_v18  ;;  %v4331_v27 = vmax.f32 %v4259_v35, %v4295_v14  ;;  %10756 = vmatpush3.bf16.msra.mxu0 %v15994_v9  ;;  %v11791_v63 = vpack.i.bf16 %v4364_v1, %v4365_v31  ;;  %v19553_v6 = vld [vmem:[#allocation30_spill] sm:$0xff]  ;;  %v19556_v39 = vld [vmem:[#allocation37_spill] sm:$0xff] }
 0x673   :  { %5344 = vrot.lane.b32.xlu0 %v15937_v19, %s13100_s14  ;;  %11787 = vrot.lane.b32.xlu1 %v11786_v51, %s13099_s21  ;;  %v11826_v4 = vpack.i.bf16 %v15980_v26, %v4389_v60  ;;  %v4314_v54 = vmul.f32 0.2, %v4278_v57  ;;  %v4313_v8 = vmul.f32 0.2, %v4277_v61  ;;  %v4261_v33 = vmul.f32 %v15793_v15, %v4225_v44  ;;  %v19554_v51 = vld [vmem:[#allocation50_spill] sm:$0xff] }
 0x674   :  { %10386 = vmatprep.subr.msk.mxu0 %vm1868_vm7, %v16001_v43  ;;  %v4243_v46 = vsub.f32 %v19549_v5, %v15755_v56  ;;  %v4368_v7 = vmul.f32 %v4332_v16, %v19550_v29  ;;  %v11796_v48 = vpack.i.bf16 %v4382_v37, %v4383_v52  ;;  %v4367_v20 = vmul.f32 %v4331_v27, %v19551_v36  ;;  %v19558_v16 = vld [vmem:[#allocation46_spill] sm:$0xff]  ;;  %v19560_v52 = vld [vmem:[#allocation60_spill] sm:$0xff] }
 0x675   :  { %v4350_v24 = vmax.f32 %v4278_v57, %v4314_v54  ;;  %v4349_v58 = vmax.f32 %v4277_v61, %v4313_v8  ;;  %v4297_v12 = vmul.f32 0.2, %v4261_v33  ;;  %v19561_v27 = vld [vmem:[#allocation56_spill] sm:$0xff]  ;;  %v19562_v54 = vld [vmem:[#allocation38_spill] sm:$0xff]  ;;  %v19563_v8 = vld [vmem:[#allocation59_spill] sm:$0xff] }
 0x676   :  { %v4279_v23 = vmul.f32 %v15816_v53, %v4243_v46  ;;  %v11801_v15 = vpack.i.bf16 %v15937_v19, %v4367_v20  ;;  %v4300_v19 = vmul.f32 0.2, %v15954_v45  ;;  %v19564_v5 = vld [vmem:[#allocation40_spill] sm:$0xff]  ;;  %v19565_v46 = vld [vmem:[#allocation54_spill] sm:$0xff] }
 0x677   :  { %11792 = vrot.lane.b32.xlu0 %v11791_v63, %s13100_s14  ;;  %5350 = vrot.lane.b32.xlu1 %v4384_v34, %s13100_s14  ;;  %v4386_v35 = vmul.f32 %v4350_v24, %v19550_v29  ;;  %v4385_v2 = vmul.f32 %v4349_v58, %v19551_v36  ;;  %v4333_v56 = vmax.f32 %v4261_v33, %v4297_v12  ;;  %v4878_v36 = vld [vmem:[%s19118_s7 + $0x100] sm:$0xf] }
 0x678   :  { %v4315_v13 = vmul.f32 0.2, %v4279_v23  ;;  %v4336_v28 = vmax.f32 %v15954_v45, %v4300_v19  ;;  %v13051_v58 = vld [vmem:[#allocation2] sm:$0xff] }
 0x679   :  { %v11806_v11 = vpack.i.bf16 %v4384_v34, %v4385_v2  ;;  %v4369_v10 = vmul.f32 %v4333_v56, %v19552_v42  ;;  %v16075_v12 = vpack.i.bf16 %v13051_v58, %v13051_v58 }
 0x67a   :  { %v4351_v21 = vmax.f32 %v4279_v23, %v4315_v13  ;;  %v4372_v1 = vmul.f32 %v4336_v28, %v19553_v6 }
 0x67b   :  { %5573 = vrot.lane.b32.xlu0 %v4368_v7, %s13101_s17  ;;  %11797 = vrot.lane.b32.xlu1 %v11796_v48, %s13100_s14  ;;  %v11811_v53 = vpack.i.bf16 %v4368_v7, %v4369_v10  ;;  %v19566_v7 = vld [vmem:[#allocation64_spill] sm:$0xff]  ;;  %s13112_s14 = smov 21  }
 0x67c   :  { %v4387_v38 = vmul.f32 %v4351_v21, %v19552_v42 }
 0x67e   :  { %v11816_v49 = vpack.i.bf16 %v4386_v35, %v4387_v38  ;;  %v5107_v38 = vld [vmem:[%s19118_s7 + $0x100] sm:$0xf] }
 0x67f   :  { %11802 = vrot.lane.b32.xlu0 %v11801_v15, %s13101_s17  ;;  %5579 = vrot.lane.b32.xlu1 %v4386_v35, %s13101_s17 }
 0x683   :  { %5799 = vrot.lane.b32.xlu0 %v15951_v32, %s13102_s1  ;;  %11807 = vrot.lane.b32.xlu1 %v11806_v11, %s13101_s17  ;;  %v4354_v32 = vmax.f32 %v15965_v41, %v4318_v0  ;;  %s13113_s17 = smov 60  }
 0x685   :  { %v4390_v18 = vmul.f32 %v4354_v32, %v19553_v6 }
 0x687   :  { %11812 = vrot.lane.b32.xlu0 %v11811_v53, %s13102_s1  ;;  %5805 = vrot.lane.b32.xlu1 %v15980_v26, %s13102_s1  ;;  %v19555_v26 = vld [vmem:[#allocation53_spill] sm:$0xff] }
 0x68b   :  { %11822 = vrot.lane.b32.xlu0 %v11821_v30, %s13103_s26  ;;  %11817 = vrot.lane.b32.xlu1 %v11816_v49, %s13102_s1  ;;  %v19557_v30 = vld [vmem:[#allocation52_spill] sm:$0xff]  ;;  %s13114_s1 = smov 61  }
 0x68f   :  { %11827 = vrot.lane.b32.xlu0 %v11826_v4, %s13103_s26  ;;  %6028 = vrot.lane.b32.xlu1 %v4372_v1, %s13103_s26 }
 0x693   :  { %6034 = vrot.lane.b32.xlu1 %v4390_v18, %s13103_s26  ;;  %11847 = vrot.lane.b32.xlu0 %v16075_v12, %s13088_s25 }
 0x697   :  { %11832 = vrot.lane.b32.xlu1 %v16075_v12, %s13087_s16  ;;  %11857 = vrot.lane.b32.xlu0 %v16075_v12, %s13090_s29 }
 0x69b   :  { %11837 = vrot.lane.b32.xlu1 %v16075_v12, %s13086_s15  ;;  %11862 = vrot.lane.b32.xlu0 %v16075_v12, %s13091_s12 }
 0x69f   :  { %11842 = vrot.lane.b32.xlu1 %v16075_v12, %s13104_s0 }
 0x6a3   :  { %11852 = vrot.lane.b32.xlu1 %v16075_v12, %s13105_s11  ;;  %v5766_v12 = vld [vmem:[%s19118_s7 + $0x40] sm:$0xff] }
 0x6c5   :  { %v4435_v31 = vpop.permute.xlu1 %4434 }
 0x6c6   :  { %10383 = vmatprep.mubr.msk.f32.mxu1 %vm4450_vm10, %v4435_v31 }
 0x6c9   :  { %v4441_v62 = vpop.permute.xlu0 %4440  ;;  %v11753_v45 = vpop.permute.xlu1 %11752 }
 0x6ca   :  { %v11755_v3 = vunpack.i.h.bf16 %v11753_v45  ;;  %v11754_v55 = vunpack.i.l.bf16 %v11753_v45  ;;  %10384 = vmatmul.mubr.msk.f32.vlgmr.msra.gmra.mrb[32].mxu1 %vm4450_vm10, %v4441_v62 }
 0x6cb   :  { %10760 = vmatpush3.bf16.msra.mxu1 %v15665_v40 }
 0x6cc   :  { %10762 = vmatprep.subr.bf16.mxu1 %v19554_v51  ;;  %v4443_v41 = vsel %vm106_vm4, %v11754_v55, %v4435_v31  ;;  %v4442_v22 = vsel %vm106_vm4, %v11755_v3, %v11754_v55  ;;  %v5333_v3 = vld [vmem:[%s19118_s7 + $0x100] sm:$0xf] }
 0x6cd   :  { %v4663_v14 = vpop.permute.xlu0 %4662  ;;  %v11758_v47 = vpop.permute.xlu1 %11757  ;;  %4522 = vmatprep.mubr.f32.mxu0 %v4443_v41 }
 0x6ce   :  { %v11760_v59 = vunpack.i.h.bf16 %v11758_v47  ;;  %v11759_v25 = vunpack.i.l.bf16 %v11758_v47  ;;  %4523 = vmatmul.mubr.f32.vlgmr.msra.gmra.mrb[32].mxu0 %v4442_v22 }
 0x6cf   :  { %10764 = vmatpush3.bf16.msra.mxu1 %v19555_v26  ;;  %10387 = vmatpush3.msk.msra.mxu0 %vm1868_vm7, %v16001_v43 }
 0x6d0   :  { %10766 = vmatprep.subr.bf16.mxu1 %v19556_v39  ;;  %v4445_v57 = vsel %vm106_vm4, %v11759_v25, %v4441_v62  ;;  %v4444_v61 = vsel %vm106_vm4, %v11760_v59, %v11759_v25  ;;  %10790 = vmatprep.subr.bf16.mxu0 %v19557_v30 }
 0x6d1   :  { %v11763_v60 = vpop.permute.xlu0 %11762  ;;  %4527 = vmatprep.mubr.f32.mxu0 %v4445_v57  ;;  %v4669_v44 = vpop.permute.xlu1 %4668 }
 0x6d2   :  { %v11764_v34 = vunpack.i.l.bf16 %v11763_v60  ;;  %4528 = vmatmul.mubr.f32.gmra.mrb[34].mxu0 %v4444_v61  ;;  %v11765_v48 = vunpack.i.h.bf16 %v11763_v60 }
 0x6d3   :  { %10768 = vmatpush3.bf16.msra.mxu1 %v19558_v16  ;;  %10388 = vmatprep.mubr.msk.f32.mxu0 %vm4450_vm10, %v4663_v14 }
 0x6d4   :  { %10770 = vmatprep.subr.bf16.mxu1 %v19559_v17  ;;  %v4671_v43 = vsel %vm203_vm6, %v11764_v34, %v4663_v14  ;;  %v4670_v35 = vsel %vm203_vm6, %v11765_v48, %v11764_v34 }
 0x6d5   :  { %v4888_v37 = vpop.permute.xlu0 %4887  ;;  %4749 = vmatprep.mubr.f32.mxu1 %v4671_v43  ;;  %v11768_v29 = vpop.permute.xlu1 %11767 }
 0x6d6   :  { %10389 = vmatmul.mubr.msk.f32.vlgmr.msra.gmra.mrb[36].mxu0 %vm4450_vm10, %v4669_v44  ;;  %v11769_v20 = vunpack.i.l.bf16 %v11768_v29  ;;  %v11770_v23 = vunpack.i.h.bf16 %v11768_v29 }
 0x6d7   :  { %10772 = vmatpush3.bf16.msra.mxu1 %v19560_v52  ;;  %10792 = vmatpush3.bf16.msra.mxu0 %v15665_v40 }
 0x6d8   :  { %10774 = vmatprep.subr.bf16.mxu1 %v19561_v27  ;;  %10794 = vmatprep.subr.bf16.mxu0 %v19554_v51  ;;  %v4673_v2 = vsel %vm203_vm6, %v11769_v20, %v4669_v44  ;;  %v4672_v13 = vsel %vm203_vm6, %v11770_v23, %v11769_v20  ;;  %v5767_v23 = vld [vmem:[%s19118_s7 + $0x48] sm:$0xff] }
 0x6d9   :  { %v16056_v4 = vpop.permute.xlu0 %11772  ;;  %v4894_v15 = vpop.permute.xlu1 %4893 }
 0x6da   :  { %v11774_v63 = vunpack.i.l.bf16 %v16056_v4  ;;  %v11775_v10 = vunpack.i.h.bf16 %v16056_v4 }
 0x6db   :  { %10776 = vmatpush3.bf16.msra.mxu1 %v19562_v54  ;;  %10796 = vmatpush3.bf16.msra.mxu0 %v19555_v26 }
 0x6dc   :  { %10778 = vmatprep.subr.bf16.mxu1 %v19563_v8  ;;  %10798 = vmatprep.subr.bf16.mxu0 %v19556_v39  ;;  %v4897_v33 = vsel %vm4895_vm11, %v11774_v63, %v4888_v37  ;;  %v4896_v28 = vsel %vm4895_vm11, %v11775_v10, %v11774_v63  ;;  %v6003_v10 = vld [vmem:[%s19118_s7 + $0x80] sm:$0xff] }
 0x6dd   :  { %4975 = vmatprep.mubr.f32.mxu0 %v4897_v33  ;;  %v5117_v24 = vpop.permute.xlu0 %5116  ;;  %v11778_v11 = vpop.permute.xlu1 %11777 }
 0x6de   :  { %v11779_v21 = vunpack.i.l.bf16 %v11778_v11  ;;  %v11780_v49 = vunpack.i.h.bf16 %v11778_v11  ;;  %v5790_v11 = vld [vmem:[%s19118_s7 + $0x100] sm:$0xf] }
 0x6df   :  { %10780 = vmatpush3.bf16.msra.mxu1 %v19564_v5  ;;  %10800 = vmatpush3.bf16.msra.mxu0 %v19558_v16 }
 0x6e0   :  { %10782 = vmatprep.subr.bf16.mxu1 %v19565_v46  ;;  %10802 = vmatprep.subr.bf16.mxu0 %v19559_v17  ;;  %v4899_v0 = vsel %vm4895_vm11, %v11779_v21, %v4894_v15  ;;  %v4898_v1 = vsel %vm4895_vm11, %v11780_v49, %v11779_v21  ;;  %v6004_v21 = vld [vmem:[%s19118_s7 + $0x88] sm:$0xff]  ;;  %vm5526_vm11 = vcmask 1048184  }
 0x6e1   :  { %v16088_v56 = vpop.permute.xlu0 %11782  ;;  %v5123_v18 = vpop.permute.xlu1 %5122  ;;  %v5771_v49 = vld [vmem:[%s19118_s7 + $0x68] sm:$0xff] }
 0x6e2   :  { %v11784_v42 = vunpack.i.l.bf16 %v16088_v56  ;;  %v11785_v45 = vunpack.i.h.bf16 %v16088_v56 }
 0x6e3   :  { %10784 = vmatpush3.bf16.msra.mxu1 %v19566_v7  ;;  %10804 = vmatpush3.bf16.msra.mxu0 %v19560_v52 }
 0x6e4   :  { %10786 = vmatprep.subr.bf16.mxu1 %v15982_v50  ;;  %10806 = vmatprep.subr.bf16.mxu0 %v19561_v27  ;;  %v5126_v19 = vsel %vm5124_vm12, %v11784_v42, %v5117_v24  ;;  %v5125_v47 = vsel %vm5124_vm12, %v11785_v45, %v11784_v42 }
 0x6e5   :  { %v16105_v53 = vpop.permute.xlu0 %5344  ;;  %v11788_v62 = vpop.permute.xlu1 %11787 }
 0x6e6   :  { %v11789_v55 = vunpack.i.l.bf16 %v11788_v62  ;;  %v11790_v22 = vunpack.i.h.bf16 %v11788_v62  ;;  %v5987_v62 = vld [vmem:[%s19118_s7] sm:$0xff] }
 0x6e7   :  { %10788 = vmatpush3.bf16.msra.mxu1 %v15994_v9  ;;  %10808 = vmatpush3.bf16.msra.mxu0 %v19562_v54 }
 0x6e8   :  { %10391 = vmatprep.subr.msk.mxu1 %vm1868_vm7, %v4878_v36  ;;  %10810 = vmatprep.subr.bf16.mxu0 %v19563_v8  ;;  %v5128_v59 = vsel %vm5124_vm12, %v11789_v55, %v5123_v18  ;;  %v5127_v57 = vsel %vm5124_vm12, %v11790_v22, %v11789_v55  ;;  %v5772_v55 = vld [vmem:[%s19118_s7 + $0x70] sm:$0xff]  ;;  %vm5528_vm12 = vcmask 121856  }
 0x6e9   :  { %v16121_v6 = vpop.permute.xlu0 %11792  ;;  %v5351_v14 = vpop.permute.xlu1 %5350 }
 0x6ea   :  { %4750 = vmatmul.mubr.f32.vlgmr.msra.gmra.mrb[34].mxu1 %v4670_v35  ;;  %v11794_v32 = vunpack.i.l.bf16 %v16121_v6  ;;  %v11795_v34 = vunpack.i.h.bf16 %v16121_v6  ;;  %v5788_v6 = vld [vmem:[%s19118_s7 + $0xf0] sm:$0xff] }
 0x6eb   :  { %4754 = vmatprep.mubr.f32.mxu1 %v4673_v2  ;;  %10812 = vmatpush3.bf16.msra.mxu0 %v19564_v5  ;;  %v5768_v2 = vld [vmem:[%s19118_s7 + $0x50] sm:$0xff] }
 0x6ec   :  { %10392 = vmatpush3.msk.msra.mxu1 %vm1868_vm7, %v4878_v36  ;;  %10814 = vmatprep.subr.bf16.mxu0 %v19565_v46  ;;  %v5354_v31 = vsel %vm5352_vm13, %v11794_v32, %v16105_v53  ;;  %v5353_v33 = vsel %vm5352_vm13, %v11795_v34, %v11794_v32  ;;  %v5989_v34 = vld [vmem:[%s19118_s7 + $0x10] sm:$0xff] }
 0x6ed   :  { %10822 = vmatprep.subr.bf16.mxu1 %v19557_v30  ;;  %v5574_v41 = vpop.permute.xlu0 %5573  ;;  %v11798_v61 = vpop.permute.xlu1 %11797 }
 0x6ee   :  { %4755 = vmatmul.mubr.f32.gmra.mrb[36].mxu1 %v4672_v13  ;;  %v11799_v43 = vunpack.i.l.bf16 %v11798_v61  ;;  %v11800_v63 = vunpack.i.h.bf16 %v11798_v61  ;;  %v5786_v13 = vld [vmem:[%s19118_s7 + $0xe0] sm:$0xff] }
 0x6ef   :  { %10816 = vmatpush3.bf16.msra.mxu0 %v19566_v7  ;;  %10393 = vmatprep.mubr.msk.f32.mxu1 %vm4450_vm10, %v4888_v37  ;;  %v5564_v37 = vld [vmem:[%s19118_s7 + $0x100] sm:$0xf] }
 0x6f0   :  { %10818 = vmatprep.subr.bf16.mxu0 %v15982_v50  ;;  %v5356_v29 = vsel %vm5352_vm13, %v11799_v43, %v5351_v14  ;;  %v5355_v36 = vsel %vm5352_vm13, %v11800_v63, %v11799_v43  ;;  %v5990_v43 = vld [vmem:[%s19118_s7 + $0x18] sm:$0xff]  ;;  %v6008_v63 = vld [vmem:[%s19118_s7 + $0xa8] sm:$0xff]  ;;  %vm5755_vm13 = vcmask 662664  }
 0x6f1   :  { %v16165_v25 = vpop.permute.xlu0 %11802 }
 0x6f2   :  { %10394 = vmatmul.mubr.msk.f32.vlgmr.msra.gmra.mrb[38].mxu1 %vm4450_vm10, %v4894_v15  ;;  %v11804_v60 = vunpack.i.l.bf16 %v16165_v25  ;;  %v11805_v56 = vunpack.i.h.bf16 %v16165_v25 }
 0x6f3   :  { %10824 = vmatpush3.bf16.msra.mxu1 %v15665_v40  ;;  %10820 = vmatpush3.bf16.msra.mxu0 %v15994_v9 }
 0x6f4   :  { %5204 = vmatprep.mubr.f32.mxu1 %v5126_v19  ;;  %10826 = vmatprep.subr.bf16.mxu1 %v19554_v51  ;;  %v5583_v4 = vsel %vm5581_vm14, %v11804_v60, %v5574_v41  ;;  %v5770_v19 = vld [vmem:[%s19118_s7 + $0x60] sm:$0xff] }
 0x6f5   :  { %10396 = vmatprep.subr.msk.mxu0 %vm1868_vm7, %v5107_v38  ;;  %v16177_v44 = vpop.permute.xlu0 %5799 }
 0x6f6   :  { %4976 = vmatmul.mubr.f32.vlgmr.msra.gmra.mrb[38].mxu0 %v4896_v28 }
 0x6f7   :  { %10828 = vmatpush3.bf16.msra.mxu1 %v19555_v26  ;;  %4980 = vmatprep.mubr.f32.mxu0 %v4899_v0  ;;  %v10949_v0 = vpack.c.bf16 %v6004_v21, %v6003_v10 }
 0x6f8   :  { %10830 = vmatprep.subr.bf16.mxu1 %v19556_v39  ;;  %10397 = vmatpush3.msk.msra.mxu0 %vm1868_vm7, %v5107_v38 }
 0x6f9   :  { %10854 = vmatprep.subr.bf16.mxu0 %v19557_v30  ;;  %v16195_v48 = vpop.permute.xlu0 %11812 }
 0x6fa   :  { %4981 = vmatmul.mubr.f32.gmra.mrb[40].mxu0 %v4898_v1  ;;  %v11814_v20 = vunpack.i.l.bf16 %v16195_v48  ;;  %v5789_v1 = vld [vmem:[%s19118_s7 + $0xf8] sm:$0xff] }
 0x6fb   :  { %10832 = vmatpush3.bf16.msra.mxu1 %v19558_v16  ;;  %10398 = vmatprep.mubr.msk.f32.mxu0 %vm4450_vm10, %v5117_v24  ;;  %v16205_v24 = vpop.permute.xlu1 %5579  ;;  %v10945_v45 = vpack.c.bf16 %v5789_v1, %v5788_v6 }
 0x6fc   :  { %10834 = vmatprep.subr.bf16.mxu1 %v19559_v17 }
 0x6fe   :  { %10399 = vmatmul.mubr.msk.f32.vlgmr.msra.gmra.mrb[42].mxu0 %vm4450_vm10, %v5123_v18 }
 0x6ff   :  { %10836 = vmatpush3.bf16.msra.mxu1 %v19560_v52  ;;  %10856 = vmatpush3.bf16.msra.mxu0 %v15665_v40 }
 0x700   :  { %5432 = vmatprep.mubr.f32.mxu0 %v5354_v31  ;;  %10838 = vmatprep.subr.bf16.mxu1 %v19561_v27  ;;  %v10943_v31 = vpack.c.bf16 %v5771_v49, %v5770_v19 }
 0x701   :  { %10858 = vmatprep.subr.bf16.mxu0 %v19554_v51 }
 0x703   :  { %10840 = vmatpush3.bf16.msra.mxu1 %v19562_v54  ;;  %10860 = vmatpush3.bf16.msra.mxu0 %v19555_v26 }
 0x704   :  { %10842 = vmatprep.subr.bf16.mxu1 %v19563_v8  ;;  %10862 = vmatprep.subr.bf16.mxu0 %v19556_v39 }
 0x707   :  { %10844 = vmatpush3.bf16.msra.mxu1 %v19564_v5  ;;  %10864 = vmatpush3.bf16.msra.mxu0 %v19558_v16 }
 0x708   :  { %10846 = vmatprep.subr.bf16.mxu1 %v19565_v46  ;;  %10866 = vmatprep.subr.bf16.mxu0 %v19559_v17 }
 0x70b   :  { %10848 = vmatpush3.bf16.msra.mxu1 %v19566_v7  ;;  %10868 = vmatpush3.bf16.msra.mxu0 %v19560_v52 }
 0x70c   :  { %10850 = vmatprep.subr.bf16.mxu1 %v15982_v50  ;;  %10870 = vmatprep.subr.bf16.mxu0 %v19561_v27 }
 0x70f   :  { %10852 = vmatpush3.bf16.msra.mxu1 %v15994_v9  ;;  %10872 = vmatpush3.bf16.msra.mxu0 %v19562_v54 }
 0x710   :  { %10874 = vmatprep.subr.bf16.mxu0 %v19563_v8  ;;  %10401 = vmatprep.subr.msk.mxu1 %vm1868_vm7, %v5333_v3 }
 0x712   :  { %5205 = vmatmul.mubr.f32.vlgmr.msra.gmra.mrb[40].mxu1 %v5125_v47  ;;  %v6006_v47 = vld [vmem:[%s19118_s7 + $0x98] sm:$0xff] }
 0x713   :  { %5209 = vmatprep.mubr.f32.mxu1 %v5128_v59  ;;  %10876 = vmatpush3.bf16.msra.mxu0 %v19564_v5  ;;  %v11823_v59 = vpop.permute.xlu0 %11822 }
 0x714   :  { %10878 = vmatprep.subr.bf16.mxu0 %v19565_v46  ;;  %10402 = vmatpush3.msk.msra.mxu1 %vm1868_vm7, %v5333_v3  ;;  %v5988_v3 = vld [vmem:[%s19118_s7 + $0x8] sm:$0xff] }
 0x715   :  { %10886 = vmatprep.subr.bf16.mxu1 %v19557_v30  ;;  %v10951_v25 = vpack.c.bf16 %v5988_v3, %v5987_v62 }
 0x716   :  { %5210 = vmatmul.mubr.f32.gmra.mrb[42].mxu1 %v5127_v57 }
 0x717   :  { %10880 = vmatpush3.bf16.msra.mxu0 %v19566_v7  ;;  %10403 = vmatprep.mubr.msk.f32.mxu1 %vm4450_vm10, %v16105_v53 }
 0x718   :  { %10882 = vmatprep.subr.bf16.mxu0 %v15982_v50 }
 0x71a   :  { %10404 = vmatmul.mubr.msk.f32.vlgmr.msra.gmra.mrb[44].mxu1 %vm4450_vm10, %v5351_v14  ;;  %v6005_v14 = vld [vmem:[%s19118_s7 + $0x90] sm:$0xff] }
 0x71b   :  { %10888 = vmatpush3.bf16.msra.mxu1 %v15665_v40  ;;  %10884 = vmatpush3.bf16.msra.mxu0 %v15994_v9 }
 0x71c   :  { %5661 = vmatprep.mubr.f32.mxu1 %v5583_v4  ;;  %10890 = vmatprep.subr.bf16.mxu1 %v19554_v51  ;;  %v11824_v4 = vunpack.i.l.bf16 %v11823_v59 }
 0x71d   :  { %10406 = vmatprep.subr.msk.mxu0 %vm1868_vm7, %v5564_v37 }
 0x71e   :  { %5433 = vmatmul.mubr.f32.vlgmr.msra.gmra.mrb[44].mxu0 %v5353_v33 }
 0x71f   :  { %10892 = vmatpush3.bf16.msra.mxu1 %v19555_v26  ;;  %5437 = vmatprep.mubr.f32.mxu0 %v5356_v29  ;;  %v6019_v29 = vld [vmem:[%s19118_s7 + $0x100] sm:$0xf] }
 0x720   :  { %10894 = vmatprep.subr.bf16.mxu1 %v19556_v39  ;;  %10407 = vmatpush3.msk.msra.mxu0 %vm1868_vm7, %v5564_v37  ;;  %v11815_v37 = vunpack.i.h.bf16 %v16195_v48 }
 0x721   :  { %10918 = vmatprep.subr.bf16.mxu0 %v19557_v30  ;;  %v5809_v30 = vsel %vm5807_vm15, %v11814_v20, %v16177_v44 }
 0x722   :  { %5438 = vmatmul.mubr.f32.gmra.mrb[46].mxu0 %v5355_v36 }
 0x723   :  { %10896 = vmatpush3.bf16.msra.mxu1 %v19558_v16  ;;  %10408 = vmatprep.mubr.msk.f32.mxu0 %vm4450_vm10, %v5574_v41  ;;  %v5773_v41 = vld [vmem:[%s19118_s7 + $0x78] sm:$0xff] }
 0x724   :  { %10898 = vmatprep.subr.bf16.mxu1 %v19559_v17  ;;  %v5780_v17 = vld [vmem:[%s19118_s7 + $0xb0] sm:$0xff]  ;;  %v10947_v57 = vpack.c.bf16 %v5773_v41, %v5772_v55 }
 0x726   :  { %10409 = vmatmul.mubr.msk.f32.vlgmr.msra.gmra.mrb[48].mxu0 %vm4450_vm10, %v16205_v24 }
 0x727   :  { %10900 = vmatpush3.bf16.msra.mxu1 %v19560_v52  ;;  %10920 = vmatpush3.bf16.msra.mxu0 %v15665_v40  ;;  %v5781_v52 = vld [vmem:[%s19118_s7 + $0xb8] sm:$0xff] }
 0x728   :  { %5887 = vmatprep.mubr.f32.mxu0 %v5809_v30  ;;  %10902 = vmatprep.subr.bf16.mxu1 %v19561_v27  ;;  %v16231_v40 = vpack.c.bf16 %v5781_v52, %v5780_v17  ;;  %v5765_v27 = vld [vmem:[%s19118_s7 + $0x38] sm:$0xff]  ;;  %v5991_v17 = vld [vmem:[%s19118_s7 + $0x20] sm:$0xff]  ;;  %v5992_v52 = vld [vmem:[%s19118_s7 + $0x28] sm:$0xff] }
 0x729   :  { %10922 = vmatprep.subr.bf16.mxu0 %v19554_v51  ;;  %v5764_v51 = vld [vmem:[%s19118_s7 + $0x30] sm:$0xff] }
 0x72b   :  { %10904 = vmatpush3.bf16.msra.mxu1 %v19562_v54  ;;  %10924 = vmatpush3.bf16.msra.mxu0 %v19555_v26  ;;  %v5782_v54 = vld [vmem:[%s19118_s7 + $0xc0] sm:$0xff]  ;;  %v5783_v26 = vld [vmem:[%s19118_s7 + $0xc8] sm:$0xff] }
 0x72c   :  { %10906 = vmatprep.subr.bf16.mxu1 %v19563_v8  ;;  %10926 = vmatprep.subr.bf16.mxu0 %v19556_v39  ;;  %v11808_v8 = vpop.permute.xlu1 %11807  ;;  %v16247_v39 = vpack.c.bf16 %v5765_v27, %v5764_v51  ;;  %v16251_v58 = vpack.c.bf16 %v5783_v26, %v5782_v54  ;;  %v5808_v27 = vsel %vm5807_vm15, %v11815_v37, %v11814_v20  ;;  %v11825_v20 = vunpack.i.h.bf16 %v11823_v59 }
 0x72d   :  { %v11809_v42 = vunpack.i.l.bf16 %v11808_v8  ;;  %v11810_v28 = vunpack.i.h.bf16 %v11808_v8  ;;  %v10959_v26 = vpack.c.bf16 %v5992_v52, %v5991_v17 }
 0x72f   :  { %10908 = vmatpush3.bf16.msra.mxu1 %v19564_v5  ;;  %10928 = vmatpush3.bf16.msra.mxu0 %v19558_v16  ;;  %v5784_v16 = vld [vmem:[%s19118_s7 + $0xd0] sm:$0xff]  ;;  %v5785_v5 = vld [vmem:[%s19118_s7 + $0xd8] sm:$0xff]  ;;  %v5585_v18 = vsel %vm5581_vm14, %v11809_v42, %v16205_v24  ;;  %v5584_v22 = vsel %vm5581_vm14, %v11810_v28, %v11809_v42  ;;  %v10955_v24 = vpack.c.bf16 %v5990_v43, %v5989_v34 }
 0x730   :  { %10910 = vmatprep.subr.bf16.mxu1 %v19565_v46  ;;  %10930 = vmatprep.subr.bf16.mxu0 %v16231_v40  ;;  %v16267_v46 = vpack.c.bf16 %v5767_v23, %v5766_v12  ;;  %v16269_v15 = vpop.permute.xlu1 %5805  ;;  %v16273_v35 = vpack.c.bf16 %v5785_v5, %v5784_v16  ;;  %v11828_v12 = vpop.permute.xlu0 %11827  ;;  %v6037_v16 = vsel %vm6036_vm0, %v11825_v20, %v11824_v4 }
 0x731   :  { %v11830_v23 = vunpack.i.h.bf16 %v11828_v12 }
 0x733   :  { %10912 = vmatpush3.bf16.msra.mxu1 %v19566_v7  ;;  %10932 = vmatpush3.bf16.msra.mxu0 %v16247_v39  ;;  %v5769_v7 = vld [vmem:[%s19118_s7 + $0x58] sm:$0xff] }
 0x734   :  { %10914 = vmatprep.subr.bf16.mxu1 %v15982_v50  ;;  %10934 = vmatprep.subr.bf16.mxu0 %v16251_v58  ;;  %v5787_v50 = vld [vmem:[%s19118_s7 + $0xe8] sm:$0xff]  ;;  %v16299_v53 = vpack.c.bf16 %v5769_v7, %v5768_v2  ;;  %v11818_v32 = vpop.permute.xlu1 %11817 }
 0x735   :  { %v16302_v38 = vpack.c.bf16 %v5787_v50, %v5786_v13  ;;  %v11819_v33 = vunpack.i.l.bf16 %v11818_v32  ;;  %v11820_v51 = vunpack.i.h.bf16 %v11818_v32 }
 0x737   :  { %10916 = vmatpush3.bf16.msra.mxu1 %v15994_v9  ;;  %10936 = vmatpush3.bf16.msra.mxu0 %v16267_v46  ;;  %v5582_v9 = vsel %vm5581_vm14, %v11805_v56, %v11804_v60  ;;  %v10953_v60 = vpack.c.bf16 %v6006_v47, %v6005_v14  ;;  %v5811_v54 = vsel %vm5807_vm15, %v11819_v33, %v16269_v15  ;;  %vm5981_vm14 = vcmask 1048216  }
 0x738   :  { %10938 = vmatprep.subr.bf16.mxu0 %v16273_v35  ;;  %10411 = vmatprep.subr.msk.mxu1 %vm1868_vm7, %v5790_v11  ;;  %v6029_v61 = vpop.permute.xlu1 %6028  ;;  %v5810_v8 = vsel %vm5807_vm15, %v11820_v51, %v11819_v33  ;;  %vm5983_vm15 = vcmask 154624  }
 0x739   :  { %v6038_v36 = vsel %vm6036_vm0, %v11824_v4, %v6029_v61 }
 0x73a   :  { %5662 = vmatmul.mubr.f32.vlgmr.msra.gmra.mrb[46].mxu1 %v5582_v9 }
 0x73b   :  { %5666 = vmatprep.mubr.f32.mxu1 %v5585_v18  ;;  %10940 = vmatpush3.bf16.msra.mxu0 %v16299_v53 }
 0x73c   :  { %10942 = vmatprep.subr.bf16.mxu0 %v16302_v38  ;;  %10412 = vmatpush3.msk.msra.mxu1 %vm1868_vm7, %v5790_v11  ;;  %v6035_v48 = vpop.permute.xlu1 %6034 }
 0x73d   :  { %10950 = vmatprep.subr.bf16.mxu1 %v10949_v0 }
 0x73e   :  { %5667 = vmatmul.mubr.f32.gmra.mrb[48].mxu1 %v5584_v22 }
 0x73f   :  { %10944 = vmatpush3.bf16.msra.mxu0 %v10943_v31  ;;  %10413 = vmatprep.mubr.msk.f32.mxu1 %vm4450_vm10, %v16177_v44  ;;  %v6007_v44 = vld [vmem:[%s19118_s7 + $0xa0] sm:$0xff]  ;;  %s13106_s7 = smov 5  }
 0x740   :  { %10946 = vmatprep.subr.bf16.mxu0 %v10945_v45  ;;  %v10957_v30 = vpack.c.bf16 %v6008_v63, %v6007_v44 }
 0x742   :  { %10414 = vmatmul.mubr.msk.f32.vlgmr.msra.gmra.mrb[50].mxu1 %vm4450_vm10, %v16269_v15 }
 0x743   :  { %10952 = vmatpush3.bf16.msra.mxu1 %v10951_v25  ;;  %10948 = vmatpush3.bf16.msra.mxu0 %v10947_v57 }
 0x744   :  { %6116 = vmatprep.mubr.f32.mxu1 %v6038_v36  ;;  %10954 = vmatprep.subr.bf16.mxu1 %v10953_v60 }
 0x745   :  { %10416 = vmatprep.subr.msk.mxu0 %vm1868_vm7, %v6019_v29 }
 0x746   :  { %5888 = vmatmul.mubr.f32.vlgmr.msra.gmra.mrb[50].mxu0 %v5808_v27  ;;  %v16393_v27 = vpop.permute.xlu1 %11832 }
 0x747   :  { %10956 = vmatpush3.bf16.msra.mxu1 %v10955_v24  ;;  %5892 = vmatprep.mubr.f32.mxu0 %v5811_v54  ;;  %v16395_v54 = vpop.permute.xlu0 %11847 }
 0x748   :  { %10958 = vmatprep.subr.bf16.mxu1 %v10957_v30  ;;  %10417 = vmatpush3.msk.msra.mxu0 %vm1868_vm7, %v6019_v29  ;;  %vm4616_vm7 = vcmask 1048088  }
 0x74a   :  { %5893 = vmatmul.mubr.f32.gmra.mrb[52].mxu0 %v5810_v8 }
 0x74b   :  { %10960 = vmatpush3.bf16.msra.mxu1 %v10959_v26  ;;  %10418 = vmatprep.mubr.msk.f32.mxu0 %vm4450_vm10, %v6029_v61  ;;  %v16397_v26 = vpop.permute.xlu1 %11837 }
 0x74c   :  { %10962 = vmatprep.subr.bf16.mxu1 %v16231_v40  ;;  %v11829_v40 = vunpack.i.l.bf16 %v11828_v12 }
 0x74e   :  { %10419 = vmatmul.mubr.msk.f32.vlgmr.msra.gmra.mrb[54].mxu0 %vm4450_vm10, %v6035_v48  ;;  %vm5298_vm10 = vcmask 597064  }
 0x74f   :  { %10964 = vmatpush3.bf16.msra.mxu1 %v16247_v39  ;;  %v6040_v39 = vsel %vm6036_vm0, %v11829_v40, %v6035_v48  ;;  %v16399_v48 = vpop.permute.xlu0 %11857 }
 0x750   :  { %10966 = vmatprep.subr.bf16.mxu1 %v16251_v58  ;;  %v6039_v58 = vsel %vm6036_vm0, %v11830_v23, %v11829_v40  ;;  %vm6210_vm0 = vcmask 695464  }
 0x753   :  { %10968 = vmatpush3.bf16.msra.mxu1 %v16267_v46 }
 0x754   :  { %10970 = vmatprep.subr.bf16.mxu1 %v16273_v35 }
 0x757   :  { %10972 = vmatpush3.bf16.msra.mxu1 %v16299_v53 }
 0x758   :  { %10974 = vmatprep.subr.bf16.mxu1 %v16302_v38 }
 0x75b   :  { %10976 = vmatpush3.bf16.msra.mxu1 %v10943_v31 }
 0x75c   :  { %10978 = vmatprep.subr.bf16.mxu1 %v10945_v45 }
 0x75f   :  { %10980 = vmatpush3.bf16.msra.mxu1 %v10947_v57 }
 0x762   :  { %6117 = vmatmul.mubr.f32.vlgmr.msra.gmra.mrb[52].mxu1 %v6037_v16  ;;  %v16401_v16 = vpop.permute.xlu1 %11842 }
 0x763   :  { %6121 = vmatprep.mubr.f32.mxu1 %v6040_v39 }
 0x766   :  { %6122 = vmatmul.mubr.f32.gmra.mrb[54].mxu1 %v6039_v58 }
 0x79d   :  { %v10385_v5 = vpop.f32.mrb[32].mxu1 }
 0x79e   :  { %v4599_v46 = vpop.f32.mrb[33].mxu1 }
 0x7a1   :  { %v9985_v15 = vpop.f32.mrb[32].mxu0 }
 0x7a2   :  { %v9986_v35 = vpop.f32.mrb[33].mxu0 }
 0x7a3   :  { %v9987_v2 = vadd.f32 %v9986_v35, %v9985_v15 }
 0x7a5   :  { %v4600_v7 = vadd.f32 %v9987_v2, %v4599_v46  ;;  %v9988_v56 = vpop.f32.mrb[34].mxu0  ;;  %v16405_v2 = vpop.permute.xlu1 %11852 }
 0x7a6   :  { %v9989_v13 = vpop.f32.mrb[35].mxu0 }
 0x7a7   :  { %v9990_v50 = vadd.f32 %v9989_v13, %v9988_v56  ;;  %4610 = vrot.lane.b32.xlu0 %v4600_v7, %s13105_s11 }
 0x7a9   :  { %v4605_v11 = vadd.f32 %v10385_v5, %v9990_v50  ;;  %v10390_v42 = vpop.f32.mrb[36].mxu0  ;;  %v16403_v5 = vpop.permute.xlu0 %11862 }
 0x7aa   :  { %v4826_v10 = vpop.f32.mrb[37].mxu0 }
 0x7ab   :  { %4612 = vrot.lane.b32.xlu1 %v4605_v11, %s13105_s11 }
 0x7bd   :  { %v10026_v21 = vpop.f32.mrb[34].mxu1 }
 0x7be   :  { %v10027_v53 = vpop.f32.mrb[35].mxu1 }
 0x7bf   :  { %v10028_v38 = vadd.f32 %v10027_v53, %v10026_v21 }
 0x7c1   :  { %v4827_v19 = vadd.f32 %v10028_v38, %v4826_v10  ;;  %v10029_v49 = vpop.f32.mrb[36].mxu1 }
 0x7c2   :  { %v10030_v28 = vpop.f32.mrb[37].mxu1 }
 0x7c3   :  { %v10031_v9 = vadd.f32 %v10030_v28, %v10029_v49  ;;  %4837 = vrot.lane.b32.xlu0 %v4827_v19, %s13106_s7 }
 0x7c5   :  { %v4832_v0 = vadd.f32 %v10390_v42, %v10031_v9  ;;  %v10395_v6 = vpop.f32.mrb[38].mxu1 }
 0x7c6   :  { %v5052_v1 = vpop.f32.mrb[39].mxu1 }
 0x7c7   :  { %4839 = vrot.lane.b32.xlu1 %v4832_v0, %s13106_s7  ;;  %s13121_s7 = smov 8  }
 0x7c9   :  { %v10067_v32 = vpop.f32.mrb[38].mxu0 }
 0x7ca   :  { %v10068_v18 = vpop.f32.mrb[39].mxu0 }
 0x7cb   :  { %v10069_v31 = vadd.f32 %v10068_v18, %v10067_v32 }
 0x7cd   :  { %v5053_v62 = vadd.f32 %v10069_v31, %v5052_v1  ;;  %v10070_v45 = vpop.f32.mrb[40].mxu0 }
 0x7ce   :  { %v10071_v3 = vpop.f32.mrb[41].mxu0 }
 0x7cf   :  { %v10072_v55 = vadd.f32 %v10071_v3, %v10070_v45  ;;  %5063 = vrot.lane.b32.xlu0 %v5053_v62, %s13107_s27 }
 0x7d1   :  { %v5058_v41 = vadd.f32 %v10395_v6, %v10072_v55  ;;  %v10400_v22 = vpop.f32.mrb[42].mxu0 }
 0x7d2   :  { %v5281_v14 = vpop.f32.mrb[43].mxu0 }
 0x7d3   :  { %5065 = vrot.lane.b32.xlu1 %v5058_v41, %s13107_s27  ;;  %s13124_s27 = smov 40  }
 0x7e5   :  { %v10108_v47 = vpop.f32.mrb[40].mxu1 }
 0x7e6   :  { %v10109_v59 = vpop.f32.mrb[41].mxu1 }
 0x7e7   :  { %v10110_v25 = vadd.f32 %v10109_v59, %v10108_v47 }
 0x7e9   :  { %v5282_v57 = vadd.f32 %v10110_v25, %v5281_v14  ;;  %v10111_v61 = vpop.f32.mrb[42].mxu1 }
 0x7ea   :  { %v10112_v60 = vpop.f32.mrb[43].mxu1 }
 0x7eb   :  { %v10113_v34 = vadd.f32 %v10112_v60, %v10111_v61  ;;  %5292 = vrot.lane.b32.xlu0 %v5282_v57, %s13108_s28 }
 0x7ed   :  { %v5287_v43 = vadd.f32 %v10400_v22, %v10113_v34  ;;  %v10405_v37 = vpop.f32.mrb[44].mxu1 }
 0x7ee   :  { %v5509_v4 = vpop.f32.mrb[45].mxu1 }
 0x7ef   :  { %5294 = vrot.lane.b32.xlu1 %v5287_v43, %s13108_s28  ;;  %s13125_s28 = smov 32  }
 0x7f1   :  { %v10149_v44 = vpop.f32.mrb[44].mxu0 }
 0x7f2   :  { %v10150_v63 = vpop.f32.mrb[45].mxu0 }
 0x7f3   :  { %v10151_v33 = vadd.f32 %v10150_v63, %v10149_v44 }
 0x7f5   :  { %v5510_v29 = vadd.f32 %v10151_v33, %v5509_v4  ;;  %v10152_v36 = vpop.f32.mrb[46].mxu0 }
 0x7f6   :  { %v10153_v24 = vpop.f32.mrb[47].mxu0 }
 0x7f7   :  { %v10154_v30 = vadd.f32 %v10153_v24, %v10152_v36  ;;  %5520 = vrot.lane.b32.xlu0 %v5510_v29, %s13109_s3 }
 0x7f9   :  { %v5515_v17 = vadd.f32 %v10405_v37, %v10154_v30  ;;  %v10410_v52 = vpop.f32.mrb[48].mxu0 }
 0x7fa   :  { %v5738_v51 = vpop.f32.mrb[49].mxu0 }
 0x7fb   :  { %5522 = vrot.lane.b32.xlu1 %v5515_v17, %s13109_s3  ;;  %s13126_s3 = smov 48  }
 0x80d   :  { %v10190_v8 = vpop.f32.mrb[46].mxu1 }
 0x80e   :  { %v10191_v20 = vpop.f32.mrb[47].mxu1 }
 0x80f   :  { %v10192_v12 = vadd.f32 %v10191_v20, %v10190_v8 }
 0x811   :  { %v5739_v40 = vadd.f32 %v10192_v12, %v5738_v51  ;;  %v10193_v23 = vpop.f32.mrb[48].mxu1 }
 0x812   :  { %v10194_v39 = vpop.f32.mrb[49].mxu1 }
 0x813   :  { %v10195_v58 = vadd.f32 %v10194_v39, %v10193_v23  ;;  %5749 = vrot.lane.b32.xlu0 %v5739_v40, %s13110_s30 }
 0x815   :  { %v5744_v46 = vadd.f32 %v10410_v52, %v10195_v58  ;;  %v10415_v15 = vpop.f32.mrb[50].mxu1 }
 0x816   :  { %v5964_v35 = vpop.f32.mrb[51].mxu1 }
 0x817   :  { %5751 = vrot.lane.b32.xlu1 %v5744_v46, %s13110_s30  ;;  %s13127_s30 = smov 56  }
 0x819   :  { %v10231_v7 = vpop.f32.mrb[50].mxu0  ;;  %v4611_v56 = vpop.permute.xlu0 %4610 }
 0x81a   :  { %v10232_v13 = vpop.f32.mrb[51].mxu0  ;;  %4617 = vst.msk [vmem:[#allocation3 + $0x8] sm:$0xff] %vm4616_vm7, %v4611_v56 }
 0x81b   :  { %4618 = vst.msk [vmem:[#allocation3 + $0x10] sm:$0xff] %vm849_vm8, %v4611_v56  ;;  %v10233_v50 = vadd.f32 %v10232_v13, %v10231_v7 }
 0x81d   :  { %v5965_v11 = vadd.f32 %v10233_v50, %v5964_v35  ;;  %v10234_v42 = vpop.f32.mrb[52].mxu0  ;;  %v4613_v10 = vpop.permute.xlu1 %4612 }
 0x81e   :  { %v10235_v21 = vpop.f32.mrb[53].mxu0  ;;  %4619 = vst.msk [vmem:[#allocation3 + $0x50] sm:$0xff] %vm4616_vm7, %v4613_v10  ;;  %vm6830_vm7 = vcmask 547840  }
 0x81f   :  { %4620 = vst.msk [vmem:[#allocation3 + $0x58] sm:$0xff] %vm849_vm8, %v4613_v10  ;;  %v10236_v53 = vadd.f32 %v10235_v21, %v10234_v42  ;;  %5975 = vrot.lane.b32.xlu0 %v5965_v11, %s13111_s13  ;;  %vm5069_vm8 = vcmask 1048120  }
 0x821   :  { %v5970_v38 = vadd.f32 %v10415_v15, %v10236_v53  ;;  %v10420_v19 = vpop.f32.mrb[54].mxu0  ;;  %v6213_v28 = vld [vmem:[#allocation3 + $0x8] sm:$0xff]  ;;  %v11855_v53 = vunpack.i.h.bf16 %v16405_v2 }
 0x822   :  { %v6193_v49 = vpop.f32.mrb[55].mxu0 }
 0x823   :  { %5977 = vrot.lane.b32.xlu1 %v5970_v38, %s13111_s13  ;;  %v11854_v38 = vunpack.i.l.bf16 %v16405_v2 }
 0x825   :  { %v6220_v9 = vld [vmem:[#allocation3 + $0x50] sm:$0xff] }
 0x826   :  { %v11866_v0 = vpack.i.bf16 %v6220_v9, %v6213_v28 }
 0x828   :  { %11867 = vrot.lane.b32.xlu1 %v11866_v0, %s13088_s25 }
 0x82c   :  { %11872 = vrot.lane.b32.xlu1 %v11866_v0, %s13090_s29 }
 0x830   :  { %11877 = vrot.lane.b32.xlu1 %v11866_v0, %s13091_s12 }
 0x835   :  { %v10272_v6 = vpop.f32.mrb[52].mxu1  ;;  %v4838_v1 = vpop.permute.xlu0 %4837 }
 0x836   :  { %v10273_v32 = vpop.f32.mrb[53].mxu1  ;;  %4844 = vst.msk [vmem:[#allocation3 + $0x10] sm:$0xff] %vm4843_vm2, %v4838_v1 }
 0x837   :  { %v10274_v18 = vadd.f32 %v10273_v32, %v10272_v6 }
 0x839   :  { %v6194_v31 = vadd.f32 %v10274_v18, %v6193_v49  ;;  %v10275_v62 = vpop.f32.mrb[54].mxu1  ;;  %v4840_v45 = vpop.permute.xlu1 %4839 }
 0x83a   :  { %v10276_v3 = vpop.f32.mrb[55].mxu1  ;;  %4845 = vst.msk [vmem:[#allocation3 + $0x58] sm:$0xff] %vm4843_vm2, %v4840_v45  ;;  %vm6357_vm2 = vcmask 506880  }
 0x83b   :  { %v10277_v55 = vadd.f32 %v10276_v3, %v10275_v62  ;;  %6204 = vrot.lane.b32.xlu0 %v6194_v31, %s13112_s14 }
 0x83d   :  { %v6199_v41 = vadd.f32 %v10420_v19, %v10277_v55 }
 0x83f   :  { %6206 = vrot.lane.b32.xlu1 %v6199_v41, %s13112_s14 }
 0x841   :  { %v5064_v22 = vpop.permute.xlu0 %5063 }
 0x842   :  { %5070 = vst.msk [vmem:[#allocation3 + $0x10] sm:$0xff] %vm5069_vm8, %v5064_v22 }
 0x843   :  { %5072 = vst.msk [vmem:[#allocation3 + $0x18] sm:$0xff] %vm5071_vm9, %v5064_v22 }
 0x845   :  { %v5066_v14 = vpop.permute.xlu1 %5065 }
 0x846   :  { %5073 = vst.msk [vmem:[#allocation3 + $0x58] sm:$0xff] %vm5069_vm8, %v5066_v14  ;;  %vm6441_vm8 = vcmask 490496  }
 0x847   :  { %5074 = vst.msk [vmem:[#allocation3 + $0x60] sm:$0xff] %vm5071_vm9, %v5066_v14  ;;  %vm6400_vm9 = vcmask 498688  }
 0x849   :  { %v6214_v47 = vld [vmem:[#allocation3 + $0x10] sm:$0xff] }
 0x84a   :  { %v11901_v59 = vpack.i.bf16 %v6214_v47, %v6213_v28 }
 0x84c   :  { %11902 = vrot.lane.b32.xlu1 %v11901_v59, %s13113_s17  ;;  %11882 = vrot.lane.b32.xlu0 %v11901_v59, %s13087_s16 }
 0x84d   :  { %v6221_v25 = vld [vmem:[#allocation3 + $0x58] sm:$0xff] }
 0x84e   :  { %v11911_v57 = vpack.i.bf16 %v6221_v25, %v6220_v9 }
 0x850   :  { %11912 = vrot.lane.b32.xlu1 %v11911_v57, %s13105_s11  ;;  %11887 = vrot.lane.b32.xlu0 %v11901_v59, %s13086_s15 }
 0x854   :  { %11892 = vrot.lane.b32.xlu0 %v11901_v59, %s13104_s0 }
 0x858   :  { %11897 = vrot.lane.b32.xlu0 %v11901_v59, %s13114_s1 }
 0x85c   :  { %11907 = vrot.lane.b32.xlu0 %v11901_v59, %s13105_s11  ;;  %v11844_v59 = vunpack.i.l.bf16 %v16401_v16 }
 0x85d   :  { %v5293_v61 = vpop.permute.xlu0 %5292 }
 0x85e   :  { %5299 = vst.msk [vmem:[#allocation3 + $0x18] sm:$0xff] %vm5298_vm10, %v5293_v61 }
 0x861   :  { %v5295_v60 = vpop.permute.xlu1 %5294 }
 0x862   :  { %5300 = vst.msk [vmem:[#allocation3 + $0x60] sm:$0xff] %vm5298_vm10, %v5295_v60  ;;  %vm7065_vm10 = vcmask 130048  }
 0x865   :  { %v6215_v34 = vld [vmem:[#allocation3 + $0x18] sm:$0xff] }
 0x866   :  { %v11936_v43 = vpack.i.bf16 %v6220_v9, %v6215_v34  ;;  %v11941_v4 = vpack.i.bf16 %v6215_v34, %v6214_v47  ;;  %v11845_v47 = vunpack.i.h.bf16 %v16401_v16 }
 0x868   :  { %11937 = vrot.lane.b32.xlu0 %v11936_v43, %s13113_s17  ;;  %11917 = vrot.lane.b32.xlu1 %v11936_v43, %s13087_s16 }
 0x869   :  { %v5521_v37 = vpop.permute.xlu0 %5520  ;;  %v6222_v63 = vld [vmem:[#allocation3 + $0x60] sm:$0xff] }
 0x86a   :  { %5527 = vst.msk [vmem:[#allocation3 + $0x20] sm:$0xff] %vm5526_vm11, %v5521_v37  ;;  %v11956_v33 = vpack.i.bf16 %v6222_v63, %v6221_v25 }
 0x86b   :  { %5529 = vst.msk [vmem:[#allocation3 + $0x28] sm:$0xff] %vm5528_vm12, %v5521_v37 }
 0x86c   :  { %11942 = vrot.lane.b32.xlu0 %v11941_v4, %s13088_s25  ;;  %11922 = vrot.lane.b32.xlu1 %v11936_v43, %s13086_s15 }
 0x86d   :  { %v5523_v44 = vpop.permute.xlu1 %5522 }
 0x86e   :  { %5530 = vst.msk [vmem:[#allocation3 + $0x68] sm:$0xff] %vm5526_vm11, %v5523_v44  ;;  %vm54_vm11 = vcmask 195584  }
 0x86f   :  { %5531 = vst.msk [vmem:[#allocation3 + $0x70] sm:$0xff] %vm5528_vm12, %v5523_v44  ;;  %vm9114_vm12 = vcmask 130112  }
 0x870   :  { %11947 = vrot.lane.b32.xlu0 %v11941_v4, %s13090_s29  ;;  %11927 = vrot.lane.b32.xlu1 %v11936_v43, %s13104_s0 }
 0x871   :  { %v6216_v29 = vld [vmem:[#allocation3 + $0x20] sm:$0xff] }
 0x872   :  { %v11981_v36 = vpack.i.bf16 %v6221_v25, %v6216_v29  ;;  %v11996_v17 = vpack.i.bf16 %v6216_v29, %v6215_v34 }
 0x874   :  { %11952 = vrot.lane.b32.xlu0 %v11941_v4, %s13091_s12  ;;  %11932 = vrot.lane.b32.xlu1 %v11936_v43, %s13114_s1 }
 0x875   :  { %v16433_v24 = vld [vmem:[#allocation3 + $0x68] sm:$0xff] }
 0x876   :  { %v12016_v52 = vpack.i.bf16 %v16433_v24, %v6222_v63  ;;  %v11835_v63 = vunpack.i.h.bf16 %v16393_v27 }
 0x878   :  { %11957 = vrot.lane.b32.xlu0 %v11956_v33, %s13087_s16  ;;  %11977 = vrot.lane.b32.xlu1 %v11956_v33, %s13113_s17 }
 0x87c   :  { %11962 = vrot.lane.b32.xlu0 %v11956_v33, %s13086_s15  ;;  %11982 = vrot.lane.b32.xlu1 %v11981_v36, %s13088_s25 }
 0x880   :  { %11967 = vrot.lane.b32.xlu0 %v11956_v33, %s13104_s0  ;;  %11987 = vrot.lane.b32.xlu1 %v11981_v36, %s13090_s29 }
 0x884   :  { %11972 = vrot.lane.b32.xlu0 %v11956_v33, %s13114_s1  ;;  %11992 = vrot.lane.b32.xlu1 %v11981_v36, %s13091_s12  ;;  %v11834_v36 = vunpack.i.l.bf16 %v16393_v27 }
 0x885   :  { %v5750_v30 = vpop.permute.xlu0 %5749 }
 0x886   :  { %5756 = vst.msk [vmem:[#allocation3 + $0x28] sm:$0xff] %vm5755_vm13, %v5750_v30 }
 0x888   :  { %11997 = vrot.lane.b32.xlu0 %v11996_v17, %s13105_s11  ;;  %12017 = vrot.lane.b32.xlu1 %v12016_v52, %s13105_s11 }
 0x889   :  { %v5752_v51 = vpop.permute.xlu1 %5751 }
 0x88a   :  { %5757 = vst.msk [vmem:[#allocation3 + $0x70] sm:$0xff] %vm5755_vm13, %v5752_v51  ;;  %vm9232_vm13 = vcmask 195712  }
 0x88c   :  { %12002 = vrot.lane.b32.xlu0 %v12016_v52, %s13088_s25 }
 0x890   :  { %12007 = vrot.lane.b32.xlu0 %v12016_v52, %s13090_s29 }
 0x891   :  { %v5976_v8 = vpop.permute.xlu0 %5975 }
 0x892   :  { %5982 = vst.msk [vmem:[#allocation3 + $0x28] sm:$0xff] %vm5981_vm14, %v5976_v8 }
 0x893   :  { %5984 = vst.msk [vmem:[#allocation3 + $0x30] sm:$0xff] %vm5983_vm15, %v5976_v8 }
 0x894   :  { %12012 = vrot.lane.b32.xlu0 %v12016_v52, %s13091_s12 }
 0x895   :  { %v5978_v20 = vpop.permute.xlu1 %5977 }
 0x896   :  { %5985 = vst.msk [vmem:[#allocation3 + $0x70] sm:$0xff] %vm5981_vm14, %v5978_v20  ;;  %vm9341_vm14 = vcmask 261312  }
 0x897   :  { %5986 = vst.msk [vmem:[#allocation3 + $0x78] sm:$0xff] %vm5983_vm15, %v5978_v20  ;;  %vm9461_vm15 = vcmask 326912  }
 0x899   :  { %v16443_v12 = vld [vmem:[#allocation3 + $0x28] sm:$0xff] }
 0x89a   :  { %v12036_v40 = vpack.i.bf16 %v16443_v12, %v6216_v29  ;;  %v16449_v23 = vpop.permute.xlu1 %11867 }
 0x89c   :  { %12037 = vrot.lane.b32.xlu1 %v12036_v40, %s13114_s1  ;;  %12022 = vrot.lane.b32.xlu0 %v12036_v40, %s13087_s16 }
 0x89d   :  { %v16519_v4 = vld [vmem:[#allocation3 + $0x70] sm:$0xff] }
 0x89e   :  { %v16452_v39 = vpop.permute.xlu1 %11872  ;;  %v12086_v8 = vpack.i.bf16 %v16519_v4, %v16433_v24 }
 0x8a0   :  { %12027 = vrot.lane.b32.xlu0 %v12036_v40, %s13086_s15 }
 0x8a2   :  { %v16455_v58 = vpop.permute.xlu1 %11877 }
 0x8a4   :  { %12032 = vrot.lane.b32.xlu0 %v12036_v40, %s13104_s0 }
 0x8a8   :  { %12042 = vrot.lane.b32.xlu0 %v12036_v40, %s13113_s17  ;;  %v11840_v40 = vunpack.i.h.bf16 %v16397_v26 }
 0x8ad   :  { %v6205_v46 = vpop.permute.xlu0 %6204 }
 0x8ae   :  { %6211 = vst.msk [vmem:[#allocation3 + $0x30] sm:$0xff] %vm6210_vm0, %v6205_v46 }
 0x8b1   :  { %v6207_v15 = vpop.permute.xlu1 %6206 }
 0x8b2   :  { %6212 = vst.msk [vmem:[#allocation3 + $0x78] sm:$0xff] %vm6210_vm0, %v6207_v15  ;;  %vm9570_vm0 = vcmask 392512  }
 0x8b5   :  { %v6218_v20 = vld [vmem:[#allocation3 + $0x30] sm:$0xff] }
 0x8be   :  { %v16457_v35 = vpop.permute.xlu0 %11882  ;;  %v16461_v56 = vpop.permute.xlu1 %11902 }
 0x8bf   :  { %v11904_v31 = vunpack.i.l.bf16 %v16461_v56  ;;  %v11884_v33 = vunpack.i.l.bf16 %v16457_v35 }
 0x8c1   :  { %v6271_v27 = vsel %vm91_vm3, %v11834_v36, %v11884_v33 }
 0x8c2   :  { %v16459_v7 = vpop.permute.xlu0 %11887  ;;  %v16465_v50 = vpop.permute.xlu1 %11912 }
 0x8c3   :  { %v11915_v42 = vunpack.i.h.bf16 %v16465_v50  ;;  %v11914_v10 = vunpack.i.l.bf16 %v16465_v50  ;;  %v11889_v46 = vunpack.i.l.bf16 %v16459_v7  ;;  %v6225_v50 = vld [vmem:[#allocation3 + $0x78] sm:$0xff] }
 0x8c5   :  { %v6837_v28 = vsel %vm6830_vm7, %v11855_v53, %v11914_v10  ;;  %v6838_v6 = vsel %vm6830_vm7, %v11914_v10, %v11915_v42  ;;  %v11839_v10 = vunpack.i.l.bf16 %v16397_v26 }
 0x8c6   :  { %v16463_v13 = vpop.permute.xlu0 %11892 }
 0x8c7   :  { %v11894_v41 = vunpack.i.l.bf16 %v16463_v13 }
 0x8c9   :  { %v6358_v57 = vsel %vm6357_vm2, %v11844_v59, %v11894_v41 }
 0x8ca   :  { %v16467_v11 = vpop.permute.xlu0 %11897 }
 0x8cb   :  { %v11899_v16 = vunpack.i.l.bf16 %v16467_v11 }
 0x8ce   :  { %v16471_v21 = vpop.permute.xlu0 %11907 }
 0x8cf   :  { %v11910_v19 = vunpack.i.h.bf16 %v16471_v21  ;;  %v11909_v49 = vunpack.i.l.bf16 %v16471_v21  ;;  %v11875_v21 = vunpack.i.h.bf16 %v16452_v39 }
 0x8d1   :  { %v6831_v9 = vsel %vm6830_vm7, %v11854_v38, %v11909_v49  ;;  %v6832_v0 = vsel %vm6830_vm7, %v11909_v49, %v11910_v19  ;;  %v16557_v49 = vpack.i.bf16 %v6218_v20, %v16443_v12 }
 0x8d2   :  { %v10981_v1 = vpack.c.bf16 %v6838_v6, %v6832_v0  ;;  %v10983_v32 = vpack.c.bf16 %v6837_v28, %v6831_v9  ;;  %v6311_v28 = vsel %vm106_vm4, %v11839_v10, %v11889_v46  ;;  %v12141_v10 = vpack.i.bf16 %v6225_v50, %v6218_v20 }
 0x8d4   :  { %10982 = vmatprep.subr.bf16.mxu0 %v10981_v1 }
 0x8d5   :  { %10984 = vmatpush1.bf16.msra.mxu0 %v10983_v32 }
 0x8da   :  { %v16485_v2 = vpop.permute.xlu1 %11917  ;;  %v16487_v18 = vpop.permute.xlu0 %11937 }
 0x8db   :  { %v11940_v62 = vunpack.i.h.bf16 %v16487_v18  ;;  %v11920_v60 = vunpack.i.h.bf16 %v16485_v2 }
 0x8dd   :  { %v12051_v45 = vpack.i.bf16 %v11940_v62, %v11904_v31  ;;  %v6277_v30 = vsel %vm91_vm3, %v11835_v63, %v11920_v60 }
 0x8de   :  { %v16495_v3 = vpop.permute.xlu1 %11922  ;;  %v16497_v55 = vpop.permute.xlu0 %11942  ;;  %v12056_v15 = vpack.i.bf16 %v6277_v30, %v6271_v27 }
 0x8df   :  { %12052 = vrot.lane.b32.xlu0 %v12051_v45, %s13105_s11  ;;  %v11925_v17 = vunpack.i.h.bf16 %v16495_v3  ;;  %v13052_v45 = vld [vmem:[#allocation2] sm:$0xff] }
 0x8e1   :  { %v6317_v24 = vsel %vm106_vm4, %v11840_v40, %v11925_v17 }
 0x8e2   :  { %v16501_v22 = vpop.permute.xlu1 %11927  ;;  %v16503_v14 = vpop.permute.xlu0 %11947  ;;  %v12061_v26 = vpack.i.bf16 %v6317_v24, %v6311_v28  ;;  %v11874_v24 = vunpack.i.l.bf16 %v16452_v39  ;;  %v11919_v28 = vunpack.i.l.bf16 %v16485_v2 }
 0x8e3   :  { %v11930_v25 = vunpack.i.h.bf16 %v16501_v22 }
 0x8e5   :  { %v6365_v61 = vsel %vm6357_vm2, %v11845_v47, %v11930_v25  ;;  %v12111_v47 = vpack.i.bf16 %v13052_v45, %v6218_v20 }
 0x8e6   :  { %v16515_v34 = vpop.permute.xlu1 %11932  ;;  %v16517_v43 = vpop.permute.xlu0 %11952  ;;  %v12066_v37 = vpack.i.bf16 %v6365_v61, %v6358_v57 }
 0x8e7   :  { %v11935_v44 = vunpack.i.h.bf16 %v16515_v34 }
 0x8e8   :  { %12067 = vrot.lane.b32.xlu0 %v12066_v37, %s13105_s11 }
 0x8e9   :  { %v12046_v29 = vpack.i.bf16 %v11935_v44, %v11899_v16 }
 0x8ea   :  { %v16535_v52 = vpop.permute.xlu1 %11977  ;;  %v16537_v51 = vpop.permute.xlu0 %11957 }
 0x8eb   :  { %12047 = vrot.lane.b32.xlu1 %v12046_v29, %s13105_s11 }
 0x8ec   :  { %12087 = vrot.lane.b32.xlu0 %v12086_v8, %s13114_s1 }
 0x8ee   :  { %v16552_v53 = vpop.permute.xlu1 %11982  ;;  %v16554_v38 = vpop.permute.xlu0 %11962 }
 0x8ef   :  { %12057 = vrot.lane.b32.xlu1 %v12056_v15, %s13105_s11  ;;  %v16609_v15 = vpack.i.bf16 %v6225_v50, %v16519_v4 }
 0x8f0   :  { %12097 = vrot.lane.b32.xlu0 %v16557_v49, %s13088_s25 }
 0x8f2   :  { %v16565_v9 = vpop.permute.xlu1 %11987  ;;  %v16567_v0 = vpop.permute.xlu0 %11967 }
 0x8f3   :  { %12062 = vrot.lane.b32.xlu1 %v12061_v26, %s13105_s11 }
 0x8f4   :  { %12102 = vrot.lane.b32.xlu0 %v16557_v49, %s13090_s29 }
 0x8f6   :  { %v16572_v12 = vpop.permute.xlu1 %11992  ;;  %v16574_v6 = vpop.permute.xlu0 %11972 }
 0x8f7   :  { %12072 = vrot.lane.b32.xlu1 %v12086_v8, %s13087_s16 }
 0x8f8   :  { %12107 = vrot.lane.b32.xlu0 %v16557_v49, %s13091_s12 }
 0x8fa   :  { %v16579_v1 = vpop.permute.xlu1 %12017  ;;  %v16581_v32 = vpop.permute.xlu0 %11997 }
 0x8fb   :  { %v19283_v59 = vunpack.i.h.bf16 %v16579_v1  ;;  %v12019_v57 = vunpack.i.l.bf16 %v16579_v1  ;;  %v19284_v61 = vunpack.i.h.bf16 %v16581_v32  ;;  %v11999_v37 = vunpack.i.l.bf16 %v16581_v32  ;;  %12077 = vrot.lane.b32.xlu1 %v12086_v8, %s13086_s15 }
 0x8fc   :  { %12112 = vrot.lane.b32.xlu0 %v12111_v47, %s13104_s0 }
 0x8fd   :  { %v6839_v63 = vsel %vm6830_vm7, %v11915_v42, %v12019_v57  ;;  %v6833_v29 = vsel %vm6830_vm7, %v11910_v19, %v11999_v37  ;;  %v6834_v36 = vsel %vm6830_vm7, %v11999_v37, %v19284_v61  ;;  %v6840_v30 = vsel %vm6830_vm7, %v12019_v57, %v19283_v59 }
 0x8fe   :  { %v11017_v40 = vpack.c.bf16 %v6840_v30, %v6834_v36  ;;  %v11019_v27 = vpack.c.bf16 %v6839_v63, %v6833_v29  ;;  %v11990_v42 = vunpack.i.h.bf16 %v16565_v9  ;;  %v11949_v19 = vunpack.i.l.bf16 %v16503_v14  ;;  %v16634_v63 = vpop.permute.xlu0 %12002 }
 0x8ff   :  { %12082 = vrot.lane.b32.xlu1 %v12086_v8, %s13104_s0  ;;  %v11890_v37 = vunpack.i.h.bf16 %v16459_v7  ;;  %v11929_v30 = vunpack.i.l.bf16 %v16501_v22  ;;  %v11995_v59 = vunpack.i.h.bf16 %v16572_v12 }
 0x900   :  { %11018 = vmatprep.subr.bf16.mxu1 %v11017_v40  ;;  %12117 = vrot.lane.b32.xlu0 %v12111_v47, %s13114_s1  ;;  %v6528_v26 = vsel %vm188_vm5, %v11875_v21, %v11990_v42  ;;  %v6522_v4 = vsel %vm188_vm5, %v11874_v24, %v11949_v19 }
 0x901   :  { %11020 = vmatpush1.bf16.msra.mxu1 %v11019_v27  ;;  %v12171_v20 = vpack.i.bf16 %v6528_v26, %v6522_v4  ;;  %v11939_v27 = vunpack.i.l.bf16 %v16487_v18  ;;  %v11905_v26 = vunpack.i.h.bf16 %v16461_v56  ;;  %v11870_v56 = vunpack.i.h.bf16 %v16449_v23 }
 0x902   :  { %v16652_v24 = vpop.permute.xlu0 %12007 }
 0x903   :  { %12092 = vrot.lane.b32.xlu1 %v12086_v8, %s13113_s17  ;;  %v11885_v8 = vunpack.i.h.bf16 %v16457_v35  ;;  %v6312_v35 = vsel %vm106_vm4, %v11889_v46, %v11890_v37  ;;  %v12151_v46 = vpack.i.bf16 %v13052_v45, %v6225_v50  ;;  %v6443_v4 = vsel %vm6441_vm8, %v11905_v26, %v11939_v27 }
 0x904   :  { %12122 = vrot.lane.b32.xlu0 %v12111_v47, %s13113_s17  ;;  %v11924_v47 = vunpack.i.l.bf16 %v16495_v3 }
 0x905   :  { %v6273_v39 = vsel %vm91_vm3, %v11885_v8, %v11919_v28  ;;  %v6272_v57 = vsel %vm91_vm3, %v11884_v33, %v11885_v8  ;;  %v11895_v33 = vunpack.i.h.bf16 %v16463_v13  ;;  %v6442_v13 = vsel %vm6441_vm8, %v11904_v31, %v11905_v26 }
 0x906   :  { %v12176_v29 = vpack.i.bf16 %v6273_v39, %v6272_v57  ;;  %v6313_v36 = vsel %vm106_vm4, %v11890_v37, %v11924_v47  ;;  %v16670_v45 = vpop.permute.xlu0 %12012  ;;  %v12196_v50 = vpack.i.bf16 %v6443_v4, %v6442_v13  ;;  %v11989_v39 = vunpack.i.l.bf16 %v16565_v9 }
 0x907   :  { %12127 = vrot.lane.b32.xlu1 %v16609_v15, %s13088_s25  ;;  %v12181_v40 = vpack.i.bf16 %v6313_v36, %v6312_v35  ;;  %v6360_v21 = vsel %vm6357_vm2, %v11895_v33, %v11929_v30  ;;  %v6359_v7 = vsel %vm6357_vm2, %v11894_v41, %v11895_v33  ;;  %v11985_v41 = vunpack.i.h.bf16 %v16552_v53 }
 0x908   :  { %12142 = vrot.lane.b32.xlu0 %v12141_v10, %s13087_s16  ;;  %v12186_v8 = vpack.i.bf16 %v6360_v21, %v6359_v7  ;;  %v11944_v31 = vunpack.i.l.bf16 %v16497_v55  ;;  %v11869_v36 = vunpack.i.l.bf16 %v16449_v23  ;;  %v11934_v35 = vunpack.i.l.bf16 %v16515_v34 }
 0x909   :  { %v12005_v26 = vunpack.i.h.bf16 %v16634_v63  ;;  %v12004_v7 = vunpack.i.l.bf16 %v16634_v63  ;;  %v11960_v13 = vunpack.i.h.bf16 %v16537_v51 }
 0x90a   :  { %v6482_v23 = vsel %vm156_vm1, %v11869_v36, %v11944_v31 }
 0x90b   :  { %12132 = vrot.lane.b32.xlu1 %v16609_v15, %s13090_s29 }
 0x90c   :  { %12172 = vrot.lane.b32.xlu0 %v12171_v20, %s13105_s11  ;;  %v11975_v20 = vunpack.i.h.bf16 %v16574_v6 }
 0x90e   :  { %v16687_v33 = vpop.permute.xlu0 %12022 }
 0x90f   :  { %12137 = vrot.lane.b32.xlu1 %v16609_v15, %s13091_s12 }
 0x910   :  { %12177 = vrot.lane.b32.xlu0 %v12176_v29, %s13105_s11  ;;  %v11950_v29 = vunpack.i.h.bf16 %v16503_v14  ;;  %v12024_v14 = vunpack.i.l.bf16 %v16687_v33 }
 0x912   :  { %v6524_v21 = vsel %vm188_vm5, %v11950_v29, %v11989_v39  ;;  %v6523_v34 = vsel %vm188_vm5, %v11949_v19, %v11950_v29  ;;  %v16716_v29 = vpop.permute.xlu0 %12027 }
 0x913   :  { %12147 = vrot.lane.b32.xlu1 %v12141_v10, %s13086_s15  ;;  %v11974_v10 = vunpack.i.l.bf16 %v16574_v6 }
 0x914   :  { %12182 = vrot.lane.b32.xlu0 %v12181_v40, %s13105_s11 }
 0x915   :  { %v6407_v57 = vsel %vm6400_vm9, %v11935_v44, %v11974_v10  ;;  %v6408_v37 = vsel %vm6400_vm9, %v11974_v10, %v11975_v20  ;;  %v6488_v44 = vsel %vm156_vm1, %v11870_v56, %v11985_v41  ;;  %v12025_v56 = vunpack.i.h.bf16 %v16687_v33 }
 0x916   :  { %v12216_v40 = vpack.i.bf16 %v6408_v37, %v6407_v57  ;;  %v12166_v4 = vpack.i.bf16 %v6488_v44, %v6482_v23  ;;  %v6489_v57 = vsel %vm156_vm1, %v11985_v41, %v12004_v7  ;;  %v6490_v37 = vsel %vm156_vm1, %v12004_v7, %v12005_v26 }
 0x917   :  { %12152 = vrot.lane.b32.xlu1 %v12151_v46, %s13104_s0  ;;  %v11964_v41 = vunpack.i.l.bf16 %v16554_v38  ;;  %v6275_v7 = vsel %vm91_vm3, %v12024_v14, %v12025_v56  ;;  %v12029_v23 = vunpack.i.l.bf16 %v16716_v29 }
 0x918   :  { %12187 = vrot.lane.b32.xlu0 %v12186_v8, %s13105_s11  ;;  %v11900_v8 = vunpack.i.h.bf16 %v16467_v11  ;;  %v12236_v11 = vpack.i.bf16 %v6490_v37, %v6489_v57 }
 0x919   :  { %v6318_v2 = vsel %vm106_vm4, %v11925_v17, %v11964_v41  ;;  %v6314_v37 = vsel %vm106_vm4, %v11924_v47, %v12029_v23 }
 0x91a   :  { %v6402_v10 = vsel %vm6400_vm9, %v11900_v8, %v11934_v35  ;;  %v6401_v19 = vsel %vm6400_vm9, %v11899_v16, %v11900_v8  ;;  %v6274_v16 = vsel %vm91_vm3, %v11919_v28, %v12024_v14  ;;  %v19288_v8 = vunpack.i.h.bf16 %v16716_v29 }
 0x91b   :  { %12157 = vrot.lane.b32.xlu1 %v12151_v46, %s13114_s1  ;;  %v12191_v36 = vpack.i.bf16 %v6402_v10, %v6401_v19  ;;  %v11969_v10 = vunpack.i.l.bf16 %v16567_v0  ;;  %v11980_v14 = vunpack.i.h.bf16 %v16535_v52 }
 0x91c   :  { %12197 = vrot.lane.b32.xlu0 %v12196_v50, %s13105_s11  ;;  %v11959_v50 = vunpack.i.l.bf16 %v16537_v51  ;;  %v6315_v17 = vsel %vm106_vm4, %v12029_v23, %v19288_v8  ;;  %v11945_v23 = vunpack.i.h.bf16 %v16497_v55 }
 0x91d   :  { %v12251_v47 = vpack.i.bf16 %v6315_v17, %v6314_v37 }
 0x91e   :  { %v6278_v44 = vsel %vm91_vm3, %v11920_v60, %v11959_v50  ;;  %v16736_v60 = vpop.permute.xlu1 %12037 }
 0x91f   :  { %12162 = vrot.lane.b32.xlu1 %v12151_v46, %s13113_s17  ;;  %v12231_v46 = vpack.i.bf16 %v6524_v21, %v6523_v34  ;;  %v11965_v21 = vunpack.i.h.bf16 %v16554_v38  ;;  %v12039_v57 = vunpack.i.l.bf16 %v16736_v60 }
 0x920   :  { %12217 = vrot.lane.b32.xlu0 %v12216_v40, %s13105_s11  ;;  %v6279_v40 = vsel %vm91_vm3, %v11959_v50, %v11960_v13  ;;  %v12246_v50 = vpack.i.bf16 %v6275_v7, %v6274_v16  ;;  %v11984_v7 = vunpack.i.l.bf16 %v16552_v53 }
 0x921   :  { %v12201_v34 = vpack.i.bf16 %v6279_v40, %v6278_v44  ;;  %v6319_v28 = vsel %vm106_vm4, %v11964_v41, %v11965_v21  ;;  %v11979_v41 = vunpack.i.l.bf16 %v16535_v52  ;;  %v6403_v44 = vsel %vm6400_vm9, %v11934_v35, %v12039_v57 }
 0x922   :  { %v12206_v19 = vpack.i.bf16 %v6319_v28, %v6318_v2  ;;  %v16781_v2 = vpop.permute.xlu0 %12032  ;;  %v12010_v28 = vunpack.i.h.bf16 %v16652_v24 }
 0x923   :  { %12167 = vrot.lane.b32.xlu1 %v12166_v4, %s13105_s11  ;;  %v11970_v4 = vunpack.i.h.bf16 %v16567_v0  ;;  %v6449_v16 = vsel %vm6441_vm8, %v11979_v41, %v11980_v14 }
 0x924   :  { %12232 = vrot.lane.b32.xlu0 %v12231_v46, %s13105_s11  ;;  %v19286_v46 = vunpack.i.h.bf16 %v16736_v60 }
 0x925   :  { %v6367_v3 = vsel %vm6357_vm2, %v11969_v10, %v11970_v4 }
 0x926   :  { %v6404_v40 = vsel %vm6400_vm9, %v12039_v57, %v19286_v46 }
 0x927   :  { %12192 = vrot.lane.b32.xlu1 %v12191_v36, %s13105_s11  ;;  %v6366_v36 = vsel %vm6357_vm2, %v11930_v25, %v11969_v10  ;;  %v6448_v25 = vsel %vm6441_vm8, %v11940_v62, %v11979_v41  ;;  %v12261_v35 = vpack.i.bf16 %v6404_v40, %v6403_v44  ;;  %v6484_v62 = vsel %vm156_vm1, %v11945_v23, %v11984_v7 }
 0x928   :  { %12237 = vrot.lane.b32.xlu0 %v12236_v11, %s13105_s11  ;;  %v12211_v11 = vpack.i.bf16 %v6367_v3, %v6366_v36  ;;  %v12009_v10 = vunpack.i.l.bf16 %v16652_v24  ;;  %v12034_v41 = vunpack.i.l.bf16 %v16781_v2  ;;  %v16800_v36 = vpop.permute.xlu0 %12042 }
 0x929   :  { %v19285_v3 = vunpack.i.h.bf16 %v16800_v36 }
 0x92a   :  { %v6529_v37 = vsel %vm188_vm5, %v11990_v42, %v12009_v10  ;;  %v6530_v17 = vsel %vm188_vm5, %v12009_v10, %v12010_v28 }
 0x92b   :  { %12202 = vrot.lane.b32.xlu1 %v12201_v34, %s13105_s11  ;;  %v12221_v34 = vpack.i.bf16 %v6449_v16, %v6448_v25  ;;  %v12241_v55 = vpack.i.bf16 %v6530_v17, %v6529_v37  ;;  %v11994_v37 = vunpack.i.l.bf16 %v16572_v12 }
 0x92c   :  { %12247 = vrot.lane.b32.xlu0 %v12246_v50, %s13105_s11  ;;  %v6483_v50 = vsel %vm156_vm1, %v11944_v31, %v11945_v23  ;;  %v6361_v31 = vsel %vm6357_vm2, %v11929_v30, %v12034_v41 }
 0x92d   :  { %v12226_v57 = vpack.i.bf16 %v6484_v62, %v6483_v50 }
 0x92f   :  { %12207 = vrot.lane.b32.xlu1 %v12206_v19, %s13105_s11  ;;  %v19287_v19 = vunpack.i.h.bf16 %v16781_v2 }
 0x930   :  { %12252 = vrot.lane.b32.xlu0 %v12251_v47, %s13105_s11  ;;  %v12044_v47 = vunpack.i.l.bf16 %v16800_v36 }
 0x931   :  { %v6362_v42 = vsel %vm6357_vm2, %v12034_v41, %v19287_v19 }
 0x932   :  { %v12256_v44 = vpack.i.bf16 %v6362_v42, %v6361_v31  ;;  %v6444_v40 = vsel %vm6441_vm8, %v11939_v27, %v12044_v47  ;;  %v6445_v22 = vsel %vm6441_vm8, %v12044_v47, %v19285_v3  ;;  %v11954_v47 = vunpack.i.l.bf16 %v16517_v43 }
 0x933   :  { %12212 = vrot.lane.b32.xlu1 %v12211_v11, %s13105_s11  ;;  %v12266_v30 = vpack.i.bf16 %v6445_v22, %v6444_v40 }
 0x934   :  { %12262 = vrot.lane.b32.xlu0 %v12261_v35, %s13105_s11 }
 0x937   :  { %12222 = vrot.lane.b32.xlu1 %v12221_v34, %s13105_s11 }
 0x93b   :  { %12227 = vrot.lane.b32.xlu1 %v12226_v57, %s13105_s11 }
 0x93f   :  { %12242 = vrot.lane.b32.xlu1 %v12241_v55, %s13105_s11  ;;  %v11955_v55 = vunpack.i.h.bf16 %v16517_v43 }
 0x941   :  { %v6564_v51 = vsel %vm203_vm6, %v11955_v55, %v11994_v37 }
 0x943   :  { %12257 = vrot.lane.b32.xlu1 %v12256_v44, %s13105_s11 }
 0x947   :  { %12267 = vrot.lane.b32.xlu1 %v12266_v30, %s13105_s11  ;;  %v12015_v30 = vunpack.i.h.bf16 %v16670_v45 }
 0x951   :  { %v16820_v11 = vpop.permute.xlu0 %12052 }
 0x95a   :  { %v16822_v25 = vpop.permute.xlu0 %12067 }
 0x95d   :  { %v16824_v16 = vpop.permute.xlu1 %12047 }
 0x95e   :  { %v16826_v35 = vpop.permute.xlu0 %12087 }
 0x95f   :  { %v19291_v61 = vunpack.i.h.bf16 %v16826_v35 }
 0x961   :  { %v16828_v18 = vpop.permute.xlu1 %12057 }
 0x962   :  { %v16830_v27 = vpop.permute.xlu0 %12097 }
 0x965   :  { %v16832_v23 = vpop.permute.xlu1 %12062 }
 0x966   :  { %v16834_v34 = vpop.permute.xlu0 %12102 }
 0x969   :  { %v16836_v62 = vpop.permute.xlu1 %12072 }
 0x96a   :  { %v19292_v10 = vunpack.i.h.bf16 %v16836_v62  ;;  %v12074_v50 = vunpack.i.l.bf16 %v16836_v62  ;;  %v16840_v57 = vpop.permute.xlu0 %12107 }
 0x96b   :  { %v12110_v63 = vunpack.i.h.bf16 %v16840_v57 }
 0x96c   :  { %v6280_v17 = vsel %vm91_vm3, %v11960_v13, %v12074_v50  ;;  %v6281_v41 = vsel %vm91_vm3, %v12074_v50, %v19292_v10  ;;  %v12014_v13 = vunpack.i.l.bf16 %v16670_v45  ;;  %v12089_v50 = vunpack.i.l.bf16 %v16826_v35  ;;  %v16989_v45 = vld [vmem:[%s19119_s5 + $0x8] sm:$0xff] }
 0x96d   :  { %v16850_v31 = vpop.permute.xlu1 %12077  ;;  %v12271_v42 = vpack.i.bf16 %v6281_v41, %v6280_v17  ;;  %9903 = vmatprep.mubr.msk.f32.mxu0 %vm7065_vm10, %v16989_v45  ;;  %9905 = vmatprep.mubr.msk.f32.mxu1 %vm7065_vm10, %v16989_v45 }
 0x96e   :  { %v19289_v44 = vunpack.i.h.bf16 %v16850_v31  ;;  %v12079_v40 = vunpack.i.l.bf16 %v16850_v31  ;;  %v16855_v22 = vpop.permute.xlu0 %12112  ;;  %v6569_v8 = vsel %vm203_vm6, %v11995_v59, %v12014_v13 }
 0x96f   :  { %12272 = vrot.lane.b32.xlu1 %v12271_v42, %s13105_s11  ;;  %v6563_v42 = vsel %vm203_vm6, %v11954_v47, %v11955_v55 }
 0x970   :  { %v6320_v17 = vsel %vm106_vm4, %v11965_v21, %v12079_v40  ;;  %v6321_v41 = vsel %vm106_vm4, %v12079_v40, %v19289_v44  ;;  %v12281_v40 = vpack.i.bf16 %v6564_v51, %v6563_v42  ;;  %v6570_v44 = vsel %vm203_vm6, %v12014_v13, %v12015_v30 }
 0x971   :  { %v16872_v3 = vpop.permute.xlu1 %12082  ;;  %v12276_v46 = vpack.i.bf16 %v6321_v41, %v6320_v17  ;;  %v6409_v17 = vsel %vm6400_vm9, %v11975_v20, %v12089_v50  ;;  %v12105_v51 = vunpack.i.h.bf16 %v16834_v34  ;;  %v12104_v13 = vunpack.i.l.bf16 %v16834_v34 }
 0x972   :  { %v19290_v19 = vunpack.i.h.bf16 %v16872_v3  ;;  %v12084_v38 = vunpack.i.l.bf16 %v16872_v3  ;;  %v16879_v21 = vpop.permute.xlu0 %12117  ;;  %v19573_v34 = vunpack.i.h.bf16 %v16826_v35  ;;  %v12064_v35 = vunpack.i.l.bf16 %v16832_v23 }
 0x973   :  { %12277 = vrot.lane.b32.xlu1 %v12276_v46, %s13105_s11  ;;  %v6410_v46 = vsel %vm6400_vm9, %v12089_v50, %v19291_v61  ;;  %v12100_v50 = vunpack.i.h.bf16 %v16830_v27  ;;  %v12099_v61 = vunpack.i.l.bf16 %v16830_v27 }
 0x974   :  { %v6368_v55 = vsel %vm6357_vm2, %v11970_v4, %v12084_v38  ;;  %v6369_v41 = vsel %vm6357_vm2, %v12084_v38, %v19290_v19  ;;  %v12291_v38 = vpack.i.bf16 %v6570_v44, %v6569_v8  ;;  %v12296_v19 = vpack.i.bf16 %v6410_v46, %v6409_v17 }
 0x975   :  { %v16900_v42 = vpop.permute.xlu1 %12092  ;;  %v12286_v6 = vpack.i.bf16 %v6369_v41, %v6368_v55  ;;  %v6525_v55 = vsel %vm188_vm5, %v11989_v39, %v12104_v13  ;;  %v6526_v41 = vsel %vm188_vm5, %v12104_v13, %v12105_v51  ;;  %v11880_v39 = vunpack.i.h.bf16 %v16455_v58 }
 0x976   :  { %v12095_v20 = vunpack.i.h.bf16 %v16900_v42  ;;  %v12094_v0 = vunpack.i.l.bf16 %v16900_v42  ;;  %v16904_v4 = vpop.permute.xlu0 %12122  ;;  %v6485_v52 = vsel %vm156_vm1, %v11984_v7, %v12099_v61 }
 0x977   :  { %12287 = vrot.lane.b32.xlu0 %v12286_v6, %s13105_s11  ;;  %12282 = vrot.lane.b32.xlu1 %v12281_v40, %s13105_s11  ;;  %v12311_v6 = vpack.i.bf16 %v6526_v41, %v6525_v55  ;;  %v12125_v27 = vunpack.i.h.bf16 %v16904_v4 }
 0x978   :  { %v6450_v40 = vsel %vm6441_vm8, %v11980_v14, %v12094_v0  ;;  %v6451_v8 = vsel %vm6441_vm8, %v12094_v0, %v12095_v20  ;;  %v6486_v14 = vsel %vm156_vm1, %v12099_v61, %v12100_v50  ;;  %v11879_v61 = vunpack.i.l.bf16 %v16455_v58 }
 0x979   :  { %v16916_v10 = vpop.permute.xlu1 %12127  ;;  %v12301_v13 = vpack.i.bf16 %v6451_v8, %v6450_v40  ;;  %v12306_v40 = vpack.i.bf16 %v6486_v14, %v6485_v52 }
 0x97a   :  { %v12130_v44 = vunpack.i.h.bf16 %v16916_v10  ;;  %v12129_v9 = vunpack.i.l.bf16 %v16916_v10  ;;  %v16926_v17 = vpop.permute.xlu0 %12142  ;;  %v6562_v52 = vsel %vm203_vm6, %v11879_v61, %v11954_v47 }
 0x97b   :  { %12292 = vrot.lane.b32.xlu0 %v12291_v38, %s13105_s11  ;;  %12297 = vrot.lane.b32.xlu1 %v12296_v19, %s13105_s11  ;;  %v6568_v38 = vsel %vm203_vm6, %v11880_v39, %v11995_v59 }
 0x97c   :  { %v6491_v0 = vsel %vm156_vm1, %v12005_v26, %v12129_v9  ;;  %v6492_v19 = vsel %vm156_vm1, %v12129_v9, %v12130_v44  ;;  %v12109_v26 = vunpack.i.l.bf16 %v16840_v57 }
 0x97d   :  { %v16937_v46 = vpop.permute.xlu1 %12132  ;;  %v12316_v8 = vpack.i.bf16 %v6492_v19, %v6491_v0 }
 0x97e   :  { %v12135_v53 = vunpack.i.h.bf16 %v16937_v46  ;;  %v12134_v7 = vunpack.i.l.bf16 %v16937_v46  ;;  %v16951_v55 = vpop.permute.xlu0 %12172 }
 0x97f   :  { %12302 = vrot.lane.b32.xlu0 %v12301_v13, %s13105_s11  ;;  %12312 = vrot.lane.b32.xlu1 %v12311_v6, %s13105_s11  ;;  %v12321_v13 = vpack.i.bf16 %v6568_v38, %v6562_v52  ;;  %v6566_v6 = vsel %vm203_vm6, %v12109_v26, %v12110_v63 }
 0x980   :  { %v6531_v9 = vsel %vm188_vm5, %v12010_v28, %v12134_v7  ;;  %v6532_v58 = vsel %vm188_vm5, %v12134_v7, %v12135_v53  ;;  %v6565_v28 = vsel %vm203_vm6, %v11994_v37, %v12109_v26  ;;  %v12144_v7 = vunpack.i.l.bf16 %v16926_v17 }
 0x981   :  { %v16955_v41 = vpop.permute.xlu1 %12137  ;;  %v12326_v24 = vpack.i.bf16 %v6532_v58, %v6531_v9  ;;  %v12331_v37 = vpack.i.bf16 %v6566_v6, %v6565_v28  ;;  %v12115_v58 = vunpack.i.h.bf16 %v16855_v22 }
 0x982   :  { %v12140_v59 = vunpack.i.h.bf16 %v16955_v41  ;;  %v12139_v39 = vunpack.i.l.bf16 %v16955_v41  ;;  %v16982_v47 = vpop.permute.xlu0 %12177  ;;  %v6276_v26 = vsel %vm91_vm3, %v12025_v56, %v12144_v7  ;;  %v19568_v56 = vunpack.i.h.bf16 %v16716_v29 }
 0x983   :  { %12307 = vrot.lane.b32.xlu0 %v12306_v40, %s13105_s11  ;;  %12317 = vrot.lane.b32.xlu1 %v12316_v8, %s13105_s11  ;;  %v19567_v40 = vunpack.i.h.bf16 %v16836_v62  ;;  %v12351_v52 = vpack.i.bf16 %v12144_v7, %v6276_v26  ;;  %v19570_v29 = vunpack.i.h.bf16 %v16781_v2  ;;  %v19571_v7 = vunpack.i.h.bf16 %v16872_v3 }
 0x984   :  { %v6571_v0 = vsel %vm203_vm6, %v12015_v30, %v12139_v39  ;;  %v6572_v43 = vsel %vm203_vm6, %v12139_v39, %v12140_v59  ;;  %v12145_v30 = vunpack.i.h.bf16 %v16926_v17  ;;  %v12114_v39 = vunpack.i.l.bf16 %v16855_v22 }
 0x985   :  { %v12148_v14 = vpop.permute.xlu1 %12147  ;;  %v12341_v19 = vpack.i.bf16 %v6572_v43, %v6571_v0  ;;  %v11859_v22 = vunpack.i.l.bf16 %v16399_v48  ;;  %v12120_v43 = vunpack.i.h.bf16 %v16879_v21  ;;  %v12069_v3 = vunpack.i.l.bf16 %v16822_v25 }
 0x986   :  { %v16999_v61 = vpop.permute.xlu0 %12182  ;;  %v6282_v17 = vsel %vm91_vm3, %v19567_v40, %v12145_v30  ;;  %v12150_v8 = vunpack.i.h.bf16 %v12148_v14  ;;  %v12149_v9 = vunpack.i.l.bf16 %v12148_v14  ;;  %v19569_v14 = vunpack.i.h.bf16 %v16850_v31 }
 0x987   :  { %12327 = vrot.lane.b32.xlu0 %v12326_v24, %s13105_s11  ;;  %12322 = vrot.lane.b32.xlu1 %v12321_v13, %s13105_s11  ;;  %v12391_v33 = vpack.i.bf16 %v12145_v30, %v6282_v17  ;;  %v6363_v0 = vsel %vm6357_vm2, %v19570_v29, %v12114_v39  ;;  %v6364_v31 = vsel %vm6357_vm2, %v12114_v39, %v12115_v58  ;;  %v11860_v58 = vunpack.i.h.bf16 %v16399_v48 }
 0x988   :  { %v6316_v62 = vsel %vm106_vm4, %v19568_v56, %v12149_v9  ;;  %v6322_v13 = vsel %vm106_vm4, %v19569_v14, %v12150_v8  ;;  %v11864_v39 = vunpack.i.l.bf16 %v16403_v5  ;;  %v12059_v29 = vunpack.i.l.bf16 %v16828_v18 }
 0x989   :  { %v12153_v12 = vpop.permute.xlu1 %12152 }
 0x98a   :  { %v12154_v28 = vunpack.i.l.bf16 %v12153_v12  ;;  %v17021_v6 = vpop.permute.xlu0 %12187 }
 0x98b   :  { %12332 = vrot.lane.b32.xlu0 %v12331_v37, %s13105_s11  ;;  %12342 = vrot.lane.b32.xlu1 %v12341_v19, %s13105_s11  ;;  %v12356_v37 = vpack.i.bf16 %v12149_v9, %v6316_v62  ;;  %v12396_v19 = vpack.i.bf16 %v12150_v8, %v6322_v13  ;;  %v12361_v13 = vpack.i.bf16 %v6364_v31, %v6363_v0  ;;  %v12180_v0 = vunpack.i.h.bf16 %v16982_v47 }
 0x98c   :  { %v6370_v26 = vsel %vm6357_vm2, %v19571_v7, %v12154_v28  ;;  %v12179_v31 = vunpack.i.l.bf16 %v16982_v47 }
 0x98d   :  { %v12158_v38 = vpop.permute.xlu1 %12157 }
 0x98e   :  { %v12160_v17 = vunpack.i.h.bf16 %v12158_v38  ;;  %v12159_v2 = vunpack.i.l.bf16 %v12158_v38  ;;  %v6527_v38 = vsel %vm188_vm5, %v12105_v51, %v11859_v22  ;;  %v17052_v9 = vpop.permute.xlu0 %12197 }
 0x98f   :  { %12337 = vrot.lane.b32.xlu0 %v16557_v49, %s13105_s11  ;;  %12347 = vrot.lane.b32.xlu1 %v16609_v15, %s13105_s11  ;;  %v12155_v49 = vunpack.i.h.bf16 %v12153_v12  ;;  %v11849_v15 = vunpack.i.l.bf16 %v16395_v54  ;;  %v12119_v12 = vunpack.i.l.bf16 %v16879_v21  ;;  %v12070_v21 = vunpack.i.h.bf16 %v16822_v25 }
 0x990   :  { %v6411_v51 = vsel %vm6400_vm9, %v19573_v34, %v12159_v2  ;;  %v6533_v34 = vsel %vm188_vm5, %v12135_v53, %v11860_v58 }
 0x991   :  { %v17013_v24 = vpop.permute.xlu1 %12162  ;;  %v6371_v40 = vsel %vm6357_vm2, %v12154_v28, %v12155_v49  ;;  %v6487_v8 = vsel %vm156_vm1, %v12100_v50, %v11849_v15  ;;  %v6406_v62 = vsel %vm6400_vm9, %v12119_v12, %v12120_v43  ;;  %v12124_v50 = vunpack.i.l.bf16 %v16904_v4 }
 0x992   :  { %v12401_v49 = vpack.i.bf16 %v6371_v40, %v6370_v26  ;;  %v6412_v28 = vsel %vm6400_vm9, %v12159_v2, %v12160_v17  ;;  %v12165_v43 = vunpack.i.h.bf16 %v17013_v24  ;;  %v12065_v4 = vunpack.i.h.bf16 %v16832_v23  ;;  %v17084_v2 = vpop.permute.xlu0 %12217 }
 0x993   :  { %12352 = vrot.lane.b32.xlu0 %v12351_v52, %s13105_s11  ;;  %12392 = vrot.lane.b32.xlu1 %v12391_v33, %s13105_s11  ;;  %v11850_v52 = vunpack.i.h.bf16 %v16395_v54  ;;  %v19572_v33 = vunpack.i.h.bf16 %v16736_v60  ;;  %v12060_v60 = vunpack.i.h.bf16 %v16828_v18  ;;  %v12406_v18 = vpack.i.bf16 %v6412_v28, %v6411_v51 }
 0x994   :  { %v12376_v7 = vpack.i.bf16 %v11849_v15, %v6487_v8  ;;  %v17078_v26 = vpack.i.bf16 %v11859_v22, %v6527_v38  ;;  %v6447_v17 = vsel %vm6441_vm8, %v12124_v50, %v12125_v27  ;;  %v6843_v22 = vsel %vm6830_vm7, %v12059_v29, %v12179_v31 }
 0x995   :  { %v17033_v30 = vpop.permute.xlu1 %12167  ;;  %v6405_v56 = vsel %vm6400_vm9, %v19572_v33, %v12119_v12  ;;  %v12164_v12 = vunpack.i.l.bf16 %v17013_v24  ;;  %v19574_v24 = vunpack.i.h.bf16 %v16800_v36  ;;  %v6844_v38 = vsel %vm6830_vm7, %v12179_v31, %v12180_v0 }
 0x996   :  { %v12189_v29 = vunpack.i.l.bf16 %v17021_v6  ;;  %v12421_v54 = vpack.i.bf16 %v11860_v58, %v6533_v34  ;;  %v12200_v58 = vunpack.i.h.bf16 %v17052_v9 }
 0x997   :  { %12357 = vrot.lane.b32.xlu0 %v12356_v37, %s13105_s11  ;;  %12397 = vrot.lane.b32.xlu1 %v12396_v19, %s13105_s11  ;;  %v12366_v19 = vpack.i.bf16 %v6406_v62, %v6405_v56  ;;  %v6446_v40 = vsel %vm6441_vm8, %v19574_v24, %v12124_v50  ;;  %v12184_v56 = vunpack.i.l.bf16 %v16999_v61  ;;  %v6452_v15 = vsel %vm6441_vm8, %v12095_v20, %v12164_v12 }
 0x998   :  { %v6453_v36 = vsel %vm6441_vm8, %v12164_v12, %v12165_v43  ;;  %v6493_v20 = vsel %vm156_vm1, %v12130_v44, %v11850_v52  ;;  %v12371_v27 = vpack.i.bf16 %v6447_v17, %v6446_v40  ;;  %v12190_v44 = vunpack.i.h.bf16 %v17021_v6  ;;  %v17125_v43 = vpop.permute.xlu0 %12232 }
 0x999   :  { %v17058_v14 = vpop.permute.xlu1 %12192  ;;  %v6855_v10 = vsel %vm6830_vm7, %v12064_v35, %v12184_v56  ;;  %v12416_v24 = vpack.i.bf16 %v11850_v52, %v6493_v20  ;;  %v12220_v17 = vunpack.i.h.bf16 %v17084_v2  ;;  %v6867_v57 = vsel %vm6830_vm7, %v12069_v3, %v12189_v29 }
 0x99a   :  { %v12195_v53 = vunpack.i.h.bf16 %v17058_v14  ;;  %v12194_v12 = vunpack.i.l.bf16 %v17058_v14  ;;  %v12049_v52 = vunpack.i.l.bf16 %v16824_v16 }
 0x99b   :  { %12362 = vrot.lane.b32.xlu0 %v12361_v13, %s13105_s11  ;;  %12402 = vrot.lane.b32.xlu1 %v12401_v49, %s13105_s11  ;;  %v12185_v13 = vunpack.i.h.bf16 %v16999_v61 }
 0x99c   :  { %v6880_v48 = vsel %vm6830_vm7, %v12194_v12, %v12195_v53  ;;  %v6879_v34 = vsel %vm6830_vm7, %v12049_v52, %v12194_v12 }
 0x99d   :  { %v17076_v37 = vpop.permute.xlu1 %12202  ;;  %v6856_v46 = vsel %vm6830_vm7, %v12184_v56, %v12185_v13 }
 0x99e   :  { %v12205_v23 = vunpack.i.h.bf16 %v17076_v37  ;;  %v12204_v33 = vunpack.i.l.bf16 %v17076_v37 }
 0x99f   :  { %12367 = vrot.lane.b32.xlu0 %v12366_v19, %s13105_s11  ;;  %12407 = vrot.lane.b32.xlu1 %v12406_v18, %s13105_s11  ;;  %v6567_v19 = vsel %vm203_vm6, %v12110_v63, %v11864_v39  ;;  %v6868_v63 = vsel %vm6830_vm7, %v12189_v29, %v12190_v44 }
 0x9a0   :  { %v6849_v8 = vsel %vm6830_vm7, %v12060_v60, %v12204_v33  ;;  %v6850_v42 = vsel %vm6830_vm7, %v12204_v33, %v12205_v23  ;;  %v12411_v60 = vpack.i.bf16 %v6453_v36, %v6452_v15  ;;  %v12219_v33 = vunpack.i.l.bf16 %v17084_v2 }
 0x9a1   :  { %v17109_v62 = vpop.permute.xlu1 %12207  ;;  %v10985_v49 = vpack.c.bf16 %v6850_v42, %v6844_v38  ;;  %v10987_v50 = vpack.c.bf16 %v6849_v8, %v6843_v22  ;;  %v11865_v36 = vunpack.i.h.bf16 %v16403_v5  ;;  %v17175_v42 = vpop.permute.xlu0 %12237 }
 0x9a2   :  { %v12210_v51 = vunpack.i.h.bf16 %v17109_v62  ;;  %v12209_v28 = vunpack.i.l.bf16 %v17109_v62  ;;  %v12239_v12 = vunpack.i.l.bf16 %v17175_v42 }
 0x9a3   :  { %10986 = vmatprep.subr.bf16.mxu0 %v10985_v49  ;;  %12372 = vrot.lane.b32.xlu0 %v12371_v27, %s13105_s11  ;;  %v6886_v27 = vsel %vm6830_vm7, %v12219_v33, %v12220_v17 }
 0x9a4   :  { %v6861_v31 = vsel %vm6830_vm7, %v12065_v4, %v12209_v28  ;;  %12412 = vrot.lane.b32.xlu1 %v12411_v60, %s13105_s11  ;;  %10988 = vmatpush1.bf16.msra.mxu0 %v10987_v50  ;;  %v6862_v35 = vsel %vm6830_vm7, %v12209_v28, %v12210_v51  ;;  %v12050_v50 = vunpack.i.h.bf16 %v16824_v16  ;;  %v10997_v41 = vpack.c.bf16 %v6886_v27, %v6880_v48 }
 0x9a5   :  { %v17139_v18 = vpop.permute.xlu1 %12212  ;;  %v10989_v40 = vpack.c.bf16 %v6862_v35, %v6856_v46  ;;  %v10991_v4 = vpack.c.bf16 %v6861_v31, %v6855_v10  ;;  %v12386_v28 = vpack.i.bf16 %v11864_v39, %v6567_v19  ;;  %v12240_v10 = vunpack.i.h.bf16 %v17175_v42 }
 0x9a6   :  { %v12215_v56 = vunpack.i.h.bf16 %v17139_v18  ;;  %v12214_v15 = vunpack.i.l.bf16 %v17139_v18  ;;  %v6885_v16 = vsel %vm6830_vm7, %v12050_v50, %v12219_v33  ;;  %v12054_v35 = vunpack.i.l.bf16 %v16820_v11 }
 0x9a7   :  { %12377 = vrot.lane.b32.xlu0 %v12376_v7, %s13105_s11  ;;  %10990 = vmatprep.subr.bf16.mxu0 %v10989_v40  ;;  %v12199_v7 = vunpack.i.l.bf16 %v17052_v9  ;;  %v10999_v31 = vpack.c.bf16 %v6885_v16, %v6879_v34  ;;  %v12169_v33 = vunpack.i.l.bf16 %v17033_v30  ;;  %v6910_v52 = vsel %vm6830_vm7, %v12239_v12, %v12240_v10 }
 0x9a8   :  { %v6873_v22 = vsel %vm6830_vm7, %v12070_v21, %v12214_v15  ;;  %12417 = vrot.lane.b32.xlu1 %v12416_v24, %s13105_s11  ;;  %10992 = vmatpush1.bf16.msra.mxu0 %v10991_v4  ;;  %v6874_v3 = vsel %vm6830_vm7, %v12214_v15, %v12215_v56  ;;  %v6573_v21 = vsel %vm203_vm6, %v12140_v59, %v11865_v36  ;;  %v12055_v59 = vunpack.i.h.bf16 %v16820_v11 }
 0x9a9   :  { %v17170_v8 = vpop.permute.xlu1 %12222  ;;  %v10993_v25 = vpack.c.bf16 %v6874_v3, %v6868_v63  ;;  %v10995_v38 = vpack.c.bf16 %v6873_v22, %v6867_v57  ;;  %v6892_v46 = vsel %vm6830_vm7, %v12199_v7, %v12200_v58  ;;  %v6891_v4 = vsel %vm6830_vm7, %v12054_v35, %v12199_v7 }
 0x9aa   :  { %v12225_v20 = vunpack.i.h.bf16 %v17170_v8  ;;  %v12224_v49 = vunpack.i.l.bf16 %v17170_v8  ;;  %v12235_v15 = vunpack.i.h.bf16 %v17125_v43  ;;  %v12234_v11 = vunpack.i.l.bf16 %v17125_v43 }
 0x9ab   :  { %12382 = vrot.lane.b32.xlu0 %v17078_v26, %s13105_s11  ;;  %10994 = vmatprep.subr.bf16.mxu0 %v10993_v25  ;;  %v12426_v26 = vpack.i.bf16 %v11865_v36, %v6573_v21  ;;  %v12170_v22 = vunpack.i.h.bf16 %v17033_v30  ;;  %v12175_v25 = vunpack.i.h.bf16 %v16951_v55  ;;  %v12174_v30 = vunpack.i.l.bf16 %v16951_v55 }
 0x9ac   :  { %12422 = vrot.lane.b32.xlu1 %v12421_v54, %s13105_s11  ;;  %10996 = vmatpush1.bf16.msra.mxu0 %v10995_v38  ;;  %v6898_v60 = vsel %vm6830_vm7, %v12224_v49, %v12225_v20  ;;  %v6897_v19 = vsel %vm6830_vm7, %v12055_v59, %v12224_v49  ;;  %v6916_v49 = vsel %vm6830_vm7, %v12234_v11, %v12235_v15 }
 0x9ad   :  { %v17195_v29 = vpop.permute.xlu1 %12227  ;;  %10998 = vmatprep.subr.bf16.mxu0 %v10997_v41  ;;  %v11001_v24 = vpack.c.bf16 %v6898_v60, %v6892_v46  ;;  %v11003_v63 = vpack.c.bf16 %v6897_v19, %v6891_v4  ;;  %v6909_v38 = vsel %vm6830_vm7, %v12170_v22, %v12239_v12  ;;  %v6915_v34 = vsel %vm6830_vm7, %v12174_v30, %v12234_v11 }
 0x9ae   :  { %v12230_v5 = vunpack.i.h.bf16 %v17195_v29  ;;  %v12229_v39 = vunpack.i.l.bf16 %v17195_v29 }
 0x9af   :  { %12387 = vrot.lane.b32.xlu0 %v12386_v28, %s13105_s11  ;;  %v17236_v28 = vpop.permute.xlu0 %12247 }
 0x9b0   :  { %12427 = vrot.lane.b32.xlu1 %v12426_v26, %s13105_s11  ;;  %11000 = vmatpush1.bf16.msra.mxu0 %v10999_v31  ;;  %v6904_v40 = vsel %vm6830_vm7, %v12229_v39, %v12230_v5  ;;  %v6903_v3 = vsel %vm6830_vm7, %v12169_v33, %v12229_v39  ;;  %v12250_v16 = vunpack.i.h.bf16 %v17236_v28  ;;  %v12249_v26 = vunpack.i.l.bf16 %v17236_v28 }
 0x9b1   :  { %v17214_v36 = vpop.permute.xlu1 %12242  ;;  %11002 = vmatprep.subr.bf16.mxu0 %v11001_v24  ;;  %v11005_v48 = vpack.c.bf16 %v6910_v52, %v6904_v40  ;;  %v11007_v21 = vpack.c.bf16 %v6909_v38, %v6903_v3 }
 0x9b2   :  { %v12245_v57 = vunpack.i.h.bf16 %v17214_v36  ;;  %v12244_v54 = vunpack.i.l.bf16 %v17214_v36  ;;  %v6845_v31 = vsel %vm6830_vm7, %v12180_v0, %v12249_v26  ;;  %v6846_v35 = vsel %vm6830_vm7, %v12249_v26, %v12250_v16 }
 0x9b3   :  { %v17242_v55 = vpop.permute.xlu0 %12252 }
 0x9b4   :  { %11004 = vmatpush1.bf16.msra.mxu0 %v11003_v63  ;;  %v6922_v7 = vsel %vm6830_vm7, %v12244_v54, %v12245_v57  ;;  %v6921_v27 = vsel %vm6830_vm7, %v12175_v25, %v12244_v54  ;;  %v12255_v19 = vunpack.i.h.bf16 %v17242_v55  ;;  %v12254_v24 = vunpack.i.l.bf16 %v17242_v55 }
 0x9b5   :  { %11006 = vmatprep.subr.bf16.mxu0 %v11005_v48  ;;  %v11009_v50 = vpack.c.bf16 %v6922_v7, %v6916_v49  ;;  %v11011_v41 = vpack.c.bf16 %v6921_v27, %v6915_v34  ;;  %v17234_v59 = vpop.permute.xlu1 %12257 }
 0x9b6   :  { %v12260_v52 = vunpack.i.h.bf16 %v17234_v59  ;;  %v12259_v37 = vunpack.i.l.bf16 %v17234_v59  ;;  %v6858_v3 = vsel %vm6830_vm7, %v12254_v24, %v12255_v19 }
 0x9b7   :  { %v17262_v33 = vpop.permute.xlu0 %12262 }
 0x9b8   :  { %11008 = vmatpush1.bf16.msra.mxu0 %v11007_v21  ;;  %v12264_v21 = vunpack.i.l.bf16 %v17262_v33  ;;  %v6869_v49 = vsel %vm6830_vm7, %v12190_v44, %v12259_v37  ;;  %v6870_v30 = vsel %vm6830_vm7, %v12259_v37, %v12260_v52 }
 0x9b9   :  { %11010 = vmatprep.subr.bf16.mxu0 %v11009_v50  ;;  %v17238_v60 = vpop.permute.xlu1 %12267 }
 0x9bc   :  { %11012 = vmatpush1.bf16.msra.mxu0 %v11011_v41 }
 0x9e1   :  { %v17244_v46 = vpop.permute.xlu1 %12272 }
 0x9e2   :  { %v12275_v12 = vunpack.i.h.bf16 %v17244_v46  ;;  %v12274_v39 = vunpack.i.l.bf16 %v17244_v46 }
 0x9e4   :  { %v6851_v40 = vsel %vm6830_vm7, %v12205_v23, %v12274_v39  ;;  %v6852_v4 = vsel %vm6830_vm7, %v12274_v39, %v12275_v12  ;;  %v6857_v23 = vsel %vm6830_vm7, %v12185_v13, %v12254_v24  ;;  %v6881_v24 = vsel %vm6830_vm7, %v12195_v53, %v12264_v21 }
 0x9e5   :  { %v17264_v47 = vpop.permute.xlu1 %12277  ;;  %v11021_v0 = vpack.c.bf16 %v6852_v4, %v6846_v35  ;;  %v11023_v11 = vpack.c.bf16 %v6851_v40, %v6845_v31  ;;  %v12270_v40 = vunpack.i.h.bf16 %v17238_v60  ;;  %v12269_v4 = vunpack.i.l.bf16 %v17238_v60 }
 0x9e6   :  { %v12280_v54 = vunpack.i.h.bf16 %v17264_v47  ;;  %v12279_v63 = vunpack.i.l.bf16 %v17264_v47 }
 0x9e7   :  { %11022 = vmatprep.subr.bf16.mxu1 %v11021_v0 }
 0x9e8   :  { %v6863_v22 = vsel %vm6830_vm7, %v12210_v51, %v12279_v63  ;;  %11024 = vmatpush1.bf16.msra.mxu1 %v11023_v11  ;;  %v6864_v48 = vsel %vm6830_vm7, %v12279_v63, %v12280_v54  ;;  %v12265_v51 = vunpack.i.h.bf16 %v17262_v33 }
 0x9e9   :  { %v17282_v7 = vpop.permute.xlu0 %12287  ;;  %v17284_v25 = vpop.permute.xlu1 %12282  ;;  %v11025_v61 = vpack.c.bf16 %v6864_v48, %v6858_v3  ;;  %v11027_v38 = vpack.c.bf16 %v6863_v22, %v6857_v23 }
 0x9ea   :  { %v12290_v13 = vunpack.i.h.bf16 %v17282_v7  ;;  %v12289_v62 = vunpack.i.l.bf16 %v17282_v7  ;;  %v12285_v50 = vunpack.i.h.bf16 %v17284_v25  ;;  %v12284_v34 = vunpack.i.l.bf16 %v17284_v25 }
 0x9eb   :  { %11026 = vmatprep.subr.bf16.mxu1 %v11025_v61  ;;  %v6882_v0 = vsel %vm6830_vm7, %v12264_v21, %v12265_v51  ;;  %v6893_v61 = vsel %vm6830_vm7, %v12200_v58, %v12269_v4 }
 0x9ec   :  { %v6875_v27 = vsel %vm6830_vm7, %v12215_v56, %v12289_v62  ;;  %11028 = vmatpush1.bf16.msra.mxu1 %v11027_v38  ;;  %v6876_v6 = vsel %vm6830_vm7, %v12289_v62, %v12290_v13  ;;  %v6928_v14 = vsel %vm6830_vm7, %v12284_v34, %v12285_v50  ;;  %v6894_v62 = vsel %vm6830_vm7, %v12269_v4, %v12270_v40 }
 0x9ed   :  { %v17304_v41 = vpop.permute.xlu0 %12292  ;;  %v17306_v44 = vpop.permute.xlu1 %12297  ;;  %v11029_v26 = vpack.c.bf16 %v6876_v6, %v6870_v30  ;;  %v11031_v39 = vpack.c.bf16 %v6875_v27, %v6869_v49 }
 0x9ee   :  { %v12295_v31 = vunpack.i.h.bf16 %v17304_v41  ;;  %v12294_v18 = vunpack.i.l.bf16 %v17304_v41  ;;  %v12300_v56 = vunpack.i.h.bf16 %v17306_v44  ;;  %v12299_v35 = vunpack.i.l.bf16 %v17306_v44 }
 0x9ef   :  { %11030 = vmatprep.subr.bf16.mxu1 %v11029_v26 }
 0x9f0   :  { %v6887_v11 = vsel %vm6830_vm7, %v12220_v17, %v12299_v35  ;;  %11032 = vmatpush1.bf16.msra.mxu1 %v11031_v39  ;;  %v6934_v53 = vsel %vm6830_vm7, %v12294_v18, %v12295_v31  ;;  %v6888_v63 = vsel %vm6830_vm7, %v12299_v35, %v12300_v56 }
 0x9f1   :  { %v17334_v37 = vpop.permute.xlu0 %12302  ;;  %v17336_v2 = vpop.permute.xlu1 %12312  ;;  %v11013_v17 = vpack.c.bf16 %v6934_v53, %v6928_v14  ;;  %v11033_v23 = vpack.c.bf16 %v6888_v63, %v6882_v0  ;;  %v11035_v22 = vpack.c.bf16 %v6887_v11, %v6881_v24 }
 0x9f2   :  { %v12305_v3 = vunpack.i.h.bf16 %v17334_v37  ;;  %v12304_v48 = vunpack.i.l.bf16 %v17334_v37  ;;  %v12315_v26 = vunpack.i.h.bf16 %v17336_v2  ;;  %v12314_v39 = vunpack.i.l.bf16 %v17336_v2 }
 0x9f3   :  { %11014 = vmatprep.subr.bf16.mxu0 %v11013_v17  ;;  %11034 = vmatprep.subr.bf16.mxu1 %v11033_v23 }
 0x9f4   :  { %v6899_v38 = vsel %vm6830_vm7, %v12225_v20, %v12304_v48  ;;  %11036 = vmatpush1.bf16.msra.mxu1 %v11035_v22  ;;  %v6900_v21 = vsel %vm6830_vm7, %v12304_v48, %v12305_v3  ;;  %v6917_v17 = vsel %vm6830_vm7, %v12235_v15, %v12314_v39  ;;  %v6918_v23 = vsel %vm6830_vm7, %v12314_v39, %v12315_v26 }
 0x9f5   :  { %v17352_v49 = vpop.permute.xlu0 %12307  ;;  %v17354_v30 = vpop.permute.xlu1 %12317  ;;  %v11037_v9 = vpack.c.bf16 %v6900_v21, %v6894_v62  ;;  %v11039_v27 = vpack.c.bf16 %v6899_v38, %v6893_v61 }
 0x9f6   :  { %v12310_v58 = vunpack.i.h.bf16 %v17352_v49  ;;  %v12309_v8 = vunpack.i.l.bf16 %v17352_v49  ;;  %v12320_v20 = vunpack.i.h.bf16 %v17354_v30  ;;  %v12319_v6 = vunpack.i.l.bf16 %v17354_v30 }
 0x9f7   :  { %11038 = vmatprep.subr.bf16.mxu1 %v11037_v9 }
 0x9f8   :  { %v6905_v35 = vsel %vm6830_vm7, %v12230_v5, %v12309_v8  ;;  %v6911_v24 = vsel %vm6830_vm7, %v12240_v10, %v12319_v6  ;;  %11040 = vmatpush1.bf16.msra.mxu1 %v11039_v27  ;;  %v6906_v4 = vsel %vm6830_vm7, %v12309_v8, %v12310_v58  ;;  %v6912_v0 = vsel %vm6830_vm7, %v12319_v6, %v12320_v20  ;;  %v17405_v27 = vld [vmem:[%s19119_s5] sm:$0xff] }
 0x9f9   :  { %v17374_v11 = vpop.permute.xlu0 %12327  ;;  %v12323_v14 = vpop.permute.xlu1 %12322  ;;  %v11041_v53 = vpack.c.bf16 %v6912_v0, %v6906_v4  ;;  %v11043_v29 = vpack.c.bf16 %v6911_v24, %v6905_v35  ;;  %v17422_v24 = vld [vmem:[%s19119_s5 + $0x18] sm:$0xff] }
 0x9fa   :  { %v12330_v5 = vunpack.i.h.bf16 %v17374_v11  ;;  %v12329_v42 = vunpack.i.l.bf16 %v17374_v11  ;;  %v12325_v63 = vunpack.i.h.bf16 %v12323_v14  ;;  %v12324_v10 = vunpack.i.l.bf16 %v12323_v14 }
 0x9fb   :  { %11042 = vmatprep.subr.bf16.mxu1 %v11041_v53 }
 0x9fc   :  { %v6923_v22 = vsel %vm6830_vm7, %v12245_v57, %v12329_v42  ;;  %v6933_v48 = vsel %vm6830_vm7, %v12325_v63, %v12294_v18  ;;  %v6927_v61 = vsel %vm6830_vm7, %v12324_v10, %v12284_v34  ;;  %11044 = vmatpush1.bf16.msra.mxu1 %v11043_v29  ;;  %v6924_v43 = vsel %vm6830_vm7, %v12329_v42, %v12330_v5  ;;  %v17430_v29 = vld [vmem:[%s19119_s5 + $0x10] sm:$0xff]  ;;  %s13118_s5 = smov 111  }
 0x9fd   :  { %v17394_v15 = vpop.permute.xlu0 %12332  ;;  %v17396_v38 = vpop.permute.xlu1 %12342  ;;  %v11015_v62 = vpack.c.bf16 %v6933_v48, %v6927_v61  ;;  %v11045_v21 = vpack.c.bf16 %v6924_v43, %v6918_v23  ;;  %v11047_v36 = vpack.c.bf16 %v6923_v22, %v6917_v17  ;;  %v19575_v42 = vunpack.i.h.bf16 %v16581_v32 }
 0x9fe   :  { %v12335_v57 = vunpack.i.h.bf16 %v17394_v15  ;;  %v12334_v18 = vunpack.i.l.bf16 %v17394_v15  ;;  %v12345_v9 = vunpack.i.h.bf16 %v17396_v38  ;;  %v12344_v34 = vunpack.i.l.bf16 %v17396_v38  ;;  %v17530_v15 = vld [vmem:[#allocation2] sm:$0xff] }
 0x9ff   :  { %11016 = vmatpush1.bf16.msra.mxu0 %v11015_v62  ;;  %11046 = vmatprep.subr.bf16.mxu1 %v11045_v21  ;;  %v19576_v10 = vunpack.i.h.bf16 %v16579_v1  ;;  %v19577_v62 = vmov 0.0|0.0   ;;  %v12431_v38 = vpack.i.bf16 %v17530_v15, %v17530_v15 }
 0xa00   :  { %v6929_v8 = vsel %vm6830_vm7, %v12285_v50, %v12334_v18  ;;  %v6935_v6 = vsel %vm6830_vm7, %v12295_v31, %v12344_v34  ;;  %11048 = vmatpush1.bf16.msra.mxu1 %v11047_v36  ;;  %v6930_v39 = vsel %vm6830_vm7, %v12334_v18, %v12335_v57  ;;  %v6936_v35 = vsel %vm6830_vm7, %v12344_v34, %v12345_v9 }
 0xa01   :  { %v12338_v25 = vpop.permute.xlu0 %12337  ;;  %v12348_v50 = vpop.permute.xlu1 %12347  ;;  %v11049_v4 = vpack.c.bf16 %v6936_v35, %v6930_v39  ;;  %v11051_v41 = vpack.c.bf16 %v6935_v6, %v6929_v8  ;;  %12432 = vrot.lane.b32.xlu1 %v12431_v38, %s13087_s16 }
 0xa02   :  { %v12340_v0 = vunpack.i.h.bf16 %v12338_v25  ;;  %v12339_v31 = vunpack.i.l.bf16 %v12338_v25  ;;  %v12350_v14 = vunpack.i.h.bf16 %v12348_v50  ;;  %v12349_v53 = vunpack.i.l.bf16 %v12348_v50  ;;  %7137 = vmatmul.mubr.f32.vlgmr.msra.gmra.mrb[56].mxu0 %v17405_v27 }
 0xa03   :  { %11050 = vmatprep.subr.bf16.mxu1 %v11049_v4  ;;  %9904 = vmatprep.mubr.msk.f32.mxu0 %vm7065_vm10, %v17422_v24 }
 0xa04   :  { %v6835_v63 = vsel %vm6830_vm7, %v19575_v42, %v12339_v31  ;;  %v6841_v17 = vsel %vm6830_vm7, %v19576_v10, %v12349_v53  ;;  %11052 = vmatpush1.bf16.msra.mxu1 %v11051_v41  ;;  %v6836_v23 = vsel %vm6830_vm7, %v12339_v31, %v12340_v0  ;;  %v11090_v22 = vpack.c.bf16 %v12350_v14, %v12340_v0 }
 0xa05   :  { %v12353_v48 = vpop.permute.xlu0 %12352  ;;  %v12393_v61 = vpop.permute.xlu1 %12392  ;;  %v6842_v43 = vsel %vm6830_vm7, %v12349_v53, %v12350_v14  ;;  %11089 = vmatprep.subr.bf16.mxu1 %v19577_v62  ;;  %v11055_v21 = vpack.c.bf16 %v6841_v17, %v6835_v63  ;;  %12437 = vrot.lane.b32.xlu1 %v12431_v38, %s13086_s15 }
 0xa06   :  { %v12355_v36 = vunpack.i.h.bf16 %v12353_v48  ;;  %v12354_v18 = vunpack.i.l.bf16 %v12353_v48  ;;  %v12395_v32 = vunpack.i.h.bf16 %v12393_v61  ;;  %v12394_v34 = vunpack.i.l.bf16 %v12393_v61  ;;  %7143 = vmatmul.mubr.f32.gmra.mrb[58].mxu0 %v17430_v29 }
 0xa07   :  { %v11053_v1 = vpack.c.bf16 %v6842_v43, %v6836_v23  ;;  %7214 = vmatmul.mubr.f32.vlgmr.msra.gmra.mrb[56].mxu1 %v17405_v27  ;;  %9907 = vmatprep.mubr.msk.f32.mxu0 %vm7065_vm10, %v16989_v45 }
 0xa08   :  { %v6847_v8 = vsel %vm6830_vm7, %v12250_v16, %v12354_v18  ;;  %v6853_v6 = vsel %vm6830_vm7, %v12275_v12, %v12394_v34  ;;  %11091 = vmatpush1.bf16.msra.mxu1 %v11090_v22  ;;  %v6848_v39 = vsel %vm6830_vm7, %v12354_v18, %v12355_v36  ;;  %v11093_v35 = vpack.c.bf16 %v12395_v32, %v12355_v36 }
 0xa09   :  { %11054 = vmatprep.subr.bf16.mxu0 %v11053_v1  ;;  %v12358_v25 = vpop.permute.xlu0 %12357  ;;  %v12398_v50 = vpop.permute.xlu1 %12397  ;;  %v6854_v4 = vsel %vm6830_vm7, %v12394_v34, %v12395_v32  ;;  %11092 = vmatprep.subr.bf16.mxu1 %v19577_v62  ;;  %v11059_v41 = vpack.c.bf16 %v6853_v6, %v6847_v8 }
 0xa0a   :  { %11056 = vmatpush1.bf16.msra.mxu0 %v11055_v21  ;;  %v12360_v28 = vunpack.i.h.bf16 %v12358_v25  ;;  %v12359_v0 = vunpack.i.l.bf16 %v12358_v25  ;;  %v12400_v16 = vunpack.i.h.bf16 %v12398_v50  ;;  %v12399_v31 = vunpack.i.l.bf16 %v12398_v50  ;;  %9906 = vmatprep.mubr.msk.f32.mxu1 %vm7065_vm10, %v17422_v24 }
 0xa0b   :  { %v11057_v46 = vpack.c.bf16 %v6854_v4, %v6848_v39  ;;  %7220 = vmatmul.mubr.f32.gmra.mrb[58].mxu1 %v17430_v29  ;;  %12442 = vrot.lane.b32.xlu1 %v12431_v38, %s13104_s0 }
 0xa0c   :  { %v6859_v12 = vsel %vm6830_vm7, %v12255_v19, %v12359_v0  ;;  %v6865_v14 = vsel %vm6830_vm7, %v12280_v54, %v12399_v31  ;;  %11094 = vmatpush1.bf16.msra.mxu1 %v11093_v35  ;;  %v6860_v53 = vsel %vm6830_vm7, %v12359_v0, %v12360_v28  ;;  %v11096_v42 = vpack.c.bf16 %v12400_v16, %v12360_v28 }
 0xa0d   :  { %11058 = vmatprep.subr.bf16.mxu0 %v11057_v46  ;;  %v12363_v63 = vpop.permute.xlu0 %12362  ;;  %v12403_v10 = vpop.permute.xlu1 %12402  ;;  %v6866_v17 = vsel %vm6830_vm7, %v12399_v31, %v12400_v16  ;;  %11095 = vmatprep.subr.bf16.mxu1 %v19577_v62  ;;  %v11063_v23 = vpack.c.bf16 %v6865_v14, %v6859_v12 }
 0xa0e   :  { %11060 = vmatpush1.bf16.msra.mxu0 %v11059_v41  ;;  %v12365_v55 = vunpack.i.h.bf16 %v12363_v63  ;;  %v12364_v22 = vunpack.i.l.bf16 %v12363_v63  ;;  %v12405_v19 = vunpack.i.h.bf16 %v12403_v10  ;;  %v12404_v48 = vunpack.i.l.bf16 %v12403_v10  ;;  %9909 = vmatprep.mubr.msk.f32.mxu1 %vm7065_vm10, %v16989_v45 }
 0xa0f   :  { %v11061_v47 = vpack.c.bf16 %v6866_v17, %v6860_v53  ;;  %12447 = vrot.lane.b32.xlu1 %v12431_v38, %s13105_s11 }
 0xa10   :  { %v6871_v54 = vsel %vm6830_vm7, %v12260_v52, %v12364_v22  ;;  %v6877_v61 = vsel %vm6830_vm7, %v12290_v13, %v12404_v48  ;;  %11097 = vmatpush1.bf16.msra.mxu1 %v11096_v42  ;;  %v6872_v43 = vsel %vm6830_vm7, %v12364_v22, %v12365_v55  ;;  %v11099_v21 = vpack.c.bf16 %v12405_v19, %v12365_v55 }
 0xa11   :  { %11062 = vmatprep.subr.bf16.mxu0 %v11061_v47  ;;  %v12368_v36 = vpop.permute.xlu0 %12367  ;;  %v12408_v18 = vpop.permute.xlu1 %12407  ;;  %v6878_v32 = vsel %vm6830_vm7, %v12404_v48, %v12405_v19  ;;  %11098 = vmatprep.subr.bf16.mxu1 %v19577_v62  ;;  %v11067_v45 = vpack.c.bf16 %v6877_v61, %v6871_v54 }
 0xa12   :  { %11064 = vmatpush1.bf16.msra.mxu0 %v11063_v23  ;;  %v12370_v59 = vunpack.i.h.bf16 %v12368_v36  ;;  %v12369_v34 = vunpack.i.l.bf16 %v12368_v36  ;;  %v12410_v52 = vunpack.i.h.bf16 %v12408_v18  ;;  %v12409_v1 = vunpack.i.l.bf16 %v12408_v18 }
 0xa13   :  { %v11065_v7 = vpack.c.bf16 %v6878_v32, %v6872_v43 }
 0xa14   :  { %v6883_v13 = vsel %vm6830_vm7, %v12265_v51, %v12369_v34  ;;  %v6889_v8 = vsel %vm6830_vm7, %v12300_v56, %v12409_v1  ;;  %11100 = vmatpush1.bf16.msra.mxu1 %v11099_v21  ;;  %v6884_v6 = vsel %vm6830_vm7, %v12369_v34, %v12370_v59  ;;  %v11102_v39 = vpack.c.bf16 %v12410_v52, %v12370_v59 }
 0xa15   :  { %11066 = vmatprep.subr.bf16.mxu0 %v11065_v7  ;;  %v12373_v35 = vpop.permute.xlu0 %12372  ;;  %v6890_v25 = vsel %vm6830_vm7, %v12409_v1, %v12410_v52  ;;  %11101 = vmatprep.subr.bf16.mxu1 %v19577_v62  ;;  %v11071_v51 = vpack.c.bf16 %v6889_v8, %v6883_v13 }
 0xa16   :  { %11068 = vmatpush1.bf16.msra.mxu0 %v11067_v45  ;;  %v12375_v50 = vunpack.i.h.bf16 %v12373_v35  ;;  %v12374_v4 = vunpack.i.l.bf16 %v12373_v35  ;;  %v12413_v33 = vpop.permute.xlu1 %12412  ;;  %v11069_v41 = vpack.c.bf16 %v6890_v25, %v6884_v6 }
 0xa17   :  { %v12415_v28 = vunpack.i.h.bf16 %v12413_v33  ;;  %v12414_v44 = vunpack.i.l.bf16 %v12413_v33 }
 0xa18   :  { %v6895_v56 = vsel %vm6830_vm7, %v12270_v40, %v12374_v4  ;;  %11070 = vmatprep.subr.bf16.mxu0 %v11069_v41  ;;  %11103 = vmatpush1.bf16.msra.mxu1 %v11102_v39  ;;  %v6896_v0 = vsel %vm6830_vm7, %v12374_v4, %v12375_v50  ;;  %v19578_v4 = vld [vmem:[#allocation4_spill] sm:$0xff]  ;;  %v19580_v41 = vld [vmem:[#allocation5_spill] sm:$0xff] }
 0xa19   :  { %v11105_v16 = vpack.c.bf16 %v12415_v28, %v12375_v50  ;;  %v6901_v31 = vsel %vm6830_vm7, %v12305_v3, %v12414_v44  ;;  %v12378_v46 = vpop.permute.xlu0 %12377  ;;  %v6902_v12 = vsel %vm6830_vm7, %v12414_v44, %v12415_v28  ;;  %11104 = vmatprep.subr.bf16.mxu1 %v19577_v62  ;;  %v38_v50 = vld [vmem:[%s19120_s2] sm:$0x7f]  ;;  %s13120_s2 = smov 107  }
 0xa1a   :  { %11072 = vmatpush1.bf16.msra.mxu0 %v11071_v51  ;;  %v12380_v14 = vunpack.i.h.bf16 %v12378_v46  ;;  %v12379_v53 = vunpack.i.l.bf16 %v12378_v46  ;;  %v12418_v60 = vpop.permute.xlu1 %12417  ;;  %v11073_v42 = vpack.c.bf16 %v6902_v12, %v6896_v0  ;;  %v11075_v40 = vpack.c.bf16 %v6901_v31, %v6895_v56  ;;  %v19582_v56 = vld [vmem:[#allocation8_spill] sm:$0xff] }
 0xa1b   :  { %v12420_v63 = vunpack.i.h.bf16 %v12418_v60  ;;  %v12419_v10 = vunpack.i.l.bf16 %v12418_v60  ;;  %v17542_v33 = vrot.slane %v38_v50, %v19578_v4  ;;  %v17545_v51 = vrot.slane %v38_v50, %v19580_v41 }
 0xa1c   :  { %v6907_v17 = vsel %vm6830_vm7, %v12310_v58, %v12379_v53  ;;  %11074 = vmatprep.subr.bf16.mxu0 %v11073_v42  ;;  %11106 = vmatpush1.bf16.msra.mxu1 %v11105_v16  ;;  %v6908_v37 = vsel %vm6830_vm7, %v12379_v53, %v12380_v14  ;;  %v17554_v0 = vrot.slane %v38_v50, %v19582_v56  ;;  %v19584_v53 = vld [vmem:[#allocation9_spill] sm:$0xff] }
 0xa1d   :  { %v11108_v3 = vpack.c.bf16 %v12420_v63, %v12380_v14  ;;  %v6913_v23 = vsel %vm6830_vm7, %v12320_v20, %v12419_v10  ;;  %v12383_v55 = vpop.permute.xlu0 %12382  ;;  %v6914_v22 = vsel %vm6830_vm7, %v12419_v10, %v12420_v63  ;;  %11107 = vmatprep.subr.bf16.mxu1 %v19577_v62  ;;  %19579 = vst [vmem:[#allocation39_spill] sm:$0xff] %v17542_v33  ;;  %19581 = vst [vmem:[#allocation57_spill] sm:$0xff] %v17545_v51 }
 0xa1e   :  { %11076 = vmatpush1.bf16.msra.mxu0 %v11075_v40  ;;  %v12385_v19 = vunpack.i.h.bf16 %v12383_v55  ;;  %v12384_v48 = vunpack.i.l.bf16 %v12383_v55  ;;  %v12423_v49 = vpop.permute.xlu1 %12422  ;;  %v11077_v47 = vpack.c.bf16 %v6914_v22, %v6908_v37  ;;  %v11079_v58 = vpack.c.bf16 %v6913_v23, %v6907_v17  ;;  %19583 = vst [vmem:[#allocation58_spill] sm:$0xff] %v17554_v0  ;;  %v19586_v23 = vld [vmem:[#allocation16_spill] sm:$0xff] }
 0xa1f   :  { %v12425_v54 = vunpack.i.h.bf16 %v12423_v49  ;;  %v12424_v61 = vunpack.i.l.bf16 %v12423_v49  ;;  %v17570_v60 = vrot.slane %v38_v50, %v19584_v53  ;;  %v17587_v55 = vrot.slane %v38_v50, %v19586_v23 }
 0xa20   :  { %v6919_v43 = vsel %vm6830_vm7, %v12315_v26, %v12384_v48  ;;  %11078 = vmatprep.subr.bf16.mxu0 %v11077_v47  ;;  %11109 = vmatpush1.bf16.msra.mxu1 %v11108_v3  ;;  %v6920_v30 = vsel %vm6830_vm7, %v12384_v48, %v12385_v19  ;;  %v19588_v48 = vld [vmem:[#allocation11_spill] sm:$0xff]  ;;  %v19590_v47 = vld [vmem:[#allocation13_spill] sm:$0xff] }
 0xa21   :  { %v11111_v20 = vpack.c.bf16 %v12425_v54, %v12385_v19  ;;  %v6925_v21 = vsel %vm6830_vm7, %v12330_v5, %v12424_v61  ;;  %v12388_v36 = vpop.permute.xlu0 %12387  ;;  %v6926_v18 = vsel %vm6830_vm7, %v12424_v61, %v12425_v54  ;;  %11110 = vmatprep.subr.bf16.mxu1 %v19577_v62  ;;  %19585 = vst [vmem:[#allocation55_spill] sm:$0xff] %v17570_v60  ;;  %19587 = vst [vmem:[#allocation63_spill] sm:$0xff] %v17587_v55 }
 0xa22   :  { %11080 = vmatpush1.bf16.msra.mxu0 %v11079_v58  ;;  %v12390_v32 = vunpack.i.h.bf16 %v12388_v36  ;;  %v12389_v45 = vunpack.i.l.bf16 %v12388_v36  ;;  %v12428_v2 = vpop.permute.xlu1 %12427  ;;  %v11081_v59 = vpack.c.bf16 %v6926_v18, %v6920_v30  ;;  %v11083_v26 = vpack.c.bf16 %v6925_v21, %v6919_v43 }
 0xa23   :  { %v12430_v34 = vunpack.i.h.bf16 %v12428_v2  ;;  %v12429_v52 = vunpack.i.l.bf16 %v12428_v2  ;;  %v17593_v49 = vrot.slane %v38_v50, %v19588_v48  ;;  %v17596_v58 = vrot.slane %v38_v50, %v19590_v47 }
 0xa24   :  { %v6931_v1 = vsel %vm6830_vm7, %v12335_v57, %v12389_v45  ;;  %11082 = vmatprep.subr.bf16.mxu0 %v11081_v59  ;;  %11112 = vmatpush1.bf16.msra.mxu1 %v11111_v20  ;;  %v6932_v11 = vsel %vm6830_vm7, %v12389_v45, %v12390_v32 }
 0xa25   :  { %v6937_v5 = vsel %vm6830_vm7, %v12345_v9, %v12429_v52  ;;  %v6938_v7 = vsel %vm6830_vm7, %v12429_v52, %v12430_v34  ;;  %11113 = vmatprep.subr.bf16.mxu1 %v19577_v62  ;;  %v11114_v13 = vpack.c.bf16 %v12430_v34, %v12390_v32  ;;  %19589 = vst [vmem:[#allocation68_spill] sm:$0xff] %v17593_v49  ;;  %19591 = vst [vmem:[#allocation61_spill] sm:$0xff] %v17596_v58 }
 0xa26   :  { %11084 = vmatpush1.bf16.msra.mxu0 %v11083_v26  ;;  %v11085_v8 = vpack.c.bf16 %v6938_v7, %v6932_v11  ;;  %v11087_v6 = vpack.c.bf16 %v6937_v5, %v6931_v1 }
 0xa28   :  { %11086 = vmatprep.subr.bf16.mxu0 %v11085_v8  ;;  %11115 = vmatpush1.bf16.msra.mxu1 %v11114_v13 }
 0xa2a   :  { %11088 = vmatpush1.bf16.msra.mxu0 %v11087_v6 }
 0xa2b   :  { %7368 = vmatmul.mubr.f32.vlgmr.msra.gmra.mrb[60].mxu1 %v17405_v27 }
 0xa2c   :  { %9910 = vmatprep.mubr.msk.f32.mxu1 %vm7065_vm10, %v17422_v24 }
 0xa2d   :  { %7291 = vmatmul.mubr.f32.vlgmr.msra.gmra.mrb[60].mxu0 %v17405_v27 }
 0xa2e   :  { %9908 = vmatprep.mubr.msk.f32.mxu0 %vm7065_vm10, %v17422_v24 }
 0xa2f   :  { %7373 = vmatmul.mubr.f32.gmra.mrb[62].mxu1 %v17430_v29 }
 0xa31   :  { %7297 = vmatmul.mubr.f32.gmra.mrb[62].mxu0 %v17430_v29 }
 0xad5   :  { %v7138_v57 = vpop.f32.mrb[56].mxu0 }
 0xad6   :  { %v7140_v9 = vpop.f32.mrb[57].mxu0  ;;  %v17548_v28 = vmul.f32 %v17542_v33, %v7138_v57 }
 0xad7   :  { %v17551_v44 = vmul.f32 %v17545_v51, %v7140_v9 }
 0xad8   :  { %v7446_v46 = vmul.f32 %v17548_v28, %v17548_v28 }
 0xad9   :  { %v7144_v27 = vpop.f32.mrb[58].mxu0  ;;  %v7447_v12 = vmul.f32 %v17551_v44, %v17551_v44  ;;  %v7428_v42 = vadd.f32 %v17551_v44, %v17548_v28 }
 0xada   :  { %v7215_v24 = vpop.f32.mrb[56].mxu1  ;;  %v7146_v39 = vpop.f32.mrb[59].mxu0  ;;  %v17557_v16 = vmul.f32 %v17542_v33, %v7144_v27 }
 0xadb   :  { %v7217_v29 = vpop.f32.mrb[57].mxu1  ;;  %v17560_v31 = vmul.f32 %v17545_v51, %v7146_v39  ;;  %v17567_v14 = vmul.f32 %v17554_v0, %v7215_v24  ;;  %v7460_v17 = vadd.f32 %v7447_v12, %v7446_v46 }
 0xadc   :  { %v7453_v40 = vmul.f32 %v17557_v16, %v17557_v16  ;;  %v17584_v3 = vmul.f32 %v17570_v60, %v7217_v29 }
 0xadd   :  { %v7454_v63 = vmul.f32 %v17560_v31, %v17560_v31  ;;  %v7448_v37 = vmul.f32 %v17567_v14, %v17567_v14  ;;  %v7429_v22 = vadd.f32 %v7428_v42, %v17567_v14  ;;  %v7437_v19 = vadd.f32 %v17560_v31, %v17557_v16 }
 0xade   :  { %v7221_v35 = vpop.f32.mrb[58].mxu1  ;;  %v7449_v21 = vmul.f32 %v17584_v3, %v17584_v3 }
 0xadf   :  { %v7223_v25 = vpop.f32.mrb[59].mxu1  ;;  %v17579_v10 = vmul.f32 %v17554_v0, %v7221_v35  ;;  %v7469_v54 = vadd.f32 %v7454_v63, %v7453_v40  ;;  %v7461_v20 = vadd.f32 %v7460_v17, %v7448_v37  ;;  %v7430_v45 = vadd.f32 %v7429_v22, %v17584_v3 }
 0xae0   :  { %v17601_v43 = vmul.f32 %v17570_v60, %v7223_v25 }
 0xae1   :  { %v7455_v61 = vmul.f32 %v17579_v10, %v17579_v10  ;;  %v7438_v2 = vadd.f32 %v7437_v19, %v17579_v10  ;;  %v7462_v5 = vadd.f32 %v7461_v20, %v7449_v21 }
 0xae2   :  { %v7456_v52 = vmul.f32 %v17601_v43, %v17601_v43 }
 0xae3   :  { %v7470_v34 = vadd.f32 %v7469_v54, %v7455_v61  ;;  %v7439_v24 = vadd.f32 %v7438_v2, %v17601_v43  ;;  %v17650_v54 = vpop.permute.xlu1 %12432 }
 0xae5   :  { %v7471_v50 = vadd.f32 %v7470_v34, %v7456_v52 }
 0xae7   :  { %v17652_v61 = vpop.permute.xlu1 %12437 }
 0xafe   :  { %v7369_v30 = vpop.f32.mrb[60].mxu1 }
 0xaff   :  { %v7371_v36 = vpop.f32.mrb[61].mxu1  ;;  %v17606_v32 = vmul.f32 %v17587_v55, %v7369_v30  ;;  %v17654_v30 = vpop.permute.xlu1 %12442 }
 0xb00   :  { %v7292_v18 = vpop.f32.mrb[60].mxu0 }
 0xb01   :  { %v17611_v59 = vmul.f32 %v17593_v49, %v7292_v18  ;;  %v7294_v26 = vpop.f32.mrb[61].mxu0  ;;  %v7452_v38 = vmul.f32 %v17606_v32, %v17606_v32  ;;  %v7433_v27 = vsel %vm54_vm11, %v17606_v32, 0.0 }
 0xb02   :  { %v17616_v1 = vmul.f32 %v17596_v58, %v7294_v26  ;;  %v7374_v11 = vpop.f32.mrb[62].mxu1 }
 0xb03   :  { %v7431_v7 = vadd.f32 %v7430_v45, %v17611_v59  ;;  %v7450_v13 = vmul.f32 %v17611_v59, %v17611_v59  ;;  %v7376_v8 = vpop.f32.mrb[63].mxu1  ;;  %v17626_v9 = vmul.f32 %v17587_v55, %v7374_v11  ;;  %v7465_v40 = vsel %vm54_vm11, %v7452_v38, 0.0  ;;  %v17656_v20 = vpop.permute.xlu1 %12447 }
 0xb04   :  { %v7451_v6 = vmul.f32 %v17616_v1, %v17616_v1  ;;  %v7298_v57 = vpop.f32.mrb[62].mxu0 }
 0xb05   :  { %v7463_v39 = vadd.f32 %v7462_v5, %v7450_v13  ;;  %v7432_v29 = vadd.f32 %v7431_v7, %v17616_v1  ;;  %v17633_v35 = vmul.f32 %v17593_v49, %v7298_v57  ;;  %v7300_v25 = vpop.f32.mrb[63].mxu0  ;;  %v7459_v42 = vmul.f32 %v17626_v9, %v17626_v9 }
 0xb06   :  { %v17636_v4 = vmul.f32 %v17596_v58, %v7300_v25  ;;  %v7442_v63 = vsel %vm54_vm11, %v17626_v9, 0.0 }
 0xb07   :  { %v7440_v41 = vadd.f32 %v7439_v24, %v17633_v35  ;;  %v7457_v56 = vmul.f32 %v17633_v35, %v17633_v35  ;;  %v7434_v46 = vadd.f32 %v7433_v27, %v7432_v29  ;;  %v7464_v12 = vadd.f32 %v7463_v39, %v7451_v6 }
 0xb08   :  { %v7458_v53 = vmul.f32 %v17636_v4, %v17636_v4  ;;  %v7474_v48 = vsel %vm54_vm11, %v7459_v42, 0.0 }
 0xb09   :  { %v7472_v17 = vadd.f32 %v7471_v50, %v7457_v56  ;;  %v7441_v37 = vadd.f32 %v7440_v41, %v17636_v4  ;;  %7435 = vadd.xlane.f32.xlu0 %v7434_v46  ;;  %v7466_v23 = vadd.f32 %v7465_v40, %v7464_v12 }
 0xb0b   :  { %v7443_v22 = vadd.f32 %v7442_v63, %v7441_v37  ;;  %v7473_v19 = vadd.f32 %v7472_v17, %v7458_v53 }
 0xb0d   :  { %7467 = vadd.xlane.f32.xlu0 %v7466_v23  ;;  %7444 = vadd.xlane.f32.xlu1 %v7443_v22  ;;  %v7475_v47 = vadd.f32 %v7474_v48, %v7473_v19 }
 0xb11   :  { %7476 = vadd.xlane.f32.xlu0 %v7475_v47 }
 0xb96   :  { %v7436_v21 = vpop.xlane.xlu0 %7435 }
 0xb97   :  { %v7478_v36 = vmul.f32 0.001953125, %v7436_v21 }
 0xb99   :  { %v7482_v2 = vmul.f32 %v7478_v36, %v7478_v36  ;;  %v7490_v38 = vsub.f32 %v17548_v28, %v7478_v36  ;;  %v7491_v57 = vsub.f32 %v17551_v44, %v7478_v36  ;;  %v7492_v27 = vsub.f32 %v17567_v14, %v7478_v36 }
 0xb9a   :  { %v7468_v18 = vpop.xlane.xlu0 %7467  ;;  %v7445_v45 = vpop.xlane.xlu1 %7444  ;;  %v7493_v24 = vsub.f32 %v17584_v3, %v7478_v36  ;;  %v7494_v39 = vsub.f32 %v17611_v59, %v7478_v36  ;;  %v7495_v29 = vsub.f32 %v17616_v1, %v7478_v36  ;;  %v7496_v50 = vsub.f32 %v17606_v32, %v7478_v36 }
 0xb9b   :  { %v7480_v26 = vmul.f32 0.001953125, %v7468_v18  ;;  %v17658_v34 = vmul.f32 0.001953125, %v7445_v45 }
 0xb9d   :  { %v7484_v52 = vsub.f32 %v7480_v26, %v7482_v2  ;;  %v7483_v13 = vmul.f32 %v17658_v34, %v17658_v34  ;;  %v7497_v41 = vsub.f32 %v17557_v16, %v17658_v34  ;;  %v7498_v56 = vsub.f32 %v17560_v31, %v17658_v34 }
 0xb9e   :  { %v7477_v11 = vpop.xlane.xlu0 %7476  ;;  %v7499_v28 = vsub.f32 %v17579_v10, %v17658_v34  ;;  %v7500_v59 = vsub.f32 %v17601_v43, %v17658_v34  ;;  %v7501_v1 = vsub.f32 %v17633_v35, %v17658_v34  ;;  %v7502_v16 = vsub.f32 %v17636_v4, %v17658_v34 }
 0xb9f   :  { %v7486_v5 = vadd.f32 1e-05, %v7484_v52  ;;  %v7481_v7 = vmul.f32 0.001953125, %v7477_v11 }
 0xba1   :  { %13037 = vrsqrt.f32 %v7486_v5  ;;  %v7485_v8 = vsub.f32 %v7481_v7, %v7483_v13  ;;  %v13054_v7 = vld [vmem:[#allocation3 + $0x20] sm:$0xff] }
 0xba3   :  { %v7487_v6 = vadd.f32 1e-05, %v7485_v8  ;;  %v13055_v8 = vld [vmem:[#allocation3 + $0x28] sm:$0xff] }
 0xba5   :  { %13039 = vrsqrt.f32 %v7487_v6 }
 0xbab   :  { %v13038_v25 = vpop.eup %13037 }
 0xbac   :  { %v7507_v44 = vmul.f32 %v13038_v25, %v7493_v24  ;;  %v7508_v14 = vmul.f32 %v13038_v25, %v7494_v39  ;;  %v7504_v46 = vmul.f32 %v13038_v25, %v7490_v38  ;;  %v7505_v3 = vmul.f32 %v13038_v25, %v7491_v57  ;;  %v13056_v38 = vld [vmem:[#allocation3 + $0x8] sm:$0xff]  ;;  %v13057_v24 = vld [vmem:[#allocation3 + $0x10] sm:$0xff] }
 0xbad   :  { %v7506_v32 = vmul.f32 %v13038_v25, %v7492_v27  ;;  %v17679_v12 = vmul.f32 %v13038_v25, %v7495_v29  ;;  %v17686_v37 = vmul.f32 %v13038_v25, %v7496_v50 }
 0xbae   :  { %v7521_v31 = vmul.f32 0.2, %v7507_v44  ;;  %v7522_v53 = vmul.f32 0.2, %v7508_v14  ;;  %v7518_v42 = vmul.f32 0.2, %v7504_v46 }
 0xbaf   :  { %v17683_v10 = vpop.eup %13039  ;;  %v7519_v40 = vmul.f32 0.2, %v7505_v3  ;;  %v7520_v63 = vmul.f32 0.2, %v7506_v32  ;;  %v7523_v17 = vmul.f32 0.2, %v17679_v12 }
 0xbb0   :  { %v7535_v43 = vmax.f32 %v7507_v44, %v7521_v31  ;;  %v7536_v23 = vmax.f32 %v7508_v14, %v7522_v53  ;;  %v7532_v35 = vmax.f32 %v7504_v46, %v7518_v42  ;;  %v7512_v22 = vmul.f32 %v17683_v10, %v7498_v56  ;;  %v13058_v31 = vld [vmem:[#allocation3 + $0x58] sm:$0xff] }
 0xbb1   :  { %v7533_v19 = vmax.f32 %v7505_v3, %v7519_v40  ;;  %v7513_v48 = vmul.f32 %v17683_v10, %v7499_v28  ;;  %v7514_v47 = vmul.f32 %v17683_v10, %v7500_v59  ;;  %v7515_v21 = vmul.f32 %v17683_v10, %v7501_v1  ;;  %v13059_v40 = vld [vmem:[#allocation3 + $0x60] sm:$0xff] }
 0xbb2   :  { %v7549_v36 = vmul.f32 %v7535_v43, %v17570_v60  ;;  %v7550_v18 = vmul.f32 %v7536_v23, %v17593_v49  ;;  %v7546_v45 = vmul.f32 %v7532_v35, %v17542_v33  ;;  %v7526_v2 = vmul.f32 0.2, %v7512_v22  ;;  %v13060_v43 = vld [vmem:[#allocation3 + $0x68] sm:$0xff]  ;;  %v13061_v35 = vld [vmem:[#allocation3 + $0x70] sm:$0xff] }
 0xbb3   :  { %v7547_v26 = vmul.f32 %v7533_v19, %v17545_v51  ;;  %v7527_v52 = vmul.f32 0.2, %v7513_v48  ;;  %v7528_v11 = vmul.f32 0.2, %v7514_v47  ;;  %v7529_v5 = vmul.f32 0.2, %v7515_v21 }
 0xbb4   :  { %v17696_v13 = vadd.f32 %v13054_v7, %v7549_v36  ;;  %v17698_v6 = vadd.f32 %v13055_v8, %v7550_v18  ;;  %v17700_v57 = vadd.f32 %v13056_v38, %v7546_v45  ;;  %v7540_v27 = vmax.f32 %v7512_v22, %v7526_v2  ;;  %v13065_v38 = vld [vmem:[#allocation3 + $0x78] sm:$0xff] }
 0xbb5   :  { %v17702_v39 = vadd.f32 %v13057_v24, %v7547_v26  ;;  %v7541_v29 = vmax.f32 %v7513_v48, %v7527_v52  ;;  %v7542_v25 = vmax.f32 %v7514_v47, %v7528_v11  ;;  %v7543_v50 = vmax.f32 %v7515_v21, %v7529_v5  ;;  %v13062_v47 = vld [vmem:[#allocation3 + $0x18] sm:$0xff] }
 0xbb6   :  { %7577 = vst [vmem:[#allocation3 + $0x20] sm:$0xff] %v17696_v13  ;;  %7578 = vst [vmem:[#allocation3 + $0x28] sm:$0xff] %v17698_v6  ;;  %v17708_v56 = vpack.i.bf16 %v17698_v6, %v17696_v13  ;;  %v7554_v28 = vmul.f32 %v7540_v27, %v17545_v51  ;;  %v7511_v44 = vmul.f32 %v17683_v10, %v7497_v41  ;;  %v7524_v19 = vmul.f32 0.2, %v17686_v37 }
 0xbb7   :  { %7574 = vst [vmem:[#allocation3 + $0x8] sm:$0xff] %v17700_v57  ;;  %v7534_v14 = vmax.f32 %v7506_v32, %v7520_v63  ;;  %7575 = vst [vmem:[#allocation3 + $0x10] sm:$0xff] %v17702_v39  ;;  %v17716_v46 = vpack.i.bf16 %v17702_v39, %v17700_v57  ;;  %v7555_v3 = vmul.f32 %v7541_v29, %v17554_v0 }
 0xbb8   :  { %v7556_v59 = vmul.f32 %v7542_v25, %v17570_v60  ;;  %v7557_v1 = vmul.f32 %v7543_v50, %v17593_v49  ;;  %12457 = vrot.lane.b32.xlu0 %v17708_v56, %s13087_s16  ;;  %v17723_v53 = vadd.f32 %v13058_v31, %v7554_v28  ;;  %v7525_v41 = vmul.f32 0.2, %v7511_v44 }
 0xbb9   :  { %v7548_v32 = vmul.f32 %v7534_v14, %v17554_v0  ;;  %v7537_v42 = vmax.f32 %v17679_v12, %v7523_v17  ;;  %12452 = vrot.lane.b32.xlu1 %v17716_v46, %s13087_s16  ;;  %v17729_v63 = vadd.f32 %v13059_v40, %v7555_v3  ;;  %v7503_v17 = vsub.f32 %v17626_v9, %v17658_v34  ;;  %v13063_v9 = vld [vmem:[#allocation3 + $0x30] sm:$0xff] }
 0xbba   :  { %v17731_v23 = vadd.f32 %v13060_v43, %v7556_v59  ;;  %v17733_v22 = vadd.f32 %v13061_v35, %v7557_v1  ;;  %7582 = vst [vmem:[#allocation3 + $0x58] sm:$0xff] %v17723_v53  ;;  %v7539_v48 = vmax.f32 %v7511_v44, %v7525_v41  ;;  %v7538_v36 = vmax.f32 %v17686_v37, %v7524_v19  ;;  %v13064_v34 = vld [vmem:[#allocation3 + $0x50] sm:$0xff] }
 0xbbb   :  { %v17737_v21 = vadd.f32 %v13062_v47, %v7548_v32  ;;  %v7551_v12 = vmul.f32 %v7537_v42, %v17596_v58  ;;  %7583 = vst [vmem:[#allocation3 + $0x60] sm:$0xff] %v17729_v63  ;;  %v7516_v18 = vmul.f32 %v17683_v10, %v7502_v16  ;;  %v7517_v4 = vmul.f32 %v17683_v10, %v7503_v17 }
 0xbbc   :  { %7584 = vst [vmem:[#allocation3 + $0x68] sm:$0xff] %v17731_v23  ;;  %7585 = vst [vmem:[#allocation3 + $0x70] sm:$0xff] %v17733_v22  ;;  %12462 = vrot.lane.b32.xlu0 %v17716_v46, %s13086_s15  ;;  %v7553_v45 = vmul.f32 %v7539_v48, %v17542_v33  ;;  %v7552_v37 = vmul.f32 %v7538_v36, %v17587_v55  ;;  %v12561_v8 = vpack.i.bf16 %v17729_v63, %v17723_v53 }
 0xbbd   :  { %7576 = vst [vmem:[#allocation3 + $0x18] sm:$0xff] %v17737_v21  ;;  %v17754_v2 = vadd.f32 %v13063_v9, %v7551_v12  ;;  %12487 = vrot.lane.b32.xlu1 %v17708_v56, %s13114_s1  ;;  %v7530_v26 = vmul.f32 0.2, %v7516_v18  ;;  %v7531_v5 = vmul.f32 0.2, %v7517_v4  ;;  %v12566_v25 = vpack.i.bf16 %v17733_v22, %v17731_v23 }
 0xbbe   :  { %v17760_v16 = vadd.f32 %v13064_v34, %v7553_v45  ;;  %v7566_v52 = vadd.f32 %v17530_v15, %v7552_v37  ;;  %v12636_v59 = vpack.i.bf16 %v17731_v23, %v17729_v63 }
 0xbbf   :  { %7579 = vst [vmem:[#allocation3 + $0x30] sm:$0xff] %v17754_v2  ;;  %v7544_v11 = vmax.f32 %v7516_v18, %v7530_v26  ;;  %v7545_v7 = vmax.f32 %v7517_v4, %v7531_v5  ;;  %v17798_v28 = vpack.i.bf16 %v17754_v2, %v17698_v6  ;;  %v12631_v6 = vpack.i.bf16 %v17723_v53, %v17696_v13 }
 0xbc0   :  { %12467 = vrot.lane.b32.xlu0 %v17708_v56, %s13086_s15  ;;  %7581 = vst [vmem:[#allocation3 + $0x50] sm:$0xff] %v17760_v16  ;;  %7580 = vst.msk [vmem:[#allocation3 + $0x38] sm:$0xff] %vm54_vm11, %v7566_v52  ;;  %v12571_v50 = vpack.i.bf16 %v17760_v16, %v17737_v21  ;;  %v12641_v44 = vpack.i.bf16 %v17760_v16, %v17700_v57  ;;  %v12551_v57 = vpack.i.bf16 %v17696_v13, %v17737_v21 }
 0xbc1   :  { %12492 = vrot.lane.b32.xlu1 %v17716_v46, %s13113_s17  ;;  %v7558_v10 = vmul.f32 %v7544_v11, %v17596_v58  ;;  %v7559_v24 = vmul.f32 %v7545_v7, %v17587_v55  ;;  %19592 = vst [vmem:[#allocation65_spill] sm:$0xff] %v17798_v28  ;;  %v12716_v1 = vpack.i.bf16 %v17723_v53, %v17760_v16 }
 0xbc3   :  { %v7572_v27 = vadd.f32 %v13065_v38, %v7558_v10  ;;  %v7573_v29 = vadd.f32 %v17530_v15, %v7559_v24  ;;  %v12501_v15 = vpack.i.bf16 %v17737_v21, %v17702_v39 }
 0xbc4   :  { %12472 = vrot.lane.b32.xlu0 %v17716_v46, %s13104_s0 }
 0xbc5   :  { %12562 = vrot.lane.b32.xlu1 %v12561_v8, %s13087_s16  ;;  %7586 = vst [vmem:[#allocation3 + $0x78] sm:$0xff] %v7572_v27  ;;  %7587 = vst.msk [vmem:[#allocation3 + $0x80] sm:$0xff] %vm54_vm11, %v7573_v29  ;;  %v17821_v14 = vpack.i.bf16 %v7572_v27, %v17733_v22  ;;  %v12696_v13 = vpack.i.bf16 %v7572_v27, %v17754_v2 }
 0xbc7   :  { %v7602_v39 = vld [vmem:[#allocation3 + $0x38] sm:$0xff]  ;;  %19593 = vst [vmem:[#allocation67_spill] sm:$0xff] %v17821_v14 }
 0xbc8   :  { %12477 = vrot.lane.b32.xlu0 %v17708_v56, %s13104_s0 }
 0xbc9   :  { %12567 = vrot.lane.b32.xlu1 %v12566_v25, %s13087_s16 }
 0xbcc   :  { %12482 = vrot.lane.b32.xlu0 %v17716_v46, %s13114_s1 }
 0xbcd   :  { %12572 = vrot.lane.b32.xlu1 %v12571_v50, %s13086_s15 }
 0xbd0   :  { %12497 = vrot.lane.b32.xlu0 %v17708_v56, %s13113_s17  ;;  %v12531_v56 = vpack.i.bf16 %v7602_v39, %v17754_v2 }
 0xbd1   :  { %12582 = vrot.lane.b32.xlu1 %v12566_v25, %s13086_s15 }
 0xbd4   :  { %12502 = vrot.lane.b32.xlu0 %v12501_v15, %s13088_s25 }
 0xbd5   :  { %12587 = vrot.lane.b32.xlu1 %v12571_v50, %s13104_s0 }
 0xbd8   :  { %12507 = vrot.lane.b32.xlu0 %v17798_v28, %s13088_s25 }
 0xbd9   :  { %12597 = vrot.lane.b32.xlu1 %v12566_v25, %s13104_s0 }
 0xbdc   :  { %12512 = vrot.lane.b32.xlu0 %v12501_v15, %s13090_s29 }
 0xbdd   :  { %12602 = vrot.lane.b32.xlu1 %v12571_v50, %s13114_s1 }
 0xbe0   :  { %12517 = vrot.lane.b32.xlu0 %v17798_v28, %s13090_s29 }
 0xbe1   :  { %12622 = vrot.lane.b32.xlu1 %v12561_v8, %s13113_s17 }
 0xbe4   :  { %12522 = vrot.lane.b32.xlu0 %v12501_v15, %s13091_s12 }
 0xbe5   :  { %12627 = vrot.lane.b32.xlu1 %v12566_v25, %s13113_s17 }
 0xbe8   :  { %12527 = vrot.lane.b32.xlu0 %v17798_v28, %s13091_s12 }
 0xbe9   :  { %12632 = vrot.lane.b32.xlu1 %v12631_v6, %s13088_s25 }
 0xbec   :  { %12532 = vrot.lane.b32.xlu0 %v12531_v56, %s13104_s0 }
 0xbed   :  { %12642 = vrot.lane.b32.xlu1 %v12641_v44, %s13088_s25 }
 0xbf0   :  { %12537 = vrot.lane.b32.xlu0 %v12531_v56, %s13114_s1 }
 0xbf1   :  { %12647 = vrot.lane.b32.xlu1 %v17821_v14, %s13088_s25 }
 0xbf4   :  { %12542 = vrot.lane.b32.xlu0 %v12531_v56, %s13113_s17 }
 0xbf5   :  { %12652 = vrot.lane.b32.xlu1 %v12631_v6, %s13090_s29 }
 0xbf8   :  { %12547 = vrot.lane.b32.xlu0 %v17716_v46, %s13105_s11  ;;  %v7603_v46 = vld [vmem:[#allocation3 + $0x80] sm:$0xff] }
 0xbf9   :  { %12662 = vrot.lane.b32.xlu1 %v12641_v44, %s13090_s29  ;;  %v12701_v3 = vpack.i.bf16 %v7603_v46, %v7572_v27  ;;  %v12721_v31 = vpack.i.bf16 %v7603_v46, %v7602_v39 }
 0xbfc   :  { %12552 = vrot.lane.b32.xlu0 %v12551_v57, %s13105_s11 }
 0xbfd   :  { %12667 = vrot.lane.b32.xlu1 %v17821_v14, %s13090_s29 }
 0xc00   :  { %12557 = vrot.lane.b32.xlu0 %v12571_v50, %s13087_s16 }
 0xc01   :  { %12672 = vrot.lane.b32.xlu1 %v12631_v6, %s13091_s12 }
 0xc04   :  { %12577 = vrot.lane.b32.xlu0 %v12561_v8, %s13086_s15 }
 0xc05   :  { %12682 = vrot.lane.b32.xlu1 %v12641_v44, %s13091_s12 }
 0xc08   :  { %12592 = vrot.lane.b32.xlu0 %v12561_v8, %s13104_s0 }
 0xc09   :  { %12687 = vrot.lane.b32.xlu1 %v17821_v14, %s13091_s12 }
 0xc0c   :  { %12607 = vrot.lane.b32.xlu0 %v12561_v8, %s13114_s1 }
 0xc0d   :  { %12697 = vrot.lane.b32.xlu1 %v12696_v13, %s13086_s15 }
 0xc10   :  { %12612 = vrot.lane.b32.xlu0 %v12566_v25, %s13114_s1 }
 0xc11   :  { %12702 = vrot.lane.b32.xlu1 %v12701_v3, %s13104_s0 }
 0xc14   :  { %12617 = vrot.lane.b32.xlu0 %v12571_v50, %s13113_s17 }
 0xc15   :  { %12707 = vrot.lane.b32.xlu1 %v12701_v3, %s13114_s1 }
 0xc18   :  { %12637 = vrot.lane.b32.xlu0 %v12636_v59, %s13088_s25 }
 0xc19   :  { %12712 = vrot.lane.b32.xlu1 %v12701_v3, %s13113_s17 }
 0xc1c   :  { %12657 = vrot.lane.b32.xlu0 %v12636_v59, %s13090_s29 }
 0xc1d   :  { %12717 = vrot.lane.b32.xlu1 %v12716_v1, %s13105_s11 }
 0xc20   :  { %12677 = vrot.lane.b32.xlu0 %v12636_v59, %s13091_s12 }
 0xc21   :  { %12727 = vrot.lane.b32.xlu1 %v12636_v59, %s13105_s11 }
 0xc24   :  { %12692 = vrot.lane.b32.xlu0 %v12696_v13, %s13087_s16 }
 0xc28   :  { %12722 = vrot.lane.b32.xlu0 %v12721_v31, %s13088_s25 }
 0xc2a   :  { %v17862_v41 = vpop.permute.xlu0 %12457 }
 0xc2b   :  { %v17864_v32 = vpop.permute.xlu1 %12452 }
 0xc2c   :  { %12732 = vrot.lane.b32.xlu0 %v12721_v31, %s13090_s29  ;;  %v12455_v1 = vunpack.i.h.bf16 %v17864_v32 }
 0xc2e   :  { %v17867_v53 = vpop.permute.xlu0 %12462 }
 0xc2f   :  { %v17869_v42 = vpop.permute.xlu1 %12487  ;;  %v12465_v49 = vunpack.i.h.bf16 %v17867_v53 }
 0xc30   :  { %19594 = vst [vmem:[#allocation66_spill] sm:$0xff] %v17869_v42  ;;  %12737 = vrot.lane.b32.xlu0 %v12721_v31, %s13091_s12  ;;  %v19301_v31 = vunpack.i.l.bf16 %v17864_v32  ;;  %v19606_v62 = vunpack.i.h.bf16 %v17869_v42 }
 0xc32   :  { %v17872_v40 = vpop.permute.xlu0 %12467 }
 0xc33   :  { %19595 = vst [vmem:[#allocation41_spill] sm:$0xff] %v17872_v40  ;;  %v17874_v63 = vpop.permute.xlu1 %12492 }
 0xc36   :  { %v17876_v43 = vpop.permute.xlu0 %12472 }
 0xc37   :  { %v17878_v23 = vpop.permute.xlu1 %12562 }
 0xc3a   :  { %v17880_v35 = vpop.permute.xlu0 %12477 }
 0xc3b   :  { %19596 = vst [vmem:[#allocation72_spill] sm:$0xff] %v17880_v35  ;;  %v17882_v22 = vpop.permute.xlu1 %12567  ;;  %v19293_v12 = vunpack.i.h.bf16 %v17880_v35  ;;  %v12479_v17 = vunpack.i.l.bf16 %v17880_v35 }
 0xc3d   :  { %v7736_v9 = vsel %vm6357_vm2, %v12479_v17, %v19293_v12 }
 0xc3e   :  { %v17884_v19 = vpop.permute.xlu0 %12482 }
 0xc3f   :  { %v17886_v48 = vpop.permute.xlu1 %12572  ;;  %v12485_v34 = vunpack.i.h.bf16 %v17884_v19  ;;  %v19294_v16 = vunpack.i.l.bf16 %v17884_v19 }
 0xc41   :  { %v7774_v10 = vsel %vm6400_vm9, %v19294_v16, %v12485_v34  ;;  %v12574_v16 = vunpack.i.l.bf16 %v17886_v48 }
 0xc42   :  { %v17888_v47 = vpop.permute.xlu0 %12497 }
 0xc43   :  { %19597 = vst [vmem:[#allocation42_spill] sm:$0xff] %v17888_v47  ;;  %v17890_v21 = vpop.permute.xlu1 %12582 }
 0xc46   :  { %v17894_v36 = vpop.permute.xlu0 %12502 }
 0xc47   :  { %v17896_v18 = vpop.permute.xlu1 %12587 }
 0xc48   :  { %v19296_v45 = vunpack.i.l.bf16 %v17896_v18 }
 0xc4a   :  { %v7735_v2 = vsel %vm6357_vm2, %v19296_v45, %v12479_v17  ;;  %v17905_v37 = vpop.permute.xlu0 %12507 }
 0xc4b   :  { %19598 = vst [vmem:[#allocation71_spill] sm:$0xff] %v17905_v37  ;;  %v17907_v26 = vpop.permute.xlu1 %12597  ;;  %v12766_v4 = vpack.i.bf16 %v7736_v9, %v7735_v2 }
 0xc4d   :  { %12767 = vrot.lane.b32.xlu1 %v12766_v4, %s13105_s11  ;;  %v19304_v4 = vunpack.i.h.bf16 %v17862_v41 }
 0xc4e   :  { %v17912_v52 = vpop.permute.xlu0 %12512 }
 0xc4f   :  { %v17914_v11 = vpop.permute.xlu1 %12602 }
 0xc50   :  { %v19295_v5 = vunpack.i.l.bf16 %v17914_v11 }
 0xc52   :  { %v7775_v7 = vsel %vm6400_vm9, %v12485_v34, %v19295_v5  ;;  %v17923_v8 = vpop.permute.xlu0 %12517  ;;  %v12459_v34 = vunpack.i.l.bf16 %v17862_v41 }
 0xc53   :  { %v17925_v38 = vpop.permute.xlu1 %12622  ;;  %v12771_v27 = vpack.i.bf16 %v7775_v7, %v7774_v10  ;;  %v7647_v10 = vsel %vm91_vm3, %v19301_v31, %v12455_v1  ;;  %v19309_v31 = vunpack.i.l.bf16 %v17867_v53 }
 0xc54   :  { %v7650_v58 = vsel %vm91_vm3, %v12459_v34, %v19304_v4 }
 0xc55   :  { %12772 = vrot.lane.b32.xlu1 %v12771_v27, %s13105_s11 }
 0xc56   :  { %v17928_v24 = vpop.permute.xlu0 %12522 }
 0xc57   :  { %v17930_v29 = vpop.permute.xlu1 %12627 }
 0xc5a   :  { %v17932_v25 = vpop.permute.xlu0 %12527 }
 0xc5b   :  { %v17934_v50 = vpop.permute.xlu1 %12632 }
 0xc5e   :  { %v17936_v15 = vpop.permute.xlu0 %12532 }
 0xc5f   :  { %19599 = vst [vmem:[#allocation69_spill] sm:$0xff] %v17936_v15  ;;  %v17938_v6 = vpop.permute.xlu1 %12642 }
 0xc62   :  { %v17940_v39 = vpop.permute.xlu0 %12537 }
 0xc63   :  { %19600 = vst [vmem:[#allocation62_spill] sm:$0xff] %v17940_v39  ;;  %v17942_v56 = vpop.permute.xlu1 %12647 }
 0xc66   :  { %v17944_v44 = vpop.permute.xlu0 %12542 }
 0xc67   :  { %19601 = vst [vmem:[#allocation73_spill] sm:$0xff] %v17944_v44  ;;  %v17946_v57 = vpop.permute.xlu1 %12652 }
 0xc6a   :  { %v17948_v13 = vpop.permute.xlu0 %12547 }
 0xc6b   :  { %v17950_v46 = vpop.permute.xlu1 %12662  ;;  %v12549_v35 = vunpack.i.l.bf16 %v17948_v13 }
 0xc6e   :  { %v17952_v3 = vpop.permute.xlu0 %12552 }
 0xc6f   :  { %v17954_v59 = vpop.permute.xlu1 %12667 }
 0xc72   :  { %v17958_v17 = vpop.permute.xlu0 %12557 }
 0xc73   :  { %v12559_v9 = vunpack.i.l.bf16 %v17958_v17  ;;  %v17961_v2 = vpop.permute.xlu1 %12672 }
 0xc75   :  { %v7648_v7 = vsel %vm91_vm3, %v12455_v1, %v12559_v9  ;;  %v7649_v5 = vsel %vm91_vm3, %v12559_v9, %v12459_v34  ;;  %v19314_v9 = vunpack.i.h.bf16 %v17872_v40  ;;  %v12469_v34 = vunpack.i.l.bf16 %v17872_v40 }
 0xc76   :  { %v17969_v27 = vpop.permute.xlu0 %12577  ;;  %v12741_v12 = vpack.i.bf16 %v7648_v7, %v7647_v10  ;;  %v12746_v55 = vpack.i.bf16 %v7650_v58, %v7649_v5  ;;  %v7688_v10 = vsel %vm106_vm4, %v12465_v49, %v12574_v16  ;;  %v12475_v5 = vunpack.i.h.bf16 %v17876_v43 }
 0xc77   :  { %v17973_v45 = vpop.permute.xlu1 %12682  ;;  %v7689_v0 = vsel %vm106_vm4, %v12574_v16, %v12469_v34  ;;  %v19604_v16 = vunpack.i.l.bf16 %v17896_v18 }
 0xc78   :  { %19602 = vst [vmem:[#allocation74_spill] sm:$0xff] %v17973_v45  ;;  %12742 = vrot.lane.b32.xlu0 %v12741_v12, %s13105_s11  ;;  %v7687_v12 = vsel %vm106_vm4, %v19309_v31, %v12465_v49  ;;  %v19319_v49 = vunpack.i.l.bf16 %v17876_v43 }
 0xc79   :  { %v12751_v60 = vpack.i.bf16 %v7688_v10, %v7687_v12  ;;  %v12489_v10 = vunpack.i.l.bf16 %v17869_v42  ;;  %v7734_v12 = vsel %vm6357_vm2, %v12475_v5, %v19604_v16  ;;  %v19607_v16 = vunpack.i.l.bf16 %v17914_v11 }
 0xc7a   :  { %v17981_v1 = vpop.permute.xlu0 %12592  ;;  %v12509_v42 = vunpack.i.l.bf16 %v17905_v37 }
 0xc7b   :  { %v17984_v7 = vpop.permute.xlu1 %12687  ;;  %v7777_v14 = vsel %vm6400_vm9, %v12489_v10, %v19606_v62  ;;  %v19609_v62 = vunpack.i.h.bf16 %v17888_v47 }
 0xc7c   :  { %19603 = vst [vmem:[#allocation76_spill] sm:$0xff] %v17984_v7  ;;  %12747 = vrot.lane.b32.xlu0 %v12746_v55, %s13105_s11  ;;  %v7690_v55 = vsel %vm106_vm4, %v12469_v34, %v19314_v9  ;;  %v7733_v34 = vsel %vm6357_vm2, %v19319_v49, %v12475_v5  ;;  %v12495_v49 = vunpack.i.h.bf16 %v17874_v63  ;;  %v12654_v7 = vunpack.i.l.bf16 %v17946_v57 }
 0xc7d   :  { %v12756_v51 = vpack.i.bf16 %v7690_v55, %v7689_v0  ;;  %v12499_v0 = vunpack.i.l.bf16 %v17888_v47  ;;  %v12761_v33 = vpack.i.bf16 %v7734_v12, %v7733_v34  ;;  %v12505_v12 = vunpack.i.h.bf16 %v17894_v36 }
 0xc7e   :  { %v17992_v4 = vpop.permute.xlu0 %12607  ;;  %v12519_v34 = vunpack.i.l.bf16 %v17923_v8 }
 0xc7f   :  { %v17995_v58 = vpop.permute.xlu1 %12697 }
 0xc80   :  { %12752 = vrot.lane.b32.xlu0 %v12751_v60, %s13105_s11 }
 0xc82   :  { %v18003_v31 = vpop.permute.xlu0 %12612 }
 0xc83   :  { %v18010_v60 = vpop.permute.xlu1 %12702 }
 0xc84   :  { %19605 = vst [vmem:[#allocation43_spill] sm:$0xff] %v18010_v60  ;;  %12757 = vrot.lane.b32.xlu0 %v12756_v51, %s13105_s11  ;;  %v7776_v60 = vsel %vm6400_vm9, %v19607_v16, %v12489_v10  ;;  %v12634_v51 = vunpack.i.l.bf16 %v17934_v50  ;;  %v7817_v10 = vsel %vm6441_vm8, %v12499_v0, %v19609_v62  ;;  %v12450_v62 = vunpack.i.h.bf16 %v17656_v20 }
 0xc85   :  { %v12776_v9 = vpack.i.bf16 %v7777_v14, %v7776_v60  ;;  %v12449_v16 = vunpack.i.l.bf16 %v17656_v20  ;;  %v19612_v14 = vunpack.i.l.bf16 %v17894_v36 }
 0xc86   :  { %v18018_v55 = vpop.permute.xlu0 %12617  ;;  %v7857_v20 = vsel %vm156_vm1, %v12634_v51, %v12509_v42 }
 0xc87   :  { %v12619_v44 = vunpack.i.l.bf16 %v18018_v55  ;;  %v18028_v5 = vpop.permute.xlu1 %12707  ;;  %v7855_v60 = vsel %vm156_vm1, %v19612_v14, %v12505_v12 }
 0xc88   :  { %19608 = vst [vmem:[#allocation75_spill] sm:$0xff] %v18028_v5  ;;  %12762 = vrot.lane.b32.xlu0 %v12761_v33, %s13105_s11  ;;  %v7856_v33 = vsel %vm156_vm1, %v12505_v12, %v12634_v51 }
 0xc89   :  { %v7816_v5 = vsel %vm6441_vm8, %v12619_v44, %v12499_v0  ;;  %v7815_v47 = vsel %vm6441_vm8, %v12495_v49, %v12619_v44  ;;  %v19611_v0 = vunpack.i.l.bf16 %v17874_v63  ;;  %v19613_v44 = vunpack.i.h.bf16 %v17905_v37 }
 0xc8a   :  { %v12786_v39 = vpack.i.bf16 %v7817_v10, %v7816_v5  ;;  %v12515_v10 = vunpack.i.h.bf16 %v17912_v52  ;;  %v12674_v37 = vunpack.i.l.bf16 %v17961_v2 }
 0xc8b   :  { %v18046_v40 = vpop.permute.xlu1 %12712  ;;  %v7814_v45 = vsel %vm6441_vm8, %v19611_v0, %v12495_v49  ;;  %v7858_v5 = vsel %vm156_vm1, %v12509_v42, %v19613_v44  ;;  %v7897_v49 = vsel %vm188_vm5, %v12654_v7, %v12519_v34  ;;  %v12550_v0 = vunpack.i.h.bf16 %v17948_v13 }
 0xc8c   :  { %19610 = vst [vmem:[#allocation79_spill] sm:$0xff] %v18046_v40  ;;  %12787 = vrot.lane.b32.xlu1 %v12786_v39, %s13105_s11  ;;  %12777 = vrot.lane.b32.xlu0 %v12776_v9, %s13105_s11  ;;  %v12791_v40 = vpack.i.bf16 %v7856_v33, %v7855_v60  ;;  %v12781_v12 = vpack.i.bf16 %v7815_v47, %v7814_v45  ;;  %v19332_v39 = vunpack.i.l.bf16 %v17912_v52  ;;  %v19614_v9 = vunpack.i.h.bf16 %v17923_v8 }
 0xc8d   :  { %v12525_v44 = vunpack.i.h.bf16 %v17928_v24  ;;  %v12796_v47 = vpack.i.bf16 %v7858_v5, %v7857_v20  ;;  %v7896_v45 = vsel %vm188_vm5, %v12515_v10, %v12654_v7  ;;  %v8202_v13 = vsel %vm6830_vm7, %v12449_v16, %v12549_v35 }
 0xc8e   :  { %v7898_v14 = vsel %vm188_vm5, %v12519_v34, %v19614_v9  ;;  %v12554_v34 = vunpack.i.l.bf16 %v17952_v3  ;;  %v12555_v60 = vunpack.i.h.bf16 %v17952_v3  ;;  %v8203_v42 = vsel %vm6830_vm7, %v12549_v35, %v12550_v0 }
 0xc8f   :  { %v12718_v15 = vpop.permute.xlu1 %12717  ;;  %v12806_v33 = vpack.i.bf16 %v7898_v14, %v7897_v49  ;;  %v7895_v16 = vsel %vm188_vm5, %v19332_v39, %v12515_v10  ;;  %v19615_v49 = vunpack.i.l.bf16 %v17928_v24  ;;  %v12530_v14 = vunpack.i.h.bf16 %v17932_v25 }
 0xc90   :  { %v12720_v51 = vunpack.i.h.bf16 %v12718_v15  ;;  %v12719_v28 = vunpack.i.l.bf16 %v12718_v15  ;;  %12792 = vrot.lane.b32.xlu1 %v12791_v40, %s13105_s11  ;;  %12782 = vrot.lane.b32.xlu0 %v12781_v12, %s13105_s11  ;;  %v12605_v40 = vunpack.i.h.bf16 %v17914_v11  ;;  %v7936_v12 = vsel %vm203_vm6, %v12525_v44, %v12674_v37 }
 0xc91   :  { %v12801_v10 = vpack.i.bf16 %v7896_v45, %v7895_v16  ;;  %v12564_v45 = vunpack.i.l.bf16 %v17878_v23 }
 0xc92   :  { %v8208_v9 = vsel %vm6830_vm7, %v12450_v62, %v12719_v28  ;;  %v8209_v15 = vsel %vm6830_vm7, %v12719_v28, %v12720_v51  ;;  %v7935_v62 = vsel %vm203_vm6, %v19615_v49, %v12525_v44  ;;  %v8205_v44 = vsel %vm6830_vm7, %v12554_v34, %v12555_v60 }
 0xc93   :  { %v18084_v5 = vpop.permute.xlu1 %12727  ;;  %v11116_v7 = vpack.c.bf16 %v8209_v15, %v8203_v42  ;;  %v11118_v20 = vpack.c.bf16 %v8208_v9, %v8202_v13  ;;  %v12529_v42 = vunpack.i.l.bf16 %v17932_v25  ;;  %v8204_v13 = vsel %vm6830_vm7, %v12550_v0, %v12554_v34 }
 0xc94   :  { %v12730_v35 = vunpack.i.h.bf16 %v18084_v5  ;;  %v12729_v28 = vunpack.i.l.bf16 %v18084_v5  ;;  %12807 = vrot.lane.b32.xlu1 %v12806_v33, %s13105_s11  ;;  %12797 = vrot.lane.b32.xlu0 %v12796_v47, %s13105_s11  ;;  %v12811_v47 = vpack.i.bf16 %v7936_v12, %v7935_v62  ;;  %v12560_v15 = vunpack.i.h.bf16 %v17958_v17 }
 0xc95   :  { %11117 = vmatprep.subr.bf16.mxu0 %v11116_v7  ;;  %v7937_v49 = vsel %vm203_vm6, %v12674_v37, %v12529_v42  ;;  %v7938_v34 = vsel %vm203_vm6, %v12529_v42, %v12530_v14  ;;  %v19616_v12 = vunpack.i.l.bf16 %v17884_v19  ;;  %v12620_v17 = vunpack.i.h.bf16 %v18018_v55 }
 0xc96   :  { %v8210_v9 = vsel %vm6830_vm7, %v12720_v51, %v12729_v28  ;;  %11119 = vmatpush1.bf16.msra.mxu0 %v11118_v20  ;;  %v8211_v33 = vsel %vm6830_vm7, %v12729_v28, %v12730_v35  ;;  %v12565_v51 = vunpack.i.h.bf16 %v17878_v23  ;;  %v12816_v7 = vpack.i.bf16 %v7938_v34, %v7937_v49 }
 0xc97   :  { %v11152_v39 = vpack.c.bf16 %v8211_v33, %v8205_v44  ;;  %v11154_v0 = vpack.c.bf16 %v8210_v9, %v8204_v13  ;;  %v12821_v37 = vpack.i.bf16 %v12605_v40, %v19616_v12  ;;  %v12590_v20 = vunpack.i.h.bf16 %v17896_v18 }
 0xc98   :  { %12812 = vrot.lane.b32.xlu1 %v12811_v47, %s13105_s11  ;;  %12802 = vrot.lane.b32.xlu0 %v12801_v10, %s13105_s11  ;;  %v7653_v16 = vsel %vm91_vm3, %v12560_v15, %v12564_v45  ;;  %v12435_v23 = vunpack.i.h.bf16 %v17650_v54  ;;  %v7654_v19 = vsel %vm91_vm3, %v12564_v45, %v12565_v51  ;;  %v12569_v62 = vunpack.i.l.bf16 %v17882_v22 }
 0xc99   :  { %11153 = vmatprep.subr.bf16.mxu1 %v11152_v39  ;;  %v12445_v39 = vunpack.i.h.bf16 %v17654_v30  ;;  %v12434_v28 = vunpack.i.l.bf16 %v17650_v54  ;;  %v12570_v42 = vunpack.i.h.bf16 %v17882_v22  ;;  %v19617_v13 = vunpack.i.l.bf16 %v17874_v63 }
 0xc9a   :  { %11155 = vmatpush1.bf16.msra.mxu1 %v11154_v0  ;;  %v12831_v9 = vpack.i.bf16 %v7654_v19, %v7653_v16  ;;  %v12444_v44 = vunpack.i.l.bf16 %v17654_v30  ;;  %v7652_v47 = vsel %vm91_vm3, %v12435_v23, %v12560_v15  ;;  %v12595_v49 = vunpack.i.h.bf16 %v17981_v1 }
 0xc9b   :  { %v12826_v10 = vpack.i.bf16 %v12620_v17, %v19617_v13  ;;  %v7739_v33 = vsel %vm6357_vm2, %v12445_v39, %v12590_v20  ;;  %v19618_v54 = vunpack.i.l.bf16 %v17864_v32  ;;  %v19619_v63 = vunpack.i.l.bf16 %v17876_v43 }
 0xc9c   :  { %12822 = vrot.lane.b32.xlu1 %v12821_v37, %s13105_s11  ;;  %12817 = vrot.lane.b32.xlu0 %v12816_v7, %s13105_s11  ;;  %v7655_v45 = vsel %vm91_vm3, %v12565_v51, %v12569_v62  ;;  %v12600_v34 = vunpack.i.h.bf16 %v17907_v26  ;;  %v12599_v15 = vunpack.i.l.bf16 %v17907_v26  ;;  %v7656_v32 = vsel %vm91_vm3, %v12569_v62, %v12570_v42 }
 0xc9d   :  { %v7646_v0 = vsel %vm91_vm3, %v12434_v28, %v19618_v54  ;;  %v7732_v30 = vsel %vm6357_vm2, %v12444_v44, %v19619_v63  ;;  %v12580_v12 = vunpack.i.h.bf16 %v17969_v27  ;;  %v12579_v16 = vunpack.i.l.bf16 %v17969_v27 }
 0xc9e   :  { %v12866_v37 = vpack.i.bf16 %v7739_v33, %v7732_v30  ;;  %v12836_v7 = vpack.i.bf16 %v7652_v47, %v7646_v0  ;;  %v7742_v43 = vsel %vm6357_vm2, %v12595_v49, %v12599_v15  ;;  %v12610_v51 = vunpack.i.h.bf16 %v17992_v4  ;;  %v18176_v33 = vpop.permute.xlu0 %12637 }
 0xc9f   :  { %v12609_v23 = vunpack.i.l.bf16 %v17992_v4  ;;  %v12575_v39 = vunpack.i.h.bf16 %v17886_v48  ;;  %v7743_v19 = vsel %vm6357_vm2, %v12599_v15, %v12600_v34  ;;  %v12630_v27 = vunpack.i.h.bf16 %v17930_v29 }
 0xca0   :  { %12832 = vrot.lane.b32.xlu1 %v12831_v9, %s13105_s11  ;;  %12827 = vrot.lane.b32.xlu0 %v12826_v10, %s13105_s11  ;;  %v12629_v62 = vunpack.i.l.bf16 %v17930_v29  ;;  %v12871_v28 = vpack.i.bf16 %v7743_v19, %v7742_v43  ;;  %v12841_v13 = vpack.i.bf16 %v7656_v32, %v7655_v45  ;;  %v7694_v4 = vsel %vm106_vm4, %v12579_v16, %v12580_v12 }
 0xca1   :  { %v7693_v10 = vsel %vm106_vm4, %v12575_v39, %v12579_v16  ;;  %v7780_v9 = vsel %vm6400_vm9, %v12605_v40, %v12609_v23  ;;  %v7781_v48 = vsel %vm6400_vm9, %v12609_v23, %v12610_v51  ;;  %v12440_v44 = vunpack.i.h.bf16 %v17652_v61 }
 0xca2   :  { %v12625_v47 = vunpack.i.h.bf16 %v17925_v38  ;;  %v12439_v54 = vunpack.i.l.bf16 %v17652_v61  ;;  %v12876_v63 = vpack.i.bf16 %v7781_v48, %v7780_v9  ;;  %v12846_v11 = vpack.i.bf16 %v7694_v4, %v7693_v10 }
 0xca3   :  { %v7692_v0 = vsel %vm106_vm4, %v12440_v44, %v12575_v39  ;;  %v7823_v30 = vsel %vm6441_vm8, %v12629_v62, %v12630_v27  ;;  %v12640_v45 = vunpack.i.h.bf16 %v18176_v33  ;;  %v12639_v15 = vunpack.i.l.bf16 %v18176_v33  ;;  %v18201_v39 = vpop.permute.xlu0 %12657 }
 0xca4   :  { %12867 = vrot.lane.b32.xlu0 %v12866_v37, %s13105_s11  ;;  %12837 = vrot.lane.b32.xlu1 %v12836_v7, %s13105_s11  ;;  %v7822_v40 = vsel %vm6441_vm8, %v12625_v47, %v12629_v62  ;;  %v19620_v32 = vunpack.i.l.bf16 %v17867_v53  ;;  %v12585_v37 = vunpack.i.h.bf16 %v17890_v21  ;;  %v12584_v7 = vunpack.i.l.bf16 %v17890_v21 }
 0xca5   :  { %v12635_v16 = vunpack.i.h.bf16 %v17934_v50  ;;  %v12664_v43 = vunpack.i.l.bf16 %v17950_v46  ;;  %v12665_v23 = vunpack.i.h.bf16 %v17950_v46  ;;  %v12891_v19 = vpack.i.bf16 %v7823_v30, %v7822_v40 }
 0xca6   :  { %v7686_v61 = vsel %vm106_vm4, %v12439_v54, %v19620_v32  ;;  %v7695_v62 = vsel %vm106_vm4, %v12580_v12, %v12584_v7  ;;  %v7862_v10 = vsel %vm156_vm1, %v12639_v15, %v12640_v45  ;;  %v12655_v50 = vunpack.i.h.bf16 %v17946_v57 }
 0xca7   :  { %v12851_v53 = vpack.i.bf16 %v7692_v0, %v7686_v61  ;;  %v7696_v46 = vsel %vm106_vm4, %v12584_v7, %v12585_v37  ;;  %v19621_v12 = vunpack.i.l.bf16 %v17912_v52  ;;  %v12614_v48 = vunpack.i.l.bf16 %v18003_v31  ;;  %v18230_v40 = vpop.permute.xlu0 %12677 }
 0xca8   :  { %12872 = vrot.lane.b32.xlu0 %v12871_v28, %s13105_s11  ;;  %12842 = vrot.lane.b32.xlu1 %v12841_v13, %s13105_s11  ;;  %v12594_v28 = vunpack.i.l.bf16 %v17981_v1  ;;  %v7861_v13 = vsel %vm156_vm1, %v12635_v16, %v12639_v15  ;;  %v7900_v9 = vsel %vm188_vm5, %v12665_v23, %v12655_v50  ;;  %v12856_v54 = vpack.i.bf16 %v7696_v46, %v7695_v62 }
 0xca9   :  { %v7894_v4 = vsel %vm188_vm5, %v12664_v43, %v19621_v12  ;;  %v12896_v44 = vpack.i.bf16 %v7862_v10, %v7861_v13  ;;  %v12615_v52 = vunpack.i.h.bf16 %v18003_v31  ;;  %v12670_v30 = vunpack.i.h.bf16 %v17954_v59 }
 0xcaa   :  { %v7740_v0 = vsel %vm6357_vm2, %v12590_v20, %v12594_v28  ;;  %v12669_v18 = vunpack.i.l.bf16 %v17954_v59  ;;  %v7782_v20 = vsel %vm6400_vm9, %v12610_v51, %v12614_v48  ;;  %v12916_v15 = vpack.i.bf16 %v7900_v9, %v7894_v4 }
 0xcab   :  { %v12680_v61 = vunpack.i.h.bf16 %v18230_v40  ;;  %v12679_v7 = vunpack.i.l.bf16 %v18230_v40  ;;  %v12624_v43 = vunpack.i.l.bf16 %v17925_v38  ;;  %v12675_v23 = vunpack.i.h.bf16 %v17961_v2  ;;  %v18259_v12 = vpop.permute.xlu0 %12692 }
 0xcac   :  { %12877 = vrot.lane.b32.xlu0 %v12876_v63, %s13105_s11  ;;  %12847 = vrot.lane.b32.xlu1 %v12846_v11, %s13105_s11  ;;  %v7741_v63 = vsel %vm6357_vm2, %v12594_v28, %v12595_v49  ;;  %v12660_v11 = vunpack.i.h.bf16 %v18201_v39  ;;  %v7783_v49 = vsel %vm6400_vm9, %v12614_v48, %v12615_v52  ;;  %v7904_v51 = vsel %vm188_vm5, %v12669_v18, %v12670_v30 }
 0xcad   :  { %v12861_v1 = vpack.i.bf16 %v7741_v63, %v7740_v0  ;;  %v12881_v62 = vpack.i.bf16 %v7783_v49, %v7782_v20  ;;  %v12644_v28 = vunpack.i.l.bf16 %v17938_v6  ;;  %v7820_v13 = vsel %vm6441_vm8, %v12620_v17, %v12624_v43  ;;  %v19625_v20 = vld [vmem:[#allocation69_spill] sm:$0xff] }
 0xcae   :  { %v7903_v32 = vsel %vm188_vm5, %v12660_v11, %v12669_v18  ;;  %v7941_v10 = vsel %vm203_vm6, %v12675_v23, %v12679_v7  ;;  %v7942_v46 = vsel %vm203_vm6, %v12679_v7, %v12680_v61  ;;  %v19622_v17 = vunpack.i.l.bf16 %v17894_v36  ;;  %v19624_v18 = vld [vmem:[#allocation65_spill] sm:$0xff] }
 0xcaf   :  { %v12926_v2 = vpack.i.bf16 %v7942_v46, %v7941_v10  ;;  %v12694_v48 = vunpack.i.l.bf16 %v18259_v12  ;;  %v12649_v38 = vunpack.i.l.bf16 %v17942_v56  ;;  %v12659_v0 = vunpack.i.l.bf16 %v18201_v39  ;;  %v19627_v7 = vld [vmem:[#allocation41_spill] sm:$0xff]  ;;  %v19631_v10 = vld [vmem:[#allocation62_spill] sm:$0xff] }
 0xcb0   :  { %12892 = vrot.lane.b32.xlu0 %v12891_v19, %s13105_s11  ;;  %12852 = vrot.lane.b32.xlu1 %v12851_v53, %s13105_s11  ;;  %v12645_v19 = vunpack.i.h.bf16 %v17938_v6  ;;  %v12921_v53 = vpack.i.bf16 %v7904_v51, %v7903_v32  ;;  %v7821_v6 = vsel %vm6441_vm8, %v12624_v43, %v12625_v47  ;;  %v7854_v4 = vsel %vm156_vm1, %v12644_v28, %v19622_v17 }
 0xcb1   :  { %v12886_v55 = vpack.i.bf16 %v7821_v6, %v7820_v13  ;;  %v12699_v47 = vunpack.i.l.bf16 %v17995_v58  ;;  %v7863_v36 = vsel %vm156_vm1, %v12640_v45, %v12649_v38  ;;  %v12534_v33 = vunpack.i.l.bf16 %v19625_v20  ;;  %v19626_v45 = vld [vmem:[#allocation74_spill] sm:$0xff] }
 0xcb2   :  { %v7860_v9 = vsel %vm156_vm1, %v12645_v19, %v12635_v16  ;;  %v19623_v16 = vunpack.i.h.bf16 %v17862_v41  ;;  %v12685_v49 = vunpack.i.h.bf16 %v19626_v45  ;;  %v12684_v41 = vunpack.i.l.bf16 %v19626_v45 }
 0xcb3   :  { %v19628_v43 = vunpack.i.h.bf16 %v19627_v7  ;;  %v7901_v19 = vsel %vm188_vm5, %v12655_v50, %v12659_v0  ;;  %v12539_v46 = vunpack.i.l.bf16 %v19631_v10  ;;  %v12540_v57 = vunpack.i.h.bf16 %v19631_v10  ;;  %v18343_v7 = vld [vmem:[%s19121_s6 + $0x8] sm:$0xff] }
 0xcb4   :  { %12897 = vrot.lane.b32.xlu0 %v12896_v44, %s13105_s11  ;;  %12857 = vrot.lane.b32.xlu1 %v12856_v54, %s13105_s11  ;;  %v12650_v44 = vunpack.i.h.bf16 %v17942_v56  ;;  %v12901_v54 = vpack.i.bf16 %v7860_v9, %v7854_v4  ;;  %v7651_v63 = vsel %vm91_vm3, %v19623_v16, %v12694_v48  ;;  %v19632_v50 = vunpack.i.l.bf16 %v17928_v24  ;;  %v18312_v4 = vpop.permute.xlu0 %12722  ;;  %v19633_v9 = vld [vmem:[#allocation76_spill] sm:$0xff]  ;;  %v19641_v10 = vld [vmem:[#allocation67_spill] sm:$0xff] }
 0xcb5   :  { %v12951_v39 = vpack.i.bf16 %v12694_v48, %v7651_v63  ;;  %v7691_v51 = vsel %vm106_vm4, %v19628_v43, %v12699_v47  ;;  %v7940_v17 = vsel %vm203_vm6, %v12685_v49, %v12675_v23  ;;  %v12690_v48 = vunpack.i.h.bf16 %v19633_v9  ;;  %v19636_v63 = vld [vmem:[#allocation73_spill] sm:$0xff]  ;;  %v19637_v49 = vld [vmem:[#allocation42_spill] sm:$0xff]  ;;  %9911 = vmatprep.mubr.msk.f32.mxu0 %vm7065_vm10, %v18343_v7  ;;  %9913 = vmatprep.mubr.msk.f32.mxu1 %vm7065_vm10, %v18343_v7 }
 0xcb6   :  { %v12956_v6 = vpack.i.bf16 %v12699_v47, %v7691_v51  ;;  %v7779_v16 = vsel %vm6400_vm9, %v12539_v46, %v12540_v57  ;;  %v12545_v23 = vunpack.i.h.bf16 %v19636_v63  ;;  %v12725_v31 = vunpack.i.h.bf16 %v18312_v4 }
 0xcb8   :  { %12917 = vrot.lane.b32.xlu0 %v12916_v15, %s13105_s11  ;;  %12862 = vrot.lane.b32.xlu1 %v12861_v1, %s13105_s11  ;;  %v12535_v15 = vunpack.i.h.bf16 %v19625_v20  ;;  %v7864_v1 = vsel %vm156_vm1, %v12649_v38, %v12650_v44  ;;  %v12689_v38 = vunpack.i.l.bf16 %v19633_v9 }
 0xcb9   :  { %v12906_v32 = vpack.i.bf16 %v7864_v1, %v7863_v36  ;;  %v18332_v1 = vpop.permute.xlu0 %12732 }
 0xcba   :  { %v7943_v20 = vsel %vm203_vm6, %v12680_v61, %v12689_v38  ;;  %v12695_v61 = vunpack.i.h.bf16 %v18259_v12  ;;  %v12700_v12 = vunpack.i.h.bf16 %v17995_v58 }
 0xcbc   :  { %12922 = vrot.lane.b32.xlu0 %v12921_v53, %s13105_s11  ;;  %12882 = vrot.lane.b32.xlu1 %v12881_v62, %s13105_s11  ;;  %v7902_v53 = vsel %vm188_vm5, %v12659_v0, %v12660_v11  ;;  %v19629_v62 = vld [vmem:[#allocation72_spill] sm:$0xff]  ;;  %v7934_v11 = vsel %vm203_vm6, %v12684_v41, %v19632_v50  ;;  %v12724_v41 = vunpack.i.l.bf16 %v18312_v4  ;;  %v7657_v51 = vsel %vm91_vm3, %v12570_v42, %v12695_v61 }
 0xcbd   :  { %v19630_v28 = vunpack.i.h.bf16 %v19629_v62  ;;  %v12936_v24 = vpack.i.bf16 %v7940_v17, %v7934_v11  ;;  %v7697_v22 = vsel %vm106_vm4, %v12585_v37, %v12700_v12  ;;  %v19644_v37 = vld [vmem:[#allocation75_spill] sm:$0xff]  ;;  %vm9142_vm3 = vcmask 465920  }
 0xcbe   :  { %v12996_v11 = vpack.i.bf16 %v12700_v12, %v7697_v22  ;;  %vm9371_vm4 = vcmask 400384  }
 0xcbf   :  { %v7737_v13 = vsel %vm6357_vm2, %v19630_v28, %v12534_v33  ;;  %v12734_v28 = vunpack.i.l.bf16 %v18332_v1 }
 0xcc0   :  { %12927 = vrot.lane.b32.xlu0 %v12926_v2, %s13105_s11  ;;  %12887 = vrot.lane.b32.xlu1 %v12886_v55, %s13105_s11  ;;  %v12911_v2 = vpack.i.bf16 %v7902_v53, %v7901_v19  ;;  %v7738_v55 = vsel %vm6357_vm2, %v12534_v33, %v12535_v15  ;;  %v7944_v15 = vsel %vm203_vm6, %v12689_v38, %v12690_v48  ;;  %v19639_v19 = vld [vmem:[#allocation71_spill] sm:$0xff] }
 0xcc1   :  { %v12961_v0 = vpack.i.bf16 %v7738_v55, %v7737_v13  ;;  %v12941_v45 = vpack.i.bf16 %v7944_v15, %v7943_v20  ;;  %v19640_v53 = vunpack.i.h.bf16 %v19639_v19  ;;  %v12738_v13 = vpop.permute.xlu0 %12737  ;;  %v19643_v55 = vunpack.i.h.bf16 %v17923_v8 }
 0xcc2   :  { %v12739_v50 = vunpack.i.l.bf16 %v12738_v13  ;;  %v7865_v20 = vsel %vm156_vm1, %v12650_v44, %v12725_v31  ;;  %v12735_v15 = vunpack.i.h.bf16 %v18332_v1  ;;  %v12740_v4 = vunpack.i.h.bf16 %v12738_v13  ;;  %v18414_v1 = vpop.permute.xlu1 %12767 }
 0xcc3   :  { %v7859_v62 = vsel %vm156_vm1, %v19640_v53, %v12724_v41  ;;  %v7899_v57 = vsel %vm188_vm5, %v19643_v55, %v12734_v28  ;;  %vm8925_vm1 = vcmask 523264  }
 0xcc4   :  { %12932 = vrot.lane.b32.xlu0 %v19624_v18, %s13105_s11  ;;  %12902 = vrot.lane.b32.xlu1 %v12901_v54, %s13105_s11  ;;  %v19634_v54 = vld [vmem:[#allocation66_spill] sm:$0xff]  ;;  %v12544_v18 = vunpack.i.l.bf16 %v19636_v63  ;;  %v12976_v58 = vpack.i.bf16 %v12724_v41, %v7859_v62  ;;  %v12981_v38 = vpack.i.bf16 %v12734_v28, %v7899_v57  ;;  %v7939_v8 = vsel %vm203_vm6, %v12530_v14, %v12739_v50 }
 0xcc5   :  { %v19635_v47 = vunpack.i.h.bf16 %v19634_v54  ;;  %v12710_v54 = vunpack.i.h.bf16 %v19644_v37  ;;  %v7945_v56 = vsel %vm203_vm6, %v12690_v48, %v12740_v4  ;;  %vm9005_vm6 = vcmask 64512  }
 0xcc6   :  { %v7819_v40 = vsel %vm6441_vm8, %v12544_v18, %v12545_v23  ;;  %v13026_v44 = vpack.i.bf16 %v12740_v4, %v7945_v56 }
 0xcc7   :  { %v7778_v36 = vsel %vm6400_vm9, %v19635_v47, %v12539_v46  ;;  %v19642_v46 = vld [vmem:[#allocation43_spill] sm:$0xff]  ;;  %v12709_v47 = vunpack.i.l.bf16 %v19644_v37  ;;  %v18419_v59 = vpop.permute.xlu1 %12772 }
 0xcc8   :  { %12952 = vrot.lane.b32.xlu0 %v12951_v39, %s13105_s11  ;;  %12907 = vrot.lane.b32.xlu1 %v12906_v32, %s13105_s11  ;;  %v12966_v33 = vpack.i.bf16 %v7779_v16, %v7778_v36  ;;  %v19638_v39 = vunpack.i.h.bf16 %v19637_v49  ;;  %v12705_v42 = vunpack.i.h.bf16 %v19642_v46  ;;  %v12986_v36 = vpack.i.bf16 %v12739_v50, %v7939_v8 }
 0xcc9   :  { %v7784_v26 = vsel %vm6400_vm9, %v12615_v52, %v12709_v47 }
 0xcca   :  { %v7818_v32 = vsel %vm6441_vm8, %v19638_v39, %v12544_v18 }
 0xccb   :  { %v12971_v43 = vpack.i.bf16 %v7819_v40, %v7818_v32 }
 0xccc   :  { %12957 = vrot.lane.b32.xlu0 %v12956_v6, %s13105_s11  ;;  %12912 = vrot.lane.b32.xlu1 %v12911_v2, %s13105_s11  ;;  %v12704_v6 = vunpack.i.l.bf16 %v19642_v46  ;;  %v12991_v2 = vpack.i.bf16 %v12695_v61, %v7657_v51 }
 0xcce   :  { %v7744_v17 = vsel %vm6357_vm2, %v12600_v34, %v12704_v6  ;;  %v7745_v21 = vsel %vm6357_vm2, %v12704_v6, %v12705_v42  ;;  %v7785_v34 = vsel %vm6400_vm9, %v12709_v47, %v12710_v54  ;;  %vm9797_vm2 = vcmask 523712  }
 0xccf   :  { %v13006_v25 = vpack.i.bf16 %v7785_v34, %v7784_v26 }
 0xcd0   :  { %12962 = vrot.lane.b32.xlu0 %v12961_v0, %s13105_s11  ;;  %12937 = vrot.lane.b32.xlu1 %v12936_v24, %s13105_s11  ;;  %v13001_v0 = vpack.i.bf16 %v7745_v21, %v7744_v17  ;;  %v19645_v24 = vld [vmem:[#allocation79_spill] sm:$0xff] }
 0xcd1   :  { %v12715_v16 = vunpack.i.h.bf16 %v19645_v24  ;;  %v12714_v63 = vunpack.i.l.bf16 %v19645_v24 }
 0xcd3   :  { %v7824_v14 = vsel %vm6441_vm8, %v12630_v27, %v12714_v63  ;;  %v7825_v23 = vsel %vm6441_vm8, %v12714_v63, %v12715_v16  ;;  %v7905_v27 = vsel %vm188_vm5, %v12670_v30, %v12735_v15  ;;  %vm9598_vm5 = vcmask 367616  }
 0xcd4   :  { %12967 = vrot.lane.b32.xlu0 %v12966_v33, %s13105_s11  ;;  %12942 = vrot.lane.b32.xlu1 %v12941_v45, %s13105_s11  ;;  %v13011_v18 = vpack.i.bf16 %v7825_v23, %v7824_v14  ;;  %v13016_v33 = vpack.i.bf16 %v12725_v31, %v7865_v20  ;;  %v13021_v45 = vpack.i.bf16 %v12735_v15, %v7905_v27  ;;  %v12775_v15 = vunpack.i.h.bf16 %v18419_v59 }
 0xcd8   :  { %12972 = vrot.lane.b32.xlu0 %v12971_v43, %s13105_s11  ;;  %12947 = vrot.lane.b32.xlu1 %v19641_v10, %s13105_s11 }
 0xcdc   :  { %12977 = vrot.lane.b32.xlu0 %v12976_v58, %s13105_s11  ;;  %12992 = vrot.lane.b32.xlu1 %v12991_v2, %s13105_s11 }
 0xce0   :  { %12982 = vrot.lane.b32.xlu0 %v12981_v38, %s13105_s11  ;;  %12997 = vrot.lane.b32.xlu1 %v12996_v11, %s13105_s11 }
 0xce4   :  { %12987 = vrot.lane.b32.xlu0 %v12986_v36, %s13105_s11  ;;  %13002 = vrot.lane.b32.xlu1 %v13001_v0, %s13105_s11  ;;  %v19335_v36 = vunpack.i.h.bf16 %v18414_v1  ;;  %v12769_v0 = vunpack.i.l.bf16 %v18414_v1 }
 0xce8   :  { %13007 = vrot.lane.b32.xlu1 %v13006_v25, %s13105_s11 }
 0xcea   :  { %v12743_v52 = vpop.permute.xlu0 %12742 }
 0xceb   :  { %v12745_v53 = vunpack.i.h.bf16 %v12743_v52  ;;  %v12744_v62 = vunpack.i.l.bf16 %v12743_v52 }
 0xcec   :  { %13012 = vrot.lane.b32.xlu1 %v13011_v18, %s13105_s11 }
 0xced   :  { %v8215_v6 = vsel %vm6830_vm7, %v12744_v62, %v12745_v53 }
 0xcee   :  { %v18402_v29 = vpop.permute.xlu0 %12747 }
 0xcef   :  { %v12750_v50 = vunpack.i.h.bf16 %v18402_v29  ;;  %v12749_v11 = vunpack.i.l.bf16 %v18402_v29 }
 0xcf0   :  { %13017 = vrot.lane.b32.xlu1 %v13016_v33, %s13105_s11  ;;  %v12774_v33 = vunpack.i.l.bf16 %v18419_v59 }
 0xcf1   :  { %v8216_v26 = vsel %vm6830_vm7, %v12745_v53, %v12749_v11  ;;  %v8217_v34 = vsel %vm6830_vm7, %v12749_v11, %v12750_v50 }
 0xcf2   :  { %v18408_v49 = vpop.permute.xlu0 %12752 }
 0xcf3   :  { %v12755_v24 = vunpack.i.h.bf16 %v18408_v49  ;;  %v12754_v16 = vunpack.i.l.bf16 %v18408_v49 }
 0xcf4   :  { %13022 = vrot.lane.b32.xlu1 %v13021_v45, %s13105_s11  ;;  %v18480_v45 = vsel %vm6830_vm7, %v12769_v0, %v19335_v36 }
 0xcf5   :  { %v8227_v27 = vsel %vm6830_vm7, %v12754_v16, %v12755_v24 }
 0xcf6   :  { %v18416_v39 = vpop.permute.xlu0 %12757 }
 0xcf7   :  { %v12760_v49 = vunpack.i.h.bf16 %v18416_v39  ;;  %v12759_v56 = vunpack.i.l.bf16 %v18416_v39 }
 0xcf8   :  { %13027 = vrot.lane.b32.xlu1 %v13026_v44, %s13105_s11 }
 0xcfa   :  { %v18421_v30 = vpop.permute.xlu0 %12762 }
 0xcfb   :  { %v12765_v44 = vunpack.i.h.bf16 %v18421_v30 }
 0xcfe   :  { %v18423_v32 = vpop.permute.xlu1 %12787  ;;  %v18425_v40 = vpop.permute.xlu0 %12777 }
 0xd02   :  { %v18427_v9 = vpop.permute.xlu1 %12792  ;;  %v18429_v48 = vpop.permute.xlu0 %12782 }
 0xd06   :  { %v18431_v61 = vpop.permute.xlu1 %12807  ;;  %v18433_v41 = vpop.permute.xlu0 %12797 }
 0xd0a   :  { %v18435_v43 = vpop.permute.xlu1 %12812  ;;  %v18437_v12 = vpop.permute.xlu0 %12802 }
 0xd0e   :  { %v18439_v51 = vpop.permute.xlu1 %12822  ;;  %v18441_v19 = vpop.permute.xlu0 %12817 }
 0xd12   :  { %v12833_v28 = vpop.permute.xlu1 %12832  ;;  %v18443_v13 = vpop.permute.xlu0 %12827 }
 0xd13   :  { %v12835_v10 = vunpack.i.h.bf16 %v12833_v28  ;;  %v12834_v46 = vunpack.i.l.bf16 %v12833_v28 }
 0xd15   :  { %v8221_v2 = vsel %vm6830_vm7, %v12834_v46, %v12835_v10 }
 0xd16   :  { %v18447_v58 = vpop.permute.xlu0 %12867  ;;  %v12838_v22 = vpop.permute.xlu1 %12837  ;;  %v11120_v42 = vpack.c.bf16 %v8221_v2, %v8215_v6 }
 0xd17   :  { %v12840_v55 = vunpack.i.h.bf16 %v12838_v22  ;;  %v12839_v57 = vunpack.i.l.bf16 %v12838_v22  ;;  %v19333_v22 = vunpack.i.h.bf16 %v18423_v32 }
 0xd18   :  { %11121 = vmatprep.subr.bf16.mxu0 %v11120_v42  ;;  %v12789_v42 = vunpack.i.l.bf16 %v18423_v32 }
 0xd19   :  { %v8220_v17 = vsel %vm6830_vm7, %v12840_v55, %v12834_v46  ;;  %v8214_v38 = vsel %vm6830_vm7, %v12839_v57, %v12744_v62  ;;  %v12779_v46 = vunpack.i.l.bf16 %v18425_v40  ;;  %v19334_v55 = vunpack.i.h.bf16 %v18425_v40 }
 0xd1a   :  { %v11122_v21 = vpack.c.bf16 %v8220_v17, %v8214_v38  ;;  %v18453_v37 = vpop.permute.xlu0 %12872  ;;  %v18455_v54 = vpop.permute.xlu1 %12842  ;;  %v18495_v57 = vsel %vm6830_vm7, %v12774_v33, %v12775_v15 }
 0xd1b   :  { %v12845_v47 = vunpack.i.h.bf16 %v18455_v54  ;;  %v12844_v8 = vunpack.i.l.bf16 %v18455_v54  ;;  %v19336_v11 = vunpack.i.h.bf16 %v18453_v37 }
 0xd1c   :  { %11123 = vmatpush1.bf16.msra.mxu0 %v11122_v21  ;;  %v8228_v21 = vsel %vm6830_vm7, %v12755_v24, %v12759_v56 }
 0xd1d   :  { %v8222_v63 = vsel %vm6830_vm7, %v12835_v10, %v12844_v8  ;;  %v8223_v25 = vsel %vm6830_vm7, %v12844_v8, %v12845_v47  ;;  %v12764_v10 = vunpack.i.l.bf16 %v18421_v30  ;;  %v12874_v30 = vunpack.i.l.bf16 %v18453_v37 }
 0xd1e   :  { %v11158_v14 = vpack.c.bf16 %v8222_v63, %v8216_v26  ;;  %v18471_v23 = vpop.permute.xlu0 %12877  ;;  %v12848_v31 = vpop.permute.xlu1 %12847  ;;  %v11156_v52 = vpack.c.bf16 %v8223_v25, %v8217_v34  ;;  %v8240_v8 = vsel %vm6830_vm7, %v12765_v44, %v12769_v0  ;;  %v8229_v25 = vsel %vm6830_vm7, %v12759_v56, %v12760_v49 }
 0xd1f   :  { %v12850_v18 = vunpack.i.h.bf16 %v12848_v31  ;;  %v12849_v20 = vunpack.i.l.bf16 %v12848_v31  ;;  %v8239_v24 = vsel %vm6830_vm7, %v12764_v10, %v12765_v44  ;;  %v12869_v0 = vunpack.i.l.bf16 %v18447_v58 }
 0xd20   :  { %11157 = vmatprep.subr.bf16.mxu1 %v11156_v52  ;;  %v12880_v52 = vunpack.i.h.bf16 %v18471_v23  ;;  %v8247_v56 = vsel %vm6830_vm7, %v12874_v30, %v19336_v11  ;;  %v12795_v44 = vunpack.i.h.bf16 %v18427_v9  ;;  %v12829_v11 = vunpack.i.l.bf16 %v18443_v13 }
 0xd21   :  { %11159 = vmatpush1.bf16.msra.mxu1 %v11158_v14  ;;  %v8233_v4 = vsel %vm6830_vm7, %v12849_v20, %v12850_v18  ;;  %v18511_v14 = vsel %vm6830_vm7, %v12775_v15, %v12779_v46 }
 0xd22   :  { %v18485_v53 = vpop.permute.xlu0 %12892  ;;  %v12853_v62 = vpop.permute.xlu1 %12852  ;;  %v11124_v28 = vpack.c.bf16 %v8233_v4, %v8227_v27  ;;  %v8253_v27 = vsel %vm6830_vm7, %v12779_v46, %v19334_v55  ;;  %v11164_v55 = vpack.c.bf16 %v8247_v56, %v18480_v45  ;;  %v12784_v56 = vunpack.i.l.bf16 %v18429_v48 }
 0xd23   :  { %v12855_v6 = vunpack.i.h.bf16 %v12853_v62  ;;  %v12854_v2 = vunpack.i.l.bf16 %v12853_v62  ;;  %v12785_v62 = vunpack.i.h.bf16 %v18429_v48 }
 0xd24   :  { %11125 = vmatprep.subr.bf16.mxu0 %v11124_v28 }
 0xd25   :  { %v8226_v17 = vsel %vm6830_vm7, %v12854_v2, %v12754_v16  ;;  %v8232_v38 = vsel %vm6830_vm7, %v12855_v6, %v12849_v20  ;;  %v12879_v20 = vunpack.i.l.bf16 %v18471_v23  ;;  %v18534_v23 = vsel %vm6830_vm7, %v12789_v42, %v19333_v22 }
 0xd26   :  { %v11126_v26 = vpack.c.bf16 %v8232_v38, %v8226_v17  ;;  %v18503_v34 = vpop.permute.xlu0 %12897  ;;  %v18505_v63 = vpop.permute.xlu1 %12857  ;;  %v12825_v2 = vunpack.i.h.bf16 %v18439_v51  ;;  %v12870_v17 = vunpack.i.h.bf16 %v18447_v58  ;;  %v12895_v22 = vunpack.i.h.bf16 %v18485_v53 }
 0xd27   :  { %v12860_v16 = vunpack.i.h.bf16 %v18505_v63  ;;  %v12859_v31 = vunpack.i.l.bf16 %v18505_v63  ;;  %v8257_v36 = vsel %vm6830_vm7, %v12879_v20, %v12880_v52  ;;  %v8263_v59 = vsel %vm6830_vm7, %v12784_v56, %v12785_v62 }
 0xd28   :  { %11127 = vmatpush1.bf16.msra.mxu0 %v11126_v26 }
 0xd29   :  { %v8234_v15 = vsel %vm6830_vm7, %v12850_v18, %v12859_v31  ;;  %v8235_v4 = vsel %vm6830_vm7, %v12859_v31, %v12860_v16  ;;  %v8238_v31 = vsel %vm6830_vm7, %v12869_v0, %v12764_v10 }
 0xd2a   :  { %v11162_v18 = vpack.c.bf16 %v8234_v15, %v8228_v21  ;;  %v18538_v28 = vpop.permute.xlu0 %12917  ;;  %v12863_v46 = vpop.permute.xlu1 %12862  ;;  %v11160_v6 = vpack.c.bf16 %v8235_v4, %v8229_v25  ;;  %v12894_v21 = vunpack.i.l.bf16 %v18485_v53  ;;  %v12824_v4 = vunpack.i.l.bf16 %v18439_v51 }
 0xd2b   :  { %v12865_v38 = vunpack.i.h.bf16 %v12863_v46  ;;  %v12864_v26 = vunpack.i.l.bf16 %v12863_v46  ;;  %v12900_v51 = vunpack.i.h.bf16 %v18503_v34 }
 0xd2c   :  { %11161 = vmatprep.subr.bf16.mxu1 %v11160_v6 }
 0xd2d   :  { %v8246_v15 = vsel %vm6830_vm7, %v12865_v38, %v12874_v30  ;;  %v8244_v25 = vsel %vm6830_vm7, %v12870_v17, %v12864_v26  ;;  %11163 = vmatpush1.bf16.msra.mxu1 %v11162_v18  ;;  %v8245_v58 = vsel %vm6830_vm7, %v12864_v26, %v12865_v38  ;;  %v8256_v17 = vsel %vm6830_vm7, %v12825_v2, %v12879_v20 }
 0xd2e   :  { %v11166_v46 = vpack.c.bf16 %v8246_v15, %v8240_v8  ;;  %v11130_v10 = vpack.c.bf16 %v8244_v25, %v8238_v31  ;;  %v18551_v0 = vpop.permute.xlu0 %12922  ;;  %v18553_v6 = vpop.permute.xlu1 %12882  ;;  %11165 = vmatprep.subr.bf16.mxu1 %v11164_v55  ;;  %v11128_v45 = vpack.c.bf16 %v8245_v58, %v8239_v24  ;;  %v12899_v8 = vunpack.i.l.bf16 %v18503_v34 }
 0xd2f   :  { %v12885_v30 = vunpack.i.h.bf16 %v18553_v6  ;;  %v12884_v18 = vunpack.i.l.bf16 %v18553_v6  ;;  %v11132_v38 = vpack.c.bf16 %v8257_v36, %v18495_v57  ;;  %v12794_v55 = vunpack.i.l.bf16 %v18427_v9 }
 0xd30   :  { %11129 = vmatprep.subr.bf16.mxu0 %v11128_v45  ;;  %v8271_v20 = vsel %vm6830_vm7, %v12894_v21, %v12895_v22  ;;  %v8264_v2 = vsel %vm6830_vm7, %v12785_v62, %v12789_v42  ;;  %v8250_v36 = vsel %vm6830_vm7, %v12824_v4, %v12774_v33  ;;  %v12830_v15 = vunpack.i.h.bf16 %v18443_v13 }
 0xd31   :  { %v8258_v24 = vsel %vm6830_vm7, %v12880_v52, %v12884_v18  ;;  %11131 = vmatpush1.bf16.msra.mxu0 %v11130_v10  ;;  %11167 = vmatpush1.bf16.msra.mxu1 %v11166_v46  ;;  %v8259_v48 = vsel %vm6830_vm7, %v12884_v18, %v12885_v30  ;;  %v11134_v25 = vpack.c.bf16 %v8256_v17, %v8250_v36  ;;  %v12920_v34 = vunpack.i.h.bf16 %v18538_v28 }
 0xd32   :  { %v11170_v57 = vpack.c.bf16 %v8258_v24, %v18511_v14  ;;  %v18578_v52 = vpop.permute.xlu0 %12927  ;;  %v12888_v26 = vpop.permute.xlu1 %12887  ;;  %11133 = vmatprep.subr.bf16.mxu0 %v11132_v38  ;;  %v11168_v31 = vpack.c.bf16 %v8259_v48, %v8253_v27  ;;  %v8262_v10 = vsel %vm6830_vm7, %v12829_v11, %v12784_v56  ;;  %v11172_v42 = vpack.c.bf16 %v8271_v20, %v18534_v23 }
 0xd33   :  { %v12890_v58 = vunpack.i.h.bf16 %v12888_v26  ;;  %v12889_v46 = vunpack.i.l.bf16 %v12888_v26  ;;  %v8281_v33 = vsel %vm6830_vm7, %v12899_v8, %v12900_v51  ;;  %v8275_v62 = vsel %vm6830_vm7, %v12794_v55, %v12795_v44 }
 0xd34   :  { %11169 = vmatprep.subr.bf16.mxu1 %v11168_v31  ;;  %v12800_v56 = vunpack.i.h.bf16 %v18433_v41  ;;  %v12925_v24 = vunpack.i.h.bf16 %v18551_v0  ;;  %v12924_v48 = vunpack.i.l.bf16 %v18551_v0  ;;  %v11140_v20 = vpack.c.bf16 %v8281_v33, %v8275_v62 }
 0xd35   :  { %v8270_v14 = vsel %vm6830_vm7, %v12890_v58, %v12894_v21  ;;  %v8268_v27 = vsel %vm6830_vm7, %v12830_v15, %v12889_v46  ;;  %11135 = vmatpush1.bf16.msra.mxu0 %v11134_v25  ;;  %11171 = vmatpush1.bf16.msra.mxu1 %v11170_v57  ;;  %v8269_v13 = vsel %vm6830_vm7, %v12889_v46, %v12890_v58  ;;  %v12799_v21 = vunpack.i.l.bf16 %v18433_v41 }
 0xd36   :  { %v11174_v4 = vpack.c.bf16 %v8270_v14, %v8264_v2  ;;  %v11138_v45 = vpack.c.bf16 %v8268_v27, %v8262_v10  ;;  %v18590_v11 = vpop.permute.xlu0 %12932  ;;  %v12903_v18 = vpop.permute.xlu1 %12902  ;;  %11173 = vmatprep.subr.bf16.mxu1 %v11172_v42  ;;  %v11136_v23 = vpack.c.bf16 %v8269_v13, %v8263_v59  ;;  %v12810_v57 = vunpack.i.h.bf16 %v18431_v61 }
 0xd37   :  { %v12905_v17 = vunpack.i.h.bf16 %v12903_v18  ;;  %v12904_v38 = vunpack.i.l.bf16 %v12903_v18  ;;  %v12809_v26 = vunpack.i.l.bf16 %v18431_v61  ;;  %v8276_v25 = vsel %vm6830_vm7, %v12795_v44, %v12799_v21 }
 0xd38   :  { %11137 = vmatprep.subr.bf16.mxu0 %v11136_v23  ;;  %v12805_v46 = vunpack.i.h.bf16 %v18437_v12  ;;  %v12804_v10 = vunpack.i.l.bf16 %v18437_v12  ;;  %v12919_v42 = vunpack.i.l.bf16 %v18538_v28  ;;  %v8295_v9 = vsel %vm6830_vm7, %v12924_v48, %v12925_v24 }
 0xd39   :  { %v8280_v2 = vsel %vm6830_vm7, %v12905_v17, %v12899_v8  ;;  %v8274_v36 = vsel %vm6830_vm7, %v12904_v38, %v12794_v55  ;;  %11139 = vmatpush1.bf16.msra.mxu0 %v11138_v45  ;;  %11175 = vmatpush1.bf16.msra.mxu1 %v11174_v4  ;;  %v8277_v55 = vsel %vm6830_vm7, %v12799_v21, %v12800_v56  ;;  %v12930_v44 = vunpack.i.h.bf16 %v18578_v52 }
 0xd3a   :  { %v11142_v31 = vpack.c.bf16 %v8280_v2, %v8274_v36  ;;  %v18603_v15 = vpop.permute.xlu1 %12907  ;;  %11141 = vmatprep.subr.bf16.mxu0 %v11140_v20  ;;  %v18616_v59 = vpop.permute.xlu0 %12952  ;;  %v12929_v33 = vunpack.i.l.bf16 %v18578_v52  ;;  %v12815_v27 = vunpack.i.h.bf16 %v18435_v43  ;;  %v8289_v18 = vsel %vm6830_vm7, %v12809_v26, %v12810_v57 }
 0xd3b   :  { %v12910_v58 = vunpack.i.h.bf16 %v18603_v15  ;;  %v12909_v8 = vunpack.i.l.bf16 %v18603_v15  ;;  %v12814_v52 = vunpack.i.l.bf16 %v18435_v43  ;;  %v8288_v62 = vsel %vm6830_vm7, %v12805_v46, %v12809_v26 }
 0xd3c   :  { %v8286_v21 = vsel %vm6830_vm7, %v12919_v42, %v12804_v10  ;;  %v11180_v17 = vpack.c.bf16 %v8295_v9, %v8289_v18  ;;  %v8287_v38 = vsel %vm6830_vm7, %v12804_v10, %v12805_v46  ;;  %v8305_v43 = vsel %vm6830_vm7, %v12929_v33, %v12930_v44 }
 0xd3d   :  { %v8282_v14 = vsel %vm6830_vm7, %v12900_v51, %v12909_v8  ;;  %11143 = vmatpush1.bf16.msra.mxu0 %v11142_v31  ;;  %v8283_v12 = vsel %vm6830_vm7, %v12909_v8, %v12910_v58  ;;  %v8299_v46 = vsel %vm6830_vm7, %v12814_v52, %v12815_v27  ;;  %v12819_v10 = vunpack.i.l.bf16 %v18441_v19 }
 0xd3e   :  { %v11178_v13 = vpack.c.bf16 %v8282_v14, %v8276_v25  ;;  %v12913_v4 = vpop.permute.xlu1 %12912  ;;  %v11176_v45 = vpack.c.bf16 %v8283_v12, %v8277_v55  ;;  %v18642_v28 = vpop.permute.xlu0 %12957  ;;  %v11148_v9 = vpack.c.bf16 %v8305_v43, %v8299_v46 }
 0xd3f   :  { %v12915_v23 = vunpack.i.h.bf16 %v12913_v4  ;;  %v12914_v51 = vunpack.i.l.bf16 %v12913_v4 }
 0xd40   :  { %11177 = vmatprep.subr.bf16.mxu1 %v11176_v45 }
 0xd41   :  { %v8294_v20 = vsel %vm6830_vm7, %v12915_v23, %v12924_v48  ;;  %v8292_v2 = vsel %vm6830_vm7, %v12920_v34, %v12914_v51  ;;  %11179 = vmatpush1.bf16.msra.mxu1 %v11178_v13  ;;  %v8293_v36 = vsel %vm6830_vm7, %v12914_v51, %v12915_v23  ;;  %v12820_v48 = vunpack.i.h.bf16 %v18441_v19 }
 0xd42   :  { %v11182_v31 = vpack.c.bf16 %v8294_v20, %v8288_v62  ;;  %v11146_v25 = vpack.c.bf16 %v8292_v2, %v8286_v21  ;;  %v12938_v26 = vpop.permute.xlu1 %12937  ;;  %11181 = vmatprep.subr.bf16.mxu1 %v11180_v17  ;;  %v11144_v8 = vpack.c.bf16 %v8293_v36, %v8287_v38  ;;  %v8300_v34 = vsel %vm6830_vm7, %v12815_v27, %v12819_v10  ;;  %v18654_v23 = vpop.permute.xlu0 %12962  ;;  %v18668_v27 = vld [vmem:[%s19121_s6] sm:$0xff] }
 0xd43   :  { %v12940_v55 = vunpack.i.h.bf16 %v12938_v26  ;;  %v12939_v42 = vunpack.i.l.bf16 %v12938_v26  ;;  %v12934_v51 = vunpack.i.l.bf16 %v18590_v11  ;;  %v12955_v26 = vunpack.i.h.bf16 %v18616_v59 }
 0xd44   :  { %11145 = vmatprep.subr.bf16.mxu0 %v11144_v8  ;;  %v12954_v8 = vunpack.i.l.bf16 %v18616_v59  ;;  %v12960_v59 = vunpack.i.h.bf16 %v18642_v28  ;;  %v12965_v29 = vunpack.i.h.bf16 %v18654_v23 }
 0xd45   :  { %v8304_v14 = vsel %vm6830_vm7, %v12940_v55, %v12929_v33  ;;  %v8298_v12 = vsel %vm6830_vm7, %v12939_v42, %v12814_v52  ;;  %11147 = vmatpush1.bf16.msra.mxu0 %v11146_v25  ;;  %11183 = vmatpush1.bf16.msra.mxu1 %v11182_v31  ;;  %v8301_v33 = vsel %vm6830_vm7, %v12819_v10, %v12820_v48  ;;  %v12935_v52 = vunpack.i.h.bf16 %v18590_v11  ;;  %v18673_v11 = vld [vmem:[%s19121_s6 + $0x18] sm:$0xff] }
 0xd46   :  { %v11150_v13 = vpack.c.bf16 %v8304_v14, %v8298_v12  ;;  %v18649_v4 = vpop.permute.xlu1 %12942  ;;  %11149 = vmatprep.subr.bf16.mxu0 %v11148_v9  ;;  %v18686_v55 = vpop.permute.xlu0 %12967  ;;  %v19646_v10 = vmov 0.0|0.0   ;;  %v18694_v9 = vld [vmem:[%s19121_s6 + $0x10] sm:$0xff]  ;;  %v12959_v14 = vunpack.i.l.bf16 %v18642_v28  ;;  %s13123_s6 = smov 16  }
 0xd47   :  { %v12945_v45 = vunpack.i.h.bf16 %v18649_v4  ;;  %v12944_v18 = vunpack.i.l.bf16 %v18649_v4  ;;  %v8207_v31 = vsel %vm6830_vm7, %v12934_v51, %v12935_v52  ;;  %v12970_v39 = vunpack.i.h.bf16 %v18686_v55 }
 0xd49   :  { %v8306_v62 = vsel %vm6830_vm7, %v12930_v44, %v12944_v18  ;;  %11151 = vmatpush1.bf16.msra.mxu0 %v11150_v13  ;;  %v8307_v21 = vsel %vm6830_vm7, %v12944_v18, %v12945_v45  ;;  %v8206_v44 = vsel %vm6830_vm7, %v12555_v60, %v12934_v51  ;;  %v8218_v13 = vsel %vm6830_vm7, %v12750_v50, %v12954_v8 }
 0xd4a   :  { %v11186_v17 = vpack.c.bf16 %v8306_v62, %v8300_v34  ;;  %v12948_v38 = vpop.permute.xlu1 %12947  ;;  %v11184_v20 = vpack.c.bf16 %v8307_v21, %v8301_v33  ;;  %v8219_v34 = vsel %vm6830_vm7, %v12954_v8, %v12955_v26  ;;  %v12964_v50 = vunpack.i.l.bf16 %v18654_v23 }
 0xd4b   :  { %v12950_v2 = vunpack.i.h.bf16 %v12948_v38  ;;  %v12949_v36 = vunpack.i.l.bf16 %v12948_v38  ;;  %v19648_v8 = vunpack.i.h.bf16 %v18414_v1 }
 0xd4c   :  { %11185 = vmatprep.subr.bf16.mxu1 %v11184_v20  ;;  %8507 = vmatmul.mubr.f32.vlgmr.msra.gmra.mrb[64].mxu0 %v18668_v27  ;;  %v8230_v20 = vsel %vm6830_vm7, %v12760_v49, %v12959_v14  ;;  %v12969_v49 = vunpack.i.l.bf16 %v18686_v55 }
 0xd4d   :  { %v8212_v43 = vsel %vm6830_vm7, %v12730_v35, %v12949_v36  ;;  %11187 = vmatpush1.bf16.msra.mxu1 %v11186_v17  ;;  %v8213_v25 = vsel %vm6830_vm7, %v12949_v36, %v12950_v2  ;;  %9912 = vmatprep.mubr.msk.f32.mxu0 %vm7065_vm10, %v18673_v11  ;;  %v11225_v60 = vpack.c.bf16 %v12950_v2, %v12935_v52 }
 0xd4e   :  { %v11190_v42 = vpack.c.bf16 %v8212_v43, %v8206_v44  ;;  %v12993_v46 = vpop.permute.xlu1 %12992  ;;  %v11188_v3 = vpack.c.bf16 %v8213_v25, %v8207_v31  ;;  %11224 = vmatprep.subr.bf16.mxu1 %v19646_v10  ;;  %v8231_v17 = vsel %vm6830_vm7, %v12959_v14, %v12960_v59  ;;  %v19647_v31 = vunpack.i.h.bf16 %v18453_v37 }
 0xd4f   :  { %v12995_v5 = vunpack.i.h.bf16 %v12993_v46  ;;  %v12994_v35 = vunpack.i.l.bf16 %v12993_v46  ;;  %v8255_v14 = vsel %vm6830_vm7, %v12969_v49, %v12970_v39 }
 0xd50   :  { %11189 = vmatprep.subr.bf16.mxu0 %v11188_v3  ;;  %8584 = vmatmul.mubr.f32.vlgmr.msra.gmra.mrb[64].mxu1 %v18668_v27 }
 0xd51   :  { %v8224_v12 = vsel %vm6830_vm7, %v12845_v47, %v12994_v35  ;;  %11191 = vmatpush1.bf16.msra.mxu0 %v11190_v42  ;;  %11226 = vmatpush1.bf16.msra.mxu1 %v11225_v60  ;;  %v8225_v33 = vsel %vm6830_vm7, %v12994_v35, %v12995_v5  ;;  %v11228_v28 = vpack.c.bf16 %v12995_v5, %v12955_v26  ;;  %v18715_v47 = vpop.permute.xlu0 %12972 }
 0xd52   :  { %v12998_v18 = vpop.permute.xlu1 %12997  ;;  %11227 = vmatprep.subr.bf16.mxu1 %v19646_v10  ;;  %8513 = vmatmul.mubr.f32.gmra.mrb[66].mxu0 %v18694_v9  ;;  %v11194_v52 = vpack.c.bf16 %v8224_v12, %v8218_v13  ;;  %v11192_v62 = vpack.c.bf16 %v8225_v33, %v8219_v34  ;;  %v8242_v42 = vsel %vm6830_vm7, %v19648_v8, %v12964_v50  ;;  %v12975_v37 = vunpack.i.h.bf16 %v18715_v47 }
 0xd53   :  { %v13000_v54 = vunpack.i.h.bf16 %v12998_v18  ;;  %v12999_v51 = vunpack.i.l.bf16 %v12998_v18  ;;  %9914 = vmatprep.mubr.msk.f32.mxu1 %vm7065_vm10, %v18673_v11  ;;  %9915 = vmatprep.mubr.msk.f32.mxu0 %vm7065_vm10, %v18343_v7  ;;  %v19649_v13 = vunpack.i.h.bf16 %v18425_v40 }
 0xd54   :  { %8590 = vmatmul.mubr.f32.gmra.mrb[66].mxu1 %v18694_v9  ;;  %11193 = vmatprep.subr.bf16.mxu0 %v11192_v62  ;;  %v19650_v62 = vunpack.i.h.bf16 %v18423_v32 }
 0xd55   :  { %v8236_v21 = vsel %vm6830_vm7, %v12860_v16, %v12999_v51  ;;  %11229 = vmatpush1.bf16.msra.mxu1 %v11228_v28  ;;  %v8237_v38 = vsel %vm6830_vm7, %v12999_v51, %v13000_v54  ;;  %v11231_v36 = vpack.c.bf16 %v13000_v54, %v12960_v59  ;;  %11195 = vmatpush1.bf16.msra.mxu0 %v11194_v52  ;;  %v12978_v46 = vpop.permute.xlu0 %12977  ;;  %v12974_v59 = vunpack.i.l.bf16 %v18715_v47 }
 0xd56   :  { %v13003_v23 = vpop.permute.xlu1 %13002  ;;  %v11196_v2 = vpack.c.bf16 %v8237_v38, %v8231_v17  ;;  %11230 = vmatprep.subr.bf16.mxu1 %v19646_v10  ;;  %v11198_v44 = vpack.c.bf16 %v8236_v21, %v8230_v20  ;;  %9917 = vmatprep.mubr.msk.f32.mxu1 %vm7065_vm10, %v18343_v7  ;;  %v8243_v16 = vsel %vm6830_vm7, %v12964_v50, %v12965_v29  ;;  %v12979_v50 = vunpack.i.l.bf16 %v12978_v46 }
 0xd57   :  { %v13005_v63 = vunpack.i.h.bf16 %v13003_v23  ;;  %v13004_v43 = vunpack.i.l.bf16 %v13003_v23  ;;  %v8254_v18 = vsel %vm6830_vm7, %v19649_v13, %v12969_v49  ;;  %v8266_v21 = vsel %vm6830_vm7, %v19650_v62, %v12974_v59  ;;  %v19654_v62 = vld [vmem:[#allocation55_spill] sm:$0xff] }
 0xd58   :  { %11197 = vmatprep.subr.bf16.mxu0 %v11196_v2 }
 0xd59   :  { %v8248_v25 = vsel %vm6830_vm7, %v19647_v31, %v13004_v43  ;;  %11232 = vmatpush1.bf16.msra.mxu1 %v11231_v36  ;;  %v8249_v26 = vsel %vm6830_vm7, %v13004_v43, %v13005_v63  ;;  %v11234_v60 = vpack.c.bf16 %v13005_v63, %v12965_v29  ;;  %11199 = vmatpush1.bf16.msra.mxu0 %v11198_v44  ;;  %v12983_v51 = vpop.permute.xlu0 %12982  ;;  %v12980_v29 = vunpack.i.h.bf16 %v12978_v46 }
 0xd5a   :  { %v13008_v7 = vpop.permute.xlu1 %13007  ;;  %v11200_v3 = vpack.c.bf16 %v8249_v26, %v8243_v16  ;;  %11233 = vmatprep.subr.bf16.mxu1 %v19646_v10  ;;  %v11202_v5 = vpack.c.bf16 %v8248_v25, %v8242_v42  ;;  %v12985_v44 = vunpack.i.h.bf16 %v12983_v51  ;;  %v12984_v53 = vunpack.i.l.bf16 %v12983_v51 }
 0xd5b   :  { %v13010_v55 = vunpack.i.h.bf16 %v13008_v7  ;;  %v13009_v35 = vunpack.i.l.bf16 %v13008_v7  ;;  %v8279_v32 = vsel %vm6830_vm7, %v12979_v50, %v12980_v29  ;;  %v8278_v43 = vsel %vm6830_vm7, %v12800_v56, %v12979_v50 }
 0xd5c   :  { %11201 = vmatprep.subr.bf16.mxu0 %v11200_v3  ;;  %v8290_v46 = vsel %vm6830_vm7, %v12810_v57, %v12984_v53 }
 0xd5d   :  { %v8260_v1 = vsel %vm6830_vm7, %v12885_v30, %v13009_v35  ;;  %11235 = vmatpush1.bf16.msra.mxu1 %v11234_v60  ;;  %v8261_v12 = vsel %vm6830_vm7, %v13009_v35, %v13010_v55  ;;  %v11237_v28 = vpack.c.bf16 %v13010_v55, %v12970_v39  ;;  %11203 = vmatpush1.bf16.msra.mxu0 %v11202_v5  ;;  %v12988_v16 = vpop.permute.xlu0 %12987 }
 0xd5e   :  { %v13013_v34 = vpop.permute.xlu1 %13012  ;;  %v11204_v33 = vpack.c.bf16 %v8261_v12, %v8255_v14  ;;  %11236 = vmatprep.subr.bf16.mxu1 %v19646_v10  ;;  %v11206_v52 = vpack.c.bf16 %v8260_v1, %v8254_v18  ;;  %v8267_v30 = vsel %vm6830_vm7, %v12974_v59, %v12975_v37  ;;  %v12990_v8 = vunpack.i.h.bf16 %v12988_v16  ;;  %v19651_v18 = vld [vmem:[#allocation39_spill] sm:$0xff] }
 0xd5f   :  { %v13015_v54 = vunpack.i.h.bf16 %v13013_v34  ;;  %v13014_v6 = vunpack.i.l.bf16 %v13013_v34  ;;  %v12989_v42 = vunpack.i.l.bf16 %v12988_v16 }
 0xd60   :  { %11205 = vmatprep.subr.bf16.mxu0 %v11204_v33  ;;  %v19652_v33 = vld [vmem:[#allocation57_spill] sm:$0xff] }
 0xd61   :  { %v8272_v40 = vsel %vm6830_vm7, %v12895_v22, %v13014_v6  ;;  %11238 = vmatpush1.bf16.msra.mxu1 %v11237_v28  ;;  %v8273_v47 = vsel %vm6830_vm7, %v13014_v6, %v13015_v54  ;;  %v11240_v20 = vpack.c.bf16 %v13015_v54, %v12975_v37  ;;  %11207 = vmatpush1.bf16.msra.mxu0 %v11206_v52  ;;  %v19653_v54 = vld [vmem:[#allocation58_spill] sm:$0xff] }
 0xd62   :  { %v13018_v17 = vpop.permute.xlu1 %13017  ;;  %v11208_v38 = vpack.c.bf16 %v8273_v47, %v8267_v30  ;;  %11239 = vmatprep.subr.bf16.mxu1 %v19646_v10  ;;  %v11210_v23 = vpack.c.bf16 %v8272_v40, %v8266_v21  ;;  %v8302_v57 = vsel %vm6830_vm7, %v12820_v48, %v12989_v42 }
 0xd63   :  { %v13020_v2 = vunpack.i.h.bf16 %v13018_v17  ;;  %v13019_v36 = vunpack.i.l.bf16 %v13018_v17 }
 0xd64   :  { %11209 = vmatprep.subr.bf16.mxu0 %v11208_v38 }
 0xd65   :  { %v8284_v22 = vsel %vm6830_vm7, %v12910_v58, %v13019_v36  ;;  %11241 = vmatpush1.bf16.msra.mxu1 %v11240_v20  ;;  %v8285_v63 = vsel %vm6830_vm7, %v13019_v36, %v13020_v2  ;;  %v11243_v31 = vpack.c.bf16 %v13020_v2, %v12980_v29  ;;  %11211 = vmatpush1.bf16.msra.mxu0 %v11210_v23 }
 0xd66   :  { %v13023_v39 = vpop.permute.xlu1 %13022  ;;  %v11212_v49 = vpack.c.bf16 %v8285_v63, %v8279_v32  ;;  %11242 = vmatprep.subr.bf16.mxu1 %v19646_v10  ;;  %v11214_v25 = vpack.c.bf16 %v8284_v22, %v8278_v43  ;;  %v8291_v58 = vsel %vm6830_vm7, %v12984_v53, %v12985_v44  ;;  %v19655_v63 = vld [vmem:[#allocation63_spill] sm:$0xff] }
 0xd67   :  { %v13025_v15 = vunpack.i.h.bf16 %v13023_v39  ;;  %v13024_v26 = vunpack.i.l.bf16 %v13023_v39 }
 0xd68   :  { %11213 = vmatprep.subr.bf16.mxu0 %v11212_v49  ;;  %v19656_v49 = vld [vmem:[#allocation68_spill] sm:$0xff] }
 0xd69   :  { %v8296_v41 = vsel %vm6830_vm7, %v12925_v24, %v13024_v26  ;;  %11244 = vmatpush1.bf16.msra.mxu1 %v11243_v31  ;;  %v8297_v56 = vsel %vm6830_vm7, %v13024_v26, %v13025_v15  ;;  %v11246_v60 = vpack.c.bf16 %v13025_v15, %v12985_v44  ;;  %11215 = vmatpush1.bf16.msra.mxu0 %v11214_v25 }
 0xd6a   :  { %v13028_v7 = vpop.permute.xlu1 %13027  ;;  %v11216_v3 = vpack.c.bf16 %v8297_v56, %v8291_v58  ;;  %11245 = vmatprep.subr.bf16.mxu1 %v19646_v10  ;;  %v11218_v5 = vpack.c.bf16 %v8296_v41, %v8290_v46  ;;  %v8303_v24 = vsel %vm6830_vm7, %v12989_v42, %v12990_v8  ;;  %v19657_v58 = vld [vmem:[#allocation61_spill] sm:$0xff] }
 0xd6b   :  { %v13030_v55 = vunpack.i.h.bf16 %v13028_v7  ;;  %v13029_v35 = vunpack.i.l.bf16 %v13028_v7 }
 0xd6c   :  { %11217 = vmatprep.subr.bf16.mxu0 %v11216_v3 }
 0xd6d   :  { %v8308_v0 = vsel %vm6830_vm7, %v12945_v45, %v13029_v35  ;;  %11247 = vmatpush1.bf16.msra.mxu1 %v11246_v60  ;;  %v8309_v61 = vsel %vm6830_vm7, %v13029_v35, %v13030_v55  ;;  %v11249_v59 = vpack.c.bf16 %v13030_v55, %v12990_v8  ;;  %11219 = vmatpush1.bf16.msra.mxu0 %v11218_v5  ;;  %vm9688_vm7 = vcmask 458112  }
 0xd6e   :  { %v11220_v37 = vpack.c.bf16 %v8309_v61, %v8303_v24  ;;  %11248 = vmatprep.subr.bf16.mxu1 %v19646_v10  ;;  %v11222_v1 = vpack.c.bf16 %v8308_v0, %v8302_v57 }
 0xd70   :  { %11221 = vmatprep.subr.bf16.mxu0 %v11220_v37 }
 0xd71   :  { %11250 = vmatpush1.bf16.msra.mxu1 %v11249_v59  ;;  %11223 = vmatpush1.bf16.msra.mxu0 %v11222_v1 }
 0xd74   :  { %8738 = vmatmul.mubr.f32.vlgmr.msra.gmra.mrb[68].mxu1 %v18668_v27  ;;  %8661 = vmatmul.mubr.f32.vlgmr.msra.gmra.mrb[68].mxu0 %v18668_v27 }
 0xd75   :  { %9918 = vmatprep.mubr.msk.f32.mxu1 %vm7065_vm10, %v18673_v11  ;;  %9916 = vmatprep.mubr.msk.f32.mxu0 %vm7065_vm10, %v18673_v11 }
 0xd78   :  { %8743 = vmatmul.mubr.f32.gmra.mrb[70].mxu1 %v18694_v9  ;;  %8667 = vmatmul.mubr.f32.gmra.mrb[70].mxu0 %v18694_v9 }
 0xe1f   :  { %v8508_v19 = vpop.f32.mrb[64].mxu0 }
 0xe20   :  { %v8510_v48 = vpop.f32.mrb[65].mxu0  ;;  %v18796_v34 = vmul.f32 %v8508_v19, %v19651_v18 }
 0xe21   :  { %v18799_v27 = vmul.f32 %v8510_v48, %v19652_v33 }
 0xe22   :  { %v8780_v9 = vmul.f32 %v18796_v34, %v18796_v34 }
 0xe23   :  { %v8585_v4 = vpop.f32.mrb[64].mxu1  ;;  %v8781_v52 = vmul.f32 %v18799_v27, %v18799_v27  ;;  %v8762_v51 = vadd.f32 %v18799_v27, %v18796_v34 }
 0xe24   :  { %v8587_v45 = vpop.f32.mrb[65].mxu1  ;;  %v18812_v6 = vmul.f32 %v8585_v4, %v19653_v54 }
 0xe25   :  { %v8514_v10 = vpop.f32.mrb[66].mxu0  ;;  %v8794_v40 = vadd.f32 %v8781_v52, %v8780_v9  ;;  %v18826_v21 = vmul.f32 %v8587_v45, %v19654_v62 }
 0xe26   :  { %v8516_v14 = vpop.f32.mrb[67].mxu0  ;;  %v18802_v11 = vmul.f32 %v8514_v10, %v19651_v18  ;;  %v8782_v47 = vmul.f32 %v18812_v6, %v18812_v6  ;;  %v8763_v17 = vadd.f32 %v8762_v51, %v18812_v6 }
 0xe27   :  { %v8591_v12 = vpop.f32.mrb[66].mxu1  ;;  %v18805_v28 = vmul.f32 %v8516_v14, %v19652_v33  ;;  %v8783_v53 = vmul.f32 %v18826_v21, %v18826_v21 }
 0xe28   :  { %v8593_v13 = vpop.f32.mrb[67].mxu1  ;;  %v8787_v30 = vmul.f32 %v18802_v11, %v18802_v11  ;;  %v18821_v50 = vmul.f32 %v8591_v12, %v19653_v54  ;;  %v8795_v44 = vadd.f32 %v8794_v40, %v8782_v47  ;;  %v8764_v16 = vadd.f32 %v8763_v17, %v18826_v21  ;;  %v8896_v17 = vld [vmem:[%s19122_s8] sm:$0xff] }
 0xe29   :  { %v8788_v29 = vmul.f32 %v18805_v28, %v18805_v28  ;;  %v8771_v38 = vadd.f32 %v18805_v28, %v18802_v11  ;;  %v18834_v2 = vmul.f32 %v8593_v13, %v19654_v62 }
 0xe2a   :  { %v8789_v23 = vmul.f32 %v18821_v50, %v18821_v50  ;;  %v8796_v41 = vadd.f32 %v8795_v44, %v8783_v53 }
 0xe2b   :  { %v8803_v20 = vadd.f32 %v8788_v29, %v8787_v30  ;;  %v8772_v39 = vadd.f32 %v8771_v38, %v18821_v50  ;;  %v8790_v26 = vmul.f32 %v18834_v2, %v18834_v2  ;;  %v8897_v38 = vld [vmem:[%s19122_s8 + $0x8] sm:$0xff] }
 0xe2d   :  { %v8804_v15 = vadd.f32 %v8803_v20, %v8789_v23  ;;  %v8773_v0 = vadd.f32 %v8772_v39, %v18834_v2  ;;  %v8898_v20 = vld [vmem:[%s19122_s8 + $0x10] sm:$0xff]  ;;  %v18882_v23 = vpack.c.bf16 %v8897_v38, %v8896_v17 }
 0xe2f   :  { %v8805_v59 = vadd.f32 %v8804_v15, %v8790_v26  ;;  %11252 = vmatprep.subr.bf16.mxu0 %v18882_v23  ;;  %11268 = vmatprep.subr.bf16.mxu1 %v18882_v23 }
 0xe30   :  { %11254 = vmatpush3.bf16.msra.mxu0 %v18882_v23  ;;  %11270 = vmatpush3.bf16.msra.mxu1 %v18882_v23 }
 0xe47   :  { %v8739_v36 = vpop.f32.mrb[68].mxu1  ;;  %v8662_v32 = vpop.f32.mrb[68].mxu0 }
 0xe48   :  { %v8741_v22 = vpop.f32.mrb[69].mxu1  ;;  %v8754_v43 = vmul.f32 %v8739_v36, %v19655_v63  ;;  %v18842_v31 = vmul.f32 %v8662_v32, %v19656_v49  ;;  %v8664_v25 = vpop.f32.mrb[69].mxu0  ;;  %v8899_v36 = vld [vmem:[%s19122_s8 + $0x18] sm:$0xff] }
 0xe49   :  { %v18847_v8 = vmul.f32 %v8664_v25, %v19657_v58  ;;  %v18887_v44 = vpack.c.bf16 %v8899_v36, %v8898_v20 }
 0xe4a   :  { %v8765_v56 = vadd.f32 %v8764_v16, %v18842_v31  ;;  %v8784_v46 = vmul.f32 %v18842_v31, %v18842_v31  ;;  %v8767_v60 = vsel %vm54_vm11, %v8754_v43, 0.0  ;;  %v8786_v5 = vmul.f32 %v8754_v43, %v8754_v43 }
 0xe4b   :  { %v8744_v42 = vpop.f32.mrb[70].mxu1  ;;  %v8785_v3 = vmul.f32 %v18847_v8, %v18847_v8  ;;  %v8668_v55 = vpop.f32.mrb[70].mxu0  ;;  %11256 = vmatprep.subr.bf16.mxu0 %v18887_v44  ;;  %11272 = vmatprep.subr.bf16.mxu1 %v18887_v44 }
 0xe4c   :  { %v8746_v7 = vpop.f32.mrb[71].mxu1  ;;  %v8761_v35 = vmul.f32 %v8744_v42, %v19655_v63  ;;  %v8797_v24 = vadd.f32 %v8796_v41, %v8784_v46  ;;  %v8766_v61 = vadd.f32 %v8765_v56, %v18847_v8  ;;  %v18859_v57 = vmul.f32 %v8668_v55, %v19656_v49  ;;  %v8670_v37 = vpop.f32.mrb[71].mxu0  ;;  %11258 = vmatpush3.bf16.msra.mxu0 %v18887_v44 }
 0xe4d   :  { %v18862_v1 = vmul.f32 %v8670_v37, %v19657_v58  ;;  %v8799_v10 = vsel %vm54_vm11, %v8786_v5, 0.0  ;;  %11274 = vmatpush3.bf16.msra.mxu1 %v18887_v44  ;;  %v8900_v7 = vld [vmem:[%s19122_s8 + $0x20] sm:$0xff] }
 0xe4e   :  { %v8768_v19 = vadd.f32 %v8767_v60, %v8766_v61  ;;  %v8774_v48 = vadd.f32 %v8773_v0, %v18859_v57  ;;  %v8791_v4 = vmul.f32 %v18859_v57, %v18859_v57  ;;  %v8798_v45 = vadd.f32 %v8797_v24, %v8785_v3  ;;  %v8901_v3 = vld [vmem:[%s19122_s8 + $0x28] sm:$0xff]  ;;  %v8902_v61 = vld [vmem:[%s19122_s8 + $0x30] sm:$0xff] }
 0xe4f   :  { %v8792_v14 = vmul.f32 %v18862_v1, %v18862_v1  ;;  %v8776_v12 = vsel %vm54_vm11, %v8761_v35, 0.0  ;;  %v8793_v13 = vmul.f32 %v8761_v35, %v8761_v35  ;;  %v18915_v55 = vpack.c.bf16 %v8901_v3, %v8900_v7 }
 0xe50   :  { %v8806_v9 = vadd.f32 %v8805_v59, %v8791_v4  ;;  %v8775_v52 = vadd.f32 %v8774_v48, %v18862_v1  ;;  %8769 = vadd.xlane.f32.xlu0 %v8768_v19  ;;  %v8800_v30 = vadd.f32 %v8799_v10, %v8798_v45 }
 0xe51   :  { %v8808_v40 = vsel %vm54_vm11, %v8793_v13, 0.0  ;;  %11260 = vmatprep.subr.bf16.mxu0 %v18915_v55  ;;  %11276 = vmatprep.subr.bf16.mxu1 %v18915_v55 }
 0xe52   :  { %v8777_v51 = vadd.f32 %v8776_v12, %v8775_v52  ;;  %v8807_v29 = vadd.f32 %v8806_v9, %v8792_v14  ;;  %11262 = vmatpush3.bf16.msra.mxu0 %v18915_v55  ;;  %11278 = vmatpush3.bf16.msra.mxu1 %v18915_v55 }
 0xe54   :  { %8801 = vadd.xlane.f32.xlu0 %v8800_v30  ;;  %8778 = vadd.xlane.f32.xlu1 %v8777_v51  ;;  %v8809_v47 = vadd.f32 %v8808_v40, %v8807_v29  ;;  %v13066_v30 = vld [vmem:[#allocation3 + $0x10] sm:$0xff]  ;;  %v13067_v40 = vld [vmem:[#allocation3 + $0x8] sm:$0xff] }
 0xe58   :  { %8810 = vadd.xlane.f32.xlu0 %v8809_v47 }
 0xedd   :  { %v8770_v53 = vpop.xlane.xlu0 %8769 }
 0xede   :  { %v18897_v22 = vmul.f32 0.001953125, %v8770_v53 }
 0xee0   :  { %v8816_v43 = vmul.f32 %v18897_v22, %v18897_v22  ;;  %v8825_v60 = vsub.f32 %v18799_v27, %v18897_v22  ;;  %v8824_v5 = vsub.f32 %v18796_v34, %v18897_v22  ;;  %v8903_v27 = vld [vmem:[%s19122_s8 + $0x38] sm:$0xff]  ;;  %v8827_v38 = vsub.f32 %v18826_v21, %v18897_v22  ;;  %s13115_s8 = smov 57  }
 0xee1   :  { %v8802_v32 = vpop.xlane.xlu0 %8801  ;;  %v8779_v63 = vpop.xlane.xlu1 %8778  ;;  %v18930_v34 = vpack.c.bf16 %v8903_v27, %v8902_v61 }
 0xee2   :  { %v8814_v16 = vmul.f32 0.001953125, %v8802_v32  ;;  %v18901_v39 = vmul.f32 0.001953125, %v8779_v63  ;;  %v13068_v32 = vld [vmem:[#allocation3 + $0x50] sm:$0xff] }
 0xee3   :  { %11264 = vmatprep.subr.bf16.mxu0 %v18930_v34  ;;  %11280 = vmatprep.subr.bf16.mxu1 %v18930_v34 }
 0xee4   :  { %v8818_v25 = vsub.f32 %v8814_v16, %v8816_v43  ;;  %v8817_v41 = vmul.f32 %v18901_v39, %v18901_v39  ;;  %v8830_v19 = vsub.f32 %v18802_v11, %v18901_v39  ;;  %v8831_v48 = vsub.f32 %v18805_v28, %v18901_v39  ;;  %11266 = vmatpush3.bf16.msra.mxu0 %v18930_v34 }
 0xee5   :  { %v8811_v15 = vpop.xlane.xlu0 %8810  ;;  %v8826_v11 = vsub.f32 %v18812_v6, %v18897_v22  ;;  %11282 = vmatpush3.bf16.msra.mxu1 %v18930_v34  ;;  %11284 = vmatprep.subr.bf16.mxu0 %v18882_v23  ;;  %v8832_v36 = vsub.f32 %v18821_v50, %v18901_v39  ;;  %v8833_v21 = vsub.f32 %v18834_v2, %v18901_v39 }
 0xee6   :  { %v8820_v26 = vadd.f32 1e-05, %v8818_v25  ;;  %v8815_v42 = vmul.f32 0.001953125, %v8811_v15  ;;  %11300 = vmatprep.subr.bf16.mxu1 %v18882_v23  ;;  %v13069_v15 = vld [vmem:[#allocation3 + $0x58] sm:$0xff] }
 0xee8   :  { %13041 = vrsqrt.f32 %v8820_v26  ;;  %v8819_v56 = vsub.f32 %v8815_v42, %v8817_v41 }
 0xeea   :  { %v8821_v46 = vadd.f32 1e-05, %v8819_v56 }
 0xeec   :  { %13043 = vrsqrt.f32 %v8821_v46 }
 0xef2   :  { %v18917_v35 = vpop.eup %13041 }
 0xef3   :  { %v8837_v0 = vmul.f32 %v18917_v35, %v8825_v60  ;;  %v8836_v24 = vmul.f32 %v18917_v35, %v8824_v5  ;;  %v8838_v51 = vmul.f32 %v18917_v35, %v8826_v11  ;;  %v8839_v53 = vmul.f32 %v18917_v35, %v8827_v38 }
 0xef4   :  { %v8834_v60 = vsub.f32 %v18859_v57, %v18901_v39 }
 0xef5   :  { %v8849_v37 = vmul.f32 0.2, %v8837_v0  ;;  %v8848_v59 = vmul.f32 0.2, %v8836_v24  ;;  %v8850_v16 = vmul.f32 0.2, %v8838_v51 }
 0xef6   :  { %v18937_v4 = vpop.eup %13043 }
 0xef7   :  { %v8861_v45 = vmax.f32 %v8837_v0, %v8849_v37  ;;  %v8860_v10 = vmax.f32 %v8836_v24, %v8848_v59  ;;  %v8842_v14 = vmul.f32 %v18937_v4, %v8830_v19  ;;  %v8843_v12 = vmul.f32 %v18937_v4, %v8831_v48  ;;  %v13070_v0 = vld [vmem:[#allocation3 + $0x18] sm:$0xff]  ;;  %v13071_v59 = vld [vmem:[#allocation3 + $0x20] sm:$0xff] }
 0xef8   :  { %v8844_v25 = vmul.f32 %v18937_v4, %v8832_v36  ;;  %v8862_v50 = vmax.f32 %v8838_v51, %v8850_v16  ;;  %v8845_v41 = vmul.f32 %v18937_v4, %v8833_v21  ;;  %v8846_v37 = vmul.f32 %v18937_v4, %v8834_v60  ;;  %v13072_v48 = vld [vmem:[#allocation3 + $0x60] sm:$0xff] }
 0xef9   :  { %v8873_v28 = vmul.f32 %v8861_v45, %v19652_v33  ;;  %v8872_v13 = vmul.f32 %v8860_v10, %v19651_v18  ;;  %v8854_v9 = vmul.f32 0.2, %v8842_v14  ;;  %v8855_v52 = vmul.f32 0.2, %v8843_v12 }
 0xefa   :  { %v8856_v42 = vmul.f32 0.2, %v8844_v25  ;;  %v8874_v2 = vmul.f32 %v8862_v50, %v19653_v54  ;;  %v8857_v3 = vmul.f32 0.2, %v8845_v41 }
 0xefb   :  { %v8885_v29 = vadd.f32 %v13066_v30, %v8873_v28  ;;  %v8884_v6 = vadd.f32 %v13067_v40, %v8872_v13  ;;  %v8866_v47 = vmax.f32 %v8842_v14, %v8854_v9  ;;  %v8867_v17 = vmax.f32 %v8843_v12, %v8855_v52  ;;  %v13073_v12 = vld [vmem:[#allocation3 + $0x68] sm:$0xff] }
 0xefc   :  { %v8868_v7 = vmax.f32 %v8844_v25, %v8856_v42  ;;  %v8886_v24 = vadd.f32 %v13070_v0, %v8874_v2  ;;  %v8869_v27 = vmax.f32 %v8845_v41, %v8857_v3  ;;  %v8858_v14 = vmul.f32 0.2, %v8846_v37  ;;  %v13074_v52 = vld [vmem:[#allocation3 + $0x28] sm:$0xff] }
 0xefd   :  { %8917 = vrot.lane.b32.xlu0 %v8885_v29, %s13114_s1  ;;  %8915 = vrot.lane.b32.xlu1 %v8884_v6, %s13114_s1  ;;  %v8878_v20 = vmul.f32 %v8866_v47, %v19651_v18  ;;  %v8879_v43 = vmul.f32 %v8867_v17, %v19652_v33  ;;  %v8851_v18 = vmul.f32 0.2, %v8839_v53  ;;  %v8828_v33 = vsub.f32 %v18842_v31, %v18897_v22 }
 0xefe   :  { %v8880_v61 = vmul.f32 %v8868_v7, %v19653_v54  ;;  %v8881_v57 = vmul.f32 %v8869_v27, %v19654_v62  ;;  %v8829_v54 = vsub.f32 %v18847_v8, %v18897_v22  ;;  %v8870_v13 = vmax.f32 %v8846_v37, %v8858_v14  ;;  %v13075_v8 = vld [vmem:[#allocation3 + $0x70] sm:$0xff] }
 0xeff   :  { %v8890_v63 = vadd.f32 %v13068_v32, %v8878_v20  ;;  %v8891_v26 = vadd.f32 %v13069_v15, %v8879_v43  ;;  %v8863_v56 = vmax.f32 %v8839_v53, %v8851_v18  ;;  %v8840_v46 = vmul.f32 %v18917_v35, %v8828_v33 }
 0xf00   :  { %v8892_v45 = vadd.f32 %v13072_v48, %v8880_v61  ;;  %v8893_v11 = vadd.f32 %v13073_v12, %v8881_v57  ;;  %v8841_v9 = vmul.f32 %v18917_v35, %v8829_v54  ;;  %v8882_v30 = vmul.f32 %v8870_v13, %v19656_v49 }
 0xf01   :  { %9023 = vrot.lane.b32.xlu0 %v8885_v29, %s13090_s29  ;;  %8919 = vrot.lane.b32.xlu1 %v8890_v63, %s13114_s1  ;;  %v8875_v31 = vmul.f32 %v8863_v56, %v19654_v62  ;;  %v8852_v5 = vmul.f32 0.2, %v8840_v46  ;;  %v8835_v62 = vsub.f32 %v18862_v1, %v18901_v39  ;;  %v13076_v39 = vld [vmem:[#allocation3 + $0x30] sm:$0xff] }
 0xf02   :  { %v8894_v22 = vadd.f32 %v13075_v8, %v8882_v30 }
 0xf03   :  { %v8887_v19 = vadd.f32 %v13071_v59, %v8875_v31  ;;  %v8864_v10 = vmax.f32 %v8840_v46, %v8852_v5  ;;  %v8847_v40 = vmul.f32 %v18937_v4, %v8835_v62  ;;  %v13077_v4 = vld [vmem:[#allocation3 + $0x78] sm:$0xff] }
 0xf04   :  { %v9919_v59 = vld [vmem:[%s19123_s9] ss:$0 sm:$0xff]  ;;  %s13122_s9 = smov 24  }
 0xf05   :  { %9134 = vrot.lane.b32.xlu0 %v8885_v29, %s13115_s8  ;;  %8921 = vrot.lane.b32.xlu1 %v8891_v26, %s13114_s1  ;;  %s13116_s1 = smov 119   ;;  %v8876_v28 = vmul.f32 %v8864_v10, %v19656_v49  ;;  %v8853_v29 = vmul.f32 0.2, %v8841_v9  ;;  %v8859_v47 = vmul.f32 0.2, %v8847_v40 }
 0xf07   :  { %v8888_v51 = vadd.f32 %v13074_v52, %v8876_v28  ;;  %v8865_v6 = vmax.f32 %v8841_v9, %v8853_v29  ;;  %v8871_v1 = vmax.f32 %v8847_v40, %v8859_v47 }
 0xf09   :  { %9138 = vrot.lane.b32.xlu0 %v8891_v26, %s13115_s8  ;;  %9025 = vrot.lane.b32.xlu1 %v8891_v26, %s13090_s29  ;;  %s13117_s29 = smov 49   ;;  %v8877_v35 = vmul.f32 %v8865_v6, %v19657_v58  ;;  %v8883_v17 = vmul.f32 %v8871_v1, %v19657_v58 }
 0xf0b   :  { %v8889_v49 = vadd.f32 %v13076_v39, %v8877_v35  ;;  %v8895_v38 = vadd.f32 %v13077_v4, %v8883_v17 }
 0xf0d   :  { %9250 = vrot.lane.b32.xlu0 %v8886_v24, %s13116_s1  ;;  %9136 = vrot.lane.b32.xlu1 %v8886_v24, %s13115_s8 }
 0xf11   :  { %9363 = vrot.lane.b32.xlu0 %v8887_v19, %s13117_s29  ;;  %9140 = vrot.lane.b32.xlu1 %v8892_v45, %s13115_s8 }
 0xf15   :  { %9367 = vrot.lane.b32.xlu0 %v8893_v11, %s13117_s29  ;;  %9252 = vrot.lane.b32.xlu1 %v8892_v45, %s13116_s1 }
 0xf19   :  { %9479 = vrot.lane.b32.xlu0 %v8888_v51, %s13118_s5  ;;  %9365 = vrot.lane.b32.xlu1 %v8888_v51, %s13117_s29 }
 0xf1d   :  { %9590 = vrot.lane.b32.xlu0 %v8888_v51, %s13119_s24  ;;  %9369 = vrot.lane.b32.xlu1 %v8894_v22, %s13117_s29 }
 0xf21   :  { %9594 = vrot.lane.b32.xlu0 %v8894_v22, %s13119_s24  ;;  %9481 = vrot.lane.b32.xlu1 %v8894_v22, %s13118_s5 }
 0xf25   :  { %9706 = vrot.lane.b32.xlu0 %v8889_v49, %s13120_s2  ;;  %9592 = vrot.lane.b32.xlu1 %v8889_v49, %s13119_s24 }
 0xf29   :  { %9596 = vrot.lane.b32.xlu1 %v8895_v38, %s13119_s24 }
 0xf2d   :  { %9708 = vrot.lane.b32.xlu1 %v8895_v38, %s13120_s2 }
 0xf6f   :  { %v8918_v20 = vpop.permute.xlu0 %8917  ;;  %v8916_v36 = vpop.permute.xlu1 %8915 }
 0xf70   :  { %v8923_v53 = vsel %vm6400_vm9, %v8916_v36, %v8918_v20 }
 0xf71   :  { %10437 = vmatprep.mubr.msk.f32.mxu0 %vm8925_vm1, %v8923_v53 }
 0xf73   :  { %v9024_v32 = vpop.permute.xlu0 %9023  ;;  %v8920_v63 = vpop.permute.xlu1 %8919 }
 0xf74   :  { %10456 = vmatprep.mubr.msk.f32.mxu1 %vm8925_vm1, %v9024_v32 }
 0xf77   :  { %v9135_v43 = vpop.permute.xlu0 %9134  ;;  %v8922_v58 = vpop.permute.xlu1 %8921 }
 0xf78   :  { %v8924_v16 = vsel %vm6400_vm9, %v8920_v63, %v8922_v58 }
 0xf79   :  { %10438 = vmatmul.mubr.msk.f32.vlgmr.msra.gmra.mrb[72].mxu0 %vm8925_vm1, %v8924_v16 }
 0xf7a   :  { %11286 = vmatpush3.bf16.msra.mxu0 %v18882_v23 }
 0xf7b   :  { %v9139_v25 = vpop.permute.xlu0 %9138  ;;  %v9026_v21 = vpop.permute.xlu1 %9025  ;;  %11288 = vmatprep.subr.bf16.mxu0 %v18887_v44 }
 0xf7c   :  { %10457 = vmatmul.mubr.msk.f32.vlgmr.msra.gmra.mrb[72].mxu1 %vm8925_vm1, %v9026_v21 }
 0xf7d   :  { %11302 = vmatpush3.bf16.msra.mxu1 %v18882_v23 }
 0xf7e   :  { %11290 = vmatpush3.bf16.msra.mxu0 %v18887_v44  ;;  %11304 = vmatprep.subr.bf16.mxu1 %v18887_v44 }
 0xf7f   :  { %v9251_v18 = vpop.permute.xlu0 %9250  ;;  %v9137_v15 = vpop.permute.xlu1 %9136  ;;  %11292 = vmatprep.subr.bf16.mxu0 %v18915_v55 }
 0xf80   :  { %v9143_v26 = vsel %vm9142_vm3, %v9135_v43, %v9137_v15  ;;  %10494 = vmatprep.mubr.msk.f32.mxu1 %vm8925_vm1, %v9251_v18 }
 0xf81   :  { %11306 = vmatpush3.bf16.msra.mxu1 %v18887_v44  ;;  %10475 = vmatprep.mubr.msk.f32.mxu0 %vm8925_vm1, %v9143_v26 }
 0xf82   :  { %11294 = vmatpush3.bf16.msra.mxu0 %v18915_v55  ;;  %11308 = vmatprep.subr.bf16.mxu1 %v18915_v55 }
 0xf83   :  { %v9364_v50 = vpop.permute.xlu0 %9363  ;;  %v9141_v42 = vpop.permute.xlu1 %9140  ;;  %11296 = vmatprep.subr.bf16.mxu0 %v18930_v34 }
 0xf84   :  { %v9144_v56 = vsel %vm9142_vm3, %v9139_v25, %v9141_v42 }
 0xf85   :  { %11310 = vmatpush3.bf16.msra.mxu1 %v18915_v55 }
 0xf86   :  { %11298 = vmatpush3.bf16.msra.mxu0 %v18930_v34  ;;  %11312 = vmatprep.subr.bf16.mxu1 %v18930_v34 }
 0xf87   :  { %v9368_v41 = vpop.permute.xlu0 %9367  ;;  %v9253_v33 = vpop.permute.xlu1 %9252  ;;  %11316 = vmatprep.subr.bf16.mxu0 %v18882_v23 }
 0xf89   :  { %10476 = vmatmul.mubr.msk.f32.vlgmr.msra.gmra.mrb[74].mxu0 %vm8925_vm1, %v9144_v56  ;;  %11314 = vmatpush3.bf16.msra.mxu1 %v18930_v34 }
 0xf8a   :  { %11318 = vmatpush3.bf16.msra.mxu0 %v18882_v23  ;;  %11332 = vmatprep.subr.bf16.mxu1 %v18882_v23 }
 0xf8b   :  { %v9480_v46 = vpop.permute.xlu0 %9479  ;;  %v9366_v2 = vpop.permute.xlu1 %9365  ;;  %11320 = vmatprep.subr.bf16.mxu0 %v18887_v44 }
 0xf8c   :  { %10495 = vmatmul.mubr.msk.f32.vlgmr.msra.gmra.mrb[74].mxu1 %vm8925_vm1, %v9253_v33  ;;  %v9372_v7 = vsel %vm9371_vm4, %v9364_v50, %v9366_v2 }
 0xf8d   :  { %11334 = vmatpush3.bf16.msra.mxu1 %v18882_v23  ;;  %10532 = vmatprep.mubr.msk.f32.mxu1 %vm8925_vm1, %v9480_v46 }
 0xf8e   :  { %11322 = vmatpush3.bf16.msra.mxu0 %v18887_v44  ;;  %10513 = vmatprep.mubr.msk.f32.mxu0 %vm8925_vm1, %v9372_v7 }
 0xf8f   :  { %11336 = vmatprep.subr.bf16.mxu1 %v18887_v44  ;;  %v9370_v3 = vpop.permute.xlu1 %9369  ;;  %11324 = vmatprep.subr.bf16.mxu0 %v18915_v55  ;;  %v9591_v60 = vpop.permute.xlu0 %9590 }
 0xf90   :  { %v9373_v24 = vsel %vm9371_vm4, %v9368_v41, %v9370_v3 }
 0xf91   :  { %11338 = vmatpush3.bf16.msra.mxu1 %v18887_v44 }
 0xf92   :  { %11326 = vmatpush3.bf16.msra.mxu0 %v18915_v55  ;;  %11340 = vmatprep.subr.bf16.mxu1 %v18915_v55 }
 0xf93   :  { %v9482_v31 = vpop.permute.xlu1 %9481  ;;  %11328 = vmatprep.subr.bf16.mxu0 %v18930_v34  ;;  %v9595_v5 = vpop.permute.xlu0 %9594 }
 0xf95   :  { %11342 = vmatpush3.bf16.msra.mxu1 %v18915_v55 }
 0xf96   :  { %11330 = vmatpush3.bf16.msra.mxu0 %v18930_v34  ;;  %11344 = vmatprep.subr.bf16.mxu1 %v18930_v34 }
 0xf97   :  { %v9593_v0 = vpop.permute.xlu1 %9592  ;;  %11348 = vmatprep.subr.bf16.mxu0 %v18882_v23  ;;  %v9707_v27 = vpop.permute.xlu0 %9706 }
 0xf98   :  { %v9599_v61 = vsel %vm9598_vm5, %v9591_v60, %v9593_v0 }
 0xf99   :  { %10514 = vmatmul.mubr.msk.f32.vlgmr.msra.gmra.mrb[76].mxu0 %vm8925_vm1, %v9373_v24  ;;  %11346 = vmatpush3.bf16.msra.mxu1 %v18930_v34 }
 0xf9a   :  { %11350 = vmatpush3.bf16.msra.mxu0 %v18882_v23  ;;  %10551 = vmatprep.mubr.msk.f32.mxu0 %vm8925_vm1, %v9599_v61 }
 0xf9b   :  { %11364 = vmatprep.subr.bf16.mxu1 %v18882_v23  ;;  %11352 = vmatprep.subr.bf16.mxu0 %v18887_v44  ;;  %v9597_v37 = vpop.permute.xlu1 %9596 }
 0xf9c   :  { %10533 = vmatmul.mubr.msk.f32.vlgmr.msra.gmra.mrb[76].mxu1 %vm8925_vm1, %v9482_v31 }
 0xf9d   :  { %11366 = vmatpush3.bf16.msra.mxu1 %v18882_v23  ;;  %10570 = vmatprep.mubr.msk.f32.mxu1 %vm8925_vm1, %v9707_v27  ;;  %v9600_v23 = vsel %vm9598_vm5, %v9595_v5, %v9597_v37 }
 0xf9e   :  { %11354 = vmatpush3.bf16.msra.mxu0 %v18887_v44  ;;  %11368 = vmatprep.subr.bf16.mxu1 %v18887_v44 }
 0xf9f   :  { %11356 = vmatprep.subr.bf16.mxu0 %v18915_v55 }
 0xfa1   :  { %11370 = vmatpush3.bf16.msra.mxu1 %v18887_v44  ;;  %v9709_v44 = vpop.permute.xlu1 %9708 }
 0xfa2   :  { %11358 = vmatpush3.bf16.msra.mxu0 %v18915_v55  ;;  %11372 = vmatprep.subr.bf16.mxu1 %v18915_v55 }
 0xfa3   :  { %11360 = vmatprep.subr.bf16.mxu0 %v18930_v34 }
 0xfa5   :  { %11374 = vmatpush3.bf16.msra.mxu1 %v18915_v55 }
 0xfa6   :  { %11362 = vmatpush3.bf16.msra.mxu0 %v18930_v34  ;;  %11376 = vmatprep.subr.bf16.mxu1 %v18930_v34 }
 0xfa9   :  { %10552 = vmatmul.mubr.msk.f32.vlgmr.msra.gmra.mrb[78].mxu0 %vm8925_vm1, %v9600_v23  ;;  %11378 = vmatpush3.bf16.msra.mxu1 %v18930_v34 }
 0xfac   :  { %10571 = vmatmul.mubr.msk.f32.vlgmr.msra.gmra.mrb[78].mxu1 %vm8925_vm1, %v9709_v44 }
0x104c   :  { %v10439_v19 = vpop.f32.mrb[72].mxu0 }
0x104d   :  { %v9002_v55 = vadd.f32 %v10439_v19, %v9919_v59  ;;  %v8996_v48 = vpop.f32.mrb[73].mxu0 }
0x104e   :  { %v8997_v45 = vadd.f32 %v9919_v59, %v8996_v48 }
0x104f   :  { %9007 = vst.msk [vmem:[%s19124_s10 + $0x8] sm:$0xff] %vm9005_vm6, %v9002_v55  ;;  %v10458_v57 = vpop.f32.mrb[72].mxu1 }
0x1050   :  { %9006 = vst.msk [vmem:[%s19124_s10] sm:$0xff] %vm9005_vm6, %v8997_v45  ;;  %v9103_v34 = vadd.f32 %v10458_v57, %v9919_v59  ;;  %v9097_v10 = vpop.f32.mrb[73].mxu1 }
0x1051   :  { %v9098_v14 = vadd.f32 %v9919_v59, %v9097_v10 }
0x1052   :  { %9110 = vrot.lane.b32.xlu1 %v9103_v34, %s13121_s7 }
0x1053   :  { %9108 = vrot.lane.b32.xlu0 %v9098_v14, %s13121_s7 }
0x105c   :  { %v10477_v54 = vpop.f32.mrb[74].mxu0 }
0x105d   :  { %v9215_v12 = vpop.f32.mrb[75].mxu0  ;;  %v9221_v62 = vadd.f32 %v10477_v54, %v9919_v59 }
0x105e   :  { %v9216_v52 = vadd.f32 %v9919_v59, %v9215_v12 }
0x105f   :  { %v10496_v11 = vpop.f32.mrb[74].mxu1 }
0x1060   :  { %v9330_v28 = vadd.f32 %v10496_v11, %v9919_v59  ;;  %v9324_v13 = vpop.f32.mrb[75].mxu1 }
0x1061   :  { %v9325_v9 = vadd.f32 %v9919_v59, %v9324_v13 }
0x1062   :  { %9337 = vrot.lane.b32.xlu1 %v9330_v28, %s13122_s9 }
0x1063   :  { %9335 = vrot.lane.b32.xlu0 %v9325_v9, %s13122_s9 }
0x1066   :  { %9228 = vrot.lane.b32.xlu1 %v9221_v62, %s13123_s6 }
0x1067   :  { %9226 = vrot.lane.b32.xlu0 %v9216_v52, %s13123_s6 }
0x106c   :  { %v10515_v51 = vpop.f32.mrb[76].mxu0 }
0x106d   :  { %v9444_v30 = vpop.f32.mrb[77].mxu0  ;;  %v9450_v6 = vadd.f32 %v10515_v51, %v9919_v59 }
0x106e   :  { %v9445_v47 = vadd.f32 %v9919_v59, %v9444_v30 }
0x106f   :  { %v10534_v29 = vpop.f32.mrb[76].mxu1 }
0x1070   :  { %v9559_v40 = vadd.f32 %v10534_v29, %v9919_v59  ;;  %v9553_v8 = vpop.f32.mrb[77].mxu1 }
0x1071   :  { %v9554_v22 = vadd.f32 %v9919_v59, %v9553_v8 }
0x1072   :  { %9566 = vrot.lane.b32.xlu1 %v9559_v40, %s13124_s27 }
0x1073   :  { %9564 = vrot.lane.b32.xlu0 %v9554_v22, %s13124_s27 }
0x1076   :  { %9457 = vrot.lane.b32.xlu1 %v9450_v6, %s13125_s28 }
0x1077   :  { %9455 = vrot.lane.b32.xlu0 %v9445_v47, %s13125_s28 }
0x107c   :  { %v10553_v35 = vpop.f32.mrb[78].mxu0 }
0x107d   :  { %v9677_v1 = vadd.f32 %v10553_v35, %v9919_v59  ;;  %v9671_v39 = vpop.f32.mrb[79].mxu0 }
0x107e   :  { %v9672_v49 = vadd.f32 %v9919_v59, %v9671_v39 }
0x107f   :  { %9684 = vrot.lane.b32.xlu1 %v9677_v1, %s13126_s3  ;;  %v10572_v17 = vpop.f32.mrb[78].mxu1 }
0x1080   :  { %v9786_v4 = vadd.f32 %v10572_v17, %v9919_v59  ;;  %9682 = vrot.lane.b32.xlu0 %v9672_v49, %s13126_s3  ;;  %v9780_v38 = vpop.f32.mrb[79].mxu1 }
0x1081   :  { %v9781_v20 = vadd.f32 %v9919_v59, %v9780_v38 }
0x1083   :  { %9793 = vrot.lane.b32.xlu1 %v9786_v4, %s13127_s30 }
0x1084   :  { %9791 = vrot.lane.b32.xlu0 %v9781_v20, %s13127_s30 }
0x10c4   :  { %v9111_v36 = vpop.permute.xlu1 %9110 }
0x10c5   :  { %9116 = vst.msk [vmem:[%s19124_s10 + $0x8] sm:$0xff] %vm9114_vm12, %v9111_v36  ;;  %v9109_v53 = vpop.permute.xlu0 %9108 }
0x10c6   :  { %9115 = vst.msk [vmem:[%s19124_s10] sm:$0xff] %vm9114_vm12, %v9109_v53 }
0x10d4   :  { %v9338_v32 = vpop.permute.xlu1 %9337 }
0x10d5   :  { %v9336_v63 = vpop.permute.xlu0 %9335 }
0x10d8   :  { %v9229_v43 = vpop.permute.xlu1 %9228 }
0x10d9   :  { %9234 = vst.msk [vmem:[%s19124_s10 + $0x8] sm:$0xff] %vm9232_vm13, %v9229_v43  ;;  %v9227_v58 = vpop.permute.xlu0 %9226 }
0x10da   :  { %9233 = vst.msk [vmem:[%s19124_s10] sm:$0xff] %vm9232_vm13, %v9227_v58 }
0x10db   :  { %9343 = vst.msk [vmem:[%s19124_s10 + $0x8] sm:$0xff] %vm9341_vm14, %v9338_v32  ;;  %9342 = vst.msk [vmem:[%s19124_s10] sm:$0xff] %vm9341_vm14, %v9336_v63 }
0x10e4   :  { %v9567_v16 = vpop.permute.xlu1 %9566 }
0x10e5   :  { %v9565_v25 = vpop.permute.xlu0 %9564 }
0x10e8   :  { %v9458_v21 = vpop.permute.xlu1 %9457 }
0x10e9   :  { %9463 = vst.msk [vmem:[%s19124_s10 + $0x8] sm:$0xff] %vm9461_vm15, %v9458_v21  ;;  %v9456_v18 = vpop.permute.xlu0 %9455 }
0x10ea   :  { %9462 = vst.msk [vmem:[%s19124_s10] sm:$0xff] %vm9461_vm15, %v9456_v18 }
0x10eb   :  { %9572 = vst.msk [vmem:[%s19124_s10 + $0x8] sm:$0xff] %vm9570_vm0, %v9567_v16  ;;  %9571 = vst.msk [vmem:[%s19124_s10] sm:$0xff] %vm9570_vm0, %v9565_v25 }
0x10f1   :  { %v9685_v15 = vpop.permute.xlu1 %9684 }
0x10f2   :  { %9690 = vst.msk [vmem:[%s19124_s10 + $0x8] sm:$0xff] %vm9688_vm7, %v9685_v15  ;;  %v9683_v26 = vpop.permute.xlu0 %9682 }
0x10f3   :  { %9689 = vst.msk [vmem:[%s19124_s10] sm:$0xff] %vm9688_vm7, %v9683_v26 }
0x10f5   :  { %v9794_v50 = vpop.permute.xlu1 %9793 }
0x10f6   :  { %9799 = vst.msk [vmem:[%s19124_s10 + $0x8] sm:$0xff] %vm9797_vm2, %v9794_v50  ;;  %v9792_v42 = vpop.permute.xlu0 %9791 }
0x10f7   :  { %9798 = vst.msk [vmem:[%s19124_s10] sm:$0xff] %vm9797_vm2, %v9792_v42 }

</bundles_post_ra>
